<compile_context>
chip_gen: v6e
topology: v6e:2x2x1
jax: 0.10.0
libtpu: 0.0.40
codegen_flags: <defaults>
</compile_context>

<pallas_src>
import jax
import jax.numpy as jnp
from jax import lax
from jax.experimental import pallas as pl
from jax.experimental.pallas import tpu as pltpu


def mlp_kernel(x_ref, w1_ref, b1_ref, w2_ref, b2_ref, w3_ref, b3_ref, o_ref):
    x = x_ref[...]  # [TM, 8], native (batch, feature) layout straight from HBM
    # hidden1 (8 -> 12) + ReLU.  Contract the feature axis of both operands
    # (w1 is [12, 8]) so the result is feature-major [12, TM]: batch on lanes.
    h1 = lax.dot_general(
        w1_ref[...], x, (((1,), (1,)), ((), ())),
        precision=lax.Precision.HIGHEST,
        preferred_element_type=jnp.float32) + b1_ref[...]
    h1 = jnp.maximum(h1, 0.0)                                       # [12, TM]
    # hidden2 (12 -> 8) + ReLU
    h2 = jnp.dot(w2_ref[...], h1,
                 precision=lax.Precision.HIGHEST,
                 preferred_element_type=jnp.float32) + b2_ref[...]
    h2 = jnp.maximum(h2, 0.0)                                       # [8, TM]
    # output (8 -> 1) + Sigmoid (exp runs on the EUP slot)
    z = jnp.dot(w3_ref[...], h2,
                precision=lax.Precision.HIGHEST,
                preferred_element_type=jnp.float32) + b3_ref[...]
    o_ref[...] = (1.0 / (1.0 + jnp.exp(-z))).astype(o_ref.dtype)    # [1, TM] wide store


def pima_classifier_forward(x, params, *, tile_m=2048):
    """x: [N, 8] float32 (PyTorch layout).  params: PyTorch-layout weights
    (w: [out, in], b: [out]).  Returns sigmoid probabilities, shape [N, 1]."""
    N, d_in = x.shape
    assert d_in == 8

    w1, b1 = params["w1"], params["b1"]   # [12, 8], [12]
    w2, b2 = params["w2"], params["b2"]   # [8, 12], [8]
    w3, b3 = params["w3"], params["b3"]   # [1, 8],  [1]

    # Column-vector biases broadcast along the lane (batch) axis in-kernel.
    b1c, b2c, b3c = b1.reshape(-1, 1), b2.reshape(-1, 1), b3.reshape(-1, 1)

    # VMEM budget: the (tm, 8) input block lane-pads 8 -> 128 in VMEM
    # (tm * 512 B per buffer, x2 double-buffering) -> cap at 8192 for v5e.
    tile_m = min(int(tile_m), 8192)
    if N <= tile_m:
        tm = N                                   # single full-array tile (always layout-legal)
    else:
        tm = max(128, (tile_m // 128) * 128)     # multiple of 128: lane-dense output blocks
    grid = (pl.cdiv(N, tm),)                     # ragged tail: bounded edge-block DMA, no pad copy

    def whole(a):
        # Full (tiny) array every step; Pallas skips the re-fetch when the
        # block index doesn't change between grid steps.
        return pl.BlockSpec(a.shape, lambda i: (0, 0))

    out = pl.pallas_call(
        mlp_kernel,
        out_shape=jax.ShapeDtypeStruct((1, N), jnp.float32),
        grid_spec=pltpu.PrefetchScalarGridSpec(
            num_scalar_prefetch=0,
            grid=grid,
            in_specs=[
                pl.BlockSpec((tm, 8), lambda i: (i, 0)),   # x tile, native layout
                whole(w1), whole(b1c),
                whole(w2), whole(b2c),
                whole(w3), whole(b3c),
            ],
            out_specs=pl.BlockSpec((1, tm), lambda i: (0, i)),
        ),
        compiler_params=pltpu.CompilerParams(
            dimension_semantics=("parallel",)),   # shards batch tiles across v7x's 2 TCs
    )(x, w1, b1c, w2, b2c, w3, b3c)

    # (1, N) and (N, 1) share the same row-major layout -> free reshape.
    return out.reshape(N, 1)


def init_params(key):
    """Deterministic init mimicking PyTorch's default nn.Linear init
    (uniform(-1/sqrt(fan_in), 1/sqrt(fan_in))), weights stored as [out, in]."""
    def linear(key, fan_in, fan_out):
        kw, kb = jax.random.split(key)
        bound = 1.0 / jnp.sqrt(fan_in)
        w = jax.random.uniform(kw, (fan_out, fan_in), jnp.float32, -bound, bound)
        b = jax.random.uniform(kb, (fan_out,), jnp.float32, -bound, bound)
        return w, b

    k1, k2, k3 = jax.random.split(key, 3)
    w1, b1 = linear(k1, 8, 12)
    w2, b2 = linear(k2, 12, 8)
    w3, b3 = linear(k3, 8, 1)
    return {"w1": w1, "b1": b1, "w2": w2, "b2": b2, "w3": w3, "b3": b3}


def reference_forward(x, p):
    hi = lax.Precision.HIGHEST   # match the kernel's f32 matmul precision
    h1 = jnp.maximum(jnp.dot(x, p["w1"].T, precision=hi) + p["b1"], 0.0)
    h2 = jnp.maximum(jnp.dot(h1, p["w2"].T, precision=hi) + p["b2"], 0.0)
    z = jnp.dot(h2, p["w3"].T, precision=hi) + p["b3"]
    return jax.nn.sigmoid(z).reshape(-1, 1)


if __name__ == "__main__":
    key = jax.random.PRNGKey(0)
    k_params, k_x1, k_x2 = jax.random.split(key, 3)
    params = init_params(k_params)

    # Case 1: default tile_m=2048 -> an even 2-step grid (keeps both v7x TCs busy,
    # only 2 steps of ~0.35 us overhead on v5e/v6e).
    n1 = 4096
    x1 = jax.random.normal(k_x1, (n1, 8), dtype=jnp.float32)
    out1 = jax.block_until_ready(pima_classifier_forward(x1, params))
    ref1 = reference_forward(x1, params)
    assert out1.shape == (n1, 1)
    assert jnp.allclose(out1, ref1, atol=2e-5, rtol=2e-5), "mismatch vs reference (case 1)"

    # Case 2: ragged batch (not a multiple of tile_m) -> edge-block masking path.
    n2 = 2600
    x2 = jax.random.normal(k_x2, (n2, 8), dtype=jnp.float32)
    out2 = jax.block_until_ready(pima_classifier_forward(x2, params, tile_m=1024))
    ref2 = reference_forward(x2, params)
    assert out2.shape == (n2, 1)
    assert jnp.allclose(out2, ref2, atol=2e-5, rtol=2e-5), "mismatch vs reference (case 2)"

    print("KERNEL_OK")
</pallas_src>

<mosaic_0001>
module attributes {stable_mosaic.version = 11 : i64} {
  func.func @mlp_kernel(%arg0: i32, %arg1: memref<2048x8xf32, #tpu.memory_space<vmem>>, %arg2: memref<12x8xf32, #tpu.memory_space<vmem>>, %arg3: memref<12x1xf32, #tpu.memory_space<vmem>>, %arg4: memref<8x12xf32, #tpu.memory_space<vmem>>, %arg5: memref<8x1xf32, #tpu.memory_space<vmem>>, %arg6: memref<1x8xf32, #tpu.memory_space<vmem>>, %arg7: memref<1x1xf32, #tpu.memory_space<vmem>>, %arg8: memref<1x2048xf32, #tpu.memory_space<vmem>>) attributes {dimension_semantics = [#tpu.dimension_semantics<parallel>], iteration_bounds = array<i64: 2>, scalar_prefetch = 0 : i64, scratch_operands = 0 : i64, tpu.core_type = #tpu.core_type<tc>, window_params = [{transform_indices = @transform_0, window_bounds = array<i64: 2048, 8>}, {pipeline_mode = #tpu.pipeline_mode<synchronous>, transform_indices = @transform_1, window_bounds = array<i64: 12, 8>}, {pipeline_mode = #tpu.pipeline_mode<synchronous>, transform_indices = @transform_2, window_bounds = array<i64: 12, 1>}, {pipeline_mode = #tpu.pipeline_mode<synchronous>, transform_indices = @transform_3, window_bounds = array<i64: 8, 12>}, {pipeline_mode = #tpu.pipeline_mode<synchronous>, transform_indices = @transform_4, window_bounds = array<i64: 8, 1>}, {pipeline_mode = #tpu.pipeline_mode<synchronous>, transform_indices = @transform_5, window_bounds = array<i64: 1, 8>}, {pipeline_mode = #tpu.pipeline_mode<synchronous>, transform_indices = @transform_6, window_bounds = array<i64: 1, 1>}, {transform_indices = @transform_7, window_bounds = array<i64: 1, 2048>}]} {
    %c0 = arith.constant 0 : index
    %c0_0 = arith.constant 0 : index
    %0 = vector.load %arg1[%c0, %c0_0] : memref<2048x8xf32, #tpu.memory_space<vmem>>, vector<2048x8xf32>
    %c0_1 = arith.constant 0 : index
    %c0_2 = arith.constant 0 : index
    %1 = vector.load %arg2[%c0_1, %c0_2] : memref<12x8xf32, #tpu.memory_space<vmem>>, vector<12x8xf32>
    %cst = arith.constant dense<0.000000e+00> : vector<12x2048xf32>
    %2 = tpu.matmul %1, %0, %cst {dimension_numbers = #tpu.dot_dimension_numbers<[1], [1], [0], [0], [0, 0, 1, 0], [], []>, precision = #tpu.contract_precision<fp32>} : vector<12x8xf32>, vector<2048x8xf32>, vector<12x2048xf32> -> vector<12x2048xf32>
    %c0_3 = arith.constant 0 : index
    %c0_4 = arith.constant 0 : index
    %3 = vector.load %arg3[%c0_3, %c0_4] : memref<12x1xf32, #tpu.memory_space<vmem>>, vector<12x1xf32>
    %4 = vector.broadcast %3 : vector<12x1xf32> to vector<12x2048xf32>
    %5 = arith.addf %2, %4 : vector<12x2048xf32>
    %cst_5 = arith.constant 0.000000e+00 : f32
    %6 = vector.broadcast %cst_5 : f32 to vector<12x2048xf32>
    %7 = arith.maximumf %5, %6 : vector<12x2048xf32>
    %c0_6 = arith.constant 0 : index
    %c0_7 = arith.constant 0 : index
    %8 = vector.load %arg4[%c0_6, %c0_7] : memref<8x12xf32, #tpu.memory_space<vmem>>, vector<8x12xf32>
    %cst_8 = arith.constant dense<0.000000e+00> : vector<8x2048xf32>
    %9 = tpu.matmul %8, %7, %cst_8 {dimension_numbers = #tpu.dot_dimension_numbers<[1], [0], [0], [1], [0, 0, 1, 1], [], []>, precision = #tpu.contract_precision<fp32>} : vector<8x12xf32>, vector<12x2048xf32>, vector<8x2048xf32> -> vector<8x2048xf32>
    %c0_9 = arith.constant 0 : index
    %c0_10 = arith.constant 0 : index
    %10 = vector.load %arg5[%c0_9, %c0_10] : memref<8x1xf32, #tpu.memory_space<vmem>>, vector<8x1xf32>
    %11 = vector.broadcast %10 : vector<8x1xf32> to vector<8x2048xf32>
    %12 = arith.addf %9, %11 : vector<8x2048xf32>
    %cst_11 = arith.constant 0.000000e+00 : f32
    %13 = vector.broadcast %cst_11 : f32 to vector<8x2048xf32>
    %14 = arith.maximumf %12, %13 : vector<8x2048xf32>
    %c0_12 = arith.constant 0 : index
    %c0_13 = arith.constant 0 : index
    %15 = vector.load %arg6[%c0_12, %c0_13] : memref<1x8xf32, #tpu.memory_space<vmem>>, vector<1x8xf32>
    %cst_14 = arith.constant dense<0.000000e+00> : vector<1x2048xf32>
    %16 = tpu.matmul %15, %14, %cst_14 {dimension_numbers = #tpu.dot_dimension_numbers<[1], [0], [0], [1], [0, 0, 1, 1], [], []>, precision = #tpu.contract_precision<fp32>} : vector<1x8xf32>, vector<8x2048xf32>, vector<1x2048xf32> -> vector<1x2048xf32>
    %c0_15 = arith.constant 0 : index
    %c0_16 = arith.constant 0 : index
    %17 = vector.load %arg7[%c0_15, %c0_16] : memref<1x1xf32, #tpu.memory_space<vmem>>, vector<1x1xf32>
    %18 = vector.broadcast %17 : vector<1x1xf32> to vector<1x2048xf32>
    %19 = arith.addf %16, %18 : vector<1x2048xf32>
    %cst_17 = arith.constant 0.000000e+00 : f32
    %20 = vector.broadcast %cst_17 : f32 to vector<1x2048xf32>
    %21 = arith.subf %20, %19 : vector<1x2048xf32>
    %22 = math.exp %21 : vector<1x2048xf32>
    %cst_18 = arith.constant 1.000000e+00 : f32
    %23 = vector.broadcast %cst_18 : f32 to vector<1x2048xf32>
    %24 = arith.addf %23, %22 : vector<1x2048xf32>
    %cst_19 = arith.constant 1.000000e+00 : f32
    %25 = vector.broadcast %cst_19 : f32 to vector<1x2048xf32>
    %26 = arith.divf %25, %24 : vector<1x2048xf32>
    %c0_20 = arith.constant 0 : index
    %c0_21 = arith.constant 0 : index
    %27 = vector.load %arg8[%c0_20, %c0_21] : memref<1x2048xf32, #tpu.memory_space<vmem>>, vector<1x2048xf32>
    tpu.vector_store %arg8[%c0_20, %c0_21], %26 {strides = array<i32>} : memref<1x2048xf32, #tpu.memory_space<vmem>>, vector<1x2048xf32>,
    return
  }
  func.func @transform_0(%arg0: i32) -> (i32, i32) {
    %c0_i32 = arith.constant 0 : i32
    %c0_i32_0 = arith.constant 0 : i32
    return %arg0, %c0_i32 : i32, i32
  }
  func.func @transform_1(%arg0: i32) -> (i32, i32) {
    %c0_i32 = arith.constant 0 : i32
    %c0_i32_0 = arith.constant 0 : i32
    %c0_i32_1 = arith.constant 0 : i32
    return %c0_i32, %c0_i32_0 : i32, i32
  }
  func.func @transform_2(%arg0: i32) -> (i32, i32) {
    %c0_i32 = arith.constant 0 : i32
    %c0_i32_0 = arith.constant 0 : i32
    %c0_i32_1 = arith.constant 0 : i32
    return %c0_i32, %c0_i32_0 : i32, i32
  }
  func.func @transform_3(%arg0: i32) -> (i32, i32) {
    %c0_i32 = arith.constant 0 : i32
    %c0_i32_0 = arith.constant 0 : i32
    %c0_i32_1 = arith.constant 0 : i32
    return %c0_i32, %c0_i32_0 : i32, i32
  }
  func.func @transform_4(%arg0: i32) -> (i32, i32) {
    %c0_i32 = arith.constant 0 : i32
    %c0_i32_0 = arith.constant 0 : i32
    %c0_i32_1 = arith.constant 0 : i32
    return %c0_i32, %c0_i32_0 : i32, i32
  }
  func.func @transform_5(%arg0: i32) -> (i32, i32) {
    %c0_i32 = arith.constant 0 : i32
    %c0_i32_0 = arith.constant 0 : i32
    %c0_i32_1 = arith.constant 0 : i32
    return %c0_i32, %c0_i32_0 : i32, i32
  }
  func.func @transform_6(%arg0: i32) -> (i32, i32) {
    %c0_i32 = arith.constant 0 : i32
    %c0_i32_0 = arith.constant 0 : i32
    %c0_i32_1 = arith.constant 0 : i32
    return %c0_i32, %c0_i32_0 : i32, i32
  }
  func.func @transform_7(%arg0: i32) -> (i32, i32) {
    %c0_i32 = arith.constant 0 : i32
    %c0_i32_0 = arith.constant 0 : i32
    return %c0_i32, %arg0 : i32, i32
  }
}

</mosaic_0001>

<bundles_post_ra>
// kernel: tpu_custom_call.1
= control target key start
LH: loop header
LB: loop body
LE: loop exit
PB: predicated region body
PF: predicated region fallthrough
CT: control target
= control target key end

     0   :  { %s24507_s0 = inlined_call_operand.vmem [shape: f32[4096,8], index: 0, kind: input, shape index: {}]   ;;  %s24508_s1 = inlined_call_operand.vmem [shape: f32[12,8], index: 1, kind: input, shape index: {}]   ;;  %s24509_s2 = inlined_call_operand.vmem [shape: f32[12,1], index: 2, kind: input, shape index: {}]   ;;  %s24510_s3 = inlined_call_operand.vmem [shape: f32[8,12], index: 3, kind: input, shape index: {}]   ;;  %s24511_s4 = inlined_call_operand.vmem [shape: f32[8,1], index: 4, kind: input, shape index: {}]   ;;  %s24512_s5 = inlined_call_operand.vmem [shape: f32[1,8], index: 5, kind: input, shape index: {}]   ;;  %s24513_s6 = inlined_call_operand.<no memory space> [shape: f32[1,1], index: 6, kind: input, shape index: {}]   ;;  %s24514_s7 = inlined_call_operand.hbm [shape: f32[1,4096], index: 7, kind: output, shape index: {}]  }
   0x1   :  { %v12_v0 = vstv %s24513_s6 }
   0x2   :  { %13 = vst [vmem:[#allocation2] sm:$0x1] %v12_v0 }
   0x3   :  { %14 = vsyncpa [#allocation4], 0 }
   0x4   :  { %16 = vsyncpa [#allocation4 + $0x1], 0  ;;  %s18575_s26 = smov 0   ;;  %s18577_s27 = smov 0  }
   0x5   :  { %s18579_s28 = smov 0   ;;  %s18581_s29 = smov 0  }
   0x6 LB: > { %s16616_s6 = sadd.s32 4294967295, %s18526_s29   ;;  %s16617_s30 = sadd.s32 4294967294, %s18526_s29   ;;  %s18526_s29 = sphi %s18581_s29, %s26026_s29   ;;  %s18522_s28 = sphi %s18579_s28, %s26025_s28   ;;  %s18518_s27 = sphi %s18577_s27, %s26024_s27   ;;  %s18514_s26 = sphi %s18575_s26, %s26023_s26  }
   0x7   : > { %s18598_s8 = sadd.s32 1, %s18526_s29   ;;  %s181_s9 = sadd.s32 1, %s18522_s28 }
   0x8   : > { %s178_s10 = ssub.s32 %s18526_s29, %s18598_s8  ;;  %p191_p0 = scmp.ne.s32.totalorder %s18522_s28, %s18518_s27 }
   0x9   : > { %p179_p1 = scmp.eq.s32.totalorder %s178_s10, 0  ;;  %p192_p2 = scmp.eq.s32.totalorder %s16616_s6, 1 }
   0xa   : > { %p197_p3 = scmp.ne.s32.totalorder %s18518_s27, %s18514_s26  ;;  %p198_p4 = scmp.eq.s32.totalorder %s16617_s30, 1 }
   0xb   : > { %s18608_s11 = scalar_select %p179_p1, %s18522_s28, %s181_s9  }
   0xc   : > { %p18610_p5 = por %p192_p2, %p191_p0  ;;  %p18614_p6 = por %p198_p4, %p197_p3 }
   0xd   : > { %p16620_p7 = scmp.ge.s32.totalorder %s18526_s29, 1  ;;  %p243_p8 = scmp.lt.s32.totalorder %s18526_s29, 3 }
   0xf   : > { %p244_p9 = pnand %p16620_p7, %p243_p8 }
  0x11   : > { %247 = sbr.rel (%p244_p9) target bundleno = 2280 (0x8e8), region = 48 }
  0x16   : > { %s18620_s14 = sshll.u32 %s16616_s6, 8  ;;  %vm552_vm0 = vcmask 64512   ;;  %v538_v1 = vld [vmem:[%s24508_s1] sm:$0xff]  ;;  %vm8598_vm1 = vcmask 97280   ;;  %vm8602_vm2 = vcmask 1043456   ;;  %s272_s19 = sand.u32 1, %s18518_s27  }
  0x17   : > { %p276_p10 = scmp.lt.s32.totalorder %s18620_s14, 511  ;;  %v18627_v2 = vsel %vm552_vm0, %v538_v1, 0  ;;  %s16621_s20 = sshll.u32 %s272_s19, 4 }
  0x18   : > { %v18630_v3 = vand.u32 4294901760, %v18627_v2  ;;  %s16556_s25 = scalar_lea.hbm %s24514_s7, %s18620_s14  ;;  %s16544_s6 = scalar_lea.sflag [#allocation4], %s272_s19 }
  0x19   : > { %s277_s17 = scalar_select %p276_p10, %s18620_s14, 511 }
  0x1a   : > { %16698 = vmatprep.mubr.f32.mxu1 %v18630_v3  ;;  %s18531_s9 = smov [#allocation3]  }
  0x1b   : > { %s16623_s18 = sshll.u32 %s277_s17, 3  ;;  %s18470_s10 = sshll.u32 %s18531_s9, 4  ;;  %s18471_s10 = int_to_ptr.vmem [resolvable:$false] %s18470_s10 }
  0x1c   : > { %s18637_s21 = scalar_lea.vmem %s24507_s0, %s16623_s18  ;;  %s18472_s15 = scalar_lea.vmem %s18471_s10, 512 }
  0x1d   : > { %v313_v4 = vld [vmem:[%s18637_s21 + $0xf8] sm:$0xff]  ;;  %v312_v6 = vld [vmem:[%s18637_s21 + $0xf0] sm:$0xff]  ;;  %v311_v11 = vld [vmem:[%s18637_s21 + $0xe8] sm:$0xff] }
  0x1e   : > { %v297_v5 = vld [vmem:[%s18637_s21 + $0x78] sm:$0xff]  ;;  %v653_v7 = vsel %vm552_vm0, %v313_v4, 0  ;;  %v650_v9 = vsel %vm552_vm0, %v312_v6, 0  ;;  %v296_v10 = vld [vmem:[%s18637_s21 + $0x70] sm:$0xff]  ;;  %v295_v12 = vld [vmem:[%s18637_s21 + $0x68] sm:$0xff]  ;;  %v647_v20 = vsel %vm552_vm0, %v311_v11, 0 }
  0x1f   : > { %v605_v8 = vsel %vm552_vm0, %v297_v5, 0  ;;  %v18648_v13 = vand.u32 4294901760, %v653_v7  ;;  %v18652_v15 = vand.u32 4294901760, %v650_v9  ;;  %v602_v16 = vsel %vm552_vm0, %v296_v10, 0  ;;  %v310_v17 = vld [vmem:[%s18637_s21 + $0xe0] sm:$0xff]  ;;  %v309_v23 = vld [vmem:[%s18637_s21 + $0xd8] sm:$0xff] }
  0x20   : > { %v18650_v14 = vand.u32 4294901760, %v605_v8  ;;  %v294_v18 = vld [vmem:[%s18637_s21 + $0x60] sm:$0xff]  ;;  %v18657_v19 = vand.u32 4294901760, %v602_v16  ;;  %v599_v21 = vsel %vm552_vm0, %v295_v12, 0  ;;  %v644_v22 = vsel %vm552_vm0, %v310_v17, 0  ;;  %v293_v31 = vld [vmem:[%s18637_s21 + $0x58] sm:$0xff] }
  0x21   : > { %16630 = vmatprep.subr.mxu0 %v18648_v13  ;;  %v18664_v24 = vand.u32 4294901760, %v647_v20  ;;  %v18667_v25 = vsub.f32 %v653_v7, %v18648_v13  ;;  %v18669_v26 = vand.u32 4294901760, %v599_v21  ;;  %v18676_v28 = vsub.f32 %v650_v9, %v18652_v15  ;;  %v308_v40 = vld [vmem:[%s18637_s21 + $0xd0] sm:$0xff]  ;;  %v307_v54 = vld [vmem:[%s18637_s21 + $0xc8] sm:$0xff]  ;;  %v306_v63 = vld [vmem:[%s18637_s21 + $0xc0] sm:$0xff] }
  0x22   : > { %v18672_v27 = vsub.f32 %v605_v8, %v18650_v14  ;;  %16631 = vmatpush3.xpose.msra.mxu0 %v18650_v14  ;;  %v596_v29 = vsel %vm552_vm0, %v294_v18, 0  ;;  %v18680_v30 = vsub.f32 %v602_v16, %v18657_v19  ;;  %v18686_v34 = vand.u32 4294901760, %v644_v22  ;;  %v292_v49 = vld [vmem:[%s18637_s21 + $0x50] sm:$0xff]  ;;  %v291_v62 = vld [vmem:[%s18637_s21 + $0x48] sm:$0xff]  ;;  %v290_v17 = vld [vmem:[%s18637_s21 + $0x40] sm:$0xff] }
  0x23   : > { %16632 = vmatprep.subr.mxu0 %v18652_v15  ;;  %v24530_v32 = vand.u32 4294901760, %v18667_v25  ;;  %v641_v35 = vsel %vm552_vm0, %v309_v23, 0  ;;  %v24527_v36 = vand.u32 4294901760, %v18676_v28  ;;  %v18690_v37 = vand.u32 4294901760, %v596_v29  ;;  %v305_v23 = vld [vmem:[%s18637_s21 + $0xb8] sm:$0xff] }
  0x24   : > { %v24529_v33 = vand.u32 4294901760, %v18672_v27  ;;  %v24526_v38 = vand.u32 4294901760, %v18680_v30  ;;  %v18694_v39 = vsub.f32 %v647_v20, %v18664_v24  ;;  %v593_v43 = vsel %vm552_vm0, %v293_v31, 0 }
  0x25   : > { %v1562_v41 = vsub.f32 %v18667_v25, %v24530_v32  ;;  %v18705_v44 = vsub.f32 %v599_v21, %v18669_v26  ;;  %v1569_v45 = vsub.f32 %v18676_v28, %v24527_v36  ;;  %v18714_v47 = vand.u32 4294901760, %v641_v35 }
  0x26   : > { %v1450_v42 = vsub.f32 %v18672_v27, %v24529_v33  ;;  %16633 = vmatpush3.xpose.msra.mxu0 %v18657_v19  ;;  %v1457_v46 = vsub.f32 %v18680_v30, %v24526_v38  ;;  %v24524_v48 = vand.u32 4294901760, %v18694_v39  ;;  %v638_v53 = vsel %vm552_vm0, %v308_v40, 0 }
  0x27   : > { %16634 = vmatprep.subr.mxu0 %v18664_v24  ;;  %v1563_v50 = vand.u32 4294901760, %v1562_v41  ;;  %v24523_v52 = vand.u32 4294901760, %v18705_v44  ;;  %v1570_v55 = vand.u32 4294901760, %v1569_v45  ;;  %v18725_v57 = vand.u32 4294901760, %v593_v43 }
  0x28   : > { %v1451_v51 = vand.u32 4294901760, %v1450_v42  ;;  %v1576_v56 = vsub.f32 %v18694_v39, %v24524_v48  ;;  %v18731_v59 = vsub.f32 %v644_v22, %v18686_v34  ;;  %v590_v60 = vsel %vm552_vm0, %v292_v49, 0 }
  0x29   : > { %16666 = vmatprep.subr.mxu1 %v1563_v50  ;;  %v1464_v58 = vsub.f32 %v18705_v44, %v24523_v52  ;;  %v18735_v61 = vsub.f32 %v596_v29, %v18690_v37  ;;  %v1458_v0 = vand.u32 4294901760, %v1457_v46  ;;  %v18740_v1 = vand.u32 4294901760, %v638_v53  ;;  %v289_v46 = vld [vmem:[%s18637_s21 + $0x38] sm:$0xff]  ;;  %v286_v52 = vld [vmem:[%s18637_s21 + $0x20] sm:$0xff] }
  0x2a   : > { %16635 = vmatpush3.xpose.msra.mxu0 %v18669_v26  ;;  %16667 = vmatpush3.xpose.msra.mxu1 %v1451_v51  ;;  %v635_v4 = vsel %vm552_vm0, %v307_v54, 0  ;;  %v18744_v5 = vsub.f32 %v641_v35, %v18714_v47  ;;  %v1577_v6 = vand.u32 4294901760, %v1576_v56  ;;  %v24522_v7 = vand.u32 4294901760, %v18731_v59  ;;  %v304_v56 = vld [vmem:[%s18637_s21 + $0xb0] sm:$0xff] }
  0x2b   : > { %16636 = vmatprep.subr.mxu0 %v18686_v34  ;;  %16668 = vmatprep.subr.mxu1 %v1570_v55  ;;  %v18748_v8 = vand.u32 4294901760, %v590_v60  ;;  %v24520_v9 = vand.u32 4294901760, %v18735_v61  ;;  %v587_v11 = vsel %vm552_vm0, %v291_v62, 0  ;;  %v18754_v12 = vsub.f32 %v593_v43, %v18725_v57 }
  0x2c   : > { %v24518_v10 = vand.u32 4294901760, %v18744_v5  ;;  %v632_v16 = vsel %vm552_vm0, %v306_v63, 0  ;;  %v1465_v18 = vand.u32 4294901760, %v1464_v58  ;;  %v1583_v20 = vsub.f32 %v18731_v59, %v24522_v7 }
  0x2d   : > { %v1471_v21 = vsub.f32 %v18735_v61, %v24520_v9  ;;  %v18764_v22 = vand.u32 4294901760, %v635_v4  ;;  %v18771_v31 = vand.u32 4294901760, %v587_v11  ;;  %v24517_v35 = vand.u32 4294901760, %v18754_v12 }
  0x2e   : > { %16637 = vmatpush3.xpose.msra.mxu0 %v18690_v37  ;;  %16669 = vmatpush3.xpose.msra.mxu1 %v1458_v0  ;;  %v1590_v29 = vsub.f32 %v18744_v5, %v24518_v10  ;;  %v18775_v40 = vsub.f32 %v638_v53, %v18740_v1  ;;  %v1584_v41 = vand.u32 4294901760, %v1583_v20  ;;  %v18778_v42 = vand.u32 4294901760, %v632_v16  ;;  %v303_v20 = vld [vmem:[%s18637_s21 + $0xa8] sm:$0xff] }
  0x2f   : > { %25038 = vst [vmem:[#allocation6_spill] sm:$0xff] %v18771_v31  ;;  %16638 = vmatprep.subr.mxu0 %v18714_v47  ;;  %16670 = vmatprep.subr.mxu1 %v1577_v6  ;;  %v584_v43 = vsel %vm552_vm0, %v290_v17, 0  ;;  %v18782_v45 = vsub.f32 %v590_v60, %v18748_v8  ;;  %v629_v50 = vsel %vm552_vm0, %v305_v23, 0  ;;  %v1472_v51 = vand.u32 4294901760, %v1471_v21  ;;  %v287_v10 = vld [vmem:[%s18637_s21 + $0x28] sm:$0xff] }
  0x30   : > { %25039 = vst [vmem:[#allocation7_spill] sm:$0xff] %v18778_v42  ;;  %v24516_v49 = vand.u32 4294901760, %v18775_v40  ;;  %v1478_v53 = vsub.f32 %v18754_v12, %v24517_v35  ;;  %v18792_v55 = vsub.f32 %v635_v4, %v18764_v22  ;;  %v1591_v58 = vand.u32 4294901760, %v1590_v29 }
  0x31   : > { %v24515_v54 = vand.u32 4294901760, %v18782_v45  ;;  %v18796_v60 = vand.u32 4294901760, %v584_v43  ;;  %v581_v62 = vsel %vm552_vm0, %v289_v46, 0  ;;  %v18800_v63 = vsub.f32 %v587_v11, %v18771_v31 }
  0x32   : > { %16639 = vmatpush3.xpose.msra.mxu0 %v18725_v57  ;;  %16671 = vmatpush3.xpose.msra.mxu1 %v1465_v18  ;;  %v1597_v0 = vsub.f32 %v18775_v40, %v24516_v49  ;;  %v18806_v4 = vand.u32 4294901760, %v629_v50  ;;  %v24519_v6 = vand.u32 4294901760, %v18792_v55  ;;  %v18810_v17 = vsub.f32 %v632_v16, %v18778_v42  ;;  %v288_v18 = vld [vmem:[%s18637_s21 + $0x30] sm:$0xff] }
  0x33   : > { %25040 = vst [vmem:[#allocation8_spill] sm:$0xff] %v18796_v60  ;;  %16640 = vmatprep.subr.mxu0 %v18740_v1  ;;  %16672 = vmatprep.subr.mxu1 %v1584_v41  ;;  %v626_v21 = vsel %vm552_vm0, %v304_v56, 0  ;;  %v1479_v11 = vand.u32 4294901760, %v1478_v53  ;;  %v1485_v23 = vsub.f32 %v18782_v45, %v24515_v54  ;;  %v18818_v29 = vand.u32 4294901760, %v581_v62 }
  0x34   : > { %25041 = vst [vmem:[#allocation9_spill] sm:$0xff] %v18806_v4  ;;  %v24521_v41 = vand.u32 4294901760, %v18800_v63  ;;  %v1604_v16 = vsub.f32 %v18792_v55, %v24519_v6  ;;  %v578_v46 = vsel %vm552_vm0, %v288_v18, 0  ;;  %v18827_v53 = vsub.f32 %v584_v43, %v18796_v60  ;;  %v302_v6 = vld [vmem:[%s18637_s21 + $0xa0] sm:$0xff] }
  0x35   : > { %25042 = vst [vmem:[#allocation10_spill] sm:$0xff] %v18818_v29  ;;  %v623_v56 = vsel %vm552_vm0, %v303_v20, 0  ;;  %v1598_v54 = vand.u32 4294901760, %v1597_v0  ;;  %v18831_v49 = vand.u32 4294901760, %v626_v21  ;;  %v24525_v35 = vand.u32 4294901760, %v18810_v17 }
  0x36   : > { %16641 = vmatpush3.xpose.msra.mxu0 %v18748_v8  ;;  %16673 = vmatpush3.xpose.msra.mxu1 %v1472_v51  ;;  %v18835_v51 = vsub.f32 %v629_v50, %v18806_v4  ;;  %v1486_v9 = vand.u32 4294901760, %v1485_v23  ;;  %v1492_v43 = vsub.f32 %v18800_v63, %v24521_v41  ;;  %v18842_v18 = vand.u32 4294901760, %v578_v46 }
  0x37   : > { %16642 = vmatprep.subr.mxu0 %v18764_v22  ;;  %16674 = vmatprep.subr.mxu1 %v1591_v58  ;;  %25043 = vst [vmem:[#allocation11_spill] sm:$0xff] %v18831_v49  ;;  %v18844_v20 = vand.u32 4294901760, %v623_v56  ;;  %v1605_v58 = vand.u32 4294901760, %v1604_v16  ;;  %v24528_v50 = vand.u32 4294901760, %v18827_v53  ;;  %v575_v0 = vsel %vm552_vm0, %v287_v10, 0 }
  0x38   : > { %25044 = vst [vmem:[#allocation12_spill] sm:$0xff] %v18842_v18  ;;  %v18850_v23 = vsub.f32 %v581_v62, %v18818_v29  ;;  %v1611_v41 = vsub.f32 %v18810_v17, %v24525_v35  ;;  %v24531_v7 = vand.u32 4294901760, %v18835_v51  ;;  %v18859_v16 = vsub.f32 %v626_v21, %v18831_v49  ;;  %v301_v35 = vld [vmem:[%s18637_s21 + $0x98] sm:$0xff] }
  0x39   : > { %25045 = vst [vmem:[#allocation13_spill] sm:$0xff] %v18844_v20  ;;  %v18864_v10 = vsub.f32 %v18627_v2, %v18630_v3  ;;  %v1493_v62 = vand.u32 4294901760, %v1492_v43  ;;  %v18866_v48 = vand.u32 4294901760, %v575_v0  ;;  %v18873_v38 = vsub.f32 %v623_v56, %v18844_v20  ;;  %v300_v2 = vld [vmem:[%s18637_s21 + $0x90] sm:$0xff] }
  0x3a   : > { %16643 = vmatpush3.xpose.msra.mxu0 %v18771_v31  ;;  %16675 = vmatpush3.xpose.msra.mxu1 %v1479_v11  ;;  %25046 = vst [vmem:[#allocation14_spill] sm:$0xff] %v18850_v23  ;;  %v620_v11 = vsel %vm552_vm0, %v302_v6, 0  ;;  %25047 = vst [vmem:[#allocation15_spill] sm:$0xff] %v18859_v16  ;;  %v1499_v6 = vsub.f32 %v18827_v53, %v24528_v50  ;;  %v572_v43 = vsel %vm552_vm0, %v286_v52, 0  ;;  %v617_v36 = vsel %vm552_vm0, %v301_v35, 0  ;;  %v285_v50 = vld [vmem:[%s18637_s21 + $0x18] sm:$0xff] }
  0x3b   : > { %16644 = vmatprep.subr.mxu0 %v18778_v42  ;;  %16676 = vmatprep.subr.mxu1 %v1598_v54  ;;  %25048 = vst [vmem:[#allocation16_spill] sm:$0xff] %v18866_v48  ;;  %v18869_v54 = vsub.f32 %v578_v46, %v18842_v18  ;;  %25050 = vst [vmem:[#allocation18_spill] sm:$0xff] %v18873_v38  ;;  %v18880_v21 = vand.u32 4294901760, %v620_v11  ;;  %v1612_v46 = vand.u32 4294901760, %v1611_v41  ;;  %v18891_v33 = vand.u32 4294901760, %v18864_v10 }
  0x3c   : > { %v1618_v56 = vsub.f32 %v18835_v51, %v24531_v7  ;;  %v18893_v32 = vand.u32 4294901760, %v572_v43  ;;  %v18898_v41 = vsub.f32 %v575_v0, %v18866_v48  ;;  %v1500_v7 = vand.u32 4294901760, %v1499_v6 }
  0x3d   : > { %25049 = vst [vmem:[#allocation17_spill] sm:$0xff] %v18869_v54  ;;  %25051 = vst [vmem:[#allocation19_spill] sm:$0xff] %v18880_v21  ;;  %v25054_v35 = vand.u32 4294901760, %v18850_v23  ;;  %v25056_v0 = vand.u32 4294901760, %v18859_v16  ;;  %v614_v6 = vsel %vm552_vm0, %v300_v2, 0  ;;  %v299_v2 = vld [vmem:[%s18637_s21 + $0x88] sm:$0xff] }
  0x3e   : > { %16645 = vmatpush3.xpose.msra.mxu0 %v18796_v60  ;;  %16677 = vmatpush3.xpose.msra.mxu1 %v1486_v9  ;;  %25052 = vst [vmem:[#allocation20_spill] sm:$0xff] %v18893_v32  ;;  %25053 = vst [vmem:[#allocation21_spill] sm:$0xff] %v18898_v41  ;;  %v18912_v60 = vand.u32 4294901760, %v617_v36 }
  0x3f   : > { %16646 = vmatprep.subr.mxu0 %v18806_v4  ;;  %16678 = vmatprep.subr.mxu1 %v1605_v58  ;;  %v1506_v9 = vsub.f32 %v18850_v23, %v25054_v35  ;;  %v18906_v4 = vsub.f32 %v620_v11, %v18880_v21  ;;  %v1619_v58 = vand.u32 4294901760, %v1618_v56  ;;  %v1625_v52 = vsub.f32 %v18859_v16, %v25056_v0 }
  0x40   : > { %25057 = vst [vmem:[#allocation23_spill] sm:$0xff] %v18912_v60  ;;  %v1427_v35 = vsub.f32 %v18864_v10, %v18891_v33  ;;  %v25058_v11 = vand.u32 4294901760, %v18869_v54 }
  0x41   : > { %25055 = vst [vmem:[#allocation22_spill] sm:$0xff] %v18906_v4  ;;  %v1507_v42 = vand.u32 4294901760, %v1506_v9 }
  0x42   : > { %16647 = vmatpush3.xpose.msra.mxu0 %v18818_v29  ;;  %16679 = vmatpush3.xpose.msra.mxu1 %v1493_v62  ;;  %v569_v62 = vsel %vm552_vm0, %v285_v50, 0  ;;  %v284_v29 = vld [vmem:[%s18637_s21 + $0x10] sm:$0xff]  ;;  %v18927_v50 = vsub.f32 %v572_v43, %v18893_v32  ;;  %v18939_v43 = vsub.f32 %v617_v36, %v18912_v60  ;;  %v18944_v9 = vand.u32 4294901760, %v1427_v35 }
  0x43   : > { %16648 = vmatprep.subr.mxu0 %v18831_v49  ;;  %16680 = vmatprep.subr.mxu1 %v1612_v46  ;;  %v1513_v49 = vsub.f32 %v18869_v54, %v25058_v11  ;;  %v25059_v46 = vand.u32 4294901760, %v18873_v38  ;;  %v18931_v16 = vand.u32 4294901760, %v569_v62  ;;  %v1626_v54 = vand.u32 4294901760, %v1625_v52 }
  0x44   : > { %25060 = vst [vmem:[#allocation24_spill] sm:$0xff] %v18927_v50  ;;  %v566_v0 = vsel %vm552_vm0, %v284_v29, 0  ;;  %25062 = vst [vmem:[#allocation26_spill] sm:$0xff] %v18939_v43  ;;  %v25064_v11 = vand.u32 4294901760, %v18898_v41  ;;  %v25065_v36 = vand.u32 4294901760, %v18906_v4  ;;  %16662 = vmatprep.mubr.f32.mxu0 %v18944_v9 }
  0x45   : > { %v1632_v56 = vsub.f32 %v18873_v38, %v25059_v46  ;;  %25061 = vst [vmem:[#allocation25_spill] sm:$0xff] %v18931_v16  ;;  %v18935_v46 = vand.u32 4294901760, %v614_v6  ;;  %v283_v38 = vld [vmem:[%s18637_s21 + $0x8] sm:$0xff]  ;;  %25063 = vst [vmem:[#allocation27_spill] sm:$0xff] %v18944_v9  ;;  %v1514_v31 = vand.u32 4294901760, %v1513_v49  ;;  %v18958_v49 = vsub.f32 %v569_v62, %v18931_v16 }
  0x46   : > { %16649 = vmatpush3.xpose.msra.mxu0 %v18842_v18  ;;  %16681 = vmatpush3.xpose.msra.mxu1 %v1500_v7  ;;  %v611_v18 = vsel %vm552_vm0, %v299_v2, 0  ;;  %v298_v7 = vld [vmem:[%s18637_s21 + $0x80] sm:$0xff]  ;;  %v1520_v52 = vsub.f32 %v18898_v41, %v25064_v11  ;;  %v1639_v29 = vsub.f32 %v18906_v4, %v25065_v36  ;;  %v18954_v2 = vand.u32 4294901760, %v566_v0 }
  0x47   : > { %16650 = vmatprep.subr.mxu0 %v18844_v20  ;;  %16682 = vmatprep.subr.mxu1 %v1619_v58  ;;  %v1633_v23 = vand.u32 4294901760, %v1632_v56  ;;  %v563_v35 = vsel %vm552_vm0, %v283_v38, 0  ;;  %v539_v56 = vld [vmem:[%s24508_s1 + $0x8] sm:$0xf]  ;;  %v18964_v11 = vand.u32 4294901760, %v611_v18  ;;  %v608_v36 = vsel %vm552_vm0, %v298_v7, 0 }
  0x48   : > { %v18969_v58 = vsub.f32 %v614_v6, %v18935_v46  ;;  %v282_v38 = vld [vmem:[%s18637_s21] sm:$0xff]  ;;  %v1521_v62 = vand.u32 4294901760, %v1520_v52  ;;  %v18976_v4 = vand.u32 4294901760, %v563_v35  ;;  %v541_v7 = vld [vmem:[%s24509_s2 + $0x8] sm:$0xf]  ;;  %v1640_v6 = vand.u32 4294901760, %v1639_v29 }
  0x4a   : > { %16651 = vmatpush3.xpose.msra.mxu0 %v18866_v48  ;;  %16683 = vmatpush3.xpose.msra.mxu1 %v1507_v42  ;;  %v25066_v48 = vand.u32 4294901760, %v18927_v50  ;;  %v18984_v42 = vand.u32 4294901760, %v608_v36 }
  0x4b   : > { %16652 = vmatprep.subr.mxu0 %v18880_v21  ;;  %16684 = vmatprep.subr.mxu1 %v1626_v54  ;;  %v557_v54 = vsel %vm552_vm0, %v539_v56, 0  ;;  %v18528_v21 = vmov 0   ;;  %v25067_v56 = vand.u32 4294901760, %v18939_v43 }
  0x4c   : > { %v1527_v20 = vsub.f32 %v18927_v50, %v25066_v48  ;;  %18400 = vset.pattern.permute.xlu0 %v18528_v21  ;;  %18401 = vset.pattern.permute.xlu1 %v18528_v21  ;;  %v18987_v48 = vsub.f32 %v566_v0, %v18954_v2  ;;  %v18998_v29 = vand.u32 4294901760, %v557_v54  ;;  %v540_v0 = vld [vmem:[%s24509_s2] sm:$0xff] }
  0x4d   : > { %v1646_v50 = vsub.f32 %v18939_v43, %v25067_v56  ;;  %549 = vperm.xlu0 %18400, %v541_v7   ;;  %v25071_v7 = vand.u32 4294901760, %v18969_v58 }
  0x4e   : > { %16653 = vmatpush3.xpose.msra.mxu0 %v18893_v32  ;;  %16685 = vmatpush3.xpose.msra.mxu1 %v1514_v31  ;;  %v560_v32 = vsel %vm552_vm0, %v282_v38, 0  ;;  %v18996_v31 = vsub.f32 %v611_v18, %v18964_v11  ;;  %25068 = vst [vmem:[#allocation28_spill] sm:$0xff] %v18998_v29  ;;  %v1528_v52 = vand.u32 4294901760, %v1527_v20  ;;  %v24571_v18 = vand.u32 4294901760, %v18987_v48 }
  0x4f   : > { %16654 = vmatprep.subr.mxu0 %v18912_v60  ;;  %16686 = vmatprep.subr.mxu1 %v1633_v23  ;;  %v25069_v23 = vand.u32 4294901760, %v18958_v49  ;;  %v19007_v21 = vand.u32 4294901760, %v560_v32  ;;  %v19011_v38 = vsub.f32 %v563_v35, %v18976_v4  ;;  %v1647_v20 = vand.u32 4294901760, %v1646_v50 }
  0x50   : > { %v19019_v60 = vsub.f32 %v608_v36, %v18984_v42  ;;  %v1541_v50 = vsub.f32 %v18987_v48, %v24571_v18 }
  0x51   : > { %v1534_v56 = vsub.f32 %v18958_v49, %v25069_v23  ;;  %25070 = vst [vmem:[#allocation29_spill] sm:$0xff] %v19011_v38  ;;  %v19022_v23 = vsub.f32 %v557_v54, %v18998_v29  ;;  %544 = vperm.xlu0 %18400, %v540_v0  }
  0x52   : > { %16655 = vmatpush3.xpose.msra.mxu0 %v18931_v16  ;;  %16687 = vmatpush3.xpose.msra.mxu1 %v1521_v62  ;;  %v1653_v16 = vsub.f32 %v18969_v58, %v25071_v7  ;;  %v24570_v62 = vand.u32 4294901760, %v18996_v31  ;;  %v19030_v7 = vsub.f32 %v560_v32, %v19007_v21 }
  0x53   : > { %16656 = vmatprep.subr.mxu0 %v18935_v46  ;;  %16688 = vmatprep.subr.mxu1 %v1640_v6  ;;  %25072 = vst [vmem:[#allocation30_spill] sm:$0xff] %v19022_v23  ;;  %v1535_v35 = vand.u32 4294901760, %v1534_v56  ;;  %v24574_v6 = vand.u32 4294901760, %v19011_v38  ;;  %v19038_v0 = vand.u32 4294901760, %v19022_v23  ;;  %v1542_v56 = vand.u32 4294901760, %v1541_v50 }
  0x54   : > { %25073 = vst [vmem:[#allocation31_spill] sm:$0xff] %v19030_v7  ;;  %v1654_v36 = vand.u32 4294901760, %v1653_v16  ;;  %v1660_v54 = vsub.f32 %v18996_v31, %v24570_v62 }
  0x55   : > { %25074 = vst [vmem:[#allocation32_spill] sm:$0xff] %v19038_v0  ;;  %v1548_v32 = vsub.f32 %v19011_v38, %v24574_v6  ;;  %v1438_v18 = vsub.f32 %v19022_v23, %v19038_v0  ;;  %v25086_v6 = vld [vmem:[#allocation11_spill] sm:$0xff] }
  0x56   : > { %16657 = vmatpush3.xpose.msra.mxu0 %v18954_v2  ;;  %16689 = vmatpush3.xpose.msra.mxu1 %v1528_v52  ;;  %v24572_v52 = vand.u32 4294901760, %v19019_v60  ;;  %v1661_v16 = vand.u32 4294901760, %v1660_v54 }
  0x57   : > { %16658 = vmatprep.subr.mxu0 %v18964_v11  ;;  %16690 = vmatprep.subr.mxu1 %v1647_v20  ;;  %v24573_v20 = vand.u32 4294901760, %v19030_v7  ;;  %v19056_v54 = vand.u32 4294901760, %v1438_v18  ;;  %v25076_v18 = vld [vmem:[#allocation14_spill] sm:$0xff] }
  0x58   : > { %v1667_v62 = vsub.f32 %v19019_v60, %v24572_v52 }
  0x59   : > { %v1555_v50 = vsub.f32 %v19030_v7, %v24573_v20  ;;  %25075 = vst [vmem:[#allocation33_spill] sm:$0xff] %v19056_v54  ;;  %v25085_v20 = vld [vmem:[#allocation22_spill] sm:$0xff] }
  0x5a   : > { %16659 = vmatpush3.xpose.msra.mxu0 %v18976_v4  ;;  %16691 = vmatpush3.xpose.msra.mxu1 %v1535_v35  ;;  %v1549_v35 = vand.u32 4294901760, %v1548_v32  ;;  %v25080_v32 = vld [vmem:[#allocation17_spill] sm:$0xff] }
  0x5b   : > { %16660 = vmatprep.subr.mxu0 %v18984_v42  ;;  %16692 = vmatprep.subr.mxu1 %v1654_v36  ;;  %v1668_v36 = vand.u32 4294901760, %v1667_v62  ;;  %v1556_v52 = vand.u32 4294901760, %v1555_v50  ;;  %v25077_v62 = vld [vmem:[#allocation6_spill] sm:$0xff]  ;;  %v25083_v50 = vld [vmem:[#allocation9_spill] sm:$0xff] }
  0x5e   : > { %16661 = vmatpush3.xpose.msra.mxu0 %v19007_v21  ;;  %16693 = vmatpush3.xpose.msra.mxu1 %v1542_v56  ;;  %v25079_v56 = vld [vmem:[#allocation7_spill] sm:$0xff] }
  0x5f   : > { %16694 = vmatprep.subr.mxu1 %v1661_v16  ;;  %16702 = vmatprep.subr.mxu0 %v18667_v25  ;;  %v25081_v16 = vld [vmem:[#allocation8_spill] sm:$0xff] }
  0x61   : > { %16663 = vmatmul.mubr.f32.vlgmr.msra.gmra.mxu0 %v18944_v9  ;;  %v25088_v9 = vld [vmem:[#allocation12_spill] sm:$0xff] }
  0x62   : > { %16695 = vmatpush3.xpose.msra.mxu1 %v1549_v35  ;;  %16703 = vmatpush3.xpose.msra.mxu0 %v18672_v27  ;;  %v25082_v35 = vld [vmem:[#allocation18_spill] sm:$0xff] }
  0x63   : > { %16696 = vmatprep.subr.mxu1 %v1668_v36  ;;  %16704 = vmatprep.subr.mxu0 %v18676_v28  ;;  %v25084_v36 = vld [vmem:[#allocation10_spill] sm:$0xff] }
  0x64   : > { %16664 = vmatprep.mubr.f32.mxu0 %v19056_v54 }
  0x65   : > { %16665 = vmatmul.mubr.f32.gmra.mxu0 %v19056_v54  ;;  %v25087_v54 = vld [vmem:[#allocation24_spill] sm:$0xff] }
  0x66   : > { %16697 = vmatpush3.xpose.msra.mxu1 %v1556_v52  ;;  %16705 = vmatpush3.xpose.msra.mxu0 %v18680_v30  ;;  %v25078_v52 = vld [vmem:[#allocation15_spill] sm:$0xff] }
  0x67   : > { %16706 = vmatprep.subr.mxu0 %v18694_v39  ;;  %16738 = vmatprep.subr.mxu1 %v18648_v13 }
  0x68   : > { %16734 = vmatprep.mubr.f32.mxu0 %v18864_v10 }
  0x69   : > { %16699 = vmatmul.mubr.f32.vlgmr.msra.gmra.mxu1 %v18630_v3 }
  0x6a   : > { %16707 = vmatpush3.xpose.msra.mxu0 %v18705_v44  ;;  %16739 = vmatpush3.xpose.msra.mxu1 %v18650_v14 }
  0x6b   : > { %16708 = vmatprep.subr.mxu0 %v18731_v59  ;;  %16740 = vmatprep.subr.mxu1 %v18652_v15 }
  0x6c   : > { %16700 = vmatprep.mubr.f32.mxu1 %v18998_v29 }
  0x6d   : > { %16701 = vmatmul.mubr.f32.gmra.mxu1 %v18998_v29  ;;  %v25089_v29 = vld [vmem:[#allocation13_spill] sm:$0xff] }
  0x6e   : > { %16709 = vmatpush3.xpose.msra.mxu0 %v18735_v61  ;;  %16741 = vmatpush3.xpose.msra.mxu1 %v18657_v19 }
  0x6f   : > { %16710 = vmatprep.subr.mxu0 %v18744_v5  ;;  %16742 = vmatprep.subr.mxu1 %v18664_v24 }
  0x70   : > { %16770 = vmatprep.mubr.f32.mxu1 %v18891_v33 }
  0x72   : > { %16711 = vmatpush3.xpose.msra.mxu0 %v18754_v12  ;;  %16743 = vmatpush3.xpose.msra.mxu1 %v18669_v26 }
  0x73   : > { %16712 = vmatprep.subr.mxu0 %v18775_v40  ;;  %16744 = vmatprep.subr.mxu1 %v18686_v34 }
  0x76   : > { %16713 = vmatpush3.xpose.msra.mxu0 %v18782_v45  ;;  %16745 = vmatpush3.xpose.msra.mxu1 %v18690_v37 }
  0x77   : > { %16714 = vmatprep.subr.mxu0 %v18792_v55  ;;  %16746 = vmatprep.subr.mxu1 %v18714_v47 }
  0x7a   : > { %16715 = vmatpush3.xpose.msra.mxu0 %v18800_v63  ;;  %16747 = vmatpush3.xpose.msra.mxu1 %v18725_v57 }
  0x7b   : > { %16716 = vmatprep.subr.mxu0 %v18810_v17  ;;  %16748 = vmatprep.subr.mxu1 %v18740_v1 }
  0x7e   : > { %16717 = vmatpush3.xpose.msra.mxu0 %v18827_v53  ;;  %16749 = vmatpush3.xpose.msra.mxu1 %v18748_v8 }
  0x7f   : > { %16718 = vmatprep.subr.mxu0 %v18835_v51  ;;  %16750 = vmatprep.subr.mxu1 %v18764_v22 }
  0x82   : > { %16719 = vmatpush3.xpose.msra.mxu0 %v25076_v18  ;;  %16751 = vmatpush3.xpose.msra.mxu1 %v25077_v62 }
  0x83   : > { %16720 = vmatprep.subr.mxu0 %v25078_v52  ;;  %16752 = vmatprep.subr.mxu1 %v25079_v56 }
  0x86   : > { %16721 = vmatpush3.xpose.msra.mxu0 %v25080_v32  ;;  %16753 = vmatpush3.xpose.msra.mxu1 %v25081_v16 }
  0x87   : > { %16722 = vmatprep.subr.mxu0 %v25082_v35  ;;  %16754 = vmatprep.subr.mxu1 %v25083_v50  ;;  %v25090_v35 = vld [vmem:[#allocation16_spill] sm:$0xff] }
  0x8a   : > { %16723 = vmatpush3.xpose.msra.mxu0 %v18898_v41  ;;  %16755 = vmatpush3.xpose.msra.mxu1 %v25084_v36  ;;  %v25091_v41 = vld [vmem:[#allocation19_spill] sm:$0xff] }
  0x8b   : > { %16724 = vmatprep.subr.mxu0 %v25085_v20  ;;  %16756 = vmatprep.subr.mxu1 %v25086_v6  ;;  %v25092_v20 = vld [vmem:[#allocation20_spill] sm:$0xff] }
  0x8e   : > { %16725 = vmatpush3.xpose.msra.mxu0 %v25087_v54  ;;  %16757 = vmatpush3.xpose.msra.mxu1 %v25088_v9  ;;  %v25093_v54 = vld [vmem:[#allocation23_spill] sm:$0xff] }
  0x8f   : > { %16726 = vmatprep.subr.mxu0 %v18939_v43  ;;  %16758 = vmatprep.subr.mxu1 %v25089_v29  ;;  %v25094_v43 = vld [vmem:[#allocation25_spill] sm:$0xff] }
  0x92   : > { %16727 = vmatpush3.xpose.msra.mxu0 %v18958_v49  ;;  %16759 = vmatpush3.xpose.msra.mxu1 %v25090_v35 }
  0x93   : > { %16728 = vmatprep.subr.mxu0 %v18969_v58  ;;  %16760 = vmatprep.subr.mxu1 %v25091_v41 }
  0x96   : > { %16729 = vmatpush3.xpose.msra.mxu0 %v18987_v48  ;;  %16761 = vmatpush3.xpose.msra.mxu1 %v25092_v20  ;;  %v25095_v20 = vand.u32 4294901760, %v18667_v25  ;;  %v25098_v25 = vand.u32 4294901760, %v18680_v30  ;;  %v25103_v30 = vand.u32 4294901760, %v18744_v5 }
  0x97   : > { %16730 = vmatprep.subr.mxu0 %v18996_v31  ;;  %16762 = vmatprep.subr.mxu1 %v25093_v54 }
  0x9a   : > { %16731 = vmatpush3.xpose.msra.mxu0 %v19011_v38  ;;  %16763 = vmatpush3.xpose.msra.mxu1 %v25094_v43  ;;  %v25096_v38 = vand.u32 4294901760, %v18672_v27  ;;  %v25100_v27 = vand.u32 4294901760, %v18705_v44  ;;  %v25112_v44 = vand.u32 4294901760, %v25076_v18  ;;  %v343_v18 = vld [vmem:[%s18637_s21 + $0x1e8] sm:$0xff] }
  0x9b   : > { %16732 = vmatprep.subr.mxu0 %v19019_v60  ;;  %16764 = vmatprep.subr.mxu1 %v18935_v46 }
  0x9e   : > { %16733 = vmatpush3.xpose.msra.mxu0 %v19030_v7  ;;  %16765 = vmatpush3.xpose.msra.mxu1 %v18954_v2  ;;  %v25097_v7 = vand.u32 4294901760, %v18676_v28  ;;  %v25101_v28 = vand.u32 4294901760, %v18731_v59  ;;  %v25115_v59 = vld [vmem:[#allocation18_spill] sm:$0xff] }
  0x9f   : > { %16766 = vmatprep.subr.mxu1 %v18964_v11  ;;  %16774 = vmatprep.subr.mxu0 %v25095_v20  ;;  %v25099_v20 = vand.u32 4294901760, %v18694_v39  ;;  %v25106_v39 = vand.u32 4294901760, %v18782_v45 }
  0xa1   : > { %16735 = vmatmul.mubr.f32.vlgmr.msra.gmra.mxu0 %v18864_v10 }
  0xa2   : > { %16767 = vmatpush3.xpose.msra.mxu1 %v18976_v4  ;;  %16775 = vmatpush3.xpose.msra.mxu0 %v25096_v38 }
  0xa3   : > { %16736 = vmatprep.mubr.f32.mxu0 %v19022_v23  ;;  %16768 = vmatprep.subr.mxu1 %v18984_v42 }
  0xa4   : > { %16776 = vmatprep.subr.mxu0 %v25097_v7  ;;  %v25126_v7 = vand.u32 4294901760, %v18969_v58 }
  0xa5   : > { %16737 = vmatmul.mubr.f32.gmra.mxu0 %v19022_v23 }
  0xa6   : > { %16769 = vmatpush3.xpose.msra.mxu1 %v19007_v21  ;;  %16777 = vmatpush3.xpose.msra.mxu0 %v25098_v25  ;;  %v25130_v25 = vld [vmem:[#allocation29_spill] sm:$0xff] }
  0xa7   : > { %16778 = vmatprep.subr.mxu0 %v25099_v20  ;;  %16810 = vmatprep.subr.mxu1 %v18648_v13  ;;  %v25102_v13 = vand.u32 4294901760, %v18735_v61  ;;  %v25116_v61 = vand.u32 4294901760, %v25115_v59  ;;  %v25131_v20 = vand.u32 4294901760, %v25130_v25  ;;  %v340_v59 = vld [vmem:[%s18637_s21 + $0x1d0] sm:$0xff] }
  0xa8   : > { %16806 = vmatprep.mubr.f32.mxu0 %v18630_v3 }
  0xa9   : > { %16771 = vmatmul.mubr.f32.vlgmr.msra.gmra.mxu1 %v18891_v33 }
  0xaa   : > { %16779 = vmatpush3.xpose.msra.mxu0 %v25100_v27  ;;  %16811 = vmatpush3.xpose.msra.mxu1 %v18650_v14  ;;  %v25104_v14 = vand.u32 4294901760, %v18754_v12 }
  0xab   : > { %16772 = vmatprep.mubr.f32.mxu1 %v19038_v0  ;;  %16780 = vmatprep.subr.mxu0 %v25101_v28 }
  0xac   : > { %16812 = vmatprep.subr.mxu1 %v18652_v15  ;;  %v25105_v15 = vand.u32 4294901760, %v18775_v40  ;;  %v25121_v40 = vld [vmem:[#allocation24_spill] sm:$0xff] }
  0xad   : > { %16773 = vmatmul.mubr.f32.gmra.mxu1 %v19038_v0  ;;  %v25122_v45 = vand.u32 4294901760, %v25121_v40 }
  0xae   : > { %16781 = vmatpush3.xpose.msra.mxu0 %v25102_v13  ;;  %16813 = vmatpush3.xpose.msra.mxu1 %v18657_v19  ;;  %v25107_v19 = vand.u32 4294901760, %v18792_v55  ;;  %v25123_v55 = vld [vmem:[#allocation26_spill] sm:$0xff]  ;;  %v25132_v13 = vand.u32 4294901760, %v19019_v60 }
  0xaf   : > { %16782 = vmatprep.subr.mxu0 %v25103_v30  ;;  %16814 = vmatprep.subr.mxu1 %v18664_v24  ;;  %v25108_v24 = vand.u32 4294901760, %v18800_v63  ;;  %v25124_v63 = vand.u32 4294901760, %v25123_v55  ;;  %v326_v30 = vld [vmem:[%s18637_s21 + $0x160] sm:$0xff] }
  0xb0   : > { %16842 = vmatprep.mubr.f32.mxu1 %v18630_v3 }
  0xb2   : > { %16783 = vmatpush3.xpose.msra.mxu0 %v25104_v14  ;;  %16815 = vmatpush3.xpose.msra.mxu1 %v18669_v26  ;;  %v25109_v26 = vand.u32 4294901760, %v18810_v17 }
  0xb3   : > { %16784 = vmatprep.subr.mxu0 %v25105_v15  ;;  %16816 = vmatprep.subr.mxu1 %v18686_v34  ;;  %v25110_v34 = vand.u32 4294901760, %v18827_v53  ;;  %v329_v53 = vld [vmem:[%s18637_s21 + $0x178] sm:$0xff] }
  0xb6   : > { %16785 = vmatpush3.xpose.msra.mxu0 %v25106_v39  ;;  %16817 = vmatpush3.xpose.msra.mxu1 %v18690_v37  ;;  %v25111_v37 = vand.u32 4294901760, %v18835_v51  ;;  %v25125_v51 = vand.u32 4294901760, %v18958_v49  ;;  %v25127_v49 = vand.u32 4294901760, %v18987_v48 }
  0xb7   : > { %16786 = vmatprep.subr.mxu0 %v25107_v19  ;;  %16818 = vmatprep.subr.mxu1 %v18714_v47  ;;  %v25113_v47 = vand.u32 4294901760, %v25078_v52  ;;  %v25128_v52 = vld [vmem:[#allocation20_spill] sm:$0xff] }
  0xb8   : > { %v341_v19 = vld [vmem:[%s18637_s21 + $0x1d8] sm:$0xff] }
  0xba   : > { %16787 = vmatpush3.xpose.msra.mxu0 %v25108_v24  ;;  %16819 = vmatpush3.xpose.msra.mxu1 %v18725_v57  ;;  %v25114_v57 = vand.u32 4294901760, %v25080_v32  ;;  %v25133_v24 = vld [vmem:[#allocation31_spill] sm:$0xff] }
  0xbb   : > { %16788 = vmatprep.subr.mxu0 %v25109_v26  ;;  %16820 = vmatprep.subr.mxu1 %v18740_v1  ;;  %v25117_v1 = vld [vmem:[#allocation21_spill] sm:$0xff]  ;;  %v25134_v26 = vand.u32 4294901760, %v25133_v24 }
  0xbc   : > { %v25118_v5 = vand.u32 4294901760, %v25117_v1 }
  0xbe   : > { %16789 = vmatpush3.xpose.msra.mxu0 %v25110_v34  ;;  %16821 = vmatpush3.xpose.msra.mxu1 %v18748_v8  ;;  %v25119_v8 = vld [vmem:[#allocation22_spill] sm:$0xff]  ;;  %v692_v34 = vsel %vm552_vm0, %v326_v30, 0 }
  0xbf   : > { %16790 = vmatprep.subr.mxu0 %v25111_v37  ;;  %16822 = vmatprep.subr.mxu1 %v18764_v22  ;;  %v25120_v12 = vand.u32 4294901760, %v25119_v8  ;;  %v345_v22 = vld [vmem:[%s18637_s21 + $0x1f8] sm:$0xff]  ;;  %v19290_v1 = vand.u32 4294901760, %v692_v34 }
  0xc0   : > { %v749_v17 = vsel %vm552_vm0, %v345_v22, 0  ;;  %v25135_v22 = vld [vmem:[#allocation28_spill] sm:$0xff] }
  0xc1   : > { %v19214_v38 = vand.u32 4294901760, %v749_v17 }
  0xc2   : > { %16791 = vmatpush3.xpose.msra.mxu0 %v25112_v44  ;;  %16823 = vmatpush3.xpose.msra.mxu1 %v25077_v62 }
  0xc3   : > { %16792 = vmatprep.subr.mxu0 %v25113_v47  ;;  %16824 = vmatprep.subr.mxu1 %v25079_v56  ;;  %v19231_v58 = vsub.f32 %v749_v17, %v19214_v38 }
  0xc6   : > { %16793 = vmatpush3.xpose.msra.mxu0 %v25114_v57  ;;  %16825 = vmatpush3.xpose.msra.mxu1 %v25081_v16  ;;  %v743_v16 = vsel %vm552_vm0, %v343_v18, 0  ;;  %v325_v57 = vld [vmem:[%s18637_s21 + $0x158] sm:$0xff] }
  0xc7   : > { %16794 = vmatprep.subr.mxu0 %v25116_v61  ;;  %16826 = vmatprep.subr.mxu1 %v25083_v50  ;;  %v19249_v27 = vand.u32 4294901760, %v743_v16 }
  0xc9   : > { %v19276_v37 = vsub.f32 %v743_v16, %v19249_v27 }
  0xca   : > { %16795 = vmatpush3.xpose.msra.mxu0 %v25118_v5  ;;  %16827 = vmatpush3.xpose.msra.mxu1 %v25084_v36  ;;  %v342_v36 = vld [vmem:[%s18637_s21 + $0x1e0] sm:$0xff] }
  0xcb   : > { %16796 = vmatprep.subr.mxu0 %v25120_v12  ;;  %16828 = vmatprep.subr.mxu1 %v25086_v6  ;;  %v344_v6 = vld [vmem:[%s18637_s21 + $0x1f0] sm:$0xff]  ;;  %v740_v14 = vsel %vm552_vm0, %v342_v36, 0  ;;  %v24592_v12 = vand.u32 4294901760, %v19276_v37 }
  0xcc   : > { %v746_v62 = vsel %vm552_vm0, %v344_v6, 0  ;;  %v19280_v44 = vand.u32 4294901760, %v740_v14  ;;  %v339_v6 = vld [vmem:[%s18637_s21 + $0x1c8] sm:$0xff] }
  0xcd   : > { %v19238_v48 = vand.u32 4294901760, %v746_v62  ;;  %v731_v16 = vsel %vm552_vm0, %v339_v6, 0 }
  0xce   : > { %16797 = vmatpush3.xpose.msra.mxu0 %v25122_v45  ;;  %16829 = vmatpush3.xpose.msra.mxu1 %v25088_v9  ;;  %v701_v9 = vsel %vm552_vm0, %v329_v53, 0  ;;  %v689_v45 = vsel %vm552_vm0, %v325_v57, 0  ;;  %v19306_v55 = vsub.f32 %v740_v14, %v19280_v44 }
  0xcf   : > { %16798 = vmatprep.subr.mxu0 %v25124_v63  ;;  %16830 = vmatprep.subr.mxu1 %v25089_v29  ;;  %v328_v29 = vld [vmem:[%s18637_s21 + $0x170] sm:$0xff]  ;;  %v19227_v56 = vand.u32 4294901760, %v701_v9 }
  0xd0   : > { %v698_v32 = vsel %vm552_vm0, %v328_v29, 0  ;;  %v324_v63 = vld [vmem:[%s18637_s21 + $0x150] sm:$0xff] }
  0xd1   : > { %v19240_v50 = vand.u32 4294901760, %v698_v32  ;;  %v686_v18 = vsel %vm552_vm0, %v324_v63, 0 }
  0xd2   : > { %16799 = vmatpush3.xpose.msra.mxu0 %v25125_v51  ;;  %16831 = vmatpush3.xpose.msra.mxu1 %v25090_v35  ;;  %v327_v35 = vld [vmem:[%s18637_s21 + $0x168] sm:$0xff] }
  0xd3   : > { %16800 = vmatprep.subr.mxu0 %v25126_v7  ;;  %16832 = vmatprep.subr.mxu1 %v25091_v41  ;;  %v25129_v41 = vand.u32 4294901760, %v18996_v31  ;;  %v19247_v31 = vsub.f32 %v701_v9, %v19227_v56  ;;  %v695_v28 = vsel %vm552_vm0, %v327_v35, 0  ;;  %v19262_v15 = vsub.f32 %v698_v32, %v19240_v50  ;;  %v338_v32 = vld [vmem:[%s18637_s21 + $0x1c0] sm:$0xff]  ;;  %v25136_v35 = vld [vmem:[#allocation27_spill] sm:$0xff] }
  0xd4   : > { %v19264_v39 = vand.u32 4294901760, %v695_v28  ;;  %v19324_v9 = vand.u32 4294901760, %v689_v45  ;;  %v728_v14 = vsel %vm552_vm0, %v338_v32, 0 }
  0xd6   : > { %16801 = vmatpush3.xpose.msra.mxu0 %v25127_v49  ;;  %16833 = vmatpush3.xpose.msra.mxu1 %v25128_v52  ;;  %v19288_v61 = vsub.f32 %v695_v28, %v19264_v39  ;;  %v24589_v49 = vand.u32 4294901760, %v19306_v55  ;;  %v323_v52 = vld [vmem:[%s18637_s21 + $0x148] sm:$0xff] }
  0xd7   : > { %16802 = vmatprep.subr.mxu0 %v25129_v41  ;;  %16834 = vmatprep.subr.mxu1 %v25093_v54  ;;  %v24599_v54 = vand.u32 4294901760, %v19231_v58  ;;  %v683_v30 = vsel %vm552_vm0, %v323_v52, 0  ;;  %v321_v52 = vld [vmem:[%s18637_s21 + $0x138] sm:$0xff] }
  0xd8   : > { %v24591_v51 = vand.u32 4294901760, %v19288_v61 }
  0xd9   : > { %v2466_v60 = vsub.f32 %v19231_v58, %v24599_v54 }
  0xda   : > { %16803 = vmatpush3.xpose.msra.mxu0 %v25131_v20  ;;  %16835 = vmatpush3.xpose.msra.mxu1 %v25094_v43  ;;  %v19259_v43 = vsub.f32 %v746_v62, %v19238_v48  ;;  %v2480_v62 = vsub.f32 %v19276_v37, %v24592_v12  ;;  %v2368_v25 = vsub.f32 %v19288_v61, %v24591_v51  ;;  %v19345_v20 = vand.u32 4294901760, %v686_v18 }
  0xdb   : > { %16804 = vmatprep.subr.mxu0 %v25132_v13  ;;  %16836 = vmatprep.subr.mxu1 %v18935_v46  ;;  %v24597_v46 = vand.u32 4294901760, %v19247_v31  ;;  %v2467_v5 = vand.u32 4294901760, %v2466_v60  ;;  %v19350_v13 = vsub.f32 %v689_v45, %v19324_v9  ;;  %v19362_v60 = vand.u32 4294901760, %v731_v16  ;;  %v337_v45 = vld [vmem:[%s18637_s21 + $0x1b8] sm:$0xff] }
  0xdc   : > { %v24595_v47 = vand.u32 4294901760, %v19259_v43  ;;  %v2481_v24 = vand.u32 4294901760, %v2480_v62  ;;  %v2369_v57 = vand.u32 4294901760, %v2368_v25  ;;  %v725_v62 = vsel %vm552_vm0, %v337_v45, 0  ;;  %v336_v25 = vld [vmem:[%s18637_s21 + $0x1b0] sm:$0xff] }
  0xdd   : > { %v2354_v8 = vsub.f32 %v19247_v31, %v24597_v46  ;;  %25137 = vst [vmem:[#allocation14_spill] sm:$0xff] %v19362_v60  ;;  %v24588_v63 = vand.u32 4294901760, %v19350_v13  ;;  %v19410_v45 = vand.u32 4294901760, %v725_v62 }
  0xde   : > { %16805 = vmatpush3.xpose.msra.mxu0 %v25134_v26  ;;  %16837 = vmatpush3.xpose.msra.mxu1 %v18954_v2  ;;  %v737_v2 = vsel %vm552_vm0, %v341_v19, 0  ;;  %v2473_v17 = vsub.f32 %v19259_v43, %v24595_v47  ;;  %v2487_v26 = vsub.f32 %v19306_v55, %v24589_v49 }
  0xdf   : > { %16838 = vmatprep.subr.mxu1 %v18964_v11  ;;  %16846 = vmatprep.subr.mxu0 %v19214_v38  ;;  %v24593_v11 = vand.u32 4294901760, %v19262_v15  ;;  %v19301_v40 = vand.u32 4294901760, %v737_v2  ;;  %v2355_v7 = vand.u32 4294901760, %v2354_v8  ;;  %v19372_v8 = vand.u32 4294901760, %v728_v14  ;;  %25141 = vst [vmem:[#allocation17_spill] sm:$0xff] %v19410_v45 }
  0xe0   : > { %v2474_v41 = vand.u32 4294901760, %v2473_v17  ;;  %v2488_v6 = vand.u32 4294901760, %v2487_v26  ;;  %v2382_v26 = vsub.f32 %v19350_v13, %v24588_v63  ;;  %v335_v63 = vld [vmem:[%s18637_s21 + $0x1a8] sm:$0xff]  ;;  %v19436_v12 = vsub.f32 %v725_v62, %v19410_v45 }
  0xe1   : > { %16807 = vmatmul.mubr.f32.vlgmr.msra.gmra.mxu0 %v18630_v3  ;;  %v2361_v53 = vsub.f32 %v19262_v15, %v24593_v11  ;;  %25139 = vst [vmem:[#allocation15_spill] sm:$0xff] %v19372_v8  ;;  %v319_v11 = vld [vmem:[%s18637_s21 + $0x128] sm:$0xff] }
  0xe2   : > { %16839 = vmatpush3.xpose.msra.mxu1 %v18976_v4  ;;  %16847 = vmatpush3.xpose.msra.mxu0 %v19227_v56  ;;  %v734_v4 = vsel %vm552_vm0, %v340_v59, 0  ;;  %v19368_v59 = vsub.f32 %v686_v18, %v19345_v20  ;;  %v19387_v18 = vsub.f32 %v731_v16, %v19362_v60 }
  0xe3   : > { %16808 = vmatprep.mubr.f32.mxu0 %v25135_v22  ;;  %16840 = vmatprep.subr.mxu1 %v18984_v42  ;;  %v19315_v42 = vsub.f32 %v692_v34, %v19290_v1  ;;  %v19326_v29 = vand.u32 4294901760, %v734_v4  ;;  %v2362_v36 = vand.u32 4294901760, %v2361_v53 }
  0xe4   : > { %16848 = vmatprep.subr.mxu0 %v19238_v48 }
  0xe5   : > { %16809 = vmatmul.mubr.f32.gmra.mxu0 %v25135_v22  ;;  %v24586_v28 = vand.u32 4294901760, %v19315_v42  ;;  %v19355_v19 = vsub.f32 %v734_v4, %v19326_v29 }
  0xe6   : > { %16841 = vmatpush3.xpose.msra.mxu1 %v19007_v21  ;;  %16849 = vmatpush3.xpose.msra.mxu0 %v19240_v50  ;;  %v19335_v21 = vsub.f32 %v737_v2, %v19301_v40  ;;  %v322_v2 = vld [vmem:[%s18637_s21 + $0x140] sm:$0xff] }
  0xe7   : > { %16850 = vmatprep.subr.mxu0 %v19249_v27  ;;  %16882 = vmatprep.subr.mxu1 %v2467_v5  ;;  %v19370_v5 = vand.u32 4294901760, %v683_v30  ;;  %v2375_v4 = vsub.f32 %v19315_v42, %v24586_v28  ;;  %v24587_v17 = vand.u32 4294901760, %v19355_v19  ;;  %v680_v53 = vsel %vm552_vm0, %v322_v2, 0 }
  0xe8   : > { %16878 = vmatprep.mubr.f32.mxu0 %v25136_v35  ;;  %v24585_v34 = vand.u32 4294901760, %v19335_v21 }
  0xe9   : > { %16843 = vmatmul.mubr.f32.vlgmr.msra.gmra.mxu1 %v18630_v3  ;;  %25138 = vst [vmem:[#allocation6_spill] sm:$0xff] %v19370_v5  ;;  %v19393_v32 = vsub.f32 %v683_v30, %v19370_v5  ;;  %v2376_v16 = vand.u32 4294901760, %v2375_v4  ;;  %v2501_v30 = vsub.f32 %v19355_v19, %v24587_v17  ;;  %v722_v4 = vsel %vm552_vm0, %v336_v25, 0 }
  0xea   : > { %16851 = vmatpush3.xpose.msra.mxu0 %v19264_v39  ;;  %16883 = vmatpush3.xpose.msra.mxu1 %v2355_v7  ;;  %v2494_v7 = vsub.f32 %v19335_v21, %v24585_v34  ;;  %v320_v34 = vld [vmem:[%s18637_s21 + $0x130] sm:$0xff] }
  0xeb   : > { %16844 = vmatprep.mubr.f32.mxu1 %v25135_v22  ;;  %16852 = vmatprep.subr.mxu0 %v19280_v44  ;;  %v2502_v25 = vand.u32 4294901760, %v2501_v30  ;;  %v674_v51 = vsel %vm552_vm0, %v320_v34, 0 }
  0xec   : > { %16884 = vmatprep.subr.mxu1 %v2474_v41  ;;  %v19395_v41 = vand.u32 4294901760, %v680_v53  ;;  %v2495_v2 = vand.u32 4294901760, %v2494_v7 }
  0xed   : > { %16845 = vmatmul.mubr.f32.gmra.mxu1 %v25135_v22 }
  0xee   : > { %16853 = vmatpush3.xpose.msra.mxu0 %v19290_v1  ;;  %16885 = vmatpush3.xpose.msra.mxu1 %v2362_v36  ;;  %25140 = vst [vmem:[#allocation7_spill] sm:$0xff] %v19395_v41  ;;  %v24590_v36 = vand.u32 4294901760, %v19368_v59  ;;  %v19417_v28 = vsub.f32 %v680_v53, %v19395_v41 }
  0xef   : > { %16854 = vmatprep.subr.mxu0 %v19301_v40  ;;  %16886 = vmatprep.subr.mxu1 %v2481_v24  ;;  %v19400_v24 = vsub.f32 %v728_v14, %v19372_v8  ;;  %v24594_v14 = vand.u32 4294901760, %v19387_v18 }
  0xf0   : > { %16914 = vmatprep.mubr.f32.mxu1 %v18630_v3  ;;  %v2389_v17 = vsub.f32 %v19368_v59, %v24590_v36  ;;  %v19432_v36 = vand.u32 4294901760, %v722_v4  ;;  %v25147_v0 = vand.u32 4294901760, %v19417_v28 }
  0xf1   : > { %v24598_v7 = vand.u32 4294901760, %v19400_v24  ;;  %v2508_v53 = vsub.f32 %v19387_v18, %v24594_v14 }
  0xf2   : > { %16855 = vmatpush3.xpose.msra.mxu0 %v19324_v9  ;;  %16887 = vmatpush3.xpose.msra.mxu1 %v2369_v57  ;;  %v677_v57 = vsel %vm552_vm0, %v321_v52, 0  ;;  %v2383_v52 = vand.u32 4294901760, %v2382_v26  ;;  %25143 = vst [vmem:[#allocation9_spill] sm:$0xff] %v19432_v36  ;;  %v719_v26 = vsel %vm552_vm0, %v335_v63, 0  ;;  %v2390_v30 = vand.u32 4294901760, %v2389_v17 }
  0xf3   : > { %16856 = vmatprep.subr.mxu0 %v19326_v29  ;;  %16888 = vmatprep.subr.mxu1 %v2488_v6  ;;  %v24596_v6 = vand.u32 4294901760, %v19393_v32  ;;  %v19426_v49 = vand.u32 4294901760, %v677_v57  ;;  %v2515_v14 = vsub.f32 %v19400_v24, %v24598_v7  ;;  %v19452_v63 = vand.u32 4294901760, %v674_v51 }
  0xf4   : > { %v671_v17 = vsel %vm552_vm0, %v319_v11, 0  ;;  %v19457_v46 = vand.u32 4294901760, %v719_v26  ;;  %v24608_v7 = vand.u32 4294901760, %v19436_v12  ;;  %v19461_v54 = vsub.f32 %v722_v4, %v19432_v36 }
  0xf5   : > { %25142 = vst [vmem:[#allocation8_spill] sm:$0xff] %v19426_v49  ;;  %v19450_v62 = vsub.f32 %v677_v57, %v19426_v49  ;;  %25144 = vst [vmem:[#allocation10_spill] sm:$0xff] %v19452_v63  ;;  %v333_v57 = vld [vmem:[%s18637_s21 + $0x198] sm:$0xff]  ;;  %v2403_v11 = vsub.f32 %v19417_v28, %v25147_v0  ;;  %v19474_v4 = vsub.f32 %v674_v51, %v19452_v63 }
  0xf6   : > { %16857 = vmatpush3.xpose.msra.mxu0 %v19345_v20  ;;  %16889 = vmatpush3.xpose.msra.mxu1 %v2376_v16  ;;  %v334_v16 = vld [vmem:[%s18637_s21 + $0x1a0] sm:$0xff]  ;;  %25145 = vst [vmem:[#allocation11_spill] sm:$0xff] %v19457_v46  ;;  %25146 = vst [vmem:[#allocation12_spill] sm:$0xff] %v19461_v54  ;;  %v2522_v0 = vsub.f32 %v19436_v12, %v24608_v7  ;;  %v317_v51 = vld [vmem:[%s18637_s21 + $0x118] sm:$0xff] }
  0xf7   : > { %16858 = vmatprep.subr.mxu0 %v19362_v60  ;;  %16890 = vmatprep.subr.mxu1 %v2495_v2  ;;  %v2396_v2 = vsub.f32 %v19393_v32, %v24596_v6  ;;  %v716_v47 = vsel %vm552_vm0, %v334_v16, 0  ;;  %v2509_v6 = vand.u32 4294901760, %v2508_v53  ;;  %v19468_v16 = vand.u32 4294901760, %v671_v17  ;;  %25149 = vst [vmem:[#allocation16_spill] sm:$0xff] %v19474_v4  ;;  %v316_v60 = vld [vmem:[%s18637_s21 + $0x110] sm:$0xff] }
  0xf8   : > { %v19470_v23 = vand.u32 4294901760, %v716_v47  ;;  %v2404_v7 = vand.u32 4294901760, %v2403_v11  ;;  %v665_v11 = vsel %vm552_vm0, %v317_v51, 0 }
  0xf9   : > { %v2397_v34 = vand.u32 4294901760, %v2396_v2  ;;  %25148 = vst [vmem:[#allocation13_spill] sm:$0xff] %v19468_v16 }
  0xfa   : > { %16859 = vmatpush3.xpose.msra.mxu0 %v19370_v5  ;;  %16891 = vmatpush3.xpose.msra.mxu1 %v2383_v52  ;;  %v318_v52 = vld [vmem:[%s18637_s21 + $0x120] sm:$0xff] }
  0xfb   : > { %16860 = vmatprep.subr.mxu0 %v19372_v8  ;;  %16892 = vmatprep.subr.mxu1 %v2502_v25  ;;  %v2516_v25 = vand.u32 4294901760, %v2515_v14  ;;  %v668_v2 = vsel %vm552_vm0, %v318_v52, 0  ;;  %v19485_v14 = vsub.f32 %v719_v26, %v19457_v46  ;;  %v332_v52 = vld [vmem:[%s18637_s21 + $0x190] sm:$0xff] }
  0xfc   : > { %v19491_v53 = vand.u32 4294901760, %v668_v2 }
  0xfd   : > { %25150 = vst [vmem:[#allocation19_spill] sm:$0xff] %v19485_v14 }
  0xfe   : > { %16861 = vmatpush3.xpose.msra.mxu0 %v19395_v41  ;;  %16893 = vmatpush3.xpose.msra.mxu1 %v2390_v30  ;;  %v713_v41 = vsel %vm552_vm0, %v333_v57, 0  ;;  %v19489_v30 = vsub.f32 %v671_v17, %v19468_v16  ;;  %25152 = vst [vmem:[#allocation25_spill] sm:$0xff] %v19491_v53  ;;  %v25154_v57 = vand.u32 4294901760, %v19450_v62 }
  0xff   : > { %16862 = vmatprep.subr.mxu0 %v19410_v45  ;;  %16894 = vmatprep.subr.mxu1 %v2509_v6  ;;  %v19495_v6 = vsub.f32 %v716_v47, %v19470_v23  ;;  %v19502_v17 = vand.u32 4294901760, %v713_v41  ;;  %v2523_v45 = vand.u32 4294901760, %v2522_v0  ;;  %v25156_v47 = vand.u32 4294901760, %v19461_v54  ;;  %v331_v0 = vld [vmem:[%s18637_s21 + $0x188] sm:$0xff] }
 0x100   : > { %25151 = vst [vmem:[#allocation23_spill] sm:$0xff] %v19489_v30  ;;  %v2410_v26 = vsub.f32 %v19450_v62, %v25154_v57  ;;  %v19513_v57 = vsub.f32 %v668_v2, %v19491_v53 }
 0x101   : > { %25153 = vst [vmem:[#allocation18_spill] sm:$0xff] %v19495_v6  ;;  %25155 = vst [vmem:[#allocation21_spill] sm:$0xff] %v19502_v17  ;;  %v2529_v5 = vsub.f32 %v19461_v54, %v25156_v47  ;;  %v19525_v2 = vsub.f32 %v713_v41, %v19502_v17  ;;  %v25163_v54 = vand.u32 4294901760, %v19495_v6 }
 0x102   : > { %16863 = vmatpush3.xpose.msra.mxu0 %v19426_v49  ;;  %16895 = vmatpush3.xpose.msra.mxu1 %v2397_v34  ;;  %v710_v49 = vsel %vm552_vm0, %v332_v52, 0  ;;  %25157 = vst [vmem:[#allocation22_spill] sm:$0xff] %v19513_v57  ;;  %v2411_v47 = vand.u32 4294901760, %v2410_v26  ;;  %v25158_v34 = vand.u32 4294901760, %v19474_v4  ;;  %v19522_v52 = vand.u32 4294901760, %v665_v11 }
 0x103   : > { %16864 = vmatprep.subr.mxu0 %v19432_v36  ;;  %16896 = vmatprep.subr.mxu1 %v2516_v25  ;;  %25160 = vst [vmem:[#allocation26_spill] sm:$0xff] %v19525_v2  ;;  %v2530_v8 = vand.u32 4294901760, %v2529_v5  ;;  %v25161_v25 = vand.u32 4294901760, %v19485_v14  ;;  %v662_v26 = vsel %vm552_vm0, %v316_v60, 0  ;;  %v707_v36 = vsel %vm552_vm0, %v331_v0, 0 }
 0x104   : > { %v2417_v51 = vsub.f32 %v19474_v4, %v25158_v34  ;;  %25159 = vst [vmem:[#allocation24_spill] sm:$0xff] %v19522_v52  ;;  %v315_v34 = vld [vmem:[%s18637_s21 + $0x108] sm:$0xff]  ;;  %v25162_v4 = vand.u32 4294901760, %v19489_v30  ;;  %v19546_v60 = vsub.f32 %v665_v11, %v19522_v52  ;;  %v19548_v0 = vand.u32 4294901760, %v662_v26 }
 0x105   : > { %v659_v5 = vsel %vm552_vm0, %v315_v34, 0 }
 0x106   : > { %16865 = vmatpush3.xpose.msra.mxu0 %v19452_v63  ;;  %16897 = vmatpush3.xpose.msra.mxu1 %v2404_v7  ;;  %v2536_v63 = vsub.f32 %v19485_v14, %v25161_v25  ;;  %v19531_v7 = vand.u32 4294901760, %v710_v49  ;;  %v2424_v41 = vsub.f32 %v19489_v30, %v25162_v4  ;;  %v2418_v25 = vand.u32 4294901760, %v2417_v51  ;;  %v314_v51 = vld [vmem:[%s18637_s21 + $0x100] sm:$0xff] }
 0x107   : > { %16866 = vmatprep.subr.mxu0 %v19457_v46  ;;  %16898 = vmatprep.subr.mxu1 %v2523_v45  ;;  %v2543_v45 = vsub.f32 %v19495_v6, %v25163_v54  ;;  %v330_v46 = vld [vmem:[%s18637_s21 + $0x180] sm:$0xff]  ;;  %v19552_v54 = vand.u32 4294901760, %v707_v36  ;;  %v25164_v30 = vand.u32 4294901760, %v19513_v57  ;;  %v19570_v34 = vand.u32 4294901760, %v659_v5 }
 0x108   : > { %v2537_v4 = vand.u32 4294901760, %v2536_v63  ;;  %v19556_v6 = vsub.f32 %v710_v49, %v19531_v7  ;;  %v2425_v11 = vand.u32 4294901760, %v2424_v41  ;;  %v25165_v63 = vand.u32 4294901760, %v19525_v2 }
 0x109   : > { %v2431_v14 = vsub.f32 %v19513_v57, %v25164_v30 }
 0x10a   : > { %16867 = vmatpush3.xpose.msra.mxu0 %v19468_v16  ;;  %16899 = vmatpush3.xpose.msra.mxu1 %v2411_v47  ;;  %v704_v47 = vsel %vm552_vm0, %v330_v46, 0  ;;  %v2544_v16 = vand.u32 4294901760, %v2543_v45  ;;  %v2550_v49 = vsub.f32 %v19525_v2, %v25165_v63  ;;  %v24637_v46 = vand.u32 4294901760, %v19546_v60 }
 0x10b   : > { %16868 = vmatprep.subr.mxu0 %v19470_v23  ;;  %16900 = vmatprep.subr.mxu1 %v2530_v8  ;;  %v19565_v8 = vsub.f32 %v662_v26, %v19548_v0  ;;  %v19574_v41 = vand.u32 4294901760, %v704_v47  ;;  %v656_v45 = vsel %vm552_vm0, %v314_v51, 0  ;;  %v19579_v26 = vsub.f32 %v707_v36, %v19552_v54 }
 0x10c   : > { %v19583_v63 = vsub.f32 %v659_v5, %v19570_v34  ;;  %v2551_v36 = vand.u32 4294901760, %v2550_v49 }
 0x10d   : > { %v24640_v30 = vand.u32 4294901760, %v19565_v8  ;;  %v19597_v5 = vsub.f32 %v704_v47, %v19574_v41 }
 0x10e   : > { %16869 = vmatpush3.xpose.msra.mxu0 %v19491_v53  ;;  %16901 = vmatpush3.xpose.msra.mxu1 %v2418_v25  ;;  %v2432_v25 = vand.u32 4294901760, %v2431_v14  ;;  %25166 = vst [vmem:[#allocation20_spill] sm:$0xff] %v19583_v63  ;;  %v25167_v14 = vand.u32 4294901760, %v19556_v6  ;;  %v24644_v49 = vand.u32 4294901760, %v19583_v63 }
 0x10f   : > { %16870 = vmatprep.subr.mxu0 %v19502_v17  ;;  %16902 = vmatprep.subr.mxu1 %v2537_v4  ;;  %v2438_v4 = vsub.f32 %v19546_v60, %v24637_v46  ;;  %v19588_v17 = vand.u32 4294901760, %v656_v45 }
 0x110   : > { %v2557_v51 = vsub.f32 %v19556_v6, %v25167_v14 }
 0x111   : > { %v2439_v46 = vand.u32 4294901760, %v2438_v4  ;;  %v2452_v4 = vsub.f32 %v19583_v63, %v24644_v49  ;;  %v25180_v49 = vld [vmem:[#allocation18_spill] sm:$0xff] }
 0x112   : > { %16871 = vmatpush3.xpose.msra.mxu0 %v19522_v52  ;;  %16903 = vmatpush3.xpose.msra.mxu1 %v2425_v11  ;;  %v24641_v11 = vand.u32 4294901760, %v19579_v26  ;;  %v19601_v52 = vsub.f32 %v656_v45, %v19588_v17  ;;  %v2558_v14 = vand.u32 4294901760, %v2557_v51 }
 0x113   : > { %16872 = vmatprep.subr.mxu0 %v19531_v7  ;;  %16904 = vmatprep.subr.mxu1 %v2544_v16  ;;  %v2445_v16 = vsub.f32 %v19565_v8, %v24640_v30 }
 0x114   : > { %25168 = vst [vmem:[#allocation29_spill] sm:$0xff] %v19601_v52  ;;  %v2564_v47 = vsub.f32 %v19579_v26, %v24641_v11  ;;  %v24642_v30 = vand.u32 4294901760, %v19601_v52  ;;  %v2453_v11 = vand.u32 4294901760, %v2452_v4  ;;  %v25172_v4 = vld [vmem:[#allocation12_spill] sm:$0xff] }
 0x115   : > { %v2446_v45 = vand.u32 4294901760, %v2445_v16 }
 0x116   : > { %16873 = vmatpush3.xpose.msra.mxu0 %v19548_v0  ;;  %16905 = vmatpush3.xpose.msra.mxu1 %v2432_v25  ;;  %v24643_v25 = vand.u32 4294901760, %v19597_v5 }
 0x117   : > { %16874 = vmatprep.subr.mxu0 %v19552_v54  ;;  %16906 = vmatprep.subr.mxu1 %v2551_v36  ;;  %v2565_v36 = vand.u32 4294901760, %v2564_v47  ;;  %v25169_v47 = vld [vmem:[#allocation33_spill] sm:$0xff] }
 0x118   : > { %v2571_v51 = vsub.f32 %v19597_v5, %v24643_v25  ;;  %v25179_v25 = vld [vmem:[#allocation8_spill] sm:$0xff] }
 0x11a   : > { %16875 = vmatpush3.xpose.msra.mxu0 %v19570_v34  ;;  %16907 = vmatpush3.xpose.msra.mxu1 %v2439_v46  ;;  %v2459_v46 = vsub.f32 %v19601_v52, %v24642_v30  ;;  %v2572_v16 = vand.u32 4294901760, %v2571_v51  ;;  %v25174_v51 = vld [vmem:[#allocation16_spill] sm:$0xff]  ;;  %v25178_v30 = vld [vmem:[#allocation23_spill] sm:$0xff] }
 0x11b   : > { %16876 = vmatprep.subr.mxu0 %v19574_v41  ;;  %16908 = vmatprep.subr.mxu1 %v2558_v14 }
 0x11c   : > { %v2460_v14 = vand.u32 4294901760, %v2459_v46  ;;  %v25175_v46 = vld [vmem:[#allocation7_spill] sm:$0xff] }
 0x11e   : > { %16877 = vmatpush3.xpose.msra.mxu0 %v19588_v17  ;;  %16909 = vmatpush3.xpose.msra.mxu1 %v2446_v45  ;;  %v25171_v45 = vld [vmem:[#allocation6_spill] sm:$0xff] }
 0x11f   : > { %16910 = vmatprep.subr.mxu1 %v2565_v36  ;;  %16918 = vmatprep.subr.mxu0 %v19231_v58  ;;  %v25173_v36 = vld [vmem:[#allocation15_spill] sm:$0xff] }
 0x121   : > { %16879 = vmatmul.mubr.f32.vlgmr.msra.gmra.mxu0 %v25136_v35  ;;  %v25182_v35 = vld [vmem:[#allocation10_spill] sm:$0xff] }
 0x122   : > { %16911 = vmatpush3.xpose.msra.mxu1 %v2453_v11  ;;  %16919 = vmatpush3.xpose.msra.mxu0 %v19247_v31  ;;  %v25170_v11 = vld [vmem:[#allocation14_spill] sm:$0xff] }
 0x123   : > { %16912 = vmatprep.subr.mxu1 %v2572_v16  ;;  %16920 = vmatprep.subr.mxu0 %v19259_v43  ;;  %v25176_v16 = vld [vmem:[#allocation19_spill] sm:$0xff] }
 0x124   : > { %16880 = vmatprep.mubr.f32.mxu0 %v25169_v47 }
 0x125   : > { %16881 = vmatmul.mubr.f32.gmra.mxu0 %v25169_v47  ;;  %v25181_v47 = vld [vmem:[#allocation9_spill] sm:$0xff] }
 0x126   : > { %16913 = vmatpush3.xpose.msra.mxu1 %v2460_v14  ;;  %16921 = vmatpush3.xpose.msra.mxu0 %v19262_v15  ;;  %v25177_v14 = vld [vmem:[#allocation17_spill] sm:$0xff] }
 0x127   : > { %16922 = vmatprep.subr.mxu0 %v19276_v37  ;;  %16954 = vmatprep.subr.mxu1 %v19214_v38 }
 0x128   : > { %16950 = vmatprep.mubr.f32.mxu0 %v18864_v10 }
 0x129   : > { %16915 = vmatmul.mubr.f32.vlgmr.msra.gmra.mxu1 %v18630_v3 }
 0x12a   : > { %16923 = vmatpush3.xpose.msra.mxu0 %v19288_v61  ;;  %16955 = vmatpush3.xpose.msra.mxu1 %v19227_v56 }
 0x12b   : > { %16924 = vmatprep.subr.mxu0 %v19306_v55  ;;  %16956 = vmatprep.subr.mxu1 %v19238_v48 }
 0x12c   : > { %16916 = vmatprep.mubr.f32.mxu1 %v25135_v22 }
 0x12d   : > { %16917 = vmatmul.mubr.f32.gmra.mxu1 %v25135_v22  ;;  %v25183_v22 = vld [vmem:[#allocation11_spill] sm:$0xff] }
 0x12e   : > { %16925 = vmatpush3.xpose.msra.mxu0 %v19315_v42  ;;  %16957 = vmatpush3.xpose.msra.mxu1 %v19240_v50 }
 0x12f   : > { %16926 = vmatprep.subr.mxu0 %v19335_v21  ;;  %16958 = vmatprep.subr.mxu1 %v19249_v27 }
 0x130   : > { %16986 = vmatprep.mubr.f32.mxu1 %v18891_v33 }
 0x132   : > { %16927 = vmatpush3.xpose.msra.mxu0 %v19350_v13  ;;  %16959 = vmatpush3.xpose.msra.mxu1 %v19264_v39 }
 0x133   : > { %16928 = vmatprep.subr.mxu0 %v19355_v19  ;;  %16960 = vmatprep.subr.mxu1 %v19280_v44 }
 0x136   : > { %16929 = vmatpush3.xpose.msra.mxu0 %v19368_v59  ;;  %16961 = vmatpush3.xpose.msra.mxu1 %v19290_v1 }
 0x137   : > { %16930 = vmatprep.subr.mxu0 %v19387_v18  ;;  %16962 = vmatprep.subr.mxu1 %v19301_v40 }
 0x13a   : > { %16931 = vmatpush3.xpose.msra.mxu0 %v19393_v32  ;;  %16963 = vmatpush3.xpose.msra.mxu1 %v19324_v9 }
 0x13b   : > { %16932 = vmatprep.subr.mxu0 %v19400_v24  ;;  %16964 = vmatprep.subr.mxu1 %v19326_v29 }
 0x13e   : > { %16933 = vmatpush3.xpose.msra.mxu0 %v19417_v28  ;;  %16965 = vmatpush3.xpose.msra.mxu1 %v19345_v20 }
 0x13f   : > { %16934 = vmatprep.subr.mxu0 %v19436_v12  ;;  %16966 = vmatprep.subr.mxu1 %v25170_v11 }
 0x142   : > { %16935 = vmatpush3.xpose.msra.mxu0 %v19450_v62  ;;  %16967 = vmatpush3.xpose.msra.mxu1 %v25171_v45 }
 0x143   : > { %16936 = vmatprep.subr.mxu0 %v25172_v4  ;;  %16968 = vmatprep.subr.mxu1 %v25173_v36 }
 0x146   : > { %16937 = vmatpush3.xpose.msra.mxu0 %v25174_v51  ;;  %16969 = vmatpush3.xpose.msra.mxu1 %v25175_v46 }
 0x147   : > { %16938 = vmatprep.subr.mxu0 %v25176_v16  ;;  %16970 = vmatprep.subr.mxu1 %v25177_v14  ;;  %v25184_v16 = vld [vmem:[#allocation13_spill] sm:$0xff] }
 0x14a   : > { %16939 = vmatpush3.xpose.msra.mxu0 %v25178_v30  ;;  %16971 = vmatpush3.xpose.msra.mxu1 %v25179_v25 }
 0x14b   : > { %16940 = vmatprep.subr.mxu0 %v25180_v49  ;;  %16972 = vmatprep.subr.mxu1 %v25181_v47 }
 0x14e   : > { %16941 = vmatpush3.xpose.msra.mxu0 %v19513_v57  ;;  %16973 = vmatpush3.xpose.msra.mxu1 %v25182_v35  ;;  %v25185_v57 = vld [vmem:[#allocation21_spill] sm:$0xff] }
 0x14f   : > { %16942 = vmatprep.subr.mxu0 %v19525_v2  ;;  %16974 = vmatprep.subr.mxu1 %v25183_v22  ;;  %v25186_v2 = vld [vmem:[#allocation24_spill] sm:$0xff] }
 0x152   : > { %16943 = vmatpush3.xpose.msra.mxu0 %v19546_v60  ;;  %16975 = vmatpush3.xpose.msra.mxu1 %v25184_v16 }
 0x153   : > { %16944 = vmatprep.subr.mxu0 %v19556_v6  ;;  %16976 = vmatprep.subr.mxu1 %v19470_v23 }
 0x156   : > { %16945 = vmatpush3.xpose.msra.mxu0 %v19565_v8  ;;  %16977 = vmatpush3.xpose.msra.mxu1 %v19491_v53  ;;  %v25187_v53 = vand.u32 4294901760, %v19231_v58  ;;  %v25191_v58 = vand.u32 4294901760, %v19262_v15  ;;  %v25197_v15 = vand.u32 4294901760, %v19335_v21  ;;  %v377_v21 = vld [vmem:[%s18637_s21 + $0x2f8] sm:$0xff] }
 0x157   : > { %16946 = vmatprep.subr.mxu0 %v19579_v26  ;;  %16978 = vmatprep.subr.mxu1 %v25185_v57 }
 0x15a   : > { %16947 = vmatpush3.xpose.msra.mxu0 %v19583_v63  ;;  %16979 = vmatpush3.xpose.msra.mxu1 %v25186_v2  ;;  %v25188_v63 = vand.u32 4294901760, %v19247_v31  ;;  %v25189_v2 = vld [vmem:[#allocation30_spill] sm:$0xff]  ;;  %v25193_v31 = vand.u32 4294901760, %v19288_v61  ;;  %v25205_v61 = vand.u32 4294901760, %v19436_v12  ;;  %v25209_v12 = vld [vmem:[#allocation19_spill] sm:$0xff] }
 0x15b   : > { %16948 = vmatprep.subr.mxu0 %v19597_v5  ;;  %16980 = vmatprep.subr.mxu1 %v19531_v7 }
 0x15e   : > { %16949 = vmatpush3.xpose.msra.mxu0 %v19601_v52  ;;  %16981 = vmatpush3.xpose.msra.mxu1 %v19548_v0  ;;  %v25190_v52 = vand.u32 4294901760, %v19259_v43  ;;  %v25194_v43 = vld [vmem:[#allocation32_spill] sm:$0xff] }
 0x15f   : > { %16982 = vmatprep.subr.mxu1 %v19552_v54  ;;  %16990 = vmatprep.subr.mxu0 %v25187_v53  ;;  %v25192_v53 = vand.u32 4294901760, %v19276_v37  ;;  %v25200_v37 = vand.u32 4294901760, %v19368_v59  ;;  %v845_v59 = vsel %vm552_vm0, %v377_v21, 0 }
 0x161   : > { %16951 = vmatmul.mubr.f32.vlgmr.msra.gmra.mxu0 %v18864_v10 }
 0x162   : > { %16983 = vmatpush3.xpose.msra.mxu1 %v19570_v34  ;;  %16991 = vmatpush3.xpose.msra.mxu0 %v25188_v63  ;;  %v375_v63 = vld [vmem:[%s18637_s21 + $0x2e8] sm:$0xff] }
 0x163   : > { %16952 = vmatprep.mubr.f32.mxu0 %v25189_v2  ;;  %16984 = vmatprep.subr.mxu1 %v19574_v41 }
 0x164   : > { %16992 = vmatprep.subr.mxu0 %v25190_v52  ;;  %v25195_v52 = vand.u32 4294901760, %v19306_v55  ;;  %v25208_v55 = vand.u32 4294901760, %v25174_v51  ;;  %v374_v51 = vld [vmem:[%s18637_s21 + $0x2e0] sm:$0xff] }
 0x165   : > { %16953 = vmatmul.mubr.f32.gmra.mxu0 %v25189_v2 }
 0x166   : > { %16985 = vmatpush3.xpose.msra.mxu1 %v19588_v17  ;;  %16993 = vmatpush3.xpose.msra.mxu0 %v25191_v58 }
 0x167   : > { %16994 = vmatprep.subr.mxu0 %v25192_v53  ;;  %17026 = vmatprep.subr.mxu1 %v19214_v38  ;;  %v25196_v38 = vand.u32 4294901760, %v19315_v42  ;;  %v25210_v42 = vand.u32 4294901760, %v25209_v12 }
 0x168   : > { %17022 = vmatprep.mubr.f32.mxu0 %v18630_v3 }
 0x169   : > { %16987 = vmatmul.mubr.f32.vlgmr.msra.gmra.mxu1 %v18891_v33 }
 0x16a   : > { %16995 = vmatpush3.xpose.msra.mxu0 %v25193_v31  ;;  %17027 = vmatpush3.xpose.msra.mxu1 %v19227_v56  ;;  %v25198_v56 = vand.u32 4294901760, %v19350_v13  ;;  %v25215_v13 = vld [vmem:[#allocation26_spill] sm:$0xff]  ;;  %v25225_v31 = vand.u32 4294901760, %v19597_v5 }
 0x16b   : > { %16988 = vmatprep.mubr.f32.mxu1 %v25194_v43  ;;  %16996 = vmatprep.subr.mxu0 %v25195_v52  ;;  %v358_v52 = vld [vmem:[%s18637_s21 + $0x260] sm:$0xff] }
 0x16c   : > { %17028 = vmatprep.subr.mxu1 %v19238_v48  ;;  %v25199_v48 = vand.u32 4294901760, %v19355_v19  ;;  %v25216_v19 = vand.u32 4294901760, %v25215_v13 }
 0x16d   : > { %16989 = vmatmul.mubr.f32.gmra.mxu1 %v25194_v43 }
 0x16e   : > { %16997 = vmatpush3.xpose.msra.mxu0 %v25196_v38  ;;  %17029 = vmatpush3.xpose.msra.mxu1 %v19240_v50  ;;  %v25201_v50 = vand.u32 4294901760, %v19387_v18  ;;  %v361_v18 = vld [vmem:[%s18637_s21 + $0x278] sm:$0xff]  ;;  %v836_v38 = vsel %vm552_vm0, %v374_v51, 0  ;;  %v25229_v51 = vld [vmem:[#allocation27_spill] sm:$0xff] }
 0x16f   : > { %16998 = vmatprep.subr.mxu0 %v25197_v15  ;;  %17030 = vmatprep.subr.mxu1 %v19249_v27  ;;  %v25202_v27 = vand.u32 4294901760, %v19393_v32  ;;  %v25217_v32 = vand.u32 4294901760, %v19546_v60  ;;  %v25219_v60 = vand.u32 4294901760, %v19565_v8 }
 0x170   : > { %17058 = vmatprep.mubr.f32.mxu1 %v18630_v3 }
 0x172   : > { %16999 = vmatpush3.xpose.msra.mxu0 %v25198_v56  ;;  %17031 = vmatpush3.xpose.msra.mxu1 %v19264_v39  ;;  %v25203_v39 = vand.u32 4294901760, %v19400_v24  ;;  %v19782_v24 = vand.u32 4294901760, %v845_v59 }
 0x173   : > { %17000 = vmatprep.subr.mxu0 %v25199_v48  ;;  %17032 = vmatprep.subr.mxu1 %v19280_v44  ;;  %v25204_v44 = vand.u32 4294901760, %v19417_v28 }
 0x176   : > { %17001 = vmatpush3.xpose.msra.mxu0 %v25200_v37  ;;  %17033 = vmatpush3.xpose.msra.mxu1 %v19290_v1  ;;  %v25206_v1 = vand.u32 4294901760, %v19450_v62  ;;  %v376_v62 = vld [vmem:[%s18637_s21 + $0x2f0] sm:$0xff]  ;;  %v373_v37 = vld [vmem:[%s18637_s21 + $0x2d8] sm:$0xff] }
 0x177   : > { %17002 = vmatprep.subr.mxu0 %v25201_v50  ;;  %17034 = vmatprep.subr.mxu1 %v19301_v40  ;;  %v25207_v40 = vand.u32 4294901760, %v25172_v4  ;;  %v359_v4 = vld [vmem:[%s18637_s21 + $0x268] sm:$0xff]  ;;  %v25226_v50 = vld [vmem:[#allocation29_spill] sm:$0xff] }
 0x178   : > { %v791_v53 = vsel %vm552_vm0, %v359_v4, 0 }
 0x179   : > { %v19832_v48 = vand.u32 4294901760, %v791_v53 }
 0x17a   : > { %17003 = vmatpush3.xpose.msra.mxu0 %v25202_v27  ;;  %17035 = vmatpush3.xpose.msra.mxu1 %v19324_v9  ;;  %v25211_v9 = vand.u32 4294901760, %v25178_v30  ;;  %v25218_v30 = vand.u32 4294901760, %v19556_v6  ;;  %v19799_v6 = vsub.f32 %v845_v59, %v19782_v24  ;;  %v25227_v27 = vand.u32 4294901760, %v25226_v50  ;;  %v356_v59 = vld [vmem:[%s18637_s21 + $0x250] sm:$0xff] }
 0x17b   : > { %17004 = vmatprep.subr.mxu0 %v25203_v39  ;;  %17036 = vmatprep.subr.mxu1 %v19326_v29  ;;  %v25212_v29 = vand.u32 4294901760, %v25180_v49  ;;  %v842_v49 = vsel %vm552_vm0, %v376_v62, 0  ;;  %v788_v39 = vsel %vm552_vm0, %v358_v52, 0  ;;  %v19856_v12 = vsub.f32 %v791_v53, %v19832_v48 }
 0x17c   : > { %v19806_v8 = vand.u32 4294901760, %v842_v49 }
 0x17d   : > { %v24659_v62 = vand.u32 4294901760, %v19856_v12 }
 0x17e   : > { %17005 = vmatpush3.xpose.msra.mxu0 %v25204_v44  ;;  %17037 = vmatpush3.xpose.msra.mxu1 %v19345_v20  ;;  %v25213_v20 = vld [vmem:[#allocation22_spill] sm:$0xff]  ;;  %v19827_v15 = vsub.f32 %v842_v49, %v19806_v8  ;;  %v782_v49 = vsel %vm552_vm0, %v356_v59, 0 }
 0x17f   : > { %17006 = vmatprep.subr.mxu0 %v25205_v61  ;;  %17038 = vmatprep.subr.mxu1 %v25170_v11  ;;  %v25214_v28 = vand.u32 4294901760, %v25213_v20  ;;  %v19848_v61 = vand.u32 4294901760, %v836_v38  ;;  %v25228_v20 = vld [vmem:[#allocation28_spill] sm:$0xff] }
 0x182   : > { %17007 = vmatpush3.xpose.msra.mxu0 %v25206_v1  ;;  %17039 = vmatpush3.xpose.msra.mxu1 %v25171_v45  ;;  %v839_v45 = vsel %vm552_vm0, %v375_v63, 0  ;;  %v24663_v1 = vand.u32 4294901760, %v19827_v15 }
 0x183   : > { %17008 = vmatprep.subr.mxu0 %v25207_v40  ;;  %17040 = vmatprep.subr.mxu1 %v25173_v36  ;;  %v19817_v58 = vand.u32 4294901760, %v839_v45  ;;  %v357_v40 = vld [vmem:[%s18637_s21 + $0x258] sm:$0xff] }
 0x184   : > { %v785_v13 = vsel %vm552_vm0, %v357_v40, 0 }
 0x185   : > { %v19844_v44 = vsub.f32 %v839_v45, %v19817_v58 }
 0x186   : > { %17009 = vmatpush3.xpose.msra.mxu0 %v25208_v55  ;;  %17041 = vmatpush3.xpose.msra.mxu1 %v25175_v46  ;;  %v25222_v46 = vld [vmem:[#allocation20_spill] sm:$0xff] }
 0x187   : > { %17010 = vmatprep.subr.mxu0 %v25210_v42  ;;  %17042 = vmatprep.subr.mxu1 %v25177_v14  ;;  %v25224_v14 = vld [vmem:[#allocation24_spill] sm:$0xff]  ;;  %v19858_v42 = vand.u32 4294901760, %v788_v39  ;;  %v24660_v21 = vand.u32 4294901760, %v19844_v44 }
 0x188   : > { %v372_v55 = vld [vmem:[%s18637_s21 + $0x2d0] sm:$0xff] }
 0x18a   : > { %17011 = vmatpush3.xpose.msra.mxu0 %v25211_v9  ;;  %17043 = vmatpush3.xpose.msra.mxu1 %v25179_v25  ;;  %v25220_v25 = vld [vmem:[#allocation25_spill] sm:$0xff] }
 0x18b   : > { %17012 = vmatprep.subr.mxu0 %v25212_v29  ;;  %17044 = vmatprep.subr.mxu1 %v25181_v47 }
 0x18e   : > { %17013 = vmatpush3.xpose.msra.mxu0 %v25214_v28  ;;  %17045 = vmatpush3.xpose.msra.mxu1 %v25182_v35  ;;  %v360_v35 = vld [vmem:[%s18637_s21 + $0x270] sm:$0xff] }
 0x18f   : > { %17014 = vmatprep.subr.mxu0 %v25216_v19  ;;  %17046 = vmatprep.subr.mxu1 %v25183_v22  ;;  %v797_v22 = vsel %vm552_vm0, %v361_v18, 0  ;;  %v794_v11 = vsel %vm552_vm0, %v360_v35, 0  ;;  %v19874_v19 = vsub.f32 %v836_v38, %v19848_v61  ;;  %v3377_v18 = vsub.f32 %v19827_v15, %v24663_v1 }
 0x190   : > { %v19795_v47 = vand.u32 4294901760, %v797_v22  ;;  %v19808_v36 = vand.u32 4294901760, %v794_v11  ;;  %v19892_v35 = vand.u32 4294901760, %v785_v13 }
 0x191   : > { %v3378_v45 = vand.u32 4294901760, %v3377_v18 }
 0x192   : > { %17015 = vmatpush3.xpose.msra.mxu0 %v25217_v32  ;;  %17047 = vmatpush3.xpose.msra.mxu1 %v25184_v16  ;;  %v25223_v16 = vand.u32 4294901760, %v25222_v46  ;;  %v19830_v56 = vsub.f32 %v794_v11, %v19808_v36  ;;  %v355_v11 = vld [vmem:[%s18637_s21 + $0x248] sm:$0xff] }
 0x193   : > { %17016 = vmatprep.subr.mxu0 %v25218_v30  ;;  %17048 = vmatprep.subr.mxu1 %v19470_v23  ;;  %v25221_v23 = vand.u32 4294901760, %v19579_v26  ;;  %v19815_v26 = vsub.f32 %v797_v22, %v19795_v47  ;;  %v371_v30 = vld [vmem:[%s18637_s21 + $0x2c8] sm:$0xff]  ;;  %v779_v52 = vsel %vm552_vm0, %v355_v11, 0  ;;  %v353_v11 = vld [vmem:[%s18637_s21 + $0x238] sm:$0xff] }
 0x194   : > { %v827_v4 = vsel %vm552_vm0, %v371_v30, 0 }
 0x195   : > { %v24665_v5 = vand.u32 4294901760, %v19815_v26 }
 0x196   : > { %17017 = vmatpush3.xpose.msra.mxu0 %v25219_v60  ;;  %17049 = vmatpush3.xpose.msra.mxu1 %v25220_v25  ;;  %v3384_v60 = vsub.f32 %v19844_v44, %v24660_v21  ;;  %v24657_v25 = vand.u32 4294901760, %v19874_v19 }
 0x197   : > { %17018 = vmatprep.subr.mxu0 %v25221_v23  ;;  %17050 = vmatprep.subr.mxu1 %v25185_v57  ;;  %v24667_v57 = vand.u32 4294901760, %v19799_v6  ;;  %v3258_v29 = vsub.f32 %v19815_v26, %v24665_v5  ;;  %v370_v23 = vld [vmem:[%s18637_s21 + $0x2c0] sm:$0xff] }
 0x198   : > { %v824_v38 = vsel %vm552_vm0, %v370_v23, 0  ;;  %v3385_v50 = vand.u32 4294901760, %v3384_v60 }
 0x199   : > { %v3259_v22 = vand.u32 4294901760, %v3258_v29  ;;  %v19940_v29 = vand.u32 4294901760, %v824_v38 }
 0x19a   : > { %17019 = vmatpush3.xpose.msra.mxu0 %v25223_v16  ;;  %17051 = vmatpush3.xpose.msra.mxu1 %v25224_v14  ;;  %v3272_v16 = vsub.f32 %v19856_v12, %v24659_v62  ;;  %v19913_v14 = vand.u32 4294901760, %v782_v49 }
 0x19b   : > { %17020 = vmatprep.subr.mxu0 %v25225_v31  ;;  %17052 = vmatprep.subr.mxu1 %v19531_v7  ;;  %v3370_v7 = vsub.f32 %v19799_v6, %v24667_v57  ;;  %v19918_v31 = vsub.f32 %v785_v13, %v19892_v35  ;;  %25232 = vst [vmem:[#allocation6_spill] sm:$0xff] %v19940_v29  ;;  %v369_v13 = vld [vmem:[%s18637_s21 + $0x2b8] sm:$0xff] }
 0x19c   : > { %v3273_v40 = vand.u32 4294901760, %v3272_v16  ;;  %v821_v60 = vsel %vm552_vm0, %v369_v13, 0  ;;  %v368_v16 = vld [vmem:[%s18637_s21 + $0x2b0] sm:$0xff] }
 0x19d   : > { %v3371_v9 = vand.u32 4294901760, %v3370_v7  ;;  %v19930_v7 = vand.u32 4294901760, %v827_v4  ;;  %v24656_v59 = vand.u32 4294901760, %v19918_v31  ;;  %v19978_v13 = vand.u32 4294901760, %v821_v60 }
 0x19e   : > { %17021 = vmatpush3.xpose.msra.mxu0 %v25227_v27  ;;  %17053 = vmatpush3.xpose.msra.mxu1 %v19548_v0  ;;  %v833_v0 = vsel %vm552_vm0, %v373_v37, 0  ;;  %v3391_v27 = vsub.f32 %v19874_v19, %v24657_v25 }
 0x19f   : > { %17054 = vmatprep.subr.mxu1 %v19552_v54  ;;  %17062 = vmatprep.subr.mxu0 %v19782_v24  ;;  %v24661_v54 = vand.u32 4294901760, %v19830_v56  ;;  %v19869_v28 = vand.u32 4294901760, %v833_v0  ;;  %25230 = vst [vmem:[#allocation31_spill] sm:$0xff] %v19930_v7  ;;  %25234 = vst [vmem:[#allocation15_spill] sm:$0xff] %v19978_v13  ;;  %v20004_v21 = vsub.f32 %v821_v60, %v19978_v13 }
 0x1a0   : > { %v3392_v30 = vand.u32 4294901760, %v3391_v27  ;;  %v3286_v27 = vsub.f32 %v19918_v31, %v24656_v59  ;;  %v367_v59 = vld [vmem:[%s18637_s21 + $0x2a8] sm:$0xff] }
 0x1a1   : > { %17023 = vmatmul.mubr.f32.vlgmr.msra.gmra.mxu0 %v18630_v3  ;;  %v3265_v32 = vsub.f32 %v19830_v56, %v24661_v54  ;;  %v351_v54 = vld [vmem:[%s18637_s21 + $0x228] sm:$0xff] }
 0x1a2   : > { %17055 = vmatpush3.xpose.msra.mxu1 %v19570_v34  ;;  %17063 = vmatpush3.xpose.msra.mxu0 %v19795_v47  ;;  %v830_v34 = vsel %vm552_vm0, %v372_v55, 0  ;;  %v19936_v55 = vsub.f32 %v782_v49, %v19913_v14  ;;  %v19955_v49 = vsub.f32 %v827_v4, %v19930_v7 }
 0x1a3   : > { %17024 = vmatprep.mubr.f32.mxu0 %v25228_v20  ;;  %17056 = vmatprep.subr.mxu1 %v19574_v41  ;;  %v19883_v41 = vsub.f32 %v788_v39, %v19858_v42  ;;  %v19894_v63 = vand.u32 4294901760, %v830_v34  ;;  %v3266_v46 = vand.u32 4294901760, %v3265_v32 }
 0x1a4   : > { %17064 = vmatprep.subr.mxu0 %v19806_v8 }
 0x1a5   : > { %17025 = vmatmul.mubr.f32.gmra.mxu0 %v25228_v20  ;;  %v24654_v53 = vand.u32 4294901760, %v19883_v41  ;;  %v19923_v37 = vsub.f32 %v830_v34, %v19894_v63 }
 0x1a6   : > { %17057 = vmatpush3.xpose.msra.mxu1 %v19588_v17  ;;  %17065 = vmatpush3.xpose.msra.mxu0 %v19808_v36  ;;  %v19903_v17 = vsub.f32 %v833_v0, %v19869_v28  ;;  %v354_v0 = vld [vmem:[%s18637_s21 + $0x240] sm:$0xff] }
 0x1a7   : > { %17066 = vmatprep.subr.mxu0 %v19817_v58  ;;  %17098 = vmatprep.subr.mxu1 %v3371_v9  ;;  %v19938_v9 = vand.u32 4294901760, %v779_v52  ;;  %v3279_v34 = vsub.f32 %v19883_v41, %v24654_v53  ;;  %v24655_v18 = vand.u32 4294901760, %v19923_v37  ;;  %v776_v32 = vsel %vm552_vm0, %v354_v0, 0 }
 0x1a8   : > { %17094 = vmatprep.mubr.f32.mxu0 %v25229_v51  ;;  %v24653_v39 = vand.u32 4294901760, %v19903_v17 }
 0x1a9   : > { %17059 = vmatmul.mubr.f32.vlgmr.msra.gmra.mxu1 %v18630_v3  ;;  %25231 = vst [vmem:[#allocation14_spill] sm:$0xff] %v19938_v9  ;;  %v19961_v23 = vsub.f32 %v779_v52, %v19938_v9  ;;  %v3280_v4 = vand.u32 4294901760, %v3279_v34  ;;  %v3405_v52 = vsub.f32 %v19923_v37, %v24655_v18  ;;  %v818_v34 = vsel %vm552_vm0, %v368_v16, 0 }
 0x1aa   : > { %17067 = vmatpush3.xpose.msra.mxu0 %v19832_v48  ;;  %17099 = vmatpush3.xpose.msra.mxu1 %v3259_v22  ;;  %v3398_v22 = vsub.f32 %v19903_v17, %v24653_v39  ;;  %v352_v39 = vld [vmem:[%s18637_s21 + $0x230] sm:$0xff] }
 0x1ab   : > { %17060 = vmatprep.mubr.f32.mxu1 %v25228_v20  ;;  %17068 = vmatprep.subr.mxu0 %v19848_v61  ;;  %v3406_v16 = vand.u32 4294901760, %v3405_v52  ;;  %v770_v62 = vsel %vm552_vm0, %v352_v39, 0 }
 0x1ac   : > { %17100 = vmatprep.subr.mxu1 %v3378_v45  ;;  %v19963_v45 = vand.u32 4294901760, %v776_v32  ;;  %v3399_v0 = vand.u32 4294901760, %v3398_v22 }
 0x1ad   : > { %17061 = vmatmul.mubr.f32.gmra.mxu1 %v25228_v20 }
 0x1ae   : > { %17069 = vmatpush3.xpose.msra.mxu0 %v19858_v42  ;;  %17101 = vmatpush3.xpose.msra.mxu1 %v3266_v46  ;;  %25233 = vst [vmem:[#allocation12_spill] sm:$0xff] %v19963_v45  ;;  %v24658_v46 = vand.u32 4294901760, %v19936_v55  ;;  %v19985_v53 = vsub.f32 %v776_v32, %v19963_v45 }
 0x1af   : > { %17070 = vmatprep.subr.mxu0 %v19869_v28  ;;  %17102 = vmatprep.subr.mxu1 %v3385_v50  ;;  %v19968_v50 = vsub.f32 %v824_v38, %v19940_v29  ;;  %v24662_v38 = vand.u32 4294901760, %v19955_v49 }
 0x1b0   : > { %17130 = vmatprep.mubr.f32.mxu1 %v18630_v3  ;;  %v3293_v18 = vsub.f32 %v19936_v55, %v24658_v46  ;;  %v20000_v46 = vand.u32 4294901760, %v818_v34  ;;  %v25240_v43 = vand.u32 4294901760, %v19985_v53 }
 0x1b1   : > { %v24666_v22 = vand.u32 4294901760, %v19968_v50  ;;  %v3412_v32 = vsub.f32 %v19955_v49, %v24662_v38 }
 0x1b2   : > { %17071 = vmatpush3.xpose.msra.mxu0 %v19892_v35  ;;  %17103 = vmatpush3.xpose.msra.mxu1 %v3273_v40  ;;  %v773_v40 = vsel %vm552_vm0, %v353_v11, 0  ;;  %v3287_v11 = vand.u32 4294901760, %v3286_v27  ;;  %25236 = vst [vmem:[#allocation7_spill] sm:$0xff] %v20000_v46  ;;  %v815_v27 = vsel %vm552_vm0, %v367_v59, 0  ;;  %v3294_v52 = vand.u32 4294901760, %v3293_v18 }
 0x1b3   : > { %17072 = vmatprep.subr.mxu0 %v19894_v63  ;;  %17104 = vmatprep.subr.mxu1 %v3392_v30  ;;  %v24664_v30 = vand.u32 4294901760, %v19961_v23  ;;  %v19994_v25 = vand.u32 4294901760, %v773_v40  ;;  %v3419_v38 = vsub.f32 %v19968_v50, %v24666_v22  ;;  %v20020_v59 = vand.u32 4294901760, %v770_v62 }
 0x1b4   : > { %v767_v18 = vsel %vm552_vm0, %v351_v54, 0  ;;  %v20025_v5 = vand.u32 4294901760, %v815_v27  ;;  %v24674_v22 = vand.u32 4294901760, %v20004_v21  ;;  %v20029_v57 = vsub.f32 %v818_v34, %v20000_v46 }
 0x1b5   : > { %25235 = vst [vmem:[#allocation16_spill] sm:$0xff] %v19994_v25  ;;  %v20018_v60 = vsub.f32 %v773_v40, %v19994_v25  ;;  %25237 = vst [vmem:[#allocation17_spill] sm:$0xff] %v20020_v59  ;;  %v365_v40 = vld [vmem:[%s18637_s21 + $0x298] sm:$0xff]  ;;  %v3307_v54 = vsub.f32 %v19985_v53, %v25240_v43  ;;  %v20042_v34 = vsub.f32 %v770_v62, %v20020_v59 }
 0x1b6   : > { %17073 = vmatpush3.xpose.msra.mxu0 %v19913_v14  ;;  %17105 = vmatpush3.xpose.msra.mxu1 %v3280_v4  ;;  %v366_v4 = vld [vmem:[%s18637_s21 + $0x2a0] sm:$0xff]  ;;  %25238 = vst [vmem:[#allocation23_spill] sm:$0xff] %v20025_v5  ;;  %25239 = vst [vmem:[#allocation8_spill] sm:$0xff] %v20029_v57  ;;  %v3426_v43 = vsub.f32 %v20004_v21, %v24674_v22  ;;  %v349_v62 = vld [vmem:[%s18637_s21 + $0x218] sm:$0xff] }
 0x1b7   : > { %17074 = vmatprep.subr.mxu0 %v19930_v7  ;;  %17106 = vmatprep.subr.mxu1 %v3399_v0  ;;  %v3300_v0 = vsub.f32 %v19961_v23, %v24664_v30  ;;  %v812_v1 = vsel %vm552_vm0, %v366_v4, 0  ;;  %v3413_v30 = vand.u32 4294901760, %v3412_v32  ;;  %v20036_v4 = vand.u32 4294901760, %v767_v18  ;;  %25242 = vst [vmem:[#allocation9_spill] sm:$0xff] %v20042_v34  ;;  %v348_v7 = vld [vmem:[%s18637_s21 + $0x210] sm:$0xff] }
 0x1b8   : > { %v20038_v2 = vand.u32 4294901760, %v812_v1  ;;  %v3308_v22 = vand.u32 4294901760, %v3307_v54  ;;  %v761_v54 = vsel %vm552_vm0, %v349_v62, 0 }
 0x1b9   : > { %v3301_v39 = vand.u32 4294901760, %v3300_v0  ;;  %25241 = vst [vmem:[#allocation18_spill] sm:$0xff] %v20036_v4 }
 0x1ba   : > { %17075 = vmatpush3.xpose.msra.mxu0 %v19938_v9  ;;  %17107 = vmatpush3.xpose.msra.mxu1 %v3287_v11  ;;  %v350_v11 = vld [vmem:[%s18637_s21 + $0x220] sm:$0xff] }
 0x1bb   : > { %17076 = vmatprep.subr.mxu0 %v19940_v29  ;;  %17108 = vmatprep.subr.mxu1 %v3406_v16  ;;  %v3420_v16 = vand.u32 4294901760, %v3419_v38  ;;  %v764_v0 = vsel %vm552_vm0, %v350_v11, 0  ;;  %v20053_v38 = vsub.f32 %v815_v27, %v20025_v5  ;;  %v364_v11 = vld [vmem:[%s18637_s21 + $0x290] sm:$0xff] }
 0x1bc   : > { %v20059_v32 = vand.u32 4294901760, %v764_v0 }
 0x1bd   : > { %25243 = vst [vmem:[#allocation10_spill] sm:$0xff] %v20053_v38 }
 0x1be   : > { %17077 = vmatpush3.xpose.msra.mxu0 %v19963_v45  ;;  %17109 = vmatpush3.xpose.msra.mxu1 %v3294_v52  ;;  %v809_v45 = vsel %vm552_vm0, %v365_v40, 0  ;;  %v20057_v52 = vsub.f32 %v767_v18, %v20036_v4  ;;  %25245 = vst [vmem:[#allocation13_spill] sm:$0xff] %v20059_v32  ;;  %v25247_v40 = vand.u32 4294901760, %v20018_v60 }
 0x1bf   : > { %17078 = vmatprep.subr.mxu0 %v19978_v13  ;;  %17110 = vmatprep.subr.mxu1 %v3413_v30  ;;  %v20063_v30 = vsub.f32 %v812_v1, %v20038_v2  ;;  %v20070_v18 = vand.u32 4294901760, %v809_v45  ;;  %v3427_v13 = vand.u32 4294901760, %v3426_v43  ;;  %v25249_v1 = vand.u32 4294901760, %v20029_v57  ;;  %v363_v43 = vld [vmem:[%s18637_s21 + $0x288] sm:$0xff] }
 0x1c0   : > { %25244 = vst [vmem:[#allocation11_spill] sm:$0xff] %v20057_v52  ;;  %v3314_v27 = vsub.f32 %v20018_v60, %v25247_v40  ;;  %v20081_v40 = vsub.f32 %v764_v0, %v20059_v32 }
 0x1c1   : > { %25246 = vst [vmem:[#allocation21_spill] sm:$0xff] %v20063_v30  ;;  %25248 = vst [vmem:[#allocation19_spill] sm:$0xff] %v20070_v18  ;;  %v3433_v9 = vsub.f32 %v20029_v57, %v25249_v1  ;;  %v20093_v0 = vsub.f32 %v809_v45, %v20070_v18  ;;  %v25256_v57 = vand.u32 4294901760, %v20063_v30 }
 0x1c2   : > { %17079 = vmatpush3.xpose.msra.mxu0 %v19994_v25  ;;  %17111 = vmatpush3.xpose.msra.mxu1 %v3301_v39  ;;  %v806_v25 = vsel %vm552_vm0, %v364_v11, 0  ;;  %25250 = vst [vmem:[#allocation22_spill] sm:$0xff] %v20081_v40  ;;  %v3315_v1 = vand.u32 4294901760, %v3314_v27  ;;  %v25251_v39 = vand.u32 4294901760, %v20042_v34  ;;  %v20090_v11 = vand.u32 4294901760, %v761_v54 }
 0x1c3   : > { %17080 = vmatprep.subr.mxu0 %v20000_v46  ;;  %17112 = vmatprep.subr.mxu1 %v3420_v16  ;;  %25253 = vst [vmem:[#allocation25_spill] sm:$0xff] %v20093_v0  ;;  %v3434_v29 = vand.u32 4294901760, %v3433_v9  ;;  %v25254_v16 = vand.u32 4294901760, %v20053_v38  ;;  %v758_v27 = vsel %vm552_vm0, %v348_v7, 0  ;;  %v803_v46 = vsel %vm552_vm0, %v363_v43, 0 }
 0x1c4   : > { %v3321_v62 = vsub.f32 %v20042_v34, %v25251_v39  ;;  %25252 = vst [vmem:[#allocation26_spill] sm:$0xff] %v20090_v11  ;;  %v347_v39 = vld [vmem:[%s18637_s21 + $0x208] sm:$0xff]  ;;  %v25255_v34 = vand.u32 4294901760, %v20057_v52  ;;  %v20114_v7 = vsub.f32 %v761_v54, %v20090_v11  ;;  %v20116_v43 = vand.u32 4294901760, %v758_v27 }
 0x1c5   : > { %v755_v9 = vsel %vm552_vm0, %v347_v39, 0 }
 0x1c6   : > { %17081 = vmatpush3.xpose.msra.mxu0 %v20020_v59  ;;  %17113 = vmatpush3.xpose.msra.mxu1 %v3308_v22  ;;  %v3440_v59 = vsub.f32 %v20053_v38, %v25254_v16  ;;  %v20099_v22 = vand.u32 4294901760, %v806_v25  ;;  %v3328_v45 = vsub.f32 %v20057_v52, %v25255_v34  ;;  %v3322_v16 = vand.u32 4294901760, %v3321_v62  ;;  %v346_v62 = vld [vmem:[%s18637_s21 + $0x200] sm:$0xff] }
 0x1c7   : > { %17082 = vmatprep.subr.mxu0 %v20025_v5  ;;  %17114 = vmatprep.subr.mxu1 %v3427_v13  ;;  %v3447_v13 = vsub.f32 %v20063_v30, %v25256_v57  ;;  %v362_v5 = vld [vmem:[%s18637_s21 + $0x280] sm:$0xff]  ;;  %v20120_v57 = vand.u32 4294901760, %v803_v46  ;;  %v25257_v52 = vand.u32 4294901760, %v20081_v40  ;;  %v20138_v39 = vand.u32 4294901760, %v755_v9 }
 0x1c8   : > { %v3441_v34 = vand.u32 4294901760, %v3440_v59  ;;  %v20124_v30 = vsub.f32 %v806_v25, %v20099_v22  ;;  %v3329_v54 = vand.u32 4294901760, %v3328_v45  ;;  %v25258_v59 = vand.u32 4294901760, %v20093_v0 }
 0x1c9   : > { %v3335_v38 = vsub.f32 %v20081_v40, %v25257_v52 }
 0x1ca   : > { %17083 = vmatpush3.xpose.msra.mxu0 %v20036_v4  ;;  %17115 = vmatpush3.xpose.msra.mxu1 %v3315_v1  ;;  %v800_v1 = vsel %vm552_vm0, %v362_v5, 0  ;;  %v3448_v4 = vand.u32 4294901760, %v3447_v13  ;;  %v3454_v25 = vsub.f32 %v20093_v0, %v25258_v59  ;;  %v24703_v5 = vand.u32 4294901760, %v20114_v7 }
 0x1cb   : > { %17084 = vmatprep.subr.mxu0 %v20038_v2  ;;  %17116 = vmatprep.subr.mxu1 %v3434_v29  ;;  %v20133_v29 = vsub.f32 %v758_v27, %v20116_v43  ;;  %v20142_v45 = vand.u32 4294901760, %v800_v1  ;;  %v752_v13 = vsel %vm552_vm0, %v346_v62, 0  ;;  %v20147_v27 = vsub.f32 %v803_v46, %v20120_v57 }
 0x1cc   : > { %v20151_v59 = vsub.f32 %v755_v9, %v20138_v39  ;;  %v3455_v46 = vand.u32 4294901760, %v3454_v25 }
 0x1cd   : > { %v24706_v52 = vand.u32 4294901760, %v20133_v29  ;;  %v20165_v9 = vsub.f32 %v800_v1, %v20142_v45 }
 0x1ce   : > { %17085 = vmatpush3.xpose.msra.mxu0 %v20059_v32  ;;  %17117 = vmatpush3.xpose.msra.mxu1 %v3322_v16  ;;  %v3336_v16 = vand.u32 4294901760, %v3335_v38  ;;  %25259 = vst [vmem:[#allocation20_spill] sm:$0xff] %v20151_v59  ;;  %v25260_v38 = vand.u32 4294901760, %v20124_v30  ;;  %v24710_v25 = vand.u32 4294901760, %v20151_v59 }
 0x1cf   : > { %17086 = vmatprep.subr.mxu0 %v20070_v18  ;;  %17118 = vmatprep.subr.mxu1 %v3441_v34  ;;  %v3342_v34 = vsub.f32 %v20114_v7, %v24703_v5  ;;  %v20156_v18 = vand.u32 4294901760, %v752_v13 }
 0x1d0   : > { %v3461_v62 = vsub.f32 %v20124_v30, %v25260_v38 }
 0x1d1   : > { %v3343_v5 = vand.u32 4294901760, %v3342_v34  ;;  %v3356_v34 = vsub.f32 %v20151_v59, %v24710_v25  ;;  %v25273_v25 = vld [vmem:[#allocation21_spill] sm:$0xff] }
 0x1d2   : > { %17087 = vmatpush3.xpose.msra.mxu0 %v20090_v11  ;;  %17119 = vmatpush3.xpose.msra.mxu1 %v3329_v54  ;;  %v24707_v54 = vand.u32 4294901760, %v20147_v27  ;;  %v20169_v11 = vsub.f32 %v752_v13, %v20156_v18  ;;  %v3462_v38 = vand.u32 4294901760, %v3461_v62 }
 0x1d3   : > { %17088 = vmatprep.subr.mxu0 %v20099_v22  ;;  %17120 = vmatprep.subr.mxu1 %v3448_v4  ;;  %v3349_v4 = vsub.f32 %v20133_v29, %v24706_v52 }
 0x1d4   : > { %25261 = vst [vmem:[#allocation24_spill] sm:$0xff] %v20169_v11  ;;  %v3468_v1 = vsub.f32 %v20147_v27, %v24707_v54  ;;  %v24708_v52 = vand.u32 4294901760, %v20169_v11  ;;  %v3357_v54 = vand.u32 4294901760, %v3356_v34  ;;  %v25265_v34 = vld [vmem:[#allocation8_spill] sm:$0xff] }
 0x1d5   : > { %v3350_v13 = vand.u32 4294901760, %v3349_v4 }
 0x1d6   : > { %17089 = vmatpush3.xpose.msra.mxu0 %v20116_v43  ;;  %17121 = vmatpush3.xpose.msra.mxu1 %v3336_v16  ;;  %v24709_v16 = vand.u32 4294901760, %v20165_v9 }
 0x1d7   : > { %17090 = vmatprep.subr.mxu0 %v20120_v57  ;;  %17122 = vmatprep.subr.mxu1 %v3455_v46  ;;  %v3469_v46 = vand.u32 4294901760, %v3468_v1  ;;  %v25262_v1 = vld [vmem:[#allocation33_spill] sm:$0xff] }
 0x1d8   : > { %v3475_v62 = vsub.f32 %v20165_v9, %v24709_v16  ;;  %v25272_v16 = vld [vmem:[#allocation16_spill] sm:$0xff] }
 0x1da   : > { %17091 = vmatpush3.xpose.msra.mxu0 %v20138_v39  ;;  %17123 = vmatpush3.xpose.msra.mxu1 %v3343_v5  ;;  %v3363_v5 = vsub.f32 %v20169_v11, %v24708_v52  ;;  %v3476_v4 = vand.u32 4294901760, %v3475_v62  ;;  %v25267_v62 = vld [vmem:[#allocation9_spill] sm:$0xff]  ;;  %v25271_v52 = vld [vmem:[#allocation11_spill] sm:$0xff] }
 0x1db   : > { %17092 = vmatprep.subr.mxu0 %v20142_v45  ;;  %17124 = vmatprep.subr.mxu1 %v3462_v38 }
 0x1dc   : > { %v3364_v38 = vand.u32 4294901760, %v3363_v5  ;;  %v25268_v5 = vld [vmem:[#allocation12_spill] sm:$0xff] }
 0x1de   : > { %17093 = vmatpush3.xpose.msra.mxu0 %v20156_v18  ;;  %17125 = vmatpush3.xpose.msra.mxu1 %v3350_v13  ;;  %v25264_v13 = vld [vmem:[#allocation14_spill] sm:$0xff] }
 0x1df   : > { %17126 = vmatprep.subr.mxu1 %v3469_v46  ;;  %17134 = vmatprep.subr.mxu0 %v19799_v6  ;;  %v25266_v46 = vld [vmem:[#allocation6_spill] sm:$0xff] }
 0x1e1   : > { %17095 = vmatmul.mubr.f32.vlgmr.msra.gmra.mxu0 %v25229_v51  ;;  %v25275_v51 = vld [vmem:[#allocation17_spill] sm:$0xff] }
 0x1e2   : > { %17127 = vmatpush3.xpose.msra.mxu1 %v3357_v54  ;;  %17135 = vmatpush3.xpose.msra.mxu0 %v19815_v26  ;;  %v25263_v54 = vld [vmem:[#allocation31_spill] sm:$0xff] }
 0x1e3   : > { %17128 = vmatprep.subr.mxu1 %v3476_v4  ;;  %17136 = vmatprep.subr.mxu0 %v19827_v15  ;;  %v25269_v4 = vld [vmem:[#allocation10_spill] sm:$0xff] }
 0x1e4   : > { %17096 = vmatprep.mubr.f32.mxu0 %v25262_v1 }
 0x1e5   : > { %17097 = vmatmul.mubr.f32.gmra.mxu0 %v25262_v1  ;;  %v25274_v1 = vld [vmem:[#allocation7_spill] sm:$0xff] }
 0x1e6   : > { %17129 = vmatpush3.xpose.msra.mxu1 %v3364_v38  ;;  %17137 = vmatpush3.xpose.msra.mxu0 %v19830_v56  ;;  %v25270_v38 = vld [vmem:[#allocation15_spill] sm:$0xff] }
 0x1e7   : > { %17138 = vmatprep.subr.mxu0 %v19844_v44  ;;  %17170 = vmatprep.subr.mxu1 %v19782_v24 }
 0x1e8   : > { %17166 = vmatprep.mubr.f32.mxu0 %v18864_v10 }
 0x1e9   : > { %17131 = vmatmul.mubr.f32.vlgmr.msra.gmra.mxu1 %v18630_v3 }
 0x1ea   : > { %17139 = vmatpush3.xpose.msra.mxu0 %v19856_v12  ;;  %17171 = vmatpush3.xpose.msra.mxu1 %v19795_v47 }
 0x1eb   : > { %17140 = vmatprep.subr.mxu0 %v19874_v19  ;;  %17172 = vmatprep.subr.mxu1 %v19806_v8 }
 0x1ec   : > { %17132 = vmatprep.mubr.f32.mxu1 %v25228_v20 }
 0x1ed   : > { %17133 = vmatmul.mubr.f32.gmra.mxu1 %v25228_v20  ;;  %v25276_v20 = vld [vmem:[#allocation23_spill] sm:$0xff] }
 0x1ee   : > { %17141 = vmatpush3.xpose.msra.mxu0 %v19883_v41  ;;  %17173 = vmatpush3.xpose.msra.mxu1 %v19808_v36 }
 0x1ef   : > { %17142 = vmatprep.subr.mxu0 %v19903_v17  ;;  %17174 = vmatprep.subr.mxu1 %v19817_v58 }
 0x1f0   : > { %17202 = vmatprep.mubr.f32.mxu1 %v18891_v33 }
 0x1f2   : > { %17143 = vmatpush3.xpose.msra.mxu0 %v19918_v31  ;;  %17175 = vmatpush3.xpose.msra.mxu1 %v19832_v48 }
 0x1f3   : > { %17144 = vmatprep.subr.mxu0 %v19923_v37  ;;  %17176 = vmatprep.subr.mxu1 %v19848_v61 }
 0x1f6   : > { %17145 = vmatpush3.xpose.msra.mxu0 %v19936_v55  ;;  %17177 = vmatpush3.xpose.msra.mxu1 %v19858_v42 }
 0x1f7   : > { %17146 = vmatprep.subr.mxu0 %v19955_v49  ;;  %17178 = vmatprep.subr.mxu1 %v19869_v28 }
 0x1fa   : > { %17147 = vmatpush3.xpose.msra.mxu0 %v19961_v23  ;;  %17179 = vmatpush3.xpose.msra.mxu1 %v19892_v35 }
 0x1fb   : > { %17148 = vmatprep.subr.mxu0 %v19968_v50  ;;  %17180 = vmatprep.subr.mxu1 %v19894_v63 }
 0x1fe   : > { %17149 = vmatpush3.xpose.msra.mxu0 %v19985_v53  ;;  %17181 = vmatpush3.xpose.msra.mxu1 %v19913_v14 }
 0x1ff   : > { %17150 = vmatprep.subr.mxu0 %v20004_v21  ;;  %17182 = vmatprep.subr.mxu1 %v25263_v54 }
 0x202   : > { %17151 = vmatpush3.xpose.msra.mxu0 %v20018_v60  ;;  %17183 = vmatpush3.xpose.msra.mxu1 %v25264_v13 }
 0x203   : > { %17152 = vmatprep.subr.mxu0 %v25265_v34  ;;  %17184 = vmatprep.subr.mxu1 %v25266_v46 }
 0x206   : > { %17153 = vmatpush3.xpose.msra.mxu0 %v25267_v62  ;;  %17185 = vmatpush3.xpose.msra.mxu1 %v25268_v5 }
 0x207   : > { %17154 = vmatprep.subr.mxu0 %v25269_v4  ;;  %17186 = vmatprep.subr.mxu1 %v25270_v38  ;;  %v25277_v4 = vld [vmem:[#allocation18_spill] sm:$0xff] }
 0x20a   : > { %17155 = vmatpush3.xpose.msra.mxu0 %v25271_v52  ;;  %17187 = vmatpush3.xpose.msra.mxu1 %v25272_v16 }
 0x20b   : > { %17156 = vmatprep.subr.mxu0 %v25273_v25  ;;  %17188 = vmatprep.subr.mxu1 %v25274_v1 }
 0x20e   : > { %17157 = vmatpush3.xpose.msra.mxu0 %v20081_v40  ;;  %17189 = vmatpush3.xpose.msra.mxu1 %v25275_v51  ;;  %v25278_v40 = vld [vmem:[#allocation19_spill] sm:$0xff] }
 0x20f   : > { %17158 = vmatprep.subr.mxu0 %v20093_v0  ;;  %17190 = vmatprep.subr.mxu1 %v25276_v20  ;;  %v25279_v0 = vld [vmem:[#allocation26_spill] sm:$0xff] }
 0x212   : > { %17159 = vmatpush3.xpose.msra.mxu0 %v20114_v7  ;;  %17191 = vmatpush3.xpose.msra.mxu1 %v25277_v4 }
 0x213   : > { %17160 = vmatprep.subr.mxu0 %v20124_v30  ;;  %17192 = vmatprep.subr.mxu1 %v20038_v2 }
 0x216   : > { %17161 = vmatpush3.xpose.msra.mxu0 %v20133_v29  ;;  %17193 = vmatpush3.xpose.msra.mxu1 %v20059_v32  ;;  %v25280_v32 = vand.u32 4294901760, %v19799_v6  ;;  %v25284_v6 = vand.u32 4294901760, %v19830_v56  ;;  %v25290_v56 = vand.u32 4294901760, %v19903_v17  ;;  %v409_v17 = vld [vmem:[%s18637_s21 + $0x3f8] sm:$0xff] }
 0x217   : > { %17162 = vmatprep.subr.mxu0 %v20147_v27  ;;  %17194 = vmatprep.subr.mxu1 %v25278_v40 }
 0x21a   : > { %17163 = vmatpush3.xpose.msra.mxu0 %v20151_v59  ;;  %17195 = vmatpush3.xpose.msra.mxu1 %v25279_v0  ;;  %v25281_v59 = vand.u32 4294901760, %v19815_v26  ;;  %v25282_v0 = vld [vmem:[#allocation30_spill] sm:$0xff]  ;;  %v25286_v26 = vand.u32 4294901760, %v19856_v12  ;;  %v25298_v12 = vand.u32 4294901760, %v20004_v21 }
 0x21b   : > { %17164 = vmatprep.subr.mxu0 %v20165_v9  ;;  %17196 = vmatprep.subr.mxu1 %v20099_v22  ;;  %v25302_v21 = vld [vmem:[#allocation10_spill] sm:$0xff] }
 0x21e   : > { %17165 = vmatpush3.xpose.msra.mxu0 %v20169_v11  ;;  %17197 = vmatpush3.xpose.msra.mxu1 %v20116_v43  ;;  %v25283_v11 = vand.u32 4294901760, %v19827_v15  ;;  %v25287_v15 = vld [vmem:[#allocation32_spill] sm:$0xff] }
 0x21f   : > { %17198 = vmatprep.subr.mxu1 %v20120_v57  ;;  %17206 = vmatprep.subr.mxu0 %v25280_v32  ;;  %v25285_v32 = vand.u32 4294901760, %v19844_v44  ;;  %v25293_v44 = vand.u32 4294901760, %v19936_v55  ;;  %v941_v55 = vsel %vm552_vm0, %v409_v17, 0 }
 0x221   : > { %17167 = vmatmul.mubr.f32.vlgmr.msra.gmra.mxu0 %v18864_v10 }
 0x222   : > { %17199 = vmatpush3.xpose.msra.mxu1 %v20138_v39  ;;  %17207 = vmatpush3.xpose.msra.mxu0 %v25281_v59  ;;  %v407_v59 = vld [vmem:[%s18637_s21 + $0x3e8] sm:$0xff] }
 0x223   : > { %17168 = vmatprep.mubr.f32.mxu0 %v25282_v0  ;;  %17200 = vmatprep.subr.mxu1 %v20142_v45 }
 0x224   : > { %17208 = vmatprep.subr.mxu0 %v25283_v11  ;;  %v25288_v11 = vand.u32 4294901760, %v19874_v19  ;;  %v25301_v19 = vand.u32 4294901760, %v25267_v62  ;;  %v406_v62 = vld [vmem:[%s18637_s21 + $0x3e0] sm:$0xff] }
 0x225   : > { %17169 = vmatmul.mubr.f32.gmra.mxu0 %v25282_v0 }
 0x226   : > { %17201 = vmatpush3.xpose.msra.mxu1 %v20156_v18  ;;  %17209 = vmatpush3.xpose.msra.mxu0 %v25284_v6 }
 0x227   : > { %17210 = vmatprep.subr.mxu0 %v25285_v32  ;;  %17242 = vmatprep.subr.mxu1 %v19782_v24  ;;  %v25289_v24 = vand.u32 4294901760, %v19883_v41  ;;  %v25303_v41 = vand.u32 4294901760, %v25302_v21 }
 0x228   : > { %17238 = vmatprep.mubr.f32.mxu0 %v18630_v3 }
 0x229   : > { %17203 = vmatmul.mubr.f32.vlgmr.msra.gmra.mxu1 %v18891_v33 }
 0x22a   : > { %17211 = vmatpush3.xpose.msra.mxu0 %v25286_v26  ;;  %17243 = vmatpush3.xpose.msra.mxu1 %v19795_v47  ;;  %v25291_v47 = vand.u32 4294901760, %v19918_v31  ;;  %v25308_v31 = vld [vmem:[#allocation25_spill] sm:$0xff]  ;;  %v25318_v26 = vand.u32 4294901760, %v20165_v9 }
 0x22b   : > { %17204 = vmatprep.mubr.f32.mxu1 %v25287_v15  ;;  %17212 = vmatprep.subr.mxu0 %v25288_v11  ;;  %v390_v11 = vld [vmem:[%s18637_s21 + $0x360] sm:$0xff] }
 0x22c   : > { %17244 = vmatprep.subr.mxu1 %v19806_v8  ;;  %v25292_v8 = vand.u32 4294901760, %v19923_v37  ;;  %v25309_v37 = vand.u32 4294901760, %v25308_v31 }
 0x22d   : > { %17205 = vmatmul.mubr.f32.gmra.mxu1 %v25287_v15 }
 0x22e   : > { %17213 = vmatpush3.xpose.msra.mxu0 %v25289_v24  ;;  %17245 = vmatpush3.xpose.msra.mxu1 %v19808_v36  ;;  %v25294_v36 = vand.u32 4294901760, %v19955_v49  ;;  %v393_v49 = vld [vmem:[%s18637_s21 + $0x378] sm:$0xff]  ;;  %v932_v24 = vsel %vm552_vm0, %v406_v62, 0  ;;  %v25322_v62 = vld [vmem:[#allocation27_spill] sm:$0xff] }
 0x22f   : > { %17214 = vmatprep.subr.mxu0 %v25290_v56  ;;  %17246 = vmatprep.subr.mxu1 %v19817_v58  ;;  %v25295_v58 = vand.u32 4294901760, %v19961_v23  ;;  %v25310_v23 = vand.u32 4294901760, %v20114_v7  ;;  %v25312_v7 = vand.u32 4294901760, %v20133_v29 }
 0x230   : > { %17274 = vmatprep.mubr.f32.mxu1 %v18630_v3 }
 0x232   : > { %17215 = vmatpush3.xpose.msra.mxu0 %v25291_v47  ;;  %17247 = vmatpush3.xpose.msra.mxu1 %v19832_v48  ;;  %v25296_v48 = vand.u32 4294901760, %v19968_v50  ;;  %v20350_v50 = vand.u32 4294901760, %v941_v55 }
 0x233   : > { %17216 = vmatprep.subr.mxu0 %v25292_v8  ;;  %17248 = vmatprep.subr.mxu1 %v19848_v61  ;;  %v25297_v61 = vand.u32 4294901760, %v19985_v53 }
 0x236   : > { %17217 = vmatpush3.xpose.msra.mxu0 %v25293_v44  ;;  %17249 = vmatpush3.xpose.msra.mxu1 %v19858_v42  ;;  %v25299_v42 = vand.u32 4294901760, %v20018_v60  ;;  %v408_v60 = vld [vmem:[%s18637_s21 + $0x3f0] sm:$0xff]  ;;  %v405_v44 = vld [vmem:[%s18637_s21 + $0x3d8] sm:$0xff] }
 0x237   : > { %17218 = vmatprep.subr.mxu0 %v25294_v36  ;;  %17250 = vmatprep.subr.mxu1 %v19869_v28  ;;  %v25300_v28 = vand.u32 4294901760, %v25265_v34  ;;  %v391_v34 = vld [vmem:[%s18637_s21 + $0x368] sm:$0xff]  ;;  %v25319_v36 = vld [vmem:[#allocation24_spill] sm:$0xff] }
 0x238   : > { %v887_v32 = vsel %vm552_vm0, %v391_v34, 0 }
 0x239   : > { %v20400_v8 = vand.u32 4294901760, %v887_v32 }
 0x23a   : > { %17219 = vmatpush3.xpose.msra.mxu0 %v25295_v58  ;;  %17251 = vmatpush3.xpose.msra.mxu1 %v19892_v35  ;;  %v25304_v35 = vand.u32 4294901760, %v25271_v52  ;;  %v25311_v52 = vand.u32 4294901760, %v20124_v30  ;;  %v20367_v30 = vsub.f32 %v941_v55, %v20350_v50  ;;  %v25320_v58 = vand.u32 4294901760, %v25319_v36  ;;  %v388_v55 = vld [vmem:[%s18637_s21 + $0x350] sm:$0xff] }
 0x23b   : > { %17220 = vmatprep.subr.mxu0 %v25296_v48  ;;  %17252 = vmatprep.subr.mxu1 %v19894_v63  ;;  %v25305_v63 = vand.u32 4294901760, %v25273_v25  ;;  %v938_v25 = vsel %vm552_vm0, %v408_v60, 0  ;;  %v884_v48 = vsel %vm552_vm0, %v390_v11, 0  ;;  %v20424_v21 = vsub.f32 %v887_v32, %v20400_v8 }
 0x23c   : > { %v20374_v29 = vand.u32 4294901760, %v938_v25 }
 0x23d   : > { %v24725_v60 = vand.u32 4294901760, %v20424_v21 }
 0x23e   : > { %17221 = vmatpush3.xpose.msra.mxu0 %v25297_v61  ;;  %17253 = vmatpush3.xpose.msra.mxu1 %v19913_v14  ;;  %v25306_v14 = vld [vmem:[#allocation22_spill] sm:$0xff]  ;;  %v20395_v56 = vsub.f32 %v938_v25, %v20374_v29  ;;  %v878_v25 = vsel %vm552_vm0, %v388_v55, 0 }
 0x23f   : > { %17222 = vmatprep.subr.mxu0 %v25298_v12  ;;  %17254 = vmatprep.subr.mxu1 %v25263_v54  ;;  %v25307_v53 = vand.u32 4294901760, %v25306_v14  ;;  %v20416_v12 = vand.u32 4294901760, %v932_v24  ;;  %v25321_v14 = vld [vmem:[#allocation28_spill] sm:$0xff] }
 0x242   : > { %17223 = vmatpush3.xpose.msra.mxu0 %v25299_v42  ;;  %17255 = vmatpush3.xpose.msra.mxu1 %v25264_v13  ;;  %v935_v13 = vsel %vm552_vm0, %v407_v59, 0  ;;  %v24729_v42 = vand.u32 4294901760, %v20395_v56 }
 0x243   : > { %17224 = vmatprep.subr.mxu0 %v25300_v28  ;;  %17256 = vmatprep.subr.mxu1 %v25266_v46  ;;  %v20385_v6 = vand.u32 4294901760, %v935_v13  ;;  %v389_v28 = vld [vmem:[%s18637_s21 + $0x358] sm:$0xff] }
 0x244   : > { %v881_v31 = vsel %vm552_vm0, %v389_v28, 0 }
 0x245   : > { %v20412_v61 = vsub.f32 %v935_v13, %v20385_v6 }
 0x246   : > { %17225 = vmatpush3.xpose.msra.mxu0 %v25301_v19  ;;  %17257 = vmatpush3.xpose.msra.mxu1 %v25268_v5  ;;  %v25315_v5 = vld [vmem:[#allocation20_spill] sm:$0xff] }
 0x247   : > { %17226 = vmatprep.subr.mxu0 %v25303_v41  ;;  %17258 = vmatprep.subr.mxu1 %v25270_v38  ;;  %v25317_v38 = vld [vmem:[#allocation26_spill] sm:$0xff]  ;;  %v404_v19 = vld [vmem:[%s18637_s21 + $0x3d0] sm:$0xff]  ;;  %v20426_v41 = vand.u32 4294901760, %v884_v48  ;;  %v24726_v17 = vand.u32 4294901760, %v20412_v61 }
 0x24a   : > { %17227 = vmatpush3.xpose.msra.mxu0 %v25304_v35  ;;  %17259 = vmatpush3.xpose.msra.mxu1 %v25272_v16  ;;  %v25313_v16 = vld [vmem:[#allocation13_spill] sm:$0xff] }
 0x24b   : > { %17228 = vmatprep.subr.mxu0 %v25305_v63  ;;  %17260 = vmatprep.subr.mxu1 %v25274_v1 }
 0x24e   : > { %17229 = vmatpush3.xpose.msra.mxu0 %v25307_v53  ;;  %17261 = vmatpush3.xpose.msra.mxu1 %v25275_v51  ;;  %v392_v51 = vld [vmem:[%s18637_s21 + $0x370] sm:$0xff] }
 0x24f   : > { %17230 = vmatprep.subr.mxu0 %v25309_v37  ;;  %17262 = vmatprep.subr.mxu1 %v25276_v20  ;;  %v893_v20 = vsel %vm552_vm0, %v393_v49, 0  ;;  %v890_v54 = vsel %vm552_vm0, %v392_v51, 0  ;;  %v20442_v37 = vsub.f32 %v932_v24, %v20416_v12  ;;  %v4281_v49 = vsub.f32 %v20395_v56, %v24729_v42 }
 0x250   : > { %v20363_v1 = vand.u32 4294901760, %v893_v20  ;;  %v20376_v46 = vand.u32 4294901760, %v890_v54  ;;  %v20460_v51 = vand.u32 4294901760, %v881_v31 }
 0x251   : > { %v4282_v13 = vand.u32 4294901760, %v4281_v49 }
 0x252   : > { %17231 = vmatpush3.xpose.msra.mxu0 %v25310_v23  ;;  %17263 = vmatpush3.xpose.msra.mxu1 %v25277_v4  ;;  %v25316_v4 = vand.u32 4294901760, %v25315_v5  ;;  %v20398_v47 = vsub.f32 %v890_v54, %v20376_v46  ;;  %v387_v54 = vld [vmem:[%s18637_s21 + $0x348] sm:$0xff] }
 0x253   : > { %17232 = vmatprep.subr.mxu0 %v25311_v52  ;;  %17264 = vmatprep.subr.mxu1 %v20038_v2  ;;  %v25314_v2 = vand.u32 4294901760, %v20147_v27  ;;  %v20383_v27 = vsub.f32 %v893_v20, %v20363_v1  ;;  %v403_v52 = vld [vmem:[%s18637_s21 + $0x3c8] sm:$0xff]  ;;  %v875_v11 = vsel %vm552_vm0, %v387_v54, 0  ;;  %v385_v54 = vld [vmem:[%s18637_s21 + $0x338] sm:$0xff] }
 0x254   : > { %v923_v34 = vsel %vm552_vm0, %v403_v52, 0 }
 0x255   : > { %v24731_v9 = vand.u32 4294901760, %v20383_v27 }
 0x256   : > { %17233 = vmatpush3.xpose.msra.mxu0 %v25312_v7  ;;  %17265 = vmatpush3.xpose.msra.mxu1 %v25313_v16  ;;  %v4288_v7 = vsub.f32 %v20412_v61, %v24726_v17  ;;  %v24723_v16 = vand.u32 4294901760, %v20442_v37 }
 0x257   : > { %17234 = vmatprep.subr.mxu0 %v25314_v2  ;;  %17266 = vmatprep.subr.mxu1 %v25278_v40  ;;  %v24733_v40 = vand.u32 4294901760, %v20367_v30  ;;  %v4162_v63 = vsub.f32 %v20383_v27, %v24731_v9  ;;  %v402_v2 = vld [vmem:[%s18637_s21 + $0x3c0] sm:$0xff] }
 0x258   : > { %v920_v24 = vsel %vm552_vm0, %v402_v2, 0  ;;  %v4289_v36 = vand.u32 4294901760, %v4288_v7 }
 0x259   : > { %v4163_v20 = vand.u32 4294901760, %v4162_v63  ;;  %v20508_v63 = vand.u32 4294901760, %v920_v24 }
 0x25a   : > { %17235 = vmatpush3.xpose.msra.mxu0 %v25316_v4  ;;  %17267 = vmatpush3.xpose.msra.mxu1 %v25317_v38  ;;  %v4176_v4 = vsub.f32 %v20424_v21, %v24725_v60  ;;  %v20481_v38 = vand.u32 4294901760, %v878_v25 }
 0x25b   : > { %17236 = vmatprep.subr.mxu0 %v25318_v26  ;;  %17268 = vmatprep.subr.mxu1 %v20099_v22  ;;  %v4274_v22 = vsub.f32 %v20367_v30, %v24733_v40  ;;  %v20486_v26 = vsub.f32 %v881_v31, %v20460_v51  ;;  %25325 = vst [vmem:[#allocation14_spill] sm:$0xff] %v20508_v63  ;;  %v401_v31 = vld [vmem:[%s18637_s21 + $0x3b8] sm:$0xff] }
 0x25c   : > { %v4177_v28 = vand.u32 4294901760, %v4176_v4  ;;  %v917_v7 = vsel %vm552_vm0, %v401_v31, 0  ;;  %v400_v4 = vld [vmem:[%s18637_s21 + $0x3b0] sm:$0xff] }
 0x25d   : > { %v4275_v35 = vand.u32 4294901760, %v4274_v22  ;;  %v20498_v22 = vand.u32 4294901760, %v923_v34  ;;  %v24722_v55 = vand.u32 4294901760, %v20486_v26  ;;  %v20546_v31 = vand.u32 4294901760, %v917_v7 }
 0x25e   : > { %17237 = vmatpush3.xpose.msra.mxu0 %v25320_v58  ;;  %17269 = vmatpush3.xpose.msra.mxu1 %v20116_v43  ;;  %v929_v43 = vsel %vm552_vm0, %v405_v44, 0  ;;  %v4295_v58 = vsub.f32 %v20442_v37, %v24723_v16 }
 0x25f   : > { %17270 = vmatprep.subr.mxu1 %v20120_v57  ;;  %17278 = vmatprep.subr.mxu0 %v20350_v50  ;;  %v24727_v57 = vand.u32 4294901760, %v20398_v47  ;;  %v20437_v53 = vand.u32 4294901760, %v929_v43  ;;  %25323 = vst [vmem:[#allocation29_spill] sm:$0xff] %v20498_v22  ;;  %25327 = vst [vmem:[#allocation6_spill] sm:$0xff] %v20546_v31  ;;  %v20572_v17 = vsub.f32 %v917_v7, %v20546_v31 }
 0x260   : > { %v4296_v52 = vand.u32 4294901760, %v4295_v58  ;;  %v4190_v58 = vsub.f32 %v20486_v26, %v24722_v55  ;;  %v399_v55 = vld [vmem:[%s18637_s21 + $0x3a8] sm:$0xff] }
 0x261   : > { %17239 = vmatmul.mubr.f32.vlgmr.msra.gmra.mxu0 %v18630_v3  ;;  %v4169_v23 = vsub.f32 %v20398_v47, %v24727_v57  ;;  %v383_v57 = vld [vmem:[%s18637_s21 + $0x328] sm:$0xff] }
 0x262   : > { %17271 = vmatpush3.xpose.msra.mxu1 %v20138_v39  ;;  %17279 = vmatpush3.xpose.msra.mxu0 %v20363_v1  ;;  %v926_v39 = vsel %vm552_vm0, %v404_v19, 0  ;;  %v20504_v19 = vsub.f32 %v878_v25, %v20481_v38  ;;  %v20523_v25 = vsub.f32 %v923_v34, %v20498_v22 }
 0x263   : > { %17240 = vmatprep.mubr.f32.mxu0 %v25321_v14  ;;  %17272 = vmatprep.subr.mxu1 %v20142_v45  ;;  %v20451_v45 = vsub.f32 %v884_v48, %v20426_v41  ;;  %v20462_v59 = vand.u32 4294901760, %v926_v39  ;;  %v4170_v5 = vand.u32 4294901760, %v4169_v23 }
 0x264   : > { %17280 = vmatprep.subr.mxu0 %v20374_v29 }
 0x265   : > { %17241 = vmatmul.mubr.f32.gmra.mxu0 %v25321_v14  ;;  %v24720_v32 = vand.u32 4294901760, %v20451_v45  ;;  %v20491_v44 = vsub.f32 %v926_v39, %v20462_v59 }
 0x266   : > { %17273 = vmatpush3.xpose.msra.mxu1 %v20156_v18  ;;  %17281 = vmatpush3.xpose.msra.mxu0 %v20376_v46  ;;  %v20471_v18 = vsub.f32 %v929_v43, %v20437_v53  ;;  %v386_v43 = vld [vmem:[%s18637_s21 + $0x340] sm:$0xff] }
 0x267   : > { %17282 = vmatprep.subr.mxu0 %v20385_v6  ;;  %17314 = vmatprep.subr.mxu1 %v4275_v35  ;;  %v20506_v35 = vand.u32 4294901760, %v875_v11  ;;  %v4183_v39 = vsub.f32 %v20451_v45, %v24720_v32  ;;  %v24721_v49 = vand.u32 4294901760, %v20491_v44  ;;  %v872_v23 = vsel %vm552_vm0, %v386_v43, 0 }
 0x268   : > { %17310 = vmatprep.mubr.f32.mxu0 %v25322_v62  ;;  %v24719_v48 = vand.u32 4294901760, %v20471_v18 }
 0x269   : > { %17275 = vmatmul.mubr.f32.vlgmr.msra.gmra.mxu1 %v18630_v3  ;;  %25324 = vst [vmem:[#allocation31_spill] sm:$0xff] %v20506_v35  ;;  %v20529_v2 = vsub.f32 %v875_v11, %v20506_v35  ;;  %v4184_v34 = vand.u32 4294901760, %v4183_v39  ;;  %v4309_v11 = vsub.f32 %v20491_v44, %v24721_v49  ;;  %v914_v39 = vsel %vm552_vm0, %v400_v4, 0 }
 0x26a   : > { %17283 = vmatpush3.xpose.msra.mxu0 %v20400_v8  ;;  %17315 = vmatpush3.xpose.msra.mxu1 %v4163_v20  ;;  %v4302_v20 = vsub.f32 %v20471_v18, %v24719_v48  ;;  %v384_v48 = vld [vmem:[%s18637_s21 + $0x330] sm:$0xff] }
 0x26b   : > { %17276 = vmatprep.mubr.f32.mxu1 %v25321_v14  ;;  %17284 = vmatprep.subr.mxu0 %v20416_v12  ;;  %v4310_v4 = vand.u32 4294901760, %v4309_v11  ;;  %v866_v60 = vsel %vm552_vm0, %v384_v48, 0 }
 0x26c   : > { %17316 = vmatprep.subr.mxu1 %v4282_v13  ;;  %v20531_v13 = vand.u32 4294901760, %v872_v23  ;;  %v4303_v43 = vand.u32 4294901760, %v4302_v20 }
 0x26d   : > { %17277 = vmatmul.mubr.f32.gmra.mxu1 %v25321_v14 }
 0x26e   : > { %17285 = vmatpush3.xpose.msra.mxu0 %v20426_v41  ;;  %17317 = vmatpush3.xpose.msra.mxu1 %v4170_v5  ;;  %25326 = vst [vmem:[#allocation8_spill] sm:$0xff] %v20531_v13  ;;  %v24724_v5 = vand.u32 4294901760, %v20504_v19  ;;  %v20553_v32 = vsub.f32 %v872_v23, %v20531_v13 }
 0x26f   : > { %17286 = vmatprep.subr.mxu0 %v20437_v53  ;;  %17318 = vmatprep.subr.mxu1 %v4289_v36  ;;  %v20536_v36 = vsub.f32 %v920_v24, %v20508_v63  ;;  %v24728_v24 = vand.u32 4294901760, %v20523_v25 }
 0x270   : > { %17346 = vmatprep.mubr.f32.mxu1 %v18630_v3  ;;  %v4197_v49 = vsub.f32 %v20504_v19, %v24724_v5  ;;  %v20568_v5 = vand.u32 4294901760, %v914_v39  ;;  %v25333_v15 = vand.u32 4294901760, %v20553_v32 }
 0x271   : > { %v24732_v20 = vand.u32 4294901760, %v20536_v36  ;;  %v4316_v23 = vsub.f32 %v20523_v25, %v24728_v24 }
 0x272   : > { %17287 = vmatpush3.xpose.msra.mxu0 %v20460_v51  ;;  %17319 = vmatpush3.xpose.msra.mxu1 %v4177_v28  ;;  %v869_v28 = vsel %vm552_vm0, %v385_v54, 0  ;;  %v4191_v54 = vand.u32 4294901760, %v4190_v58  ;;  %25329 = vst [vmem:[#allocation12_spill] sm:$0xff] %v20568_v5  ;;  %v911_v58 = vsel %vm552_vm0, %v399_v55, 0  ;;  %v4198_v11 = vand.u32 4294901760, %v4197_v49 }
 0x273   : > { %17288 = vmatprep.subr.mxu0 %v20462_v59  ;;  %17320 = vmatprep.subr.mxu1 %v4296_v52  ;;  %v24730_v52 = vand.u32 4294901760, %v20529_v2  ;;  %v20562_v16 = vand.u32 4294901760, %v869_v28  ;;  %v4323_v24 = vsub.f32 %v20536_v36, %v24732_v20  ;;  %v20588_v55 = vand.u32 4294901760, %v866_v60 }
 0x274   : > { %v863_v49 = vsel %vm552_vm0, %v383_v57, 0  ;;  %v20593_v9 = vand.u32 4294901760, %v911_v58  ;;  %v24740_v20 = vand.u32 4294901760, %v20572_v17  ;;  %v20597_v40 = vsub.f32 %v914_v39, %v20568_v5 }
 0x275   : > { %25328 = vst [vmem:[#allocation9_spill] sm:$0xff] %v20562_v16  ;;  %v20586_v7 = vsub.f32 %v869_v28, %v20562_v16  ;;  %25330 = vst [vmem:[#allocation15_spill] sm:$0xff] %v20588_v55  ;;  %v397_v28 = vld [vmem:[%s18637_s21 + $0x398] sm:$0xff]  ;;  %v4211_v57 = vsub.f32 %v20553_v32, %v25333_v15  ;;  %v20610_v39 = vsub.f32 %v866_v60, %v20588_v55 }
 0x276   : > { %17289 = vmatpush3.xpose.msra.mxu0 %v20481_v38  ;;  %17321 = vmatpush3.xpose.msra.mxu1 %v4184_v34  ;;  %v398_v34 = vld [vmem:[%s18637_s21 + $0x3a0] sm:$0xff]  ;;  %25331 = vst [vmem:[#allocation11_spill] sm:$0xff] %v20593_v9  ;;  %25332 = vst [vmem:[#allocation16_spill] sm:$0xff] %v20597_v40  ;;  %v4330_v15 = vsub.f32 %v20572_v17, %v24740_v20  ;;  %v381_v60 = vld [vmem:[%s18637_s21 + $0x318] sm:$0xff] }
 0x277   : > { %17290 = vmatprep.subr.mxu0 %v20498_v22  ;;  %17322 = vmatprep.subr.mxu1 %v4303_v43  ;;  %v4204_v43 = vsub.f32 %v20529_v2, %v24730_v52  ;;  %v908_v42 = vsel %vm552_vm0, %v398_v34, 0  ;;  %v4317_v52 = vand.u32 4294901760, %v4316_v23  ;;  %v20604_v34 = vand.u32 4294901760, %v863_v49  ;;  %25335 = vst [vmem:[#allocation7_spill] sm:$0xff] %v20610_v39  ;;  %v380_v22 = vld [vmem:[%s18637_s21 + $0x310] sm:$0xff] }
 0x278   : > { %v20606_v0 = vand.u32 4294901760, %v908_v42  ;;  %v4212_v20 = vand.u32 4294901760, %v4211_v57  ;;  %v857_v57 = vsel %vm552_vm0, %v381_v60, 0 }
 0x279   : > { %v4205_v48 = vand.u32 4294901760, %v4204_v43  ;;  %25334 = vst [vmem:[#allocation21_spill] sm:$0xff] %v20604_v34 }
 0x27a   : > { %17291 = vmatpush3.xpose.msra.mxu0 %v20506_v35  ;;  %17323 = vmatpush3.xpose.msra.mxu1 %v4191_v54  ;;  %v382_v54 = vld [vmem:[%s18637_s21 + $0x320] sm:$0xff] }
 0x27b   : > { %17292 = vmatprep.subr.mxu0 %v20508_v63  ;;  %17324 = vmatprep.subr.mxu1 %v4310_v4  ;;  %v4324_v4 = vand.u32 4294901760, %v4323_v24  ;;  %v860_v43 = vsel %vm552_vm0, %v382_v54, 0  ;;  %v20621_v24 = vsub.f32 %v911_v58, %v20593_v9  ;;  %v396_v54 = vld [vmem:[%s18637_s21 + $0x390] sm:$0xff] }
 0x27c   : > { %v20627_v23 = vand.u32 4294901760, %v860_v43 }
 0x27d   : > { %25336 = vst [vmem:[#allocation17_spill] sm:$0xff] %v20621_v24 }
 0x27e   : > { %17293 = vmatpush3.xpose.msra.mxu0 %v20531_v13  ;;  %17325 = vmatpush3.xpose.msra.mxu1 %v4198_v11  ;;  %v905_v13 = vsel %vm552_vm0, %v397_v28, 0  ;;  %v20625_v11 = vsub.f32 %v863_v49, %v20604_v34  ;;  %25338 = vst [vmem:[#allocation18_spill] sm:$0xff] %v20627_v23  ;;  %v25340_v28 = vand.u32 4294901760, %v20586_v7 }
 0x27f   : > { %17294 = vmatprep.subr.mxu0 %v20546_v31  ;;  %17326 = vmatprep.subr.mxu1 %v4317_v52  ;;  %v20631_v52 = vsub.f32 %v908_v42, %v20606_v0  ;;  %v20638_v49 = vand.u32 4294901760, %v905_v13  ;;  %v4331_v31 = vand.u32 4294901760, %v4330_v15  ;;  %v25342_v42 = vand.u32 4294901760, %v20597_v40  ;;  %v395_v15 = vld [vmem:[%s18637_s21 + $0x388] sm:$0xff] }
 0x280   : > { %25337 = vst [vmem:[#allocation23_spill] sm:$0xff] %v20625_v11  ;;  %v4218_v58 = vsub.f32 %v20586_v7, %v25340_v28  ;;  %v20649_v28 = vsub.f32 %v860_v43, %v20627_v23 }
 0x281   : > { %25339 = vst [vmem:[#allocation19_spill] sm:$0xff] %v20631_v52  ;;  %25341 = vst [vmem:[#allocation10_spill] sm:$0xff] %v20638_v49  ;;  %v4337_v35 = vsub.f32 %v20597_v40, %v25342_v42  ;;  %v20661_v43 = vsub.f32 %v905_v13, %v20638_v49  ;;  %v25349_v40 = vand.u32 4294901760, %v20631_v52 }
 0x282   : > { %17295 = vmatpush3.xpose.msra.mxu0 %v20562_v16  ;;  %17327 = vmatpush3.xpose.msra.mxu1 %v4205_v48  ;;  %v902_v16 = vsel %vm552_vm0, %v396_v54, 0  ;;  %25343 = vst [vmem:[#allocation22_spill] sm:$0xff] %v20649_v28  ;;  %v4219_v42 = vand.u32 4294901760, %v4218_v58  ;;  %v25344_v48 = vand.u32 4294901760, %v20610_v39  ;;  %v20658_v54 = vand.u32 4294901760, %v857_v57 }
 0x283   : > { %17296 = vmatprep.subr.mxu0 %v20568_v5  ;;  %17328 = vmatprep.subr.mxu1 %v4324_v4  ;;  %25346 = vst [vmem:[#allocation13_spill] sm:$0xff] %v20661_v43  ;;  %v4338_v63 = vand.u32 4294901760, %v4337_v35  ;;  %v25347_v4 = vand.u32 4294901760, %v20621_v24  ;;  %v854_v58 = vsel %vm552_vm0, %v380_v22, 0  ;;  %v899_v5 = vsel %vm552_vm0, %v395_v15, 0 }
 0x284   : > { %v4225_v60 = vsub.f32 %v20610_v39, %v25344_v48  ;;  %25345 = vst [vmem:[#allocation25_spill] sm:$0xff] %v20658_v54  ;;  %v379_v48 = vld [vmem:[%s18637_s21 + $0x308] sm:$0xff]  ;;  %v25348_v39 = vand.u32 4294901760, %v20625_v11  ;;  %v20682_v22 = vsub.f32 %v857_v57, %v20658_v54  ;;  %v20684_v15 = vand.u32 4294901760, %v854_v58 }
 0x285   : > { %v851_v35 = vsel %vm552_vm0, %v379_v48, 0 }
 0x286   : > { %17297 = vmatpush3.xpose.msra.mxu0 %v20588_v55  ;;  %17329 = vmatpush3.xpose.msra.mxu1 %v4212_v20  ;;  %v4344_v55 = vsub.f32 %v20621_v24, %v25347_v4  ;;  %v20667_v20 = vand.u32 4294901760, %v902_v16  ;;  %v4232_v13 = vsub.f32 %v20625_v11, %v25348_v39  ;;  %v4226_v4 = vand.u32 4294901760, %v4225_v60  ;;  %v378_v60 = vld [vmem:[%s18637_s21 + $0x300] sm:$0xff] }
 0x287   : > { %17298 = vmatprep.subr.mxu0 %v20593_v9  ;;  %17330 = vmatprep.subr.mxu1 %v4331_v31  ;;  %v4351_v31 = vsub.f32 %v20631_v52, %v25349_v40  ;;  %v394_v9 = vld [vmem:[%s18637_s21 + $0x380] sm:$0xff]  ;;  %v20688_v40 = vand.u32 4294901760, %v899_v5  ;;  %v25350_v11 = vand.u32 4294901760, %v20649_v28  ;;  %v20706_v48 = vand.u32 4294901760, %v851_v35 }
 0x288   : > { %v4345_v39 = vand.u32 4294901760, %v4344_v55  ;;  %v20692_v52 = vsub.f32 %v902_v16, %v20667_v20  ;;  %v4233_v57 = vand.u32 4294901760, %v4232_v13  ;;  %v25351_v55 = vand.u32 4294901760, %v20661_v43 }
 0x289   : > { %v4239_v24 = vsub.f32 %v20649_v28, %v25350_v11 }
 0x28a   : > { %17299 = vmatpush3.xpose.msra.mxu0 %v20604_v34  ;;  %17331 = vmatpush3.xpose.msra.mxu1 %v4219_v42  ;;  %v896_v42 = vsel %vm552_vm0, %v394_v9, 0  ;;  %v4352_v34 = vand.u32 4294901760, %v4351_v31  ;;  %v4358_v16 = vsub.f32 %v20661_v43, %v25351_v55  ;;  %v24769_v9 = vand.u32 4294901760, %v20682_v22 }
 0x28b   : > { %17300 = vmatprep.subr.mxu0 %v20606_v0  ;;  %17332 = vmatprep.subr.mxu1 %v4338_v63  ;;  %v20701_v63 = vsub.f32 %v854_v58, %v20684_v15  ;;  %v20710_v13 = vand.u32 4294901760, %v896_v42  ;;  %v848_v31 = vsel %vm552_vm0, %v378_v60, 0  ;;  %v20715_v58 = vsub.f32 %v899_v5, %v20688_v40 }
 0x28c   : > { %v20719_v55 = vsub.f32 %v851_v35, %v20706_v48  ;;  %v4359_v5 = vand.u32 4294901760, %v4358_v16 }
 0x28d   : > { %v24772_v11 = vand.u32 4294901760, %v20701_v63  ;;  %v20733_v35 = vsub.f32 %v896_v42, %v20710_v13 }
 0x28e   : > { %17301 = vmatpush3.xpose.msra.mxu0 %v20627_v23  ;;  %17333 = vmatpush3.xpose.msra.mxu1 %v4226_v4  ;;  %v4240_v4 = vand.u32 4294901760, %v4239_v24  ;;  %25352 = vst [vmem:[#allocation20_spill] sm:$0xff] %v20719_v55  ;;  %v25353_v24 = vand.u32 4294901760, %v20692_v52  ;;  %v24776_v16 = vand.u32 4294901760, %v20719_v55 }
 0x28f   : > { %17302 = vmatprep.subr.mxu0 %v20638_v49  ;;  %17334 = vmatprep.subr.mxu1 %v4345_v39  ;;  %v4246_v39 = vsub.f32 %v20682_v22, %v24769_v9  ;;  %v20724_v49 = vand.u32 4294901760, %v848_v31 }
 0x290   : > { %v4365_v60 = vsub.f32 %v20692_v52, %v25353_v24 }
 0x291   : > { %v4247_v9 = vand.u32 4294901760, %v4246_v39  ;;  %v4260_v39 = vsub.f32 %v20719_v55, %v24776_v16  ;;  %v25366_v16 = vld [vmem:[#allocation19_spill] sm:$0xff] }
 0x292   : > { %17303 = vmatpush3.xpose.msra.mxu0 %v20658_v54  ;;  %17335 = vmatpush3.xpose.msra.mxu1 %v4233_v57  ;;  %v24773_v57 = vand.u32 4294901760, %v20715_v58  ;;  %v20737_v54 = vsub.f32 %v848_v31, %v20724_v49  ;;  %v4366_v24 = vand.u32 4294901760, %v4365_v60 }
 0x293   : > { %17304 = vmatprep.subr.mxu0 %v20667_v20  ;;  %17336 = vmatprep.subr.mxu1 %v4352_v34  ;;  %v4253_v34 = vsub.f32 %v20701_v63, %v24772_v11 }
 0x294   : > { %25354 = vst [vmem:[#allocation26_spill] sm:$0xff] %v20737_v54  ;;  %v4372_v42 = vsub.f32 %v20715_v58, %v24773_v57  ;;  %v24774_v11 = vand.u32 4294901760, %v20737_v54  ;;  %v4261_v57 = vand.u32 4294901760, %v4260_v39  ;;  %v25358_v39 = vld [vmem:[#allocation16_spill] sm:$0xff] }
 0x295   : > { %v4254_v31 = vand.u32 4294901760, %v4253_v34 }
 0x296   : > { %17305 = vmatpush3.xpose.msra.mxu0 %v20684_v15  ;;  %17337 = vmatpush3.xpose.msra.mxu1 %v4240_v4  ;;  %v24775_v4 = vand.u32 4294901760, %v20733_v35 }
 0x297   : > { %17306 = vmatprep.subr.mxu0 %v20688_v40  ;;  %17338 = vmatprep.subr.mxu1 %v4359_v5  ;;  %v4373_v5 = vand.u32 4294901760, %v4372_v42  ;;  %v25355_v42 = vld [vmem:[#allocation33_spill] sm:$0xff] }
 0x298   : > { %v4379_v60 = vsub.f32 %v20733_v35, %v24775_v4  ;;  %v25365_v4 = vld [vmem:[#allocation9_spill] sm:$0xff] }
 0x29a   : > { %17307 = vmatpush3.xpose.msra.mxu0 %v20706_v48  ;;  %17339 = vmatpush3.xpose.msra.mxu1 %v4247_v9  ;;  %v4267_v9 = vsub.f32 %v20737_v54, %v24774_v11  ;;  %v4380_v34 = vand.u32 4294901760, %v4379_v60  ;;  %v25360_v60 = vld [vmem:[#allocation7_spill] sm:$0xff] }
 0x29b   : > { %17308 = vmatprep.subr.mxu0 %v20710_v13  ;;  %17340 = vmatprep.subr.mxu1 %v4366_v24  ;;  %v25364_v11 = vld [vmem:[#allocation23_spill] sm:$0xff] }
 0x29c   : > { %v4268_v24 = vand.u32 4294901760, %v4267_v9  ;;  %v25361_v9 = vld [vmem:[#allocation8_spill] sm:$0xff] }
 0x29e   : > { %17309 = vmatpush3.xpose.msra.mxu0 %v20724_v49  ;;  %17341 = vmatpush3.xpose.msra.mxu1 %v4254_v31  ;;  %v25357_v31 = vld [vmem:[#allocation31_spill] sm:$0xff] }
 0x29f   : > { %17342 = vmatprep.subr.mxu1 %v4373_v5  ;;  %17350 = vmatprep.subr.mxu0 %v20367_v30  ;;  %v25359_v5 = vld [vmem:[#allocation14_spill] sm:$0xff] }
 0x2a1   : > { %17311 = vmatmul.mubr.f32.vlgmr.msra.gmra.mxu0 %v25322_v62  ;;  %v25368_v62 = vld [vmem:[#allocation15_spill] sm:$0xff] }
 0x2a2   : > { %17343 = vmatpush3.xpose.msra.mxu1 %v4261_v57  ;;  %17351 = vmatpush3.xpose.msra.mxu0 %v20383_v27  ;;  %v25356_v57 = vld [vmem:[#allocation29_spill] sm:$0xff] }
 0x2a3   : > { %17344 = vmatprep.subr.mxu1 %v4380_v34  ;;  %17352 = vmatprep.subr.mxu0 %v20395_v56  ;;  %v25362_v34 = vld [vmem:[#allocation17_spill] sm:$0xff] }
 0x2a4   : > { %17312 = vmatprep.mubr.f32.mxu0 %v25355_v42 }
 0x2a5   : > { %17313 = vmatmul.mubr.f32.gmra.mxu0 %v25355_v42  ;;  %v25367_v42 = vld [vmem:[#allocation12_spill] sm:$0xff] }
 0x2a6   : > { %17345 = vmatpush3.xpose.msra.mxu1 %v4268_v24  ;;  %17353 = vmatpush3.xpose.msra.mxu0 %v20398_v47  ;;  %v25363_v24 = vld [vmem:[#allocation6_spill] sm:$0xff] }
 0x2a7   : > { %17354 = vmatprep.subr.mxu0 %v20412_v61  ;;  %17386 = vmatprep.subr.mxu1 %v20350_v50 }
 0x2a8   : > { %17382 = vmatprep.mubr.f32.mxu0 %v18864_v10 }
 0x2a9   : > { %17347 = vmatmul.mubr.f32.vlgmr.msra.gmra.mxu1 %v18630_v3 }
 0x2aa   : > { %17355 = vmatpush3.xpose.msra.mxu0 %v20424_v21  ;;  %17387 = vmatpush3.xpose.msra.mxu1 %v20363_v1 }
 0x2ab   : > { %17356 = vmatprep.subr.mxu0 %v20442_v37  ;;  %17388 = vmatprep.subr.mxu1 %v20374_v29 }
 0x2ac   : > { %17348 = vmatprep.mubr.f32.mxu1 %v25321_v14 }
 0x2ad   : > { %17349 = vmatmul.mubr.f32.gmra.mxu1 %v25321_v14  ;;  %v25369_v14 = vld [vmem:[#allocation11_spill] sm:$0xff] }
 0x2ae   : > { %17357 = vmatpush3.xpose.msra.mxu0 %v20451_v45  ;;  %17389 = vmatpush3.xpose.msra.mxu1 %v20376_v46 }
 0x2af   : > { %17358 = vmatprep.subr.mxu0 %v20471_v18  ;;  %17390 = vmatprep.subr.mxu1 %v20385_v6 }
 0x2b0   : > { %17418 = vmatprep.mubr.f32.mxu1 %v18891_v33 }
 0x2b2   : > { %17359 = vmatpush3.xpose.msra.mxu0 %v20486_v26  ;;  %17391 = vmatpush3.xpose.msra.mxu1 %v20400_v8 }
 0x2b3   : > { %17360 = vmatprep.subr.mxu0 %v20491_v44  ;;  %17392 = vmatprep.subr.mxu1 %v20416_v12 }
 0x2b6   : > { %17361 = vmatpush3.xpose.msra.mxu0 %v20504_v19  ;;  %17393 = vmatpush3.xpose.msra.mxu1 %v20426_v41 }
 0x2b7   : > { %17362 = vmatprep.subr.mxu0 %v20523_v25  ;;  %17394 = vmatprep.subr.mxu1 %v20437_v53 }
 0x2ba   : > { %17363 = vmatpush3.xpose.msra.mxu0 %v20529_v2  ;;  %17395 = vmatpush3.xpose.msra.mxu1 %v20460_v51 }
 0x2bb   : > { %17364 = vmatprep.subr.mxu0 %v20536_v36  ;;  %17396 = vmatprep.subr.mxu1 %v20462_v59 }
 0x2be   : > { %17365 = vmatpush3.xpose.msra.mxu0 %v20553_v32  ;;  %17397 = vmatpush3.xpose.msra.mxu1 %v20481_v38 }
 0x2bf   : > { %17366 = vmatprep.subr.mxu0 %v20572_v17  ;;  %17398 = vmatprep.subr.mxu1 %v25356_v57 }
 0x2c2   : > { %17367 = vmatpush3.xpose.msra.mxu0 %v20586_v7  ;;  %17399 = vmatpush3.xpose.msra.mxu1 %v25357_v31 }
 0x2c3   : > { %17368 = vmatprep.subr.mxu0 %v25358_v39  ;;  %17400 = vmatprep.subr.mxu1 %v25359_v5 }
 0x2c6   : > { %17369 = vmatpush3.xpose.msra.mxu0 %v25360_v60  ;;  %17401 = vmatpush3.xpose.msra.mxu1 %v25361_v9 }
 0x2c7   : > { %17370 = vmatprep.subr.mxu0 %v25362_v34  ;;  %17402 = vmatprep.subr.mxu1 %v25363_v24  ;;  %v25370_v34 = vld [vmem:[#allocation21_spill] sm:$0xff] }
 0x2ca   : > { %17371 = vmatpush3.xpose.msra.mxu0 %v25364_v11  ;;  %17403 = vmatpush3.xpose.msra.mxu1 %v25365_v4 }
 0x2cb   : > { %17372 = vmatprep.subr.mxu0 %v25366_v16  ;;  %17404 = vmatprep.subr.mxu1 %v25367_v42 }
 0x2ce   : > { %17373 = vmatpush3.xpose.msra.mxu0 %v20649_v28  ;;  %17405 = vmatpush3.xpose.msra.mxu1 %v25368_v62  ;;  %v25371_v28 = vld [vmem:[#allocation10_spill] sm:$0xff] }
 0x2cf   : > { %17374 = vmatprep.subr.mxu0 %v20661_v43  ;;  %17406 = vmatprep.subr.mxu1 %v25369_v14  ;;  %v25372_v43 = vld [vmem:[#allocation25_spill] sm:$0xff] }
 0x2d2   : > { %17375 = vmatpush3.xpose.msra.mxu0 %v20682_v22  ;;  %17407 = vmatpush3.xpose.msra.mxu1 %v25370_v34 }
 0x2d3   : > { %17376 = vmatprep.subr.mxu0 %v20692_v52  ;;  %17408 = vmatprep.subr.mxu1 %v20606_v0 }
 0x2d6   : > { %17377 = vmatpush3.xpose.msra.mxu0 %v20701_v63  ;;  %17409 = vmatpush3.xpose.msra.mxu1 %v20627_v23  ;;  %v25373_v23 = vand.u32 4294901760, %v20367_v30  ;;  %v25377_v30 = vand.u32 4294901760, %v20398_v47  ;;  %v25383_v47 = vand.u32 4294901760, %v20471_v18  ;;  %v441_v18 = vld [vmem:[%s18637_s21 + $0x4f8] sm:$0xff] }
 0x2d7   : > { %17378 = vmatprep.subr.mxu0 %v20715_v58  ;;  %17410 = vmatprep.subr.mxu1 %v25371_v28 }
 0x2da   : > { %17379 = vmatpush3.xpose.msra.mxu0 %v20719_v55  ;;  %17411 = vmatpush3.xpose.msra.mxu1 %v25372_v43  ;;  %v25374_v55 = vand.u32 4294901760, %v20383_v27  ;;  %v25375_v43 = vld [vmem:[#allocation30_spill] sm:$0xff]  ;;  %v25379_v27 = vand.u32 4294901760, %v20424_v21  ;;  %v25391_v21 = vand.u32 4294901760, %v20572_v17  ;;  %v25395_v17 = vld [vmem:[#allocation17_spill] sm:$0xff] }
 0x2db   : > { %17380 = vmatprep.subr.mxu0 %v20733_v35  ;;  %17412 = vmatprep.subr.mxu1 %v20667_v20 }
 0x2de   : > { %17381 = vmatpush3.xpose.msra.mxu0 %v20737_v54  ;;  %17413 = vmatpush3.xpose.msra.mxu1 %v20684_v15  ;;  %v25376_v54 = vand.u32 4294901760, %v20395_v56  ;;  %v25380_v56 = vld [vmem:[#allocation32_spill] sm:$0xff] }
 0x2df   : > { %17414 = vmatprep.subr.mxu1 %v20688_v40  ;;  %17422 = vmatprep.subr.mxu0 %v25373_v23  ;;  %v25378_v23 = vand.u32 4294901760, %v20412_v61  ;;  %v25386_v61 = vand.u32 4294901760, %v20504_v19  ;;  %v1037_v19 = vsel %vm552_vm0, %v441_v18, 0 }
 0x2e1   : > { %17383 = vmatmul.mubr.f32.vlgmr.msra.gmra.mxu0 %v18864_v10 }
 0x2e2   : > { %17415 = vmatpush3.xpose.msra.mxu1 %v20706_v48  ;;  %17423 = vmatpush3.xpose.msra.mxu0 %v25374_v55  ;;  %v439_v55 = vld [vmem:[%s18637_s21 + $0x4e8] sm:$0xff] }
 0x2e3   : > { %17384 = vmatprep.mubr.f32.mxu0 %v25375_v43  ;;  %17416 = vmatprep.subr.mxu1 %v20710_v13 }
 0x2e4   : > { %17424 = vmatprep.subr.mxu0 %v25376_v54  ;;  %v25381_v54 = vand.u32 4294901760, %v20442_v37  ;;  %v25394_v37 = vand.u32 4294901760, %v25360_v60  ;;  %v438_v60 = vld [vmem:[%s18637_s21 + $0x4e0] sm:$0xff] }
 0x2e5   : > { %17385 = vmatmul.mubr.f32.gmra.mxu0 %v25375_v43 }
 0x2e6   : > { %17417 = vmatpush3.xpose.msra.mxu1 %v20724_v49  ;;  %17425 = vmatpush3.xpose.msra.mxu0 %v25377_v30 }
 0x2e7   : > { %17426 = vmatprep.subr.mxu0 %v25378_v23  ;;  %17458 = vmatprep.subr.mxu1 %v20350_v50  ;;  %v25382_v50 = vand.u32 4294901760, %v20451_v45  ;;  %v25396_v45 = vand.u32 4294901760, %v25395_v17 }
 0x2e8   : > { %17454 = vmatprep.mubr.f32.mxu0 %v18630_v3 }
 0x2e9   : > { %17419 = vmatmul.mubr.f32.vlgmr.msra.gmra.mxu1 %v18891_v33 }
 0x2ea   : > { %17427 = vmatpush3.xpose.msra.mxu0 %v25379_v27  ;;  %17459 = vmatpush3.xpose.msra.mxu1 %v20363_v1  ;;  %v25384_v1 = vand.u32 4294901760, %v20486_v26  ;;  %v25401_v26 = vld [vmem:[#allocation13_spill] sm:$0xff]  ;;  %v25411_v27 = vand.u32 4294901760, %v20733_v35 }
 0x2eb   : > { %17420 = vmatprep.mubr.f32.mxu1 %v25380_v56  ;;  %17428 = vmatprep.subr.mxu0 %v25381_v54  ;;  %v422_v54 = vld [vmem:[%s18637_s21 + $0x460] sm:$0xff] }
 0x2ec   : > { %17460 = vmatprep.subr.mxu1 %v20374_v29  ;;  %v25385_v29 = vand.u32 4294901760, %v20491_v44  ;;  %v25402_v44 = vand.u32 4294901760, %v25401_v26 }
 0x2ed   : > { %17421 = vmatmul.mubr.f32.gmra.mxu1 %v25380_v56 }
 0x2ee   : > { %17429 = vmatpush3.xpose.msra.mxu0 %v25382_v50  ;;  %17461 = vmatpush3.xpose.msra.mxu1 %v20376_v46  ;;  %v25387_v46 = vand.u32 4294901760, %v20523_v25  ;;  %v425_v25 = vld [vmem:[%s18637_s21 + $0x478] sm:$0xff]  ;;  %v1028_v50 = vsel %vm552_vm0, %v438_v60, 0  ;;  %v25415_v60 = vld [vmem:[#allocation27_spill] sm:$0xff] }
 0x2ef   : > { %17430 = vmatprep.subr.mxu0 %v25383_v47  ;;  %17462 = vmatprep.subr.mxu1 %v20385_v6  ;;  %v25388_v6 = vand.u32 4294901760, %v20529_v2  ;;  %v25403_v2 = vand.u32 4294901760, %v20682_v22  ;;  %v25405_v22 = vand.u32 4294901760, %v20701_v63 }
 0x2f0   : > { %17490 = vmatprep.mubr.f32.mxu1 %v18630_v3 }
 0x2f2   : > { %17431 = vmatpush3.xpose.msra.mxu0 %v25384_v1  ;;  %17463 = vmatpush3.xpose.msra.mxu1 %v20400_v8  ;;  %v25389_v8 = vand.u32 4294901760, %v20536_v36  ;;  %v20918_v36 = vand.u32 4294901760, %v1037_v19 }
 0x2f3   : > { %17432 = vmatprep.subr.mxu0 %v25385_v29  ;;  %17464 = vmatprep.subr.mxu1 %v20416_v12  ;;  %v25390_v12 = vand.u32 4294901760, %v20553_v32 }
 0x2f6   : > { %17433 = vmatpush3.xpose.msra.mxu0 %v25386_v61  ;;  %17465 = vmatpush3.xpose.msra.mxu1 %v20426_v41  ;;  %v25392_v41 = vand.u32 4294901760, %v20586_v7  ;;  %v440_v7 = vld [vmem:[%s18637_s21 + $0x4f0] sm:$0xff]  ;;  %v437_v61 = vld [vmem:[%s18637_s21 + $0x4d8] sm:$0xff] }
 0x2f7   : > { %17434 = vmatprep.subr.mxu0 %v25387_v46  ;;  %17466 = vmatprep.subr.mxu1 %v20437_v53  ;;  %v25393_v53 = vand.u32 4294901760, %v25358_v39  ;;  %v423_v39 = vld [vmem:[%s18637_s21 + $0x468] sm:$0xff] }
 0x2f8   : > { %v983_v23 = vsel %vm552_vm0, %v423_v39, 0  ;;  %v25412_v46 = vld [vmem:[#allocation26_spill] sm:$0xff] }
 0x2f9   : > { %v20968_v29 = vand.u32 4294901760, %v983_v23 }
 0x2fa   : > { %17435 = vmatpush3.xpose.msra.mxu0 %v25388_v6  ;;  %17467 = vmatpush3.xpose.msra.mxu1 %v20460_v51  ;;  %v25397_v51 = vand.u32 4294901760, %v25364_v11  ;;  %v25404_v11 = vand.u32 4294901760, %v20692_v52  ;;  %v20935_v52 = vsub.f32 %v1037_v19, %v20918_v36  ;;  %v25413_v6 = vand.u32 4294901760, %v25412_v46  ;;  %v420_v19 = vld [vmem:[%s18637_s21 + $0x450] sm:$0xff] }
 0x2fb   : > { %17436 = vmatprep.subr.mxu0 %v25389_v8  ;;  %17468 = vmatprep.subr.mxu1 %v20462_v59  ;;  %v25398_v59 = vand.u32 4294901760, %v25366_v16  ;;  %v1034_v16 = vsel %vm552_vm0, %v440_v7, 0  ;;  %v980_v8 = vsel %vm552_vm0, %v422_v54, 0  ;;  %v20992_v17 = vsub.f32 %v983_v23, %v20968_v29 }
 0x2fc   : > { %v20942_v63 = vand.u32 4294901760, %v1034_v16 }
 0x2fd   : > { %v24791_v7 = vand.u32 4294901760, %v20992_v17 }
 0x2fe   : > { %17437 = vmatpush3.xpose.msra.mxu0 %v25390_v12  ;;  %17469 = vmatpush3.xpose.msra.mxu1 %v20481_v38  ;;  %v25399_v38 = vld [vmem:[#allocation22_spill] sm:$0xff]  ;;  %v20963_v47 = vsub.f32 %v1034_v16, %v20942_v63  ;;  %v974_v16 = vsel %vm552_vm0, %v420_v19, 0 }
 0x2ff   : > { %17438 = vmatprep.subr.mxu0 %v25391_v21  ;;  %17470 = vmatprep.subr.mxu1 %v25356_v57  ;;  %v25400_v32 = vand.u32 4294901760, %v25399_v38  ;;  %v20984_v21 = vand.u32 4294901760, %v1028_v50  ;;  %v25414_v38 = vld [vmem:[#allocation28_spill] sm:$0xff] }
 0x302   : > { %17439 = vmatpush3.xpose.msra.mxu0 %v25392_v41  ;;  %17471 = vmatpush3.xpose.msra.mxu1 %v25357_v31  ;;  %v1031_v31 = vsel %vm552_vm0, %v439_v55, 0  ;;  %v24795_v41 = vand.u32 4294901760, %v20963_v47 }
 0x303   : > { %17440 = vmatprep.subr.mxu0 %v25393_v53  ;;  %17472 = vmatprep.subr.mxu1 %v25359_v5  ;;  %v20953_v30 = vand.u32 4294901760, %v1031_v31  ;;  %v421_v53 = vld [vmem:[%s18637_s21 + $0x458] sm:$0xff] }
 0x304   : > { %v977_v26 = vsel %vm552_vm0, %v421_v53, 0 }
 0x305   : > { %v20980_v12 = vsub.f32 %v1031_v31, %v20953_v30 }
 0x306   : > { %17441 = vmatpush3.xpose.msra.mxu0 %v25394_v37  ;;  %17473 = vmatpush3.xpose.msra.mxu1 %v25361_v9  ;;  %v25408_v9 = vld [vmem:[#allocation20_spill] sm:$0xff] }
 0x307   : > { %17442 = vmatprep.subr.mxu0 %v25396_v45  ;;  %17474 = vmatprep.subr.mxu1 %v25363_v24  ;;  %v25410_v24 = vld [vmem:[#allocation25_spill] sm:$0xff]  ;;  %v436_v37 = vld [vmem:[%s18637_s21 + $0x4d0] sm:$0xff]  ;;  %v20994_v45 = vand.u32 4294901760, %v980_v8  ;;  %v24792_v18 = vand.u32 4294901760, %v20980_v12 }
 0x30a   : > { %17443 = vmatpush3.xpose.msra.mxu0 %v25397_v51  ;;  %17475 = vmatpush3.xpose.msra.mxu1 %v25365_v4  ;;  %v25406_v4 = vld [vmem:[#allocation18_spill] sm:$0xff] }
 0x30b   : > { %17444 = vmatprep.subr.mxu0 %v25398_v59  ;;  %17476 = vmatprep.subr.mxu1 %v25367_v42 }
 0x30e   : > { %17445 = vmatpush3.xpose.msra.mxu0 %v25400_v32  ;;  %17477 = vmatpush3.xpose.msra.mxu1 %v25368_v62  ;;  %v424_v62 = vld [vmem:[%s18637_s21 + $0x470] sm:$0xff] }
 0x30f   : > { %17446 = vmatprep.subr.mxu0 %v25402_v44  ;;  %17478 = vmatprep.subr.mxu1 %v25369_v14  ;;  %v989_v14 = vsel %vm552_vm0, %v425_v25, 0  ;;  %v986_v57 = vsel %vm552_vm0, %v424_v62, 0  ;;  %v21010_v44 = vsub.f32 %v1028_v50, %v20984_v21  ;;  %v5185_v25 = vsub.f32 %v20963_v47, %v24795_v41 }
 0x310   : > { %v20931_v42 = vand.u32 4294901760, %v989_v14  ;;  %v20944_v5 = vand.u32 4294901760, %v986_v57  ;;  %v21028_v62 = vand.u32 4294901760, %v977_v26 }
 0x311   : > { %v5186_v31 = vand.u32 4294901760, %v5185_v25 }
 0x312   : > { %17447 = vmatpush3.xpose.msra.mxu0 %v25403_v2  ;;  %17479 = vmatpush3.xpose.msra.mxu1 %v25370_v34  ;;  %v25409_v34 = vand.u32 4294901760, %v25408_v9  ;;  %v20966_v1 = vsub.f32 %v986_v57, %v20944_v5  ;;  %v419_v57 = vld [vmem:[%s18637_s21 + $0x448] sm:$0xff] }
 0x313   : > { %17448 = vmatprep.subr.mxu0 %v25404_v11  ;;  %17480 = vmatprep.subr.mxu1 %v20606_v0  ;;  %v25407_v0 = vand.u32 4294901760, %v20715_v58  ;;  %v20951_v58 = vsub.f32 %v989_v14, %v20931_v42  ;;  %v435_v11 = vld [vmem:[%s18637_s21 + $0x4c8] sm:$0xff]  ;;  %v971_v54 = vsel %vm552_vm0, %v419_v57, 0  ;;  %v417_v57 = vld [vmem:[%s18637_s21 + $0x438] sm:$0xff] }
 0x314   : > { %v1019_v39 = vsel %vm552_vm0, %v435_v11, 0 }
 0x315   : > { %v24797_v35 = vand.u32 4294901760, %v20951_v58 }
 0x316   : > { %17449 = vmatpush3.xpose.msra.mxu0 %v25405_v22  ;;  %17481 = vmatpush3.xpose.msra.mxu1 %v25406_v4  ;;  %v5192_v22 = vsub.f32 %v20980_v12, %v24792_v18  ;;  %v24789_v4 = vand.u32 4294901760, %v21010_v44 }
 0x317   : > { %17450 = vmatprep.subr.mxu0 %v25407_v0  ;;  %17482 = vmatprep.subr.mxu1 %v25371_v28  ;;  %v24799_v28 = vand.u32 4294901760, %v20935_v52  ;;  %v5066_v59 = vsub.f32 %v20951_v58, %v24797_v35  ;;  %v434_v0 = vld [vmem:[%s18637_s21 + $0x4c0] sm:$0xff] }
 0x318   : > { %v1016_v50 = vsel %vm552_vm0, %v434_v0, 0  ;;  %v5193_v46 = vand.u32 4294901760, %v5192_v22 }
 0x319   : > { %v5067_v14 = vand.u32 4294901760, %v5066_v59  ;;  %v21076_v59 = vand.u32 4294901760, %v1016_v50 }
 0x31a   : > { %17451 = vmatpush3.xpose.msra.mxu0 %v25409_v34  ;;  %17483 = vmatpush3.xpose.msra.mxu1 %v25410_v24  ;;  %v5080_v34 = vsub.f32 %v20992_v17, %v24791_v7  ;;  %v21049_v24 = vand.u32 4294901760, %v974_v16 }
 0x31b   : > { %17452 = vmatprep.subr.mxu0 %v25411_v27  ;;  %17484 = vmatprep.subr.mxu1 %v20667_v20  ;;  %v5178_v20 = vsub.f32 %v20935_v52, %v24799_v28  ;;  %v21054_v27 = vsub.f32 %v977_v26, %v21028_v62  ;;  %25418 = vst [vmem:[#allocation31_spill] sm:$0xff] %v21076_v59  ;;  %v433_v26 = vld [vmem:[%s18637_s21 + $0x4b8] sm:$0xff] }
 0x31c   : > { %v5081_v53 = vand.u32 4294901760, %v5080_v34  ;;  %v1013_v22 = vsel %vm552_vm0, %v433_v26, 0  ;;  %v432_v34 = vld [vmem:[%s18637_s21 + $0x4b0] sm:$0xff] }
 0x31d   : > { %v5179_v51 = vand.u32 4294901760, %v5178_v20  ;;  %v21066_v20 = vand.u32 4294901760, %v1019_v39  ;;  %v24788_v19 = vand.u32 4294901760, %v21054_v27  ;;  %v21114_v26 = vand.u32 4294901760, %v1013_v22 }
 0x31e   : > { %17453 = vmatpush3.xpose.msra.mxu0 %v25413_v6  ;;  %17485 = vmatpush3.xpose.msra.mxu1 %v20684_v15  ;;  %v1025_v15 = vsel %vm552_vm0, %v437_v61, 0  ;;  %v5199_v6 = vsub.f32 %v21010_v44, %v24789_v4 }
 0x31f   : > { %17486 = vmatprep.subr.mxu1 %v20688_v40  ;;  %17494 = vmatprep.subr.mxu0 %v20918_v36  ;;  %v24793_v40 = vand.u32 4294901760, %v20966_v1  ;;  %v21005_v32 = vand.u32 4294901760, %v1025_v15  ;;  %25416 = vst [vmem:[#allocation24_spill] sm:$0xff] %v21066_v20  ;;  %25420 = vst [vmem:[#allocation14_spill] sm:$0xff] %v21114_v26  ;;  %v21140_v18 = vsub.f32 %v1013_v22, %v21114_v26 }
 0x320   : > { %v5200_v11 = vand.u32 4294901760, %v5199_v6  ;;  %v5094_v6 = vsub.f32 %v21054_v27, %v24788_v19  ;;  %v431_v19 = vld [vmem:[%s18637_s21 + $0x4a8] sm:$0xff] }
 0x321   : > { %17455 = vmatmul.mubr.f32.vlgmr.msra.gmra.mxu0 %v18630_v3  ;;  %v5073_v2 = vsub.f32 %v20966_v1, %v24793_v40  ;;  %v415_v40 = vld [vmem:[%s18637_s21 + $0x428] sm:$0xff] }
 0x322   : > { %17487 = vmatpush3.xpose.msra.mxu1 %v20706_v48  ;;  %17495 = vmatpush3.xpose.msra.mxu0 %v20931_v42  ;;  %v1022_v48 = vsel %vm552_vm0, %v436_v37, 0  ;;  %v21072_v37 = vsub.f32 %v974_v16, %v21049_v24  ;;  %v21091_v16 = vsub.f32 %v1019_v39, %v21066_v20 }
 0x323   : > { %17456 = vmatprep.mubr.f32.mxu0 %v25414_v38  ;;  %17488 = vmatprep.subr.mxu1 %v20710_v13  ;;  %v21019_v13 = vsub.f32 %v980_v8, %v20994_v45  ;;  %v21030_v55 = vand.u32 4294901760, %v1022_v48  ;;  %v5074_v9 = vand.u32 4294901760, %v5073_v2 }
 0x324   : > { %17496 = vmatprep.subr.mxu0 %v20942_v63 }
 0x325   : > { %17457 = vmatmul.mubr.f32.gmra.mxu0 %v25414_v38  ;;  %v24786_v23 = vand.u32 4294901760, %v21019_v13  ;;  %v21059_v61 = vsub.f32 %v1022_v48, %v21030_v55 }
 0x326   : > { %17489 = vmatpush3.xpose.msra.mxu1 %v20724_v49  ;;  %17497 = vmatpush3.xpose.msra.mxu0 %v20944_v5  ;;  %v21039_v49 = vsub.f32 %v1025_v15, %v21005_v32  ;;  %v418_v15 = vld [vmem:[%s18637_s21 + $0x440] sm:$0xff] }
 0x327   : > { %17498 = vmatprep.subr.mxu0 %v20953_v30  ;;  %17530 = vmatprep.subr.mxu1 %v5179_v51  ;;  %v21074_v51 = vand.u32 4294901760, %v971_v54  ;;  %v5087_v48 = vsub.f32 %v21019_v13, %v24786_v23  ;;  %v24787_v25 = vand.u32 4294901760, %v21059_v61  ;;  %v968_v2 = vsel %vm552_vm0, %v418_v15, 0 }
 0x328   : > { %17526 = vmatprep.mubr.f32.mxu0 %v25415_v60  ;;  %v24785_v8 = vand.u32 4294901760, %v21039_v49 }
 0x329   : > { %17491 = vmatmul.mubr.f32.vlgmr.msra.gmra.mxu1 %v18630_v3  ;;  %25417 = vst [vmem:[#allocation29_spill] sm:$0xff] %v21074_v51  ;;  %v21097_v0 = vsub.f32 %v971_v54, %v21074_v51  ;;  %v5088_v39 = vand.u32 4294901760, %v5087_v48  ;;  %v5213_v54 = vsub.f32 %v21059_v61, %v24787_v25  ;;  %v1010_v48 = vsel %vm552_vm0, %v432_v34, 0 }
 0x32a   : > { %17499 = vmatpush3.xpose.msra.mxu0 %v20968_v29  ;;  %17531 = vmatpush3.xpose.msra.mxu1 %v5067_v14  ;;  %v5206_v14 = vsub.f32 %v21039_v49, %v24785_v8  ;;  %v416_v8 = vld [vmem:[%s18637_s21 + $0x430] sm:$0xff] }
 0x32b   : > { %17492 = vmatprep.mubr.f32.mxu1 %v25414_v38  ;;  %17500 = vmatprep.subr.mxu0 %v20984_v21  ;;  %v5214_v34 = vand.u32 4294901760, %v5213_v54  ;;  %v962_v7 = vsel %vm552_vm0, %v416_v8, 0 }
 0x32c   : > { %17532 = vmatprep.subr.mxu1 %v5186_v31  ;;  %v21099_v31 = vand.u32 4294901760, %v968_v2  ;;  %v5207_v15 = vand.u32 4294901760, %v5206_v14 }
 0x32d   : > { %17493 = vmatmul.mubr.f32.gmra.mxu1 %v25414_v38 }
 0x32e   : > { %17501 = vmatpush3.xpose.msra.mxu0 %v20994_v45  ;;  %17533 = vmatpush3.xpose.msra.mxu1 %v5074_v9  ;;  %25419 = vst [vmem:[#allocation16_spill] sm:$0xff] %v21099_v31  ;;  %v24790_v9 = vand.u32 4294901760, %v21072_v37  ;;  %v21121_v23 = vsub.f32 %v968_v2, %v21099_v31 }
 0x32f   : > { %17502 = vmatprep.subr.mxu0 %v21005_v32  ;;  %17534 = vmatprep.subr.mxu1 %v5193_v46  ;;  %v21104_v46 = vsub.f32 %v1016_v50, %v21076_v59  ;;  %v24794_v50 = vand.u32 4294901760, %v21091_v16 }
 0x330   : > { %17562 = vmatprep.mubr.f32.mxu1 %v18630_v3  ;;  %v5101_v25 = vsub.f32 %v21072_v37, %v24790_v9  ;;  %v21136_v9 = vand.u32 4294901760, %v1010_v48  ;;  %v25426_v56 = vand.u32 4294901760, %v21121_v23 }
 0x331   : > { %v24798_v14 = vand.u32 4294901760, %v21104_v46  ;;  %v5220_v2 = vsub.f32 %v21091_v16, %v24794_v50 }
 0x332   : > { %17503 = vmatpush3.xpose.msra.mxu0 %v21028_v62  ;;  %17535 = vmatpush3.xpose.msra.mxu1 %v5081_v53  ;;  %v965_v53 = vsel %vm552_vm0, %v417_v57, 0  ;;  %v5095_v57 = vand.u32 4294901760, %v5094_v6  ;;  %25422 = vst [vmem:[#allocation8_spill] sm:$0xff] %v21136_v9  ;;  %v1007_v6 = vsel %vm552_vm0, %v431_v19, 0  ;;  %v5102_v54 = vand.u32 4294901760, %v5101_v25 }
 0x333   : > { %17504 = vmatprep.subr.mxu0 %v21030_v55  ;;  %17536 = vmatprep.subr.mxu1 %v5200_v11  ;;  %v24796_v11 = vand.u32 4294901760, %v21097_v0  ;;  %v21130_v4 = vand.u32 4294901760, %v965_v53  ;;  %v5227_v50 = vsub.f32 %v21104_v46, %v24798_v14  ;;  %v21156_v19 = vand.u32 4294901760, %v962_v7 }
 0x334   : > { %v959_v25 = vsel %vm552_vm0, %v415_v40, 0  ;;  %v21161_v35 = vand.u32 4294901760, %v1007_v6  ;;  %v24806_v14 = vand.u32 4294901760, %v21140_v18  ;;  %v21165_v28 = vsub.f32 %v1010_v48, %v21136_v9 }
 0x335   : > { %25421 = vst [vmem:[#allocation7_spill] sm:$0xff] %v21130_v4  ;;  %v21154_v22 = vsub.f32 %v965_v53, %v21130_v4  ;;  %25423 = vst [vmem:[#allocation6_spill] sm:$0xff] %v21156_v19  ;;  %v429_v53 = vld [vmem:[%s18637_s21 + $0x498] sm:$0xff]  ;;  %v5115_v40 = vsub.f32 %v21121_v23, %v25426_v56  ;;  %v21178_v48 = vsub.f32 %v962_v7, %v21156_v19 }
 0x336   : > { %17505 = vmatpush3.xpose.msra.mxu0 %v21049_v24  ;;  %17537 = vmatpush3.xpose.msra.mxu1 %v5088_v39  ;;  %v430_v39 = vld [vmem:[%s18637_s21 + $0x4a0] sm:$0xff]  ;;  %25424 = vst [vmem:[#allocation23_spill] sm:$0xff] %v21161_v35  ;;  %25425 = vst [vmem:[#allocation9_spill] sm:$0xff] %v21165_v28  ;;  %v5234_v56 = vsub.f32 %v21140_v18, %v24806_v14  ;;  %v413_v7 = vld [vmem:[%s18637_s21 + $0x418] sm:$0xff] }
 0x337   : > { %17506 = vmatprep.subr.mxu0 %v21066_v20  ;;  %17538 = vmatprep.subr.mxu1 %v5207_v15  ;;  %v5108_v15 = vsub.f32 %v21097_v0, %v24796_v11  ;;  %v1004_v41 = vsel %vm552_vm0, %v430_v39, 0  ;;  %v5221_v11 = vand.u32 4294901760, %v5220_v2  ;;  %v21172_v39 = vand.u32 4294901760, %v959_v25  ;;  %25428 = vst [vmem:[#allocation12_spill] sm:$0xff] %v21178_v48  ;;  %v412_v20 = vld [vmem:[%s18637_s21 + $0x410] sm:$0xff] }
 0x338   : > { %v21174_v43 = vand.u32 4294901760, %v1004_v41  ;;  %v5116_v14 = vand.u32 4294901760, %v5115_v40  ;;  %v953_v40 = vsel %vm552_vm0, %v413_v7, 0 }
 0x339   : > { %v5109_v8 = vand.u32 4294901760, %v5108_v15  ;;  %25427 = vst [vmem:[#allocation19_spill] sm:$0xff] %v21172_v39 }
 0x33a   : > { %17507 = vmatpush3.xpose.msra.mxu0 %v21074_v51  ;;  %17539 = vmatpush3.xpose.msra.mxu1 %v5095_v57  ;;  %v414_v57 = vld [vmem:[%s18637_s21 + $0x420] sm:$0xff] }
 0x33b   : > { %17508 = vmatprep.subr.mxu0 %v21076_v59  ;;  %17540 = vmatprep.subr.mxu1 %v5214_v34  ;;  %v5228_v34 = vand.u32 4294901760, %v5227_v50  ;;  %v956_v15 = vsel %vm552_vm0, %v414_v57, 0  ;;  %v21189_v50 = vsub.f32 %v1007_v6, %v21161_v35  ;;  %v428_v57 = vld [vmem:[%s18637_s21 + $0x490] sm:$0xff] }
 0x33c   : > { %v21195_v2 = vand.u32 4294901760, %v956_v15 }
 0x33d   : > { %25429 = vst [vmem:[#allocation15_spill] sm:$0xff] %v21189_v50 }
 0x33e   : > { %17509 = vmatpush3.xpose.msra.mxu0 %v21099_v31  ;;  %17541 = vmatpush3.xpose.msra.mxu1 %v5102_v54  ;;  %v1001_v31 = vsel %vm552_vm0, %v429_v53, 0  ;;  %v21193_v54 = vsub.f32 %v959_v25, %v21172_v39  ;;  %25431 = vst [vmem:[#allocation21_spill] sm:$0xff] %v21195_v2  ;;  %v25433_v53 = vand.u32 4294901760, %v21154_v22 }
 0x33f   : > { %17510 = vmatprep.subr.mxu0 %v21114_v26  ;;  %17542 = vmatprep.subr.mxu1 %v5221_v11  ;;  %v21199_v11 = vsub.f32 %v1004_v41, %v21174_v43  ;;  %v21206_v25 = vand.u32 4294901760, %v1001_v31  ;;  %v5235_v26 = vand.u32 4294901760, %v5234_v56  ;;  %v25435_v41 = vand.u32 4294901760, %v21165_v28  ;;  %v427_v56 = vld [vmem:[%s18637_s21 + $0x488] sm:$0xff] }
 0x340   : > { %25430 = vst [vmem:[#allocation11_spill] sm:$0xff] %v21193_v54  ;;  %v5122_v6 = vsub.f32 %v21154_v22, %v25433_v53  ;;  %v21217_v53 = vsub.f32 %v956_v15, %v21195_v2 }
 0x341   : > { %25432 = vst [vmem:[#allocation10_spill] sm:$0xff] %v21199_v11  ;;  %25434 = vst [vmem:[#allocation17_spill] sm:$0xff] %v21206_v25  ;;  %v5241_v51 = vsub.f32 %v21165_v28, %v25435_v41  ;;  %v21229_v15 = vsub.f32 %v1001_v31, %v21206_v25  ;;  %v25442_v28 = vand.u32 4294901760, %v21199_v11 }
 0x342   : > { %17511 = vmatpush3.xpose.msra.mxu0 %v21130_v4  ;;  %17543 = vmatpush3.xpose.msra.mxu1 %v5109_v8  ;;  %v998_v4 = vsel %vm552_vm0, %v428_v57, 0  ;;  %25436 = vst [vmem:[#allocation22_spill] sm:$0xff] %v21217_v53  ;;  %v5123_v41 = vand.u32 4294901760, %v5122_v6  ;;  %v25437_v8 = vand.u32 4294901760, %v21178_v48  ;;  %v21226_v57 = vand.u32 4294901760, %v953_v40 }
 0x343   : > { %17512 = vmatprep.subr.mxu0 %v21136_v9  ;;  %17544 = vmatprep.subr.mxu1 %v5228_v34  ;;  %25439 = vst [vmem:[#allocation18_spill] sm:$0xff] %v21229_v15  ;;  %v5242_v59 = vand.u32 4294901760, %v5241_v51  ;;  %v25440_v34 = vand.u32 4294901760, %v21189_v50  ;;  %v950_v6 = vsel %vm552_vm0, %v412_v20, 0  ;;  %v995_v9 = vsel %vm552_vm0, %v427_v56, 0 }
 0x344   : > { %v5129_v7 = vsub.f32 %v21178_v48, %v25437_v8  ;;  %25438 = vst [vmem:[#allocation13_spill] sm:$0xff] %v21226_v57  ;;  %v411_v8 = vld [vmem:[%s18637_s21 + $0x408] sm:$0xff]  ;;  %v25441_v48 = vand.u32 4294901760, %v21193_v54  ;;  %v21250_v20 = vsub.f32 %v953_v40, %v21226_v57  ;;  %v21252_v56 = vand.u32 4294901760, %v950_v6 }
 0x345   : > { %v947_v51 = vsel %vm552_vm0, %v411_v8, 0 }
 0x346   : > { %17513 = vmatpush3.xpose.msra.mxu0 %v21156_v19  ;;  %17545 = vmatpush3.xpose.msra.mxu1 %v5116_v14  ;;  %v5248_v19 = vsub.f32 %v21189_v50, %v25440_v34  ;;  %v21235_v14 = vand.u32 4294901760, %v998_v4  ;;  %v5136_v31 = vsub.f32 %v21193_v54, %v25441_v48  ;;  %v5130_v34 = vand.u32 4294901760, %v5129_v7  ;;  %v410_v7 = vld [vmem:[%s18637_s21 + $0x400] sm:$0xff] }
 0x347   : > { %17514 = vmatprep.subr.mxu0 %v21161_v35  ;;  %17546 = vmatprep.subr.mxu1 %v5235_v26  ;;  %v5255_v26 = vsub.f32 %v21199_v11, %v25442_v28  ;;  %v426_v35 = vld [vmem:[%s18637_s21 + $0x480] sm:$0xff]  ;;  %v21256_v28 = vand.u32 4294901760, %v995_v9  ;;  %v25443_v54 = vand.u32 4294901760, %v21217_v53  ;;  %v21274_v8 = vand.u32 4294901760, %v947_v51 }
 0x348   : > { %v5249_v48 = vand.u32 4294901760, %v5248_v19  ;;  %v21260_v11 = vsub.f32 %v998_v4, %v21235_v14  ;;  %v5137_v40 = vand.u32 4294901760, %v5136_v31  ;;  %v25444_v19 = vand.u32 4294901760, %v21229_v15 }
 0x349   : > { %v5143_v50 = vsub.f32 %v21217_v53, %v25443_v54 }
 0x34a   : > { %17515 = vmatpush3.xpose.msra.mxu0 %v21172_v39  ;;  %17547 = vmatpush3.xpose.msra.mxu1 %v5123_v41  ;;  %v992_v41 = vsel %vm552_vm0, %v426_v35, 0  ;;  %v5256_v39 = vand.u32 4294901760, %v5255_v26  ;;  %v5262_v4 = vsub.f32 %v21229_v15, %v25444_v19  ;;  %v24835_v35 = vand.u32 4294901760, %v21250_v20 }
 0x34b   : > { %17516 = vmatprep.subr.mxu0 %v21174_v43  ;;  %17548 = vmatprep.subr.mxu1 %v5242_v59  ;;  %v21269_v59 = vsub.f32 %v950_v6, %v21252_v56  ;;  %v21278_v31 = vand.u32 4294901760, %v992_v41  ;;  %v944_v26 = vsel %vm552_vm0, %v410_v7, 0  ;;  %v21283_v6 = vsub.f32 %v995_v9, %v21256_v28 }
 0x34c   : > { %v21287_v19 = vsub.f32 %v947_v51, %v21274_v8  ;;  %v5263_v9 = vand.u32 4294901760, %v5262_v4 }
 0x34d   : > { %v24838_v54 = vand.u32 4294901760, %v21269_v59  ;;  %v21301_v51 = vsub.f32 %v992_v41, %v21278_v31 }
 0x34e   : > { %17517 = vmatpush3.xpose.msra.mxu0 %v21195_v2  ;;  %17549 = vmatpush3.xpose.msra.mxu1 %v5130_v34  ;;  %v5144_v34 = vand.u32 4294901760, %v5143_v50  ;;  %25445 = vst [vmem:[#allocation20_spill] sm:$0xff] %v21287_v19  ;;  %v25446_v50 = vand.u32 4294901760, %v21260_v11  ;;  %v24842_v4 = vand.u32 4294901760, %v21287_v19 }
 0x34f   : > { %17518 = vmatprep.subr.mxu0 %v21206_v25  ;;  %17550 = vmatprep.subr.mxu1 %v5249_v48  ;;  %v5150_v48 = vsub.f32 %v21250_v20, %v24835_v35  ;;  %v21292_v25 = vand.u32 4294901760, %v944_v26 }
 0x350   : > { %v5269_v7 = vsub.f32 %v21260_v11, %v25446_v50 }
 0x351   : > { %v5151_v35 = vand.u32 4294901760, %v5150_v48  ;;  %v5164_v48 = vsub.f32 %v21287_v19, %v24842_v4  ;;  %v25459_v4 = vld [vmem:[#allocation10_spill] sm:$0xff] }
 0x352   : > { %17519 = vmatpush3.xpose.msra.mxu0 %v21226_v57  ;;  %17551 = vmatpush3.xpose.msra.mxu1 %v5137_v40  ;;  %v24839_v40 = vand.u32 4294901760, %v21283_v6  ;;  %v21305_v57 = vsub.f32 %v944_v26, %v21292_v25  ;;  %v5270_v50 = vand.u32 4294901760, %v5269_v7 }
 0x353   : > { %17520 = vmatprep.subr.mxu0 %v21235_v14  ;;  %17552 = vmatprep.subr.mxu1 %v5256_v39  ;;  %v5157_v39 = vsub.f32 %v21269_v59, %v24838_v54 }
 0x354   : > { %25447 = vst [vmem:[#allocation25_spill] sm:$0xff] %v21305_v57  ;;  %v5276_v41 = vsub.f32 %v21283_v6, %v24839_v40  ;;  %v24840_v54 = vand.u32 4294901760, %v21305_v57  ;;  %v5165_v40 = vand.u32 4294901760, %v5164_v48  ;;  %v25451_v48 = vld [vmem:[#allocation9_spill] sm:$0xff] }
 0x355   : > { %v5158_v26 = vand.u32 4294901760, %v5157_v39 }
 0x356   : > { %17521 = vmatpush3.xpose.msra.mxu0 %v21252_v56  ;;  %17553 = vmatpush3.xpose.msra.mxu1 %v5144_v34  ;;  %v24841_v34 = vand.u32 4294901760, %v21301_v51 }
 0x357   : > { %17522 = vmatprep.subr.mxu0 %v21256_v28  ;;  %17554 = vmatprep.subr.mxu1 %v5263_v9  ;;  %v5277_v9 = vand.u32 4294901760, %v5276_v41  ;;  %v25448_v41 = vld [vmem:[#allocation33_spill] sm:$0xff] }
 0x358   : > { %v5283_v7 = vsub.f32 %v21301_v51, %v24841_v34  ;;  %v25458_v34 = vld [vmem:[#allocation7_spill] sm:$0xff] }
 0x35a   : > { %17523 = vmatpush3.xpose.msra.mxu0 %v21274_v8  ;;  %17555 = vmatpush3.xpose.msra.mxu1 %v5151_v35  ;;  %v5171_v35 = vsub.f32 %v21305_v57, %v24840_v54  ;;  %v5284_v39 = vand.u32 4294901760, %v5283_v7  ;;  %v25453_v7 = vld [vmem:[#allocation12_spill] sm:$0xff]  ;;  %v25457_v54 = vld [vmem:[#allocation11_spill] sm:$0xff] }
 0x35b   : > { %17524 = vmatprep.subr.mxu0 %v21278_v31  ;;  %17556 = vmatprep.subr.mxu1 %v5270_v50 }
 0x35c   : > { %v5172_v50 = vand.u32 4294901760, %v5171_v35  ;;  %v25454_v35 = vld [vmem:[#allocation16_spill] sm:$0xff] }
 0x35e   : > { %17525 = vmatpush3.xpose.msra.mxu0 %v21292_v25  ;;  %17557 = vmatpush3.xpose.msra.mxu1 %v5158_v26  ;;  %v25450_v26 = vld [vmem:[#allocation29_spill] sm:$0xff] }
 0x35f   : > { %17558 = vmatprep.subr.mxu1 %v5277_v9  ;;  %17566 = vmatprep.subr.mxu0 %v20935_v52  ;;  %v25452_v9 = vld [vmem:[#allocation31_spill] sm:$0xff] }
 0x361   : > { %17527 = vmatmul.mubr.f32.vlgmr.msra.gmra.mxu0 %v25415_v60  ;;  %v25461_v60 = vld [vmem:[#allocation6_spill] sm:$0xff] }
 0x362   : > { %17559 = vmatpush3.xpose.msra.mxu1 %v5165_v40  ;;  %17567 = vmatpush3.xpose.msra.mxu0 %v20951_v58  ;;  %v25449_v40 = vld [vmem:[#allocation24_spill] sm:$0xff] }
 0x363   : > { %17560 = vmatprep.subr.mxu1 %v5284_v39  ;;  %17568 = vmatprep.subr.mxu0 %v20963_v47  ;;  %v25455_v39 = vld [vmem:[#allocation15_spill] sm:$0xff] }
 0x364   : > { %17528 = vmatprep.mubr.f32.mxu0 %v25448_v41 }
 0x365   : > { %17529 = vmatmul.mubr.f32.gmra.mxu0 %v25448_v41  ;;  %v25460_v41 = vld [vmem:[#allocation8_spill] sm:$0xff] }
 0x366   : > { %17561 = vmatpush3.xpose.msra.mxu1 %v5172_v50  ;;  %17569 = vmatpush3.xpose.msra.mxu0 %v20966_v1  ;;  %v25456_v50 = vld [vmem:[#allocation14_spill] sm:$0xff] }
 0x367   : > { %17570 = vmatprep.subr.mxu0 %v20980_v12  ;;  %17602 = vmatprep.subr.mxu1 %v20918_v36 }
 0x368   : > { %17598 = vmatprep.mubr.f32.mxu0 %v18864_v10 }
 0x369   : > { %17563 = vmatmul.mubr.f32.vlgmr.msra.gmra.mxu1 %v18630_v3 }
 0x36a   : > { %17571 = vmatpush3.xpose.msra.mxu0 %v20992_v17  ;;  %17603 = vmatpush3.xpose.msra.mxu1 %v20931_v42 }
 0x36b   : > { %17572 = vmatprep.subr.mxu0 %v21010_v44  ;;  %17604 = vmatprep.subr.mxu1 %v20942_v63 }
 0x36c   : > { %17564 = vmatprep.mubr.f32.mxu1 %v25414_v38 }
 0x36d   : > { %17565 = vmatmul.mubr.f32.gmra.mxu1 %v25414_v38  ;;  %v25462_v38 = vld [vmem:[#allocation23_spill] sm:$0xff] }
 0x36e   : > { %17573 = vmatpush3.xpose.msra.mxu0 %v21019_v13  ;;  %17605 = vmatpush3.xpose.msra.mxu1 %v20944_v5 }
 0x36f   : > { %17574 = vmatprep.subr.mxu0 %v21039_v49  ;;  %17606 = vmatprep.subr.mxu1 %v20953_v30 }
 0x370   : > { %17634 = vmatprep.mubr.f32.mxu1 %v18891_v33 }
 0x372   : > { %17575 = vmatpush3.xpose.msra.mxu0 %v21054_v27  ;;  %17607 = vmatpush3.xpose.msra.mxu1 %v20968_v29 }
 0x373   : > { %17576 = vmatprep.subr.mxu0 %v21059_v61  ;;  %17608 = vmatprep.subr.mxu1 %v20984_v21 }
 0x376   : > { %17577 = vmatpush3.xpose.msra.mxu0 %v21072_v37  ;;  %17609 = vmatpush3.xpose.msra.mxu1 %v20994_v45 }
 0x377   : > { %17578 = vmatprep.subr.mxu0 %v21091_v16  ;;  %17610 = vmatprep.subr.mxu1 %v21005_v32 }
 0x37a   : > { %17579 = vmatpush3.xpose.msra.mxu0 %v21097_v0  ;;  %17611 = vmatpush3.xpose.msra.mxu1 %v21028_v62 }
 0x37b   : > { %17580 = vmatprep.subr.mxu0 %v21104_v46  ;;  %17612 = vmatprep.subr.mxu1 %v21030_v55 }
 0x37e   : > { %17581 = vmatpush3.xpose.msra.mxu0 %v21121_v23  ;;  %17613 = vmatpush3.xpose.msra.mxu1 %v21049_v24 }
 0x37f   : > { %17582 = vmatprep.subr.mxu0 %v21140_v18  ;;  %17614 = vmatprep.subr.mxu1 %v25449_v40 }
 0x382   : > { %17583 = vmatpush3.xpose.msra.mxu0 %v21154_v22  ;;  %17615 = vmatpush3.xpose.msra.mxu1 %v25450_v26 }
 0x383   : > { %17584 = vmatprep.subr.mxu0 %v25451_v48  ;;  %17616 = vmatprep.subr.mxu1 %v25452_v9 }
 0x386   : > { %17585 = vmatpush3.xpose.msra.mxu0 %v25453_v7  ;;  %17617 = vmatpush3.xpose.msra.mxu1 %v25454_v35 }
 0x387   : > { %17586 = vmatprep.subr.mxu0 %v25455_v39  ;;  %17618 = vmatprep.subr.mxu1 %v25456_v50  ;;  %v25463_v39 = vld [vmem:[#allocation19_spill] sm:$0xff] }
 0x38a   : > { %17587 = vmatpush3.xpose.msra.mxu0 %v25457_v54  ;;  %17619 = vmatpush3.xpose.msra.mxu1 %v25458_v34 }
 0x38b   : > { %17588 = vmatprep.subr.mxu0 %v25459_v4  ;;  %17620 = vmatprep.subr.mxu1 %v25460_v41 }
 0x38e   : > { %17589 = vmatpush3.xpose.msra.mxu0 %v21217_v53  ;;  %17621 = vmatpush3.xpose.msra.mxu1 %v25461_v60  ;;  %v25464_v53 = vld [vmem:[#allocation17_spill] sm:$0xff] }
 0x38f   : > { %17590 = vmatprep.subr.mxu0 %v21229_v15  ;;  %17622 = vmatprep.subr.mxu1 %v25462_v38  ;;  %v25465_v15 = vld [vmem:[#allocation13_spill] sm:$0xff] }
 0x392   : > { %17591 = vmatpush3.xpose.msra.mxu0 %v21250_v20  ;;  %17623 = vmatpush3.xpose.msra.mxu1 %v25463_v39 }
 0x393   : > { %17592 = vmatprep.subr.mxu0 %v21260_v11  ;;  %17624 = vmatprep.subr.mxu1 %v21174_v43 }
 0x396   : > { %17593 = vmatpush3.xpose.msra.mxu0 %v21269_v59  ;;  %17625 = vmatpush3.xpose.msra.mxu1 %v21195_v2  ;;  %v25466_v2 = vand.u32 4294901760, %v20935_v52  ;;  %v25470_v52 = vand.u32 4294901760, %v20966_v1  ;;  %v25476_v1 = vand.u32 4294901760, %v21039_v49  ;;  %v473_v49 = vld [vmem:[%s18637_s21 + $0x5f8] sm:$0xff] }
 0x397   : > { %17594 = vmatprep.subr.mxu0 %v21283_v6  ;;  %17626 = vmatprep.subr.mxu1 %v25464_v53 }
 0x39a   : > { %17595 = vmatpush3.xpose.msra.mxu0 %v21287_v19  ;;  %17627 = vmatpush3.xpose.msra.mxu1 %v25465_v15  ;;  %v25467_v19 = vand.u32 4294901760, %v20951_v58  ;;  %v25468_v15 = vld [vmem:[#allocation30_spill] sm:$0xff]  ;;  %v25472_v58 = vand.u32 4294901760, %v20992_v17  ;;  %v25484_v17 = vand.u32 4294901760, %v21140_v18  ;;  %v25488_v18 = vld [vmem:[#allocation15_spill] sm:$0xff] }
 0x39b   : > { %17596 = vmatprep.subr.mxu0 %v21301_v51  ;;  %17628 = vmatprep.subr.mxu1 %v21235_v14 }
 0x39e   : > { %17597 = vmatpush3.xpose.msra.mxu0 %v21305_v57  ;;  %17629 = vmatpush3.xpose.msra.mxu1 %v21252_v56  ;;  %v25469_v57 = vand.u32 4294901760, %v20963_v47  ;;  %v25473_v47 = vld [vmem:[#allocation32_spill] sm:$0xff] }
 0x39f   : > { %17630 = vmatprep.subr.mxu1 %v21256_v28  ;;  %17638 = vmatprep.subr.mxu0 %v25466_v2  ;;  %v25471_v2 = vand.u32 4294901760, %v20980_v12  ;;  %v25479_v12 = vand.u32 4294901760, %v21072_v37  ;;  %v1133_v37 = vsel %vm552_vm0, %v473_v49, 0 }
 0x3a1   : > { %17599 = vmatmul.mubr.f32.vlgmr.msra.gmra.mxu0 %v18864_v10 }
 0x3a2   : > { %17631 = vmatpush3.xpose.msra.mxu1 %v21274_v8  ;;  %17639 = vmatpush3.xpose.msra.mxu0 %v25467_v19  ;;  %v471_v19 = vld [vmem:[%s18637_s21 + $0x5e8] sm:$0xff] }
 0x3a3   : > { %17600 = vmatprep.mubr.f32.mxu0 %v25468_v15  ;;  %17632 = vmatprep.subr.mxu1 %v21278_v31 }
 0x3a4   : > { %17640 = vmatprep.subr.mxu0 %v25469_v57  ;;  %v25474_v57 = vand.u32 4294901760, %v21010_v44  ;;  %v25487_v44 = vand.u32 4294901760, %v25453_v7  ;;  %v470_v7 = vld [vmem:[%s18637_s21 + $0x5e0] sm:$0xff] }
 0x3a5   : > { %17601 = vmatmul.mubr.f32.gmra.mxu0 %v25468_v15 }
 0x3a6   : > { %17633 = vmatpush3.xpose.msra.mxu1 %v21292_v25  ;;  %17641 = vmatpush3.xpose.msra.mxu0 %v25470_v52 }
 0x3a7   : > { %17642 = vmatprep.subr.mxu0 %v25471_v2  ;;  %17674 = vmatprep.subr.mxu1 %v20918_v36  ;;  %v25475_v36 = vand.u32 4294901760, %v21019_v13  ;;  %v25489_v13 = vand.u32 4294901760, %v25488_v18 }
 0x3a8   : > { %17670 = vmatprep.mubr.f32.mxu0 %v18630_v3 }
 0x3a9   : > { %17635 = vmatmul.mubr.f32.vlgmr.msra.gmra.mxu1 %v18891_v33 }
 0x3aa   : > { %17643 = vmatpush3.xpose.msra.mxu0 %v25472_v58  ;;  %17675 = vmatpush3.xpose.msra.mxu1 %v20931_v42  ;;  %v25477_v42 = vand.u32 4294901760, %v21054_v27  ;;  %v25494_v27 = vld [vmem:[#allocation18_spill] sm:$0xff]  ;;  %v25504_v58 = vand.u32 4294901760, %v21301_v51 }
 0x3ab   : > { %17636 = vmatprep.mubr.f32.mxu1 %v25473_v47  ;;  %17644 = vmatprep.subr.mxu0 %v25474_v57  ;;  %v454_v57 = vld [vmem:[%s18637_s21 + $0x560] sm:$0xff] }
 0x3ac   : > { %17676 = vmatprep.subr.mxu1 %v20942_v63  ;;  %v25478_v63 = vand.u32 4294901760, %v21059_v61  ;;  %v25495_v61 = vand.u32 4294901760, %v25494_v27 }
 0x3ad   : > { %17637 = vmatmul.mubr.f32.gmra.mxu1 %v25473_v47 }
 0x3ae   : > { %17645 = vmatpush3.xpose.msra.mxu0 %v25475_v36  ;;  %17677 = vmatpush3.xpose.msra.mxu1 %v20944_v5  ;;  %v25480_v5 = vand.u32 4294901760, %v21091_v16  ;;  %v457_v16 = vld [vmem:[%s18637_s21 + $0x578] sm:$0xff]  ;;  %v1124_v36 = vsel %vm552_vm0, %v470_v7, 0  ;;  %v25508_v7 = vld [vmem:[#allocation27_spill] sm:$0xff] }
 0x3af   : > { %17646 = vmatprep.subr.mxu0 %v25476_v1  ;;  %17678 = vmatprep.subr.mxu1 %v20953_v30  ;;  %v25481_v30 = vand.u32 4294901760, %v21097_v0  ;;  %v25496_v0 = vand.u32 4294901760, %v21250_v20  ;;  %v25498_v20 = vand.u32 4294901760, %v21269_v59 }
 0x3b0   : > { %17706 = vmatprep.mubr.f32.mxu1 %v18630_v3 }
 0x3b2   : > { %17647 = vmatpush3.xpose.msra.mxu0 %v25477_v42  ;;  %17679 = vmatpush3.xpose.msra.mxu1 %v20968_v29  ;;  %v25482_v29 = vand.u32 4294901760, %v21104_v46  ;;  %v21486_v46 = vand.u32 4294901760, %v1133_v37 }
 0x3b3   : > { %17648 = vmatprep.subr.mxu0 %v25478_v63  ;;  %17680 = vmatprep.subr.mxu1 %v20984_v21  ;;  %v25483_v21 = vand.u32 4294901760, %v21121_v23 }
 0x3b6   : > { %17649 = vmatpush3.xpose.msra.mxu0 %v25479_v12  ;;  %17681 = vmatpush3.xpose.msra.mxu1 %v20994_v45  ;;  %v25485_v45 = vand.u32 4294901760, %v21154_v22  ;;  %v472_v22 = vld [vmem:[%s18637_s21 + $0x5f0] sm:$0xff]  ;;  %v469_v12 = vld [vmem:[%s18637_s21 + $0x5d8] sm:$0xff] }
 0x3b7   : > { %17650 = vmatprep.subr.mxu0 %v25480_v5  ;;  %17682 = vmatprep.subr.mxu1 %v21005_v32  ;;  %v25486_v32 = vand.u32 4294901760, %v25451_v48  ;;  %v455_v48 = vld [vmem:[%s18637_s21 + $0x568] sm:$0xff]  ;;  %v25505_v5 = vld [vmem:[#allocation25_spill] sm:$0xff] }
 0x3b8   : > { %v1079_v2 = vsel %vm552_vm0, %v455_v48, 0 }
 0x3b9   : > { %v21536_v63 = vand.u32 4294901760, %v1079_v2 }
 0x3ba   : > { %17651 = vmatpush3.xpose.msra.mxu0 %v25481_v30  ;;  %17683 = vmatpush3.xpose.msra.mxu1 %v21028_v62  ;;  %v25490_v62 = vand.u32 4294901760, %v25457_v54  ;;  %v25497_v54 = vand.u32 4294901760, %v21260_v11  ;;  %v21503_v11 = vsub.f32 %v1133_v37, %v21486_v46  ;;  %v25506_v30 = vand.u32 4294901760, %v25505_v5  ;;  %v452_v37 = vld [vmem:[%s18637_s21 + $0x550] sm:$0xff] }
 0x3bb   : > { %17652 = vmatprep.subr.mxu0 %v25482_v29  ;;  %17684 = vmatprep.subr.mxu1 %v21030_v55  ;;  %v25491_v55 = vand.u32 4294901760, %v25459_v4  ;;  %v1130_v4 = vsel %vm552_vm0, %v472_v22, 0  ;;  %v1076_v29 = vsel %vm552_vm0, %v454_v57, 0  ;;  %v21560_v18 = vsub.f32 %v1079_v2, %v21536_v63 }
 0x3bc   : > { %v21510_v59 = vand.u32 4294901760, %v1130_v4 }
 0x3bd   : > { %v24857_v22 = vand.u32 4294901760, %v21560_v18 }
 0x3be   : > { %17653 = vmatpush3.xpose.msra.mxu0 %v25483_v21  ;;  %17685 = vmatpush3.xpose.msra.mxu1 %v21049_v24  ;;  %v25492_v24 = vld [vmem:[#allocation22_spill] sm:$0xff]  ;;  %v21531_v1 = vsub.f32 %v1130_v4, %v21510_v59  ;;  %v1070_v4 = vsel %vm552_vm0, %v452_v37, 0 }
 0x3bf   : > { %17654 = vmatprep.subr.mxu0 %v25484_v17  ;;  %17686 = vmatprep.subr.mxu1 %v25449_v40  ;;  %v25493_v23 = vand.u32 4294901760, %v25492_v24  ;;  %v21552_v17 = vand.u32 4294901760, %v1124_v36  ;;  %v25507_v24 = vld [vmem:[#allocation28_spill] sm:$0xff] }
 0x3c2   : > { %17655 = vmatpush3.xpose.msra.mxu0 %v25485_v45  ;;  %17687 = vmatpush3.xpose.msra.mxu1 %v25450_v26  ;;  %v1127_v26 = vsel %vm552_vm0, %v471_v19, 0  ;;  %v24861_v45 = vand.u32 4294901760, %v21531_v1 }
 0x3c3   : > { %17656 = vmatprep.subr.mxu0 %v25486_v32  ;;  %17688 = vmatprep.subr.mxu1 %v25452_v9  ;;  %v21521_v52 = vand.u32 4294901760, %v1127_v26  ;;  %v453_v32 = vld [vmem:[%s18637_s21 + $0x558] sm:$0xff] }
 0x3c4   : > { %v1073_v27 = vsel %vm552_vm0, %v453_v32, 0 }
 0x3c5   : > { %v21548_v21 = vsub.f32 %v1127_v26, %v21521_v52 }
 0x3c6   : > { %17657 = vmatpush3.xpose.msra.mxu0 %v25487_v44  ;;  %17689 = vmatpush3.xpose.msra.mxu1 %v25454_v35  ;;  %v25501_v35 = vld [vmem:[#allocation20_spill] sm:$0xff] }
 0x3c7   : > { %17658 = vmatprep.subr.mxu0 %v25489_v13  ;;  %17690 = vmatprep.subr.mxu1 %v25456_v50  ;;  %v25503_v50 = vld [vmem:[#allocation13_spill] sm:$0xff]  ;;  %v468_v44 = vld [vmem:[%s18637_s21 + $0x5d0] sm:$0xff]  ;;  %v21562_v13 = vand.u32 4294901760, %v1076_v29  ;;  %v24858_v49 = vand.u32 4294901760, %v21548_v21 }
 0x3ca   : > { %17659 = vmatpush3.xpose.msra.mxu0 %v25490_v62  ;;  %17691 = vmatpush3.xpose.msra.mxu1 %v25458_v34  ;;  %v25499_v34 = vld [vmem:[#allocation21_spill] sm:$0xff] }
 0x3cb   : > { %17660 = vmatprep.subr.mxu0 %v25491_v55  ;;  %17692 = vmatprep.subr.mxu1 %v25460_v41 }
 0x3ce   : > { %17661 = vmatpush3.xpose.msra.mxu0 %v25493_v23  ;;  %17693 = vmatpush3.xpose.msra.mxu1 %v25461_v60  ;;  %v456_v60 = vld [vmem:[%s18637_s21 + $0x570] sm:$0xff] }
 0x3cf   : > { %17662 = vmatprep.subr.mxu0 %v25495_v61  ;;  %17694 = vmatprep.subr.mxu1 %v25462_v38  ;;  %v1085_v38 = vsel %vm552_vm0, %v457_v16, 0  ;;  %v1082_v40 = vsel %vm552_vm0, %v456_v60, 0  ;;  %v21578_v61 = vsub.f32 %v1124_v36, %v21552_v17  ;;  %v6089_v16 = vsub.f32 %v21531_v1, %v24861_v45 }
 0x3d0   : > { %v21499_v41 = vand.u32 4294901760, %v1085_v38  ;;  %v21512_v9 = vand.u32 4294901760, %v1082_v40  ;;  %v21596_v60 = vand.u32 4294901760, %v1073_v27 }
 0x3d1   : > { %v6090_v26 = vand.u32 4294901760, %v6089_v16 }
 0x3d2   : > { %17663 = vmatpush3.xpose.msra.mxu0 %v25496_v0  ;;  %17695 = vmatpush3.xpose.msra.mxu1 %v25463_v39  ;;  %v25502_v39 = vand.u32 4294901760, %v25501_v35  ;;  %v21534_v42 = vsub.f32 %v1082_v40, %v21512_v9  ;;  %v451_v40 = vld [vmem:[%s18637_s21 + $0x548] sm:$0xff] }
 0x3d3   : > { %17664 = vmatprep.subr.mxu0 %v25497_v54  ;;  %17696 = vmatprep.subr.mxu1 %v21174_v43  ;;  %v25500_v43 = vand.u32 4294901760, %v21283_v6  ;;  %v21519_v6 = vsub.f32 %v1085_v38, %v21499_v41  ;;  %v467_v54 = vld [vmem:[%s18637_s21 + $0x5c8] sm:$0xff]  ;;  %v1067_v57 = vsel %vm552_vm0, %v451_v40, 0  ;;  %v449_v40 = vld [vmem:[%s18637_s21 + $0x538] sm:$0xff] }
 0x3d4   : > { %v1115_v48 = vsel %vm552_vm0, %v467_v54, 0 }
 0x3d5   : > { %v24863_v51 = vand.u32 4294901760, %v21519_v6 }
 0x3d6   : > { %17665 = vmatpush3.xpose.msra.mxu0 %v25498_v20  ;;  %17697 = vmatpush3.xpose.msra.mxu1 %v25499_v34  ;;  %v6096_v20 = vsub.f32 %v21548_v21, %v24858_v49  ;;  %v24855_v34 = vand.u32 4294901760, %v21578_v61 }
 0x3d7   : > { %17666 = vmatprep.subr.mxu0 %v25500_v43  ;;  %17698 = vmatprep.subr.mxu1 %v25464_v53  ;;  %v24865_v53 = vand.u32 4294901760, %v21503_v11  ;;  %v5970_v55 = vsub.f32 %v21519_v6, %v24863_v51  ;;  %v466_v43 = vld [vmem:[%s18637_s21 + $0x5c0] sm:$0xff] }
 0x3d8   : > { %v1112_v36 = vsel %vm552_vm0, %v466_v43, 0  ;;  %v6097_v5 = vand.u32 4294901760, %v6096_v20 }
 0x3d9   : > { %v5971_v38 = vand.u32 4294901760, %v5970_v55  ;;  %v21644_v55 = vand.u32 4294901760, %v1112_v36 }
 0x3da   : > { %17667 = vmatpush3.xpose.msra.mxu0 %v25502_v39  ;;  %17699 = vmatpush3.xpose.msra.mxu1 %v25503_v50  ;;  %v5984_v39 = vsub.f32 %v21560_v18, %v24857_v22  ;;  %v21617_v50 = vand.u32 4294901760, %v1070_v4 }
 0x3db   : > { %17668 = vmatprep.subr.mxu0 %v25504_v58  ;;  %17700 = vmatprep.subr.mxu1 %v21235_v14  ;;  %v6082_v14 = vsub.f32 %v21503_v11, %v24865_v53  ;;  %v21622_v58 = vsub.f32 %v1073_v27, %v21596_v60  ;;  %25511 = vst [vmem:[#allocation29_spill] sm:$0xff] %v21644_v55  ;;  %v465_v27 = vld [vmem:[%s18637_s21 + $0x5b8] sm:$0xff] }
 0x3dc   : > { %v5985_v32 = vand.u32 4294901760, %v5984_v39  ;;  %v1109_v20 = vsel %vm552_vm0, %v465_v27, 0  ;;  %v464_v39 = vld [vmem:[%s18637_s21 + $0x5b0] sm:$0xff] }
 0x3dd   : > { %v6083_v62 = vand.u32 4294901760, %v6082_v14  ;;  %v21634_v14 = vand.u32 4294901760, %v1115_v48  ;;  %v24854_v37 = vand.u32 4294901760, %v21622_v58  ;;  %v21682_v27 = vand.u32 4294901760, %v1109_v20 }
 0x3de   : > { %17669 = vmatpush3.xpose.msra.mxu0 %v25506_v30  ;;  %17701 = vmatpush3.xpose.msra.mxu1 %v21252_v56  ;;  %v1121_v56 = vsel %vm552_vm0, %v469_v12, 0  ;;  %v6103_v30 = vsub.f32 %v21578_v61, %v24855_v34 }
 0x3df   : > { %17702 = vmatprep.subr.mxu1 %v21256_v28  ;;  %17710 = vmatprep.subr.mxu0 %v21486_v46  ;;  %v24859_v28 = vand.u32 4294901760, %v21534_v42  ;;  %v21573_v23 = vand.u32 4294901760, %v1121_v56  ;;  %25509 = vst [vmem:[#allocation26_spill] sm:$0xff] %v21634_v14  ;;  %25513 = vst [vmem:[#allocation31_spill] sm:$0xff] %v21682_v27  ;;  %v21708_v49 = vsub.f32 %v1109_v20, %v21682_v27 }
 0x3e0   : > { %v6104_v54 = vand.u32 4294901760, %v6103_v30  ;;  %v5998_v30 = vsub.f32 %v21622_v58, %v24854_v37  ;;  %v463_v37 = vld [vmem:[%s18637_s21 + $0x5a8] sm:$0xff] }
 0x3e1   : > { %17671 = vmatmul.mubr.f32.vlgmr.msra.gmra.mxu0 %v18630_v3  ;;  %v5977_v0 = vsub.f32 %v21534_v42, %v24859_v28  ;;  %v447_v28 = vld [vmem:[%s18637_s21 + $0x528] sm:$0xff] }
 0x3e2   : > { %17703 = vmatpush3.xpose.msra.mxu1 %v21274_v8  ;;  %17711 = vmatpush3.xpose.msra.mxu0 %v21499_v41  ;;  %v1118_v8 = vsel %vm552_vm0, %v468_v44, 0  ;;  %v21640_v44 = vsub.f32 %v1070_v4, %v21617_v50  ;;  %v21659_v4 = vsub.f32 %v1115_v48, %v21634_v14 }
 0x3e3   : > { %17672 = vmatprep.mubr.f32.mxu0 %v25507_v24  ;;  %17704 = vmatprep.subr.mxu1 %v21278_v31  ;;  %v21587_v31 = vsub.f32 %v1076_v29, %v21562_v13  ;;  %v21598_v19 = vand.u32 4294901760, %v1118_v8  ;;  %v5978_v35 = vand.u32 4294901760, %v5977_v0 }
 0x3e4   : > { %17712 = vmatprep.subr.mxu0 %v21510_v59 }
 0x3e5   : > { %17673 = vmatmul.mubr.f32.gmra.mxu0 %v25507_v24  ;;  %v24852_v2 = vand.u32 4294901760, %v21587_v31  ;;  %v21627_v12 = vsub.f32 %v1118_v8, %v21598_v19 }
 0x3e6   : > { %17705 = vmatpush3.xpose.msra.mxu1 %v21292_v25  ;;  %17713 = vmatpush3.xpose.msra.mxu0 %v21512_v9  ;;  %v21607_v25 = vsub.f32 %v1121_v56, %v21573_v23  ;;  %v450_v56 = vld [vmem:[%s18637_s21 + $0x540] sm:$0xff] }
 0x3e7   : > { %17714 = vmatprep.subr.mxu0 %v21521_v52  ;;  %17746 = vmatprep.subr.mxu1 %v6083_v62  ;;  %v21642_v62 = vand.u32 4294901760, %v1067_v57  ;;  %v5991_v8 = vsub.f32 %v21587_v31, %v24852_v2  ;;  %v24853_v16 = vand.u32 4294901760, %v21627_v12  ;;  %v1064_v0 = vsel %vm552_vm0, %v450_v56, 0 }
 0x3e8   : > { %17742 = vmatprep.mubr.f32.mxu0 %v25508_v7  ;;  %v24851_v29 = vand.u32 4294901760, %v21607_v25 }
 0x3e9   : > { %17707 = vmatmul.mubr.f32.vlgmr.msra.gmra.mxu1 %v18630_v3  ;;  %25510 = vst [vmem:[#allocation24_spill] sm:$0xff] %v21642_v62  ;;  %v21665_v43 = vsub.f32 %v1067_v57, %v21642_v62  ;;  %v5992_v48 = vand.u32 4294901760, %v5991_v8  ;;  %v6117_v57 = vsub.f32 %v21627_v12, %v24853_v16  ;;  %v1106_v8 = vsel %vm552_vm0, %v464_v39, 0 }
 0x3ea   : > { %17715 = vmatpush3.xpose.msra.mxu0 %v21536_v63  ;;  %17747 = vmatpush3.xpose.msra.mxu1 %v5971_v38  ;;  %v6110_v38 = vsub.f32 %v21607_v25, %v24851_v29  ;;  %v448_v29 = vld [vmem:[%s18637_s21 + $0x530] sm:$0xff] }
 0x3eb   : > { %17708 = vmatprep.mubr.f32.mxu1 %v25507_v24  ;;  %17716 = vmatprep.subr.mxu0 %v21552_v17  ;;  %v6118_v39 = vand.u32 4294901760, %v6117_v57  ;;  %v1058_v22 = vsel %vm552_vm0, %v448_v29, 0 }
 0x3ec   : > { %17748 = vmatprep.subr.mxu1 %v6090_v26  ;;  %v21667_v26 = vand.u32 4294901760, %v1064_v0  ;;  %v6111_v56 = vand.u32 4294901760, %v6110_v38 }
 0x3ed   : > { %17709 = vmatmul.mubr.f32.gmra.mxu1 %v25507_v24 }
 0x3ee   : > { %17717 = vmatpush3.xpose.msra.mxu0 %v21562_v13  ;;  %17749 = vmatpush3.xpose.msra.mxu1 %v5978_v35  ;;  %25512 = vst [vmem:[#allocation9_spill] sm:$0xff] %v21667_v26  ;;  %v24856_v35 = vand.u32 4294901760, %v21640_v44  ;;  %v21689_v2 = vsub.f32 %v1064_v0, %v21667_v26 }
 0x3ef   : > { %17718 = vmatprep.subr.mxu0 %v21573_v23  ;;  %17750 = vmatprep.subr.mxu1 %v6097_v5  ;;  %v21672_v5 = vsub.f32 %v1112_v36, %v21644_v55  ;;  %v24860_v36 = vand.u32 4294901760, %v21659_v4 }
 0x3f0   : > { %17778 = vmatprep.mubr.f32.mxu1 %v18630_v3  ;;  %v6005_v16 = vsub.f32 %v21640_v44, %v24856_v35  ;;  %v21704_v35 = vand.u32 4294901760, %v1106_v8  ;;  %v25519_v47 = vand.u32 4294901760, %v21689_v2 }
 0x3f1   : > { %v24864_v38 = vand.u32 4294901760, %v21672_v5  ;;  %v6124_v0 = vsub.f32 %v21659_v4, %v24860_v36 }
 0x3f2   : > { %17719 = vmatpush3.xpose.msra.mxu0 %v21596_v60  ;;  %17751 = vmatpush3.xpose.msra.mxu1 %v5985_v32  ;;  %v1061_v32 = vsel %vm552_vm0, %v449_v40, 0  ;;  %v5999_v40 = vand.u32 4294901760, %v5998_v30  ;;  %25515 = vst [vmem:[#allocation16_spill] sm:$0xff] %v21704_v35  ;;  %v1103_v30 = vsel %vm552_vm0, %v463_v37, 0  ;;  %v6006_v57 = vand.u32 4294901760, %v6005_v16 }
 0x3f3   : > { %17720 = vmatprep.subr.mxu0 %v21598_v19  ;;  %17752 = vmatprep.subr.mxu1 %v6104_v54  ;;  %v24862_v54 = vand.u32 4294901760, %v21665_v43  ;;  %v21698_v34 = vand.u32 4294901760, %v1061_v32  ;;  %v6131_v36 = vsub.f32 %v21672_v5, %v24864_v38  ;;  %v21724_v37 = vand.u32 4294901760, %v1058_v22 }
 0x3f4   : > { %v1055_v16 = vsel %vm552_vm0, %v447_v28, 0  ;;  %v21729_v51 = vand.u32 4294901760, %v1103_v30  ;;  %v24872_v38 = vand.u32 4294901760, %v21708_v49  ;;  %v21733_v53 = vsub.f32 %v1106_v8, %v21704_v35 }
 0x3f5   : > { %25514 = vst [vmem:[#allocation12_spill] sm:$0xff] %v21698_v34  ;;  %v21722_v20 = vsub.f32 %v1061_v32, %v21698_v34  ;;  %25516 = vst [vmem:[#allocation14_spill] sm:$0xff] %v21724_v37  ;;  %v461_v32 = vld [vmem:[%s18637_s21 + $0x598] sm:$0xff]  ;;  %v6019_v28 = vsub.f32 %v21689_v2, %v25519_v47  ;;  %v21746_v8 = vsub.f32 %v1058_v22, %v21724_v37 }
 0x3f6   : > { %17721 = vmatpush3.xpose.msra.mxu0 %v21617_v50  ;;  %17753 = vmatpush3.xpose.msra.mxu1 %v5992_v48  ;;  %v462_v48 = vld [vmem:[%s18637_s21 + $0x5a0] sm:$0xff]  ;;  %25517 = vst [vmem:[#allocation11_spill] sm:$0xff] %v21729_v51  ;;  %25518 = vst [vmem:[#allocation7_spill] sm:$0xff] %v21733_v53  ;;  %v6138_v47 = vsub.f32 %v21708_v49, %v24872_v38  ;;  %v445_v22 = vld [vmem:[%s18637_s21 + $0x518] sm:$0xff] }
 0x3f7   : > { %17722 = vmatprep.subr.mxu0 %v21634_v14  ;;  %17754 = vmatprep.subr.mxu1 %v6111_v56  ;;  %v6012_v56 = vsub.f32 %v21665_v43, %v24862_v54  ;;  %v1100_v45 = vsel %vm552_vm0, %v462_v48, 0  ;;  %v6125_v54 = vand.u32 4294901760, %v6124_v0  ;;  %v21740_v48 = vand.u32 4294901760, %v1055_v16  ;;  %25521 = vst [vmem:[#allocation8_spill] sm:$0xff] %v21746_v8  ;;  %v444_v14 = vld [vmem:[%s18637_s21 + $0x510] sm:$0xff] }
 0x3f8   : > { %v21742_v15 = vand.u32 4294901760, %v1100_v45  ;;  %v6020_v38 = vand.u32 4294901760, %v6019_v28  ;;  %v1049_v28 = vsel %vm552_vm0, %v445_v22, 0 }
 0x3f9   : > { %v6013_v29 = vand.u32 4294901760, %v6012_v56  ;;  %25520 = vst [vmem:[#allocation10_spill] sm:$0xff] %v21740_v48 }
 0x3fa   : > { %17723 = vmatpush3.xpose.msra.mxu0 %v21642_v62  ;;  %17755 = vmatpush3.xpose.msra.mxu1 %v5999_v40  ;;  %v446_v40 = vld [vmem:[%s18637_s21 + $0x520] sm:$0xff] }
 0x3fb   : > { %17724 = vmatprep.subr.mxu0 %v21644_v55  ;;  %17756 = vmatprep.subr.mxu1 %v6118_v39  ;;  %v6132_v39 = vand.u32 4294901760, %v6131_v36  ;;  %v1052_v56 = vsel %vm552_vm0, %v446_v40, 0  ;;  %v21757_v36 = vsub.f32 %v1103_v30, %v21729_v51  ;;  %v460_v40 = vld [vmem:[%s18637_s21 + $0x590] sm:$0xff] }
 0x3fc   : > { %v21763_v0 = vand.u32 4294901760, %v1052_v56 }
 0x3fd   : > { %25522 = vst [vmem:[#allocation6_spill] sm:$0xff] %v21757_v36 }
 0x3fe   : > { %17725 = vmatpush3.xpose.msra.mxu0 %v21667_v26  ;;  %17757 = vmatpush3.xpose.msra.mxu1 %v6006_v57  ;;  %v1097_v26 = vsel %vm552_vm0, %v461_v32, 0  ;;  %v21761_v57 = vsub.f32 %v1055_v16, %v21740_v48  ;;  %25524 = vst [vmem:[#allocation19_spill] sm:$0xff] %v21763_v0  ;;  %v25526_v32 = vand.u32 4294901760, %v21722_v20 }
 0x3ff   : > { %17726 = vmatprep.subr.mxu0 %v21682_v27  ;;  %17758 = vmatprep.subr.mxu1 %v6125_v54  ;;  %v21767_v54 = vsub.f32 %v1100_v45, %v21742_v15  ;;  %v21774_v16 = vand.u32 4294901760, %v1097_v26  ;;  %v6139_v27 = vand.u32 4294901760, %v6138_v47  ;;  %v25528_v45 = vand.u32 4294901760, %v21733_v53  ;;  %v459_v47 = vld [vmem:[%s18637_s21 + $0x588] sm:$0xff] }
 0x400   : > { %25523 = vst [vmem:[#allocation23_spill] sm:$0xff] %v21761_v57  ;;  %v6026_v30 = vsub.f32 %v21722_v20, %v25526_v32  ;;  %v21785_v32 = vsub.f32 %v1052_v56, %v21763_v0 }
 0x401   : > { %25525 = vst [vmem:[#allocation17_spill] sm:$0xff] %v21767_v54  ;;  %25527 = vst [vmem:[#allocation15_spill] sm:$0xff] %v21774_v16  ;;  %v6145_v62 = vsub.f32 %v21733_v53, %v25528_v45  ;;  %v21797_v56 = vsub.f32 %v1097_v26, %v21774_v16  ;;  %v25535_v53 = vand.u32 4294901760, %v21767_v54 }
 0x402   : > { %17727 = vmatpush3.xpose.msra.mxu0 %v21698_v34  ;;  %17759 = vmatpush3.xpose.msra.mxu1 %v6013_v29  ;;  %v1094_v34 = vsel %vm552_vm0, %v460_v40, 0  ;;  %25529 = vst [vmem:[#allocation22_spill] sm:$0xff] %v21785_v32  ;;  %v6027_v45 = vand.u32 4294901760, %v6026_v30  ;;  %v25530_v29 = vand.u32 4294901760, %v21746_v8  ;;  %v21794_v40 = vand.u32 4294901760, %v1049_v28 }
 0x403   : > { %17728 = vmatprep.subr.mxu0 %v21704_v35  ;;  %17760 = vmatprep.subr.mxu1 %v6132_v39  ;;  %25532 = vst [vmem:[#allocation21_spill] sm:$0xff] %v21797_v56  ;;  %v6146_v55 = vand.u32 4294901760, %v6145_v62  ;;  %v25533_v39 = vand.u32 4294901760, %v21757_v36  ;;  %v1046_v30 = vsel %vm552_vm0, %v444_v14, 0  ;;  %v1091_v35 = vsel %vm552_vm0, %v459_v47, 0 }
 0x404   : > { %v6033_v22 = vsub.f32 %v21746_v8, %v25530_v29  ;;  %25531 = vst [vmem:[#allocation18_spill] sm:$0xff] %v21794_v40  ;;  %v443_v29 = vld [vmem:[%s18637_s21 + $0x508] sm:$0xff]  ;;  %v25534_v8 = vand.u32 4294901760, %v21761_v57  ;;  %v21818_v14 = vsub.f32 %v1049_v28, %v21794_v40  ;;  %v21820_v47 = vand.u32 4294901760, %v1046_v30 }
 0x405   : > { %v1043_v62 = vsel %vm552_vm0, %v443_v29, 0 }
 0x406   : > { %17729 = vmatpush3.xpose.msra.mxu0 %v21724_v37  ;;  %17761 = vmatpush3.xpose.msra.mxu1 %v6020_v38  ;;  %v6152_v37 = vsub.f32 %v21757_v36, %v25533_v39  ;;  %v21803_v38 = vand.u32 4294901760, %v1094_v34  ;;  %v6040_v26 = vsub.f32 %v21761_v57, %v25534_v8  ;;  %v6034_v39 = vand.u32 4294901760, %v6033_v22  ;;  %v442_v22 = vld [vmem:[%s18637_s21 + $0x500] sm:$0xff] }
 0x407   : > { %17730 = vmatprep.subr.mxu0 %v21729_v51  ;;  %17762 = vmatprep.subr.mxu1 %v6139_v27  ;;  %v6159_v27 = vsub.f32 %v21767_v54, %v25535_v53  ;;  %v458_v51 = vld [vmem:[%s18637_s21 + $0x580] sm:$0xff]  ;;  %v21824_v53 = vand.u32 4294901760, %v1091_v35  ;;  %v25536_v57 = vand.u32 4294901760, %v21785_v32  ;;  %v21842_v29 = vand.u32 4294901760, %v1043_v62 }
 0x408   : > { %v6153_v8 = vand.u32 4294901760, %v6152_v37  ;;  %v21828_v54 = vsub.f32 %v1094_v34, %v21803_v38  ;;  %v6041_v28 = vand.u32 4294901760, %v6040_v26  ;;  %v25537_v37 = vand.u32 4294901760, %v21797_v56 }
 0x409   : > { %v6047_v36 = vsub.f32 %v21785_v32, %v25536_v57 }
 0x40a   : > { %17731 = vmatpush3.xpose.msra.mxu0 %v21740_v48  ;;  %17763 = vmatpush3.xpose.msra.mxu1 %v6027_v45  ;;  %v1088_v45 = vsel %vm552_vm0, %v458_v51, 0  ;;  %v6160_v48 = vand.u32 4294901760, %v6159_v27  ;;  %v6166_v34 = vsub.f32 %v21797_v56, %v25537_v37  ;;  %v24901_v51 = vand.u32 4294901760, %v21818_v14 }
 0x40b   : > { %17732 = vmatprep.subr.mxu0 %v21742_v15  ;;  %17764 = vmatprep.subr.mxu1 %v6146_v55  ;;  %v21837_v55 = vsub.f32 %v1046_v30, %v21820_v47  ;;  %v21846_v26 = vand.u32 4294901760, %v1088_v45  ;;  %v1040_v27 = vsel %vm552_vm0, %v442_v22, 0  ;;  %v21851_v30 = vsub.f32 %v1091_v35, %v21824_v53 }
 0x40c   : > { %v21855_v37 = vsub.f32 %v1043_v62, %v21842_v29  ;;  %v6167_v35 = vand.u32 4294901760, %v6166_v34 }
 0x40d   : > { %v24904_v57 = vand.u32 4294901760, %v21837_v55  ;;  %v21869_v62 = vsub.f32 %v1088_v45, %v21846_v26 }
 0x40e   : > { %17733 = vmatpush3.xpose.msra.mxu0 %v21763_v0  ;;  %17765 = vmatpush3.xpose.msra.mxu1 %v6034_v39  ;;  %v6048_v39 = vand.u32 4294901760, %v6047_v36  ;;  %25538 = vst [vmem:[#allocation20_spill] sm:$0xff] %v21855_v37  ;;  %v25539_v36 = vand.u32 4294901760, %v21828_v54  ;;  %v24908_v34 = vand.u32 4294901760, %v21855_v37 }
 0x40f   : > { %17734 = vmatprep.subr.mxu0 %v21774_v16  ;;  %17766 = vmatprep.subr.mxu1 %v6153_v8  ;;  %v6054_v8 = vsub.f32 %v21818_v14, %v24901_v51  ;;  %v21860_v16 = vand.u32 4294901760, %v1040_v27 }
 0x410   : > { %v6173_v22 = vsub.f32 %v21828_v54, %v25539_v36 }
 0x411   : > { %v6055_v51 = vand.u32 4294901760, %v6054_v8  ;;  %v6068_v8 = vsub.f32 %v21855_v37, %v24908_v34  ;;  %v25552_v34 = vld [vmem:[#allocation17_spill] sm:$0xff] }
 0x412   : > { %17735 = vmatpush3.xpose.msra.mxu0 %v21794_v40  ;;  %17767 = vmatpush3.xpose.msra.mxu1 %v6041_v28  ;;  %v24905_v28 = vand.u32 4294901760, %v21851_v30  ;;  %v21873_v40 = vsub.f32 %v1040_v27, %v21860_v16  ;;  %v6174_v36 = vand.u32 4294901760, %v6173_v22 }
 0x413   : > { %17736 = vmatprep.subr.mxu0 %v21803_v38  ;;  %17768 = vmatprep.subr.mxu1 %v6160_v48  ;;  %v6061_v48 = vsub.f32 %v21837_v55, %v24904_v57 }
 0x414   : > { %25540 = vst [vmem:[#allocation13_spill] sm:$0xff] %v21873_v40  ;;  %v6180_v45 = vsub.f32 %v21851_v30, %v24905_v28  ;;  %v24906_v57 = vand.u32 4294901760, %v21873_v40  ;;  %v6069_v28 = vand.u32 4294901760, %v6068_v8  ;;  %v25544_v8 = vld [vmem:[#allocation7_spill] sm:$0xff] }
 0x415   : > { %v6062_v27 = vand.u32 4294901760, %v6061_v48 }
 0x416   : > { %17737 = vmatpush3.xpose.msra.mxu0 %v21820_v47  ;;  %17769 = vmatpush3.xpose.msra.mxu1 %v6048_v39  ;;  %v24907_v39 = vand.u32 4294901760, %v21869_v62 }
 0x417   : > { %17738 = vmatprep.subr.mxu0 %v21824_v53  ;;  %17770 = vmatprep.subr.mxu1 %v6167_v35  ;;  %v6181_v35 = vand.u32 4294901760, %v6180_v45  ;;  %v25541_v45 = vld [vmem:[#allocation33_spill] sm:$0xff] }
 0x418   : > { %v6187_v22 = vsub.f32 %v21869_v62, %v24907_v39  ;;  %v25551_v39 = vld [vmem:[#allocation12_spill] sm:$0xff] }
 0x41a   : > { %17739 = vmatpush3.xpose.msra.mxu0 %v21842_v29  ;;  %17771 = vmatpush3.xpose.msra.mxu1 %v6055_v51  ;;  %v6075_v51 = vsub.f32 %v21873_v40, %v24906_v57  ;;  %v6188_v48 = vand.u32 4294901760, %v6187_v22  ;;  %v25546_v22 = vld [vmem:[#allocation8_spill] sm:$0xff]  ;;  %v25550_v57 = vld [vmem:[#allocation23_spill] sm:$0xff] }
 0x41b   : > { %17740 = vmatprep.subr.mxu0 %v21846_v26  ;;  %17772 = vmatprep.subr.mxu1 %v6174_v36 }
 0x41c   : > { %v6076_v36 = vand.u32 4294901760, %v6075_v51  ;;  %v25547_v51 = vld [vmem:[#allocation9_spill] sm:$0xff] }
 0x41e   : > { %17741 = vmatpush3.xpose.msra.mxu0 %v21860_v16  ;;  %17773 = vmatpush3.xpose.msra.mxu1 %v6062_v27  ;;  %v25543_v27 = vld [vmem:[#allocation24_spill] sm:$0xff] }
 0x41f   : > { %17774 = vmatprep.subr.mxu1 %v6181_v35  ;;  %17782 = vmatprep.subr.mxu0 %v21503_v11  ;;  %v25545_v35 = vld [vmem:[#allocation29_spill] sm:$0xff] }
 0x421   : > { %17743 = vmatmul.mubr.f32.vlgmr.msra.gmra.mxu0 %v25508_v7  ;;  %v25554_v7 = vld [vmem:[#allocation14_spill] sm:$0xff] }
 0x422   : > { %17775 = vmatpush3.xpose.msra.mxu1 %v6069_v28  ;;  %17783 = vmatpush3.xpose.msra.mxu0 %v21519_v6  ;;  %v25542_v28 = vld [vmem:[#allocation26_spill] sm:$0xff] }
 0x423   : > { %17776 = vmatprep.subr.mxu1 %v6188_v48  ;;  %17784 = vmatprep.subr.mxu0 %v21531_v1  ;;  %v25548_v48 = vld [vmem:[#allocation6_spill] sm:$0xff] }
 0x424   : > { %17744 = vmatprep.mubr.f32.mxu0 %v25541_v45 }
 0x425   : > { %17745 = vmatmul.mubr.f32.gmra.mxu0 %v25541_v45  ;;  %v25553_v45 = vld [vmem:[#allocation16_spill] sm:$0xff] }
 0x426   : > { %17777 = vmatpush3.xpose.msra.mxu1 %v6076_v36  ;;  %17785 = vmatpush3.xpose.msra.mxu0 %v21534_v42  ;;  %v25549_v36 = vld [vmem:[#allocation31_spill] sm:$0xff] }
 0x427   : > { %17786 = vmatprep.subr.mxu0 %v21548_v21  ;;  %17818 = vmatprep.subr.mxu1 %v21486_v46 }
 0x428   : > { %17814 = vmatprep.mubr.f32.mxu0 %v18864_v10 }
 0x429   : > { %17779 = vmatmul.mubr.f32.vlgmr.msra.gmra.mxu1 %v18630_v3 }
 0x42a   : > { %17787 = vmatpush3.xpose.msra.mxu0 %v21560_v18  ;;  %17819 = vmatpush3.xpose.msra.mxu1 %v21499_v41 }
 0x42b   : > { %17788 = vmatprep.subr.mxu0 %v21578_v61  ;;  %17820 = vmatprep.subr.mxu1 %v21510_v59 }
 0x42c   : > { %17780 = vmatprep.mubr.f32.mxu1 %v25507_v24 }
 0x42d   : > { %17781 = vmatmul.mubr.f32.gmra.mxu1 %v25507_v24  ;;  %v25555_v24 = vld [vmem:[#allocation11_spill] sm:$0xff] }
 0x42e   : > { %17789 = vmatpush3.xpose.msra.mxu0 %v21587_v31  ;;  %17821 = vmatpush3.xpose.msra.mxu1 %v21512_v9 }
 0x42f   : > { %17790 = vmatprep.subr.mxu0 %v21607_v25  ;;  %17822 = vmatprep.subr.mxu1 %v21521_v52 }
 0x430   : > { %17850 = vmatprep.mubr.f32.mxu1 %v18891_v33 }
 0x432   : > { %17791 = vmatpush3.xpose.msra.mxu0 %v21622_v58  ;;  %17823 = vmatpush3.xpose.msra.mxu1 %v21536_v63 }
 0x433   : > { %17792 = vmatprep.subr.mxu0 %v21627_v12  ;;  %17824 = vmatprep.subr.mxu1 %v21552_v17 }
 0x436   : > { %17793 = vmatpush3.xpose.msra.mxu0 %v21640_v44  ;;  %17825 = vmatpush3.xpose.msra.mxu1 %v21562_v13 }
 0x437   : > { %17794 = vmatprep.subr.mxu0 %v21659_v4  ;;  %17826 = vmatprep.subr.mxu1 %v21573_v23 }
 0x43a   : > { %17795 = vmatpush3.xpose.msra.mxu0 %v21665_v43  ;;  %17827 = vmatpush3.xpose.msra.mxu1 %v21596_v60 }
 0x43b   : > { %17796 = vmatprep.subr.mxu0 %v21672_v5  ;;  %17828 = vmatprep.subr.mxu1 %v21598_v19 }
 0x43e   : > { %17797 = vmatpush3.xpose.msra.mxu0 %v21689_v2  ;;  %17829 = vmatpush3.xpose.msra.mxu1 %v21617_v50 }
 0x43f   : > { %17798 = vmatprep.subr.mxu0 %v21708_v49  ;;  %17830 = vmatprep.subr.mxu1 %v25542_v28 }
 0x442   : > { %17799 = vmatpush3.xpose.msra.mxu0 %v21722_v20  ;;  %17831 = vmatpush3.xpose.msra.mxu1 %v25543_v27 }
 0x443   : > { %17800 = vmatprep.subr.mxu0 %v25544_v8  ;;  %17832 = vmatprep.subr.mxu1 %v25545_v35 }
 0x446   : > { %17801 = vmatpush3.xpose.msra.mxu0 %v25546_v22  ;;  %17833 = vmatpush3.xpose.msra.mxu1 %v25547_v51 }
 0x447   : > { %17802 = vmatprep.subr.mxu0 %v25548_v48  ;;  %17834 = vmatprep.subr.mxu1 %v25549_v36  ;;  %v25556_v48 = vld [vmem:[#allocation10_spill] sm:$0xff] }
 0x44a   : > { %17803 = vmatpush3.xpose.msra.mxu0 %v25550_v57  ;;  %17835 = vmatpush3.xpose.msra.mxu1 %v25551_v39 }
 0x44b   : > { %17804 = vmatprep.subr.mxu0 %v25552_v34  ;;  %17836 = vmatprep.subr.mxu1 %v25553_v45 }
 0x44e   : > { %17805 = vmatpush3.xpose.msra.mxu0 %v21785_v32  ;;  %17837 = vmatpush3.xpose.msra.mxu1 %v25554_v7  ;;  %v25557_v32 = vld [vmem:[#allocation15_spill] sm:$0xff] }
 0x44f   : > { %17806 = vmatprep.subr.mxu0 %v21797_v56  ;;  %17838 = vmatprep.subr.mxu1 %v25555_v24  ;;  %v25558_v56 = vld [vmem:[#allocation18_spill] sm:$0xff] }
 0x452   : > { %17807 = vmatpush3.xpose.msra.mxu0 %v21818_v14  ;;  %17839 = vmatpush3.xpose.msra.mxu1 %v25556_v48 }
 0x453   : > { %17808 = vmatprep.subr.mxu0 %v21828_v54  ;;  %17840 = vmatprep.subr.mxu1 %v21742_v15 }
 0x456   : > { %17809 = vmatpush3.xpose.msra.mxu0 %v21837_v55  ;;  %17841 = vmatpush3.xpose.msra.mxu1 %v21763_v0  ;;  %v25559_v0 = vand.u32 4294901760, %v21503_v11  ;;  %v25563_v11 = vand.u32 4294901760, %v21534_v42  ;;  %v25569_v42 = vand.u32 4294901760, %v21607_v25  ;;  %v505_v25 = vld [vmem:[%s18637_s21 + $0x6f8] sm:$0xff] }
 0x457   : > { %17810 = vmatprep.subr.mxu0 %v21851_v30  ;;  %17842 = vmatprep.subr.mxu1 %v25557_v32 }
 0x45a   : > { %17811 = vmatpush3.xpose.msra.mxu0 %v21855_v37  ;;  %17843 = vmatpush3.xpose.msra.mxu1 %v25558_v56  ;;  %v25560_v37 = vand.u32 4294901760, %v21519_v6  ;;  %v25561_v56 = vld [vmem:[#allocation30_spill] sm:$0xff]  ;;  %v25565_v6 = vand.u32 4294901760, %v21560_v18  ;;  %v25577_v18 = vand.u32 4294901760, %v21708_v49 }
 0x45b   : > { %17812 = vmatprep.subr.mxu0 %v21869_v62  ;;  %17844 = vmatprep.subr.mxu1 %v21803_v38  ;;  %v25581_v49 = vld [vmem:[#allocation6_spill] sm:$0xff] }
 0x45e   : > { %17813 = vmatpush3.xpose.msra.mxu0 %v21873_v40  ;;  %17845 = vmatpush3.xpose.msra.mxu1 %v21820_v47  ;;  %v25562_v40 = vand.u32 4294901760, %v21531_v1  ;;  %v25566_v1 = vld [vmem:[#allocation32_spill] sm:$0xff] }
 0x45f   : > { %17846 = vmatprep.subr.mxu1 %v21824_v53  ;;  %17854 = vmatprep.subr.mxu0 %v25559_v0  ;;  %v25564_v0 = vand.u32 4294901760, %v21548_v21  ;;  %v25572_v21 = vand.u32 4294901760, %v21640_v44  ;;  %v1229_v44 = vsel %vm552_vm0, %v505_v25, 0 }
 0x461   : > { %17815 = vmatmul.mubr.f32.vlgmr.msra.gmra.mxu0 %v18864_v10 }
 0x462   : > { %17847 = vmatpush3.xpose.msra.mxu1 %v21842_v29  ;;  %17855 = vmatpush3.xpose.msra.mxu0 %v25560_v37  ;;  %v503_v37 = vld [vmem:[%s18637_s21 + $0x6e8] sm:$0xff] }
 0x463   : > { %17816 = vmatprep.mubr.f32.mxu0 %v25561_v56  ;;  %17848 = vmatprep.subr.mxu1 %v21846_v26 }
 0x464   : > { %17856 = vmatprep.subr.mxu0 %v25562_v40  ;;  %v25567_v40 = vand.u32 4294901760, %v21578_v61  ;;  %v25580_v61 = vand.u32 4294901760, %v25546_v22  ;;  %v502_v22 = vld [vmem:[%s18637_s21 + $0x6e0] sm:$0xff] }
 0x465   : > { %17817 = vmatmul.mubr.f32.gmra.mxu0 %v25561_v56 }
 0x466   : > { %17849 = vmatpush3.xpose.msra.mxu1 %v21860_v16  ;;  %17857 = vmatpush3.xpose.msra.mxu0 %v25563_v11 }
 0x467   : > { %17858 = vmatprep.subr.mxu0 %v25564_v0  ;;  %17890 = vmatprep.subr.mxu1 %v21486_v46  ;;  %v25568_v46 = vand.u32 4294901760, %v21587_v31  ;;  %v25582_v31 = vand.u32 4294901760, %v25581_v49 }
 0x468   : > { %17886 = vmatprep.mubr.f32.mxu0 %v18630_v3 }
 0x469   : > { %17851 = vmatmul.mubr.f32.vlgmr.msra.gmra.mxu1 %v18891_v33 }
 0x46a   : > { %17859 = vmatpush3.xpose.msra.mxu0 %v25565_v6  ;;  %17891 = vmatpush3.xpose.msra.mxu1 %v21499_v41  ;;  %v25570_v41 = vand.u32 4294901760, %v21622_v58  ;;  %v25587_v58 = vld [vmem:[#allocation21_spill] sm:$0xff]  ;;  %v25597_v6 = vand.u32 4294901760, %v21869_v62 }
 0x46b   : > { %17852 = vmatprep.mubr.f32.mxu1 %v25566_v1  ;;  %17860 = vmatprep.subr.mxu0 %v25567_v40  ;;  %v486_v40 = vld [vmem:[%s18637_s21 + $0x660] sm:$0xff] }
 0x46c   : > { %17892 = vmatprep.subr.mxu1 %v21510_v59  ;;  %v25571_v59 = vand.u32 4294901760, %v21627_v12  ;;  %v25588_v12 = vand.u32 4294901760, %v25587_v58 }
 0x46d   : > { %17853 = vmatmul.mubr.f32.gmra.mxu1 %v25566_v1 }
 0x46e   : > { %17861 = vmatpush3.xpose.msra.mxu0 %v25568_v46  ;;  %17893 = vmatpush3.xpose.msra.mxu1 %v21512_v9  ;;  %v25573_v9 = vand.u32 4294901760, %v21659_v4  ;;  %v489_v4 = vld [vmem:[%s18637_s21 + $0x678] sm:$0xff]  ;;  %v1220_v46 = vsel %vm552_vm0, %v502_v22, 0  ;;  %v25601_v22 = vld [vmem:[#allocation27_spill] sm:$0xff] }
 0x46f   : > { %17862 = vmatprep.subr.mxu0 %v25569_v42  ;;  %17894 = vmatprep.subr.mxu1 %v21521_v52  ;;  %v25574_v52 = vand.u32 4294901760, %v21665_v43  ;;  %v25589_v43 = vand.u32 4294901760, %v21818_v14  ;;  %v25591_v14 = vand.u32 4294901760, %v21837_v55 }
 0x470   : > { %17922 = vmatprep.mubr.f32.mxu1 %v18630_v3 }
 0x472   : > { %17863 = vmatpush3.xpose.msra.mxu0 %v25570_v41  ;;  %17895 = vmatpush3.xpose.msra.mxu1 %v21536_v63  ;;  %v25575_v63 = vand.u32 4294901760, %v21672_v5  ;;  %v22054_v5 = vand.u32 4294901760, %v1229_v44 }
 0x473   : > { %17864 = vmatprep.subr.mxu0 %v25571_v59  ;;  %17896 = vmatprep.subr.mxu1 %v21552_v17  ;;  %v25576_v17 = vand.u32 4294901760, %v21689_v2 }
 0x476   : > { %17865 = vmatpush3.xpose.msra.mxu0 %v25572_v21  ;;  %17897 = vmatpush3.xpose.msra.mxu1 %v21562_v13  ;;  %v25578_v13 = vand.u32 4294901760, %v21722_v20  ;;  %v504_v20 = vld [vmem:[%s18637_s21 + $0x6f0] sm:$0xff]  ;;  %v501_v21 = vld [vmem:[%s18637_s21 + $0x6d8] sm:$0xff] }
 0x477   : > { %17866 = vmatprep.subr.mxu0 %v25573_v9  ;;  %17898 = vmatprep.subr.mxu1 %v21573_v23  ;;  %v25579_v23 = vand.u32 4294901760, %v25544_v8  ;;  %v487_v8 = vld [vmem:[%s18637_s21 + $0x668] sm:$0xff]  ;;  %v25598_v9 = vld [vmem:[#allocation13_spill] sm:$0xff] }
 0x478   : > { %v1175_v0 = vsel %vm552_vm0, %v487_v8, 0 }
 0x479   : > { %v22104_v59 = vand.u32 4294901760, %v1175_v0 }
 0x47a   : > { %17867 = vmatpush3.xpose.msra.mxu0 %v25574_v52  ;;  %17899 = vmatpush3.xpose.msra.mxu1 %v21596_v60  ;;  %v25583_v60 = vand.u32 4294901760, %v25550_v57  ;;  %v25590_v57 = vand.u32 4294901760, %v21828_v54  ;;  %v22071_v54 = vsub.f32 %v1229_v44, %v22054_v5  ;;  %v25599_v52 = vand.u32 4294901760, %v25598_v9  ;;  %v484_v44 = vld [vmem:[%s18637_s21 + $0x650] sm:$0xff] }
 0x47b   : > { %17868 = vmatprep.subr.mxu0 %v25575_v63  ;;  %17900 = vmatprep.subr.mxu1 %v21598_v19  ;;  %v25584_v19 = vand.u32 4294901760, %v25552_v34  ;;  %v1226_v34 = vsel %vm552_vm0, %v504_v20, 0  ;;  %v1172_v63 = vsel %vm552_vm0, %v486_v40, 0  ;;  %v22128_v49 = vsub.f32 %v1175_v0, %v22104_v59 }
 0x47c   : > { %v22078_v55 = vand.u32 4294901760, %v1226_v34 }
 0x47d   : > { %v24923_v20 = vand.u32 4294901760, %v22128_v49 }
 0x47e   : > { %17869 = vmatpush3.xpose.msra.mxu0 %v25576_v17  ;;  %17901 = vmatpush3.xpose.msra.mxu1 %v21617_v50  ;;  %v25585_v50 = vld [vmem:[#allocation22_spill] sm:$0xff]  ;;  %v22099_v42 = vsub.f32 %v1226_v34, %v22078_v55  ;;  %v1166_v34 = vsel %vm552_vm0, %v484_v44, 0 }
 0x47f   : > { %17870 = vmatprep.subr.mxu0 %v25577_v18  ;;  %17902 = vmatprep.subr.mxu1 %v25542_v28  ;;  %v25586_v2 = vand.u32 4294901760, %v25585_v50  ;;  %v22120_v18 = vand.u32 4294901760, %v1220_v46  ;;  %v25600_v50 = vld [vmem:[#allocation28_spill] sm:$0xff] }
 0x482   : > { %17871 = vmatpush3.xpose.msra.mxu0 %v25578_v13  ;;  %17903 = vmatpush3.xpose.msra.mxu1 %v25543_v27  ;;  %v1223_v27 = vsel %vm552_vm0, %v503_v37, 0  ;;  %v24927_v13 = vand.u32 4294901760, %v22099_v42 }
 0x483   : > { %17872 = vmatprep.subr.mxu0 %v25579_v23  ;;  %17904 = vmatprep.subr.mxu1 %v25545_v35  ;;  %v22089_v11 = vand.u32 4294901760, %v1223_v27  ;;  %v485_v23 = vld [vmem:[%s18637_s21 + $0x658] sm:$0xff] }
 0x484   : > { %v1169_v58 = vsel %vm552_vm0, %v485_v23, 0 }
 0x485   : > { %v22116_v17 = vsub.f32 %v1223_v27, %v22089_v11 }
 0x486   : > { %17873 = vmatpush3.xpose.msra.mxu0 %v25580_v61  ;;  %17905 = vmatpush3.xpose.msra.mxu1 %v25547_v51  ;;  %v25594_v51 = vld [vmem:[#allocation20_spill] sm:$0xff] }
 0x487   : > { %17874 = vmatprep.subr.mxu0 %v25582_v31  ;;  %17906 = vmatprep.subr.mxu1 %v25549_v36  ;;  %v25596_v36 = vld [vmem:[#allocation18_spill] sm:$0xff]  ;;  %v500_v61 = vld [vmem:[%s18637_s21 + $0x6d0] sm:$0xff]  ;;  %v22130_v31 = vand.u32 4294901760, %v1172_v63  ;;  %v24924_v25 = vand.u32 4294901760, %v22116_v17 }
 0x48a   : > { %17875 = vmatpush3.xpose.msra.mxu0 %v25583_v60  ;;  %17907 = vmatpush3.xpose.msra.mxu1 %v25551_v39  ;;  %v25592_v39 = vld [vmem:[#allocation19_spill] sm:$0xff] }
 0x48b   : > { %17876 = vmatprep.subr.mxu0 %v25584_v19  ;;  %17908 = vmatprep.subr.mxu1 %v25553_v45 }
 0x48e   : > { %17877 = vmatpush3.xpose.msra.mxu0 %v25586_v2  ;;  %17909 = vmatpush3.xpose.msra.mxu1 %v25554_v7  ;;  %v488_v7 = vld [vmem:[%s18637_s21 + $0x670] sm:$0xff] }
 0x48f   : > { %17878 = vmatprep.subr.mxu0 %v25588_v12  ;;  %17910 = vmatprep.subr.mxu1 %v25555_v24  ;;  %v1181_v24 = vsel %vm552_vm0, %v489_v4, 0  ;;  %v1178_v28 = vsel %vm552_vm0, %v488_v7, 0  ;;  %v22146_v12 = vsub.f32 %v1220_v46, %v22120_v18  ;;  %v6993_v4 = vsub.f32 %v22099_v42, %v24927_v13 }
 0x490   : > { %v22067_v45 = vand.u32 4294901760, %v1181_v24  ;;  %v22080_v35 = vand.u32 4294901760, %v1178_v28  ;;  %v22164_v7 = vand.u32 4294901760, %v1169_v58 }
 0x491   : > { %v6994_v27 = vand.u32 4294901760, %v6993_v4 }
 0x492   : > { %17879 = vmatpush3.xpose.msra.mxu0 %v25589_v43  ;;  %17911 = vmatpush3.xpose.msra.mxu1 %v25556_v48  ;;  %v25595_v48 = vand.u32 4294901760, %v25594_v51  ;;  %v22102_v41 = vsub.f32 %v1178_v28, %v22080_v35  ;;  %v483_v28 = vld [vmem:[%s18637_s21 + $0x648] sm:$0xff] }
 0x493   : > { %17880 = vmatprep.subr.mxu0 %v25590_v57  ;;  %17912 = vmatprep.subr.mxu1 %v21742_v15  ;;  %v25593_v15 = vand.u32 4294901760, %v21851_v30  ;;  %v22087_v30 = vsub.f32 %v1181_v24, %v22067_v45  ;;  %v499_v57 = vld [vmem:[%s18637_s21 + $0x6c8] sm:$0xff]  ;;  %v1163_v40 = vsel %vm552_vm0, %v483_v28, 0  ;;  %v481_v28 = vld [vmem:[%s18637_s21 + $0x638] sm:$0xff] }
 0x494   : > { %v1211_v8 = vsel %vm552_vm0, %v499_v57, 0 }
 0x495   : > { %v24929_v62 = vand.u32 4294901760, %v22087_v30 }
 0x496   : > { %17881 = vmatpush3.xpose.msra.mxu0 %v25591_v14  ;;  %17913 = vmatpush3.xpose.msra.mxu1 %v25592_v39  ;;  %v7000_v14 = vsub.f32 %v22116_v17, %v24924_v25  ;;  %v24921_v39 = vand.u32 4294901760, %v22146_v12 }
 0x497   : > { %17882 = vmatprep.subr.mxu0 %v25593_v15  ;;  %17914 = vmatprep.subr.mxu1 %v25557_v32  ;;  %v24931_v32 = vand.u32 4294901760, %v22071_v54  ;;  %v6874_v19 = vsub.f32 %v22087_v30, %v24929_v62  ;;  %v498_v15 = vld [vmem:[%s18637_s21 + $0x6c0] sm:$0xff] }
 0x498   : > { %v1208_v46 = vsel %vm552_vm0, %v498_v15, 0  ;;  %v7001_v9 = vand.u32 4294901760, %v7000_v14 }
 0x499   : > { %v6875_v24 = vand.u32 4294901760, %v6874_v19  ;;  %v22212_v19 = vand.u32 4294901760, %v1208_v46 }
 0x49a   : > { %17883 = vmatpush3.xpose.msra.mxu0 %v25595_v48  ;;  %17915 = vmatpush3.xpose.msra.mxu1 %v25596_v36  ;;  %v6888_v48 = vsub.f32 %v22128_v49, %v24923_v20  ;;  %v22185_v36 = vand.u32 4294901760, %v1166_v34 }
 0x49b   : > { %17884 = vmatprep.subr.mxu0 %v25597_v6  ;;  %17916 = vmatprep.subr.mxu1 %v21803_v38  ;;  %v6986_v38 = vsub.f32 %v22071_v54, %v24931_v32  ;;  %v22190_v6 = vsub.f32 %v1169_v58, %v22164_v7  ;;  %25604 = vst [vmem:[#allocation24_spill] sm:$0xff] %v22212_v19  ;;  %v497_v58 = vld [vmem:[%s18637_s21 + $0x6b8] sm:$0xff] }
 0x49c   : > { %v6889_v23 = vand.u32 4294901760, %v6888_v48  ;;  %v1205_v14 = vsel %vm552_vm0, %v497_v58, 0  ;;  %v496_v48 = vld [vmem:[%s18637_s21 + $0x6b0] sm:$0xff] }
 0x49d   : > { %v6987_v60 = vand.u32 4294901760, %v6986_v38  ;;  %v22202_v38 = vand.u32 4294901760, %v1211_v8  ;;  %v24920_v44 = vand.u32 4294901760, %v22190_v6  ;;  %v22250_v58 = vand.u32 4294901760, %v1205_v14 }
 0x49e   : > { %17885 = vmatpush3.xpose.msra.mxu0 %v25599_v52  ;;  %17917 = vmatpush3.xpose.msra.mxu1 %v21820_v47  ;;  %v1217_v47 = vsel %vm552_vm0, %v501_v21, 0  ;;  %v7007_v52 = vsub.f32 %v22146_v12, %v24921_v39 }
 0x49f   : > { %17918 = vmatprep.subr.mxu1 %v21824_v53  ;;  %17926 = vmatprep.subr.mxu0 %v22054_v5  ;;  %v24925_v53 = vand.u32 4294901760, %v22102_v41  ;;  %v22141_v2 = vand.u32 4294901760, %v1217_v47  ;;  %25602 = vst [vmem:[#allocation25_spill] sm:$0xff] %v22202_v38  ;;  %25606 = vst [vmem:[#allocation29_spill] sm:$0xff] %v22250_v58  ;;  %v22276_v25 = vsub.f32 %v1205_v14, %v22250_v58 }
 0x4a0   : > { %v7008_v57 = vand.u32 4294901760, %v7007_v52  ;;  %v6902_v52 = vsub.f32 %v22190_v6, %v24920_v44  ;;  %v495_v44 = vld [vmem:[%s18637_s21 + $0x6a8] sm:$0xff] }
 0x4a1   : > { %17887 = vmatmul.mubr.f32.vlgmr.msra.gmra.mxu0 %v18630_v3  ;;  %v6881_v43 = vsub.f32 %v22102_v41, %v24925_v53  ;;  %v479_v53 = vld [vmem:[%s18637_s21 + $0x628] sm:$0xff] }
 0x4a2   : > { %17919 = vmatpush3.xpose.msra.mxu1 %v21842_v29  ;;  %17927 = vmatpush3.xpose.msra.mxu0 %v22067_v45  ;;  %v1214_v29 = vsel %vm552_vm0, %v500_v61, 0  ;;  %v22208_v61 = vsub.f32 %v1166_v34, %v22185_v36  ;;  %v22227_v34 = vsub.f32 %v1211_v8, %v22202_v38 }
 0x4a3   : > { %17888 = vmatprep.mubr.f32.mxu0 %v25600_v50  ;;  %17920 = vmatprep.subr.mxu1 %v21846_v26  ;;  %v22155_v26 = vsub.f32 %v1172_v63, %v22130_v31  ;;  %v22166_v37 = vand.u32 4294901760, %v1214_v29  ;;  %v6882_v51 = vand.u32 4294901760, %v6881_v43 }
 0x4a4   : > { %17928 = vmatprep.subr.mxu0 %v22078_v55 }
 0x4a5   : > { %17889 = vmatmul.mubr.f32.gmra.mxu0 %v25600_v50  ;;  %v24918_v0 = vand.u32 4294901760, %v22155_v26  ;;  %v22195_v21 = vsub.f32 %v1214_v29, %v22166_v37 }
 0x4a6   : > { %17921 = vmatpush3.xpose.msra.mxu1 %v21860_v16  ;;  %17929 = vmatpush3.xpose.msra.mxu0 %v22080_v35  ;;  %v22175_v16 = vsub.f32 %v1217_v47, %v22141_v2  ;;  %v482_v47 = vld [vmem:[%s18637_s21 + $0x640] sm:$0xff] }
 0x4a7   : > { %17930 = vmatprep.subr.mxu0 %v22089_v11  ;;  %17962 = vmatprep.subr.mxu1 %v6987_v60  ;;  %v22210_v60 = vand.u32 4294901760, %v1163_v40  ;;  %v6895_v29 = vsub.f32 %v22155_v26, %v24918_v0  ;;  %v24919_v4 = vand.u32 4294901760, %v22195_v21  ;;  %v1160_v43 = vsel %vm552_vm0, %v482_v47, 0 }
 0x4a8   : > { %17958 = vmatprep.mubr.f32.mxu0 %v25601_v22  ;;  %v24917_v63 = vand.u32 4294901760, %v22175_v16 }
 0x4a9   : > { %17923 = vmatmul.mubr.f32.vlgmr.msra.gmra.mxu1 %v18630_v3  ;;  %25603 = vst [vmem:[#allocation26_spill] sm:$0xff] %v22210_v60  ;;  %v22233_v15 = vsub.f32 %v1163_v40, %v22210_v60  ;;  %v6896_v8 = vand.u32 4294901760, %v6895_v29  ;;  %v7021_v40 = vsub.f32 %v22195_v21, %v24919_v4  ;;  %v1202_v29 = vsel %vm552_vm0, %v496_v48, 0 }
 0x4aa   : > { %17931 = vmatpush3.xpose.msra.mxu0 %v22104_v59  ;;  %17963 = vmatpush3.xpose.msra.mxu1 %v6875_v24  ;;  %v7014_v24 = vsub.f32 %v22175_v16, %v24917_v63  ;;  %v480_v63 = vld [vmem:[%s18637_s21 + $0x630] sm:$0xff] }
 0x4ab   : > { %17924 = vmatprep.mubr.f32.mxu1 %v25600_v50  ;;  %17932 = vmatprep.subr.mxu0 %v22120_v18  ;;  %v7022_v48 = vand.u32 4294901760, %v7021_v40  ;;  %v1154_v20 = vsel %vm552_vm0, %v480_v63, 0 }
 0x4ac   : > { %17964 = vmatprep.subr.mxu1 %v6994_v27  ;;  %v22235_v27 = vand.u32 4294901760, %v1160_v43  ;;  %v7015_v47 = vand.u32 4294901760, %v7014_v24 }
 0x4ad   : > { %17925 = vmatmul.mubr.f32.gmra.mxu1 %v25600_v50 }
 0x4ae   : > { %17933 = vmatpush3.xpose.msra.mxu0 %v22130_v31  ;;  %17965 = vmatpush3.xpose.msra.mxu1 %v6882_v51  ;;  %25605 = vst [vmem:[#allocation7_spill] sm:$0xff] %v22235_v27  ;;  %v24922_v51 = vand.u32 4294901760, %v22208_v61  ;;  %v22257_v0 = vsub.f32 %v1160_v43, %v22235_v27 }
 0x4af   : > { %17934 = vmatprep.subr.mxu0 %v22141_v2  ;;  %17966 = vmatprep.subr.mxu1 %v7001_v9  ;;  %v22240_v9 = vsub.f32 %v1208_v46, %v22212_v19  ;;  %v24926_v46 = vand.u32 4294901760, %v22227_v34 }
 0x4b0   : > { %17994 = vmatprep.mubr.f32.mxu1 %v18630_v3  ;;  %v6909_v4 = vsub.f32 %v22208_v61, %v24922_v51  ;;  %v22272_v51 = vand.u32 4294901760, %v1202_v29  ;;  %v25612_v1 = vand.u32 4294901760, %v22257_v0 }
 0x4b1   : > { %v24930_v24 = vand.u32 4294901760, %v22240_v9  ;;  %v7028_v43 = vsub.f32 %v22227_v34, %v24926_v46 }
 0x4b2   : > { %17935 = vmatpush3.xpose.msra.mxu0 %v22164_v7  ;;  %17967 = vmatpush3.xpose.msra.mxu1 %v6889_v23  ;;  %v1157_v23 = vsel %vm552_vm0, %v481_v28, 0  ;;  %v6903_v28 = vand.u32 4294901760, %v6902_v52  ;;  %25608 = vst [vmem:[#allocation9_spill] sm:$0xff] %v22272_v51  ;;  %v1199_v52 = vsel %vm552_vm0, %v495_v44, 0  ;;  %v6910_v40 = vand.u32 4294901760, %v6909_v4 }
 0x4b3   : > { %17936 = vmatprep.subr.mxu0 %v22166_v37  ;;  %17968 = vmatprep.subr.mxu1 %v7008_v57  ;;  %v24928_v57 = vand.u32 4294901760, %v22233_v15  ;;  %v22266_v39 = vand.u32 4294901760, %v1157_v23  ;;  %v7035_v46 = vsub.f32 %v22240_v9, %v24930_v24  ;;  %v22292_v44 = vand.u32 4294901760, %v1154_v20 }
 0x4b4   : > { %v1151_v4 = vsel %vm552_vm0, %v479_v53, 0  ;;  %v22297_v62 = vand.u32 4294901760, %v1199_v52  ;;  %v24938_v24 = vand.u32 4294901760, %v22276_v25  ;;  %v22301_v32 = vsub.f32 %v1202_v29, %v22272_v51 }
 0x4b5   : > { %25607 = vst [vmem:[#allocation8_spill] sm:$0xff] %v22266_v39  ;;  %v22290_v14 = vsub.f32 %v1157_v23, %v22266_v39  ;;  %25609 = vst [vmem:[#allocation31_spill] sm:$0xff] %v22292_v44  ;;  %v493_v23 = vld [vmem:[%s18637_s21 + $0x698] sm:$0xff]  ;;  %v6923_v53 = vsub.f32 %v22257_v0, %v25612_v1  ;;  %v22314_v29 = vsub.f32 %v1154_v20, %v22292_v44 }
 0x4b6   : > { %17937 = vmatpush3.xpose.msra.mxu0 %v22185_v36  ;;  %17969 = vmatpush3.xpose.msra.mxu1 %v6896_v8  ;;  %v494_v8 = vld [vmem:[%s18637_s21 + $0x6a0] sm:$0xff]  ;;  %25610 = vst [vmem:[#allocation23_spill] sm:$0xff] %v22297_v62  ;;  %25611 = vst [vmem:[#allocation12_spill] sm:$0xff] %v22301_v32  ;;  %v7042_v1 = vsub.f32 %v22276_v25, %v24938_v24  ;;  %v477_v20 = vld [vmem:[%s18637_s21 + $0x618] sm:$0xff] }
 0x4b7   : > { %17938 = vmatprep.subr.mxu0 %v22202_v38  ;;  %17970 = vmatprep.subr.mxu1 %v7015_v47  ;;  %v6916_v47 = vsub.f32 %v22233_v15, %v24928_v57  ;;  %v1196_v13 = vsel %vm552_vm0, %v494_v8, 0  ;;  %v7029_v57 = vand.u32 4294901760, %v7028_v43  ;;  %v22308_v8 = vand.u32 4294901760, %v1151_v4  ;;  %25614 = vst [vmem:[#allocation16_spill] sm:$0xff] %v22314_v29  ;;  %v476_v38 = vld [vmem:[%s18637_s21 + $0x610] sm:$0xff] }
 0x4b8   : > { %v22310_v56 = vand.u32 4294901760, %v1196_v13  ;;  %v6924_v24 = vand.u32 4294901760, %v6923_v53  ;;  %v1145_v53 = vsel %vm552_vm0, %v477_v20, 0 }
 0x4b9   : > { %v6917_v63 = vand.u32 4294901760, %v6916_v47  ;;  %25613 = vst [vmem:[#allocation17_spill] sm:$0xff] %v22308_v8 }
 0x4ba   : > { %17939 = vmatpush3.xpose.msra.mxu0 %v22210_v60  ;;  %17971 = vmatpush3.xpose.msra.mxu1 %v6903_v28  ;;  %v478_v28 = vld [vmem:[%s18637_s21 + $0x620] sm:$0xff] }
 0x4bb   : > { %17940 = vmatprep.subr.mxu0 %v22212_v19  ;;  %17972 = vmatprep.subr.mxu1 %v7022_v48  ;;  %v7036_v48 = vand.u32 4294901760, %v7035_v46  ;;  %v1148_v47 = vsel %vm552_vm0, %v478_v28, 0  ;;  %v22325_v46 = vsub.f32 %v1199_v52, %v22297_v62  ;;  %v492_v28 = vld [vmem:[%s18637_s21 + $0x690] sm:$0xff] }
 0x4bc   : > { %v22331_v43 = vand.u32 4294901760, %v1148_v47 }
 0x4bd   : > { %25615 = vst [vmem:[#allocation14_spill] sm:$0xff] %v22325_v46 }
 0x4be   : > { %17941 = vmatpush3.xpose.msra.mxu0 %v22235_v27  ;;  %17973 = vmatpush3.xpose.msra.mxu1 %v6910_v40  ;;  %v1193_v27 = vsel %vm552_vm0, %v493_v23, 0  ;;  %v22329_v40 = vsub.f32 %v1151_v4, %v22308_v8  ;;  %25617 = vst [vmem:[#allocation10_spill] sm:$0xff] %v22331_v43  ;;  %v25619_v23 = vand.u32 4294901760, %v22290_v14 }
 0x4bf   : > { %17942 = vmatprep.subr.mxu0 %v22250_v58  ;;  %17974 = vmatprep.subr.mxu1 %v7029_v57  ;;  %v22335_v57 = vsub.f32 %v1196_v13, %v22310_v56  ;;  %v22342_v4 = vand.u32 4294901760, %v1193_v27  ;;  %v7043_v58 = vand.u32 4294901760, %v7042_v1  ;;  %v25621_v13 = vand.u32 4294901760, %v22301_v32  ;;  %v491_v1 = vld [vmem:[%s18637_s21 + $0x688] sm:$0xff] }
 0x4c0   : > { %25616 = vst [vmem:[#allocation11_spill] sm:$0xff] %v22329_v40  ;;  %v6930_v52 = vsub.f32 %v22290_v14, %v25619_v23  ;;  %v22353_v23 = vsub.f32 %v1148_v47, %v22331_v43 }
 0x4c1   : > { %25618 = vst [vmem:[#allocation15_spill] sm:$0xff] %v22335_v57  ;;  %25620 = vst [vmem:[#allocation6_spill] sm:$0xff] %v22342_v4  ;;  %v7049_v60 = vsub.f32 %v22301_v32, %v25621_v13  ;;  %v22365_v47 = vsub.f32 %v1193_v27, %v22342_v4  ;;  %v25628_v32 = vand.u32 4294901760, %v22335_v57 }
 0x4c2   : > { %17943 = vmatpush3.xpose.msra.mxu0 %v22266_v39  ;;  %17975 = vmatpush3.xpose.msra.mxu1 %v6917_v63  ;;  %v1190_v39 = vsel %vm552_vm0, %v492_v28, 0  ;;  %25622 = vst [vmem:[#allocation22_spill] sm:$0xff] %v22353_v23  ;;  %v6931_v13 = vand.u32 4294901760, %v6930_v52  ;;  %v25623_v63 = vand.u32 4294901760, %v22314_v29  ;;  %v22362_v28 = vand.u32 4294901760, %v1145_v53 }
 0x4c3   : > { %17944 = vmatprep.subr.mxu0 %v22272_v51  ;;  %17976 = vmatprep.subr.mxu1 %v7036_v48  ;;  %25625 = vst [vmem:[#allocation19_spill] sm:$0xff] %v22365_v47  ;;  %v7050_v19 = vand.u32 4294901760, %v7049_v60  ;;  %v25626_v48 = vand.u32 4294901760, %v22325_v46  ;;  %v1142_v52 = vsel %vm552_vm0, %v476_v38, 0  ;;  %v1187_v51 = vsel %vm552_vm0, %v491_v1, 0 }
 0x4c4   : > { %v6937_v20 = vsub.f32 %v22314_v29, %v25623_v63  ;;  %25624 = vst [vmem:[#allocation21_spill] sm:$0xff] %v22362_v28  ;;  %v475_v63 = vld [vmem:[%s18637_s21 + $0x608] sm:$0xff]  ;;  %v25627_v29 = vand.u32 4294901760, %v22329_v40  ;;  %v22386_v38 = vsub.f32 %v1145_v53, %v22362_v28  ;;  %v22388_v1 = vand.u32 4294901760, %v1142_v52 }
 0x4c5   : > { %v1139_v60 = vsel %vm552_vm0, %v475_v63, 0 }
 0x4c6   : > { %17945 = vmatpush3.xpose.msra.mxu0 %v22292_v44  ;;  %17977 = vmatpush3.xpose.msra.mxu1 %v6924_v24  ;;  %v7056_v44 = vsub.f32 %v22325_v46, %v25626_v48  ;;  %v22371_v24 = vand.u32 4294901760, %v1190_v39  ;;  %v6944_v27 = vsub.f32 %v22329_v40, %v25627_v29  ;;  %v6938_v48 = vand.u32 4294901760, %v6937_v20  ;;  %v474_v20 = vld [vmem:[%s18637_s21 + $0x600] sm:$0xff] }
 0x4c7   : > { %17946 = vmatprep.subr.mxu0 %v22297_v62  ;;  %17978 = vmatprep.subr.mxu1 %v7043_v58  ;;  %v7063_v58 = vsub.f32 %v22335_v57, %v25628_v32  ;;  %v490_v62 = vld [vmem:[%s18637_s21 + $0x680] sm:$0xff]  ;;  %v22392_v32 = vand.u32 4294901760, %v1187_v51  ;;  %v25629_v40 = vand.u32 4294901760, %v22353_v23  ;;  %v22410_v63 = vand.u32 4294901760, %v1139_v60 }
 0x4c8   : > { %v7057_v29 = vand.u32 4294901760, %v7056_v44  ;;  %v22396_v57 = vsub.f32 %v1190_v39, %v22371_v24  ;;  %v6945_v53 = vand.u32 4294901760, %v6944_v27  ;;  %v25630_v44 = vand.u32 4294901760, %v22365_v47 }
 0x4c9   : > { %v6951_v46 = vsub.f32 %v22353_v23, %v25629_v40 }
 0x4ca   : > { %17947 = vmatpush3.xpose.msra.mxu0 %v22308_v8  ;;  %17979 = vmatpush3.xpose.msra.mxu1 %v6931_v13  ;;  %v1184_v13 = vsel %vm552_vm0, %v490_v62, 0  ;;  %v7064_v8 = vand.u32 4294901760, %v7063_v58  ;;  %v7070_v39 = vsub.f32 %v22365_v47, %v25630_v44  ;;  %v24967_v62 = vand.u32 4294901760, %v22386_v38 }
 0x4cb   : > { %17948 = vmatprep.subr.mxu0 %v22310_v56  ;;  %17980 = vmatprep.subr.mxu1 %v7050_v19  ;;  %v22405_v19 = vsub.f32 %v1142_v52, %v22388_v1  ;;  %v22414_v27 = vand.u32 4294901760, %v1184_v13  ;;  %v1136_v58 = vsel %vm552_vm0, %v474_v20, 0  ;;  %v22419_v52 = vsub.f32 %v1187_v51, %v22392_v32 }
 0x4cc   : > { %v22423_v44 = vsub.f32 %v1139_v60, %v22410_v63  ;;  %v7071_v51 = vand.u32 4294901760, %v7070_v39 }
 0x4cd   : > { %v24970_v40 = vand.u32 4294901760, %v22405_v19  ;;  %v22437_v60 = vsub.f32 %v1184_v13, %v22414_v27 }
 0x4ce   : > { %17949 = vmatpush3.xpose.msra.mxu0 %v22331_v43  ;;  %17981 = vmatpush3.xpose.msra.mxu1 %v6938_v48  ;;  %v6952_v48 = vand.u32 4294901760, %v6951_v46  ;;  %25631 = vst [vmem:[#allocation20_spill] sm:$0xff] %v22423_v44  ;;  %v25632_v46 = vand.u32 4294901760, %v22396_v57  ;;  %v24974_v39 = vand.u32 4294901760, %v22423_v44 }
 0x4cf   : > { %17950 = vmatprep.subr.mxu0 %v22342_v4  ;;  %17982 = vmatprep.subr.mxu1 %v7057_v29  ;;  %v6958_v29 = vsub.f32 %v22386_v38, %v24967_v62  ;;  %v22428_v4 = vand.u32 4294901760, %v1136_v58 }
 0x4d0   : > { %v7077_v20 = vsub.f32 %v22396_v57, %v25632_v46 }
 0x4d1   : > { %v6959_v62 = vand.u32 4294901760, %v6958_v29  ;;  %v6972_v29 = vsub.f32 %v22423_v44, %v24974_v39  ;;  %v25645_v39 = vld [vmem:[#allocation15_spill] sm:$0xff] }
 0x4d2   : > { %17951 = vmatpush3.xpose.msra.mxu0 %v22362_v28  ;;  %17983 = vmatpush3.xpose.msra.mxu1 %v6945_v53  ;;  %v24971_v53 = vand.u32 4294901760, %v22419_v52  ;;  %v22441_v28 = vsub.f32 %v1136_v58, %v22428_v4  ;;  %v7078_v46 = vand.u32 4294901760, %v7077_v20 }
 0x4d3   : > { %17952 = vmatprep.subr.mxu0 %v22371_v24  ;;  %17984 = vmatprep.subr.mxu1 %v7064_v8  ;;  %v6965_v8 = vsub.f32 %v22405_v19, %v24970_v40 }
 0x4d4   : > { %25633 = vst [vmem:[#allocation18_spill] sm:$0xff] %v22441_v28  ;;  %v7084_v13 = vsub.f32 %v22419_v52, %v24971_v53  ;;  %v24972_v40 = vand.u32 4294901760, %v22441_v28  ;;  %v6973_v53 = vand.u32 4294901760, %v6972_v29  ;;  %v25637_v29 = vld [vmem:[#allocation12_spill] sm:$0xff] }
 0x4d5   : > { %v6966_v58 = vand.u32 4294901760, %v6965_v8 }
 0x4d6   : > { %17953 = vmatpush3.xpose.msra.mxu0 %v22388_v1  ;;  %17985 = vmatpush3.xpose.msra.mxu1 %v6952_v48  ;;  %v24973_v48 = vand.u32 4294901760, %v22437_v60 }
 0x4d7   : > { %17954 = vmatprep.subr.mxu0 %v22392_v32  ;;  %17986 = vmatprep.subr.mxu1 %v7071_v51  ;;  %v7085_v51 = vand.u32 4294901760, %v7084_v13  ;;  %v25634_v13 = vld [vmem:[#allocation33_spill] sm:$0xff] }
 0x4d8   : > { %v7091_v20 = vsub.f32 %v22437_v60, %v24973_v48  ;;  %v25644_v48 = vld [vmem:[#allocation8_spill] sm:$0xff] }
 0x4da   : > { %17955 = vmatpush3.xpose.msra.mxu0 %v22410_v63  ;;  %17987 = vmatpush3.xpose.msra.mxu1 %v6959_v62  ;;  %v6979_v62 = vsub.f32 %v22441_v28, %v24972_v40  ;;  %v7092_v8 = vand.u32 4294901760, %v7091_v20  ;;  %v25639_v20 = vld [vmem:[#allocation16_spill] sm:$0xff]  ;;  %v25643_v40 = vld [vmem:[#allocation11_spill] sm:$0xff] }
 0x4db   : > { %17956 = vmatprep.subr.mxu0 %v22414_v27  ;;  %17988 = vmatprep.subr.mxu1 %v7078_v46 }
 0x4dc   : > { %v6980_v46 = vand.u32 4294901760, %v6979_v62  ;;  %v25640_v62 = vld [vmem:[#allocation7_spill] sm:$0xff] }
 0x4de   : > { %17957 = vmatpush3.xpose.msra.mxu0 %v22428_v4  ;;  %17989 = vmatpush3.xpose.msra.mxu1 %v6966_v58  ;;  %v25636_v58 = vld [vmem:[#allocation26_spill] sm:$0xff] }
 0x4df   : > { %17990 = vmatprep.subr.mxu1 %v7085_v51  ;;  %17998 = vmatprep.subr.mxu0 %v22071_v54  ;;  %v25638_v51 = vld [vmem:[#allocation24_spill] sm:$0xff] }
 0x4e1   : > { %17959 = vmatmul.mubr.f32.vlgmr.msra.gmra.mxu0 %v25601_v22  ;;  %v25647_v22 = vld [vmem:[#allocation31_spill] sm:$0xff] }
 0x4e2   : > { %17991 = vmatpush3.xpose.msra.mxu1 %v6973_v53  ;;  %17999 = vmatpush3.xpose.msra.mxu0 %v22087_v30  ;;  %v25635_v53 = vld [vmem:[#allocation25_spill] sm:$0xff] }
 0x4e3   : > { %17992 = vmatprep.subr.mxu1 %v7092_v8  ;;  %18000 = vmatprep.subr.mxu0 %v22099_v42  ;;  %v25641_v8 = vld [vmem:[#allocation14_spill] sm:$0xff] }
 0x4e4   : > { %17960 = vmatprep.mubr.f32.mxu0 %v25634_v13 }
 0x4e5   : > { %17961 = vmatmul.mubr.f32.gmra.mxu0 %v25634_v13  ;;  %v25646_v13 = vld [vmem:[#allocation9_spill] sm:$0xff] }
 0x4e6   : > { %17993 = vmatpush3.xpose.msra.mxu1 %v6980_v46  ;;  %18001 = vmatpush3.xpose.msra.mxu0 %v22102_v41  ;;  %v25642_v46 = vld [vmem:[#allocation29_spill] sm:$0xff] }
 0x4e7   : > { %18002 = vmatprep.subr.mxu0 %v22116_v17  ;;  %18034 = vmatprep.subr.mxu1 %v22054_v5 }
 0x4e8   : > { %18030 = vmatprep.mubr.f32.mxu0 %v18864_v10 }
 0x4e9   : > { %17995 = vmatmul.mubr.f32.vlgmr.msra.gmra.mxu1 %v18630_v3 }
 0x4ea   : > { %18003 = vmatpush3.xpose.msra.mxu0 %v22128_v49  ;;  %18035 = vmatpush3.xpose.msra.mxu1 %v22067_v45 }
 0x4eb   : > { %18004 = vmatprep.subr.mxu0 %v22146_v12  ;;  %18036 = vmatprep.subr.mxu1 %v22078_v55 }
 0x4ec   : > { %17996 = vmatprep.mubr.f32.mxu1 %v25600_v50 }
 0x4ed   : > { %17997 = vmatmul.mubr.f32.gmra.mxu1 %v25600_v50  ;;  %v25648_v50 = vld [vmem:[#allocation23_spill] sm:$0xff] }
 0x4ee   : > { %18005 = vmatpush3.xpose.msra.mxu0 %v22155_v26  ;;  %18037 = vmatpush3.xpose.msra.mxu1 %v22080_v35 }
 0x4ef   : > { %18006 = vmatprep.subr.mxu0 %v22175_v16  ;;  %18038 = vmatprep.subr.mxu1 %v22089_v11 }
 0x4f0   : > { %18066 = vmatprep.mubr.f32.mxu1 %v18891_v33 }
 0x4f2   : > { %18007 = vmatpush3.xpose.msra.mxu0 %v22190_v6  ;;  %18039 = vmatpush3.xpose.msra.mxu1 %v22104_v59 }
 0x4f3   : > { %18008 = vmatprep.subr.mxu0 %v22195_v21  ;;  %18040 = vmatprep.subr.mxu1 %v22120_v18 }
 0x4f6   : > { %18009 = vmatpush3.xpose.msra.mxu0 %v22208_v61  ;;  %18041 = vmatpush3.xpose.msra.mxu1 %v22130_v31 }
 0x4f7   : > { %18010 = vmatprep.subr.mxu0 %v22227_v34  ;;  %18042 = vmatprep.subr.mxu1 %v22141_v2 }
 0x4fa   : > { %18011 = vmatpush3.xpose.msra.mxu0 %v22233_v15  ;;  %18043 = vmatpush3.xpose.msra.mxu1 %v22164_v7 }
 0x4fb   : > { %18012 = vmatprep.subr.mxu0 %v22240_v9  ;;  %18044 = vmatprep.subr.mxu1 %v22166_v37 }
 0x4fe   : > { %18013 = vmatpush3.xpose.msra.mxu0 %v22257_v0  ;;  %18045 = vmatpush3.xpose.msra.mxu1 %v22185_v36 }
 0x4ff   : > { %18014 = vmatprep.subr.mxu0 %v22276_v25  ;;  %18046 = vmatprep.subr.mxu1 %v25635_v53 }
 0x502   : > { %18015 = vmatpush3.xpose.msra.mxu0 %v22290_v14  ;;  %18047 = vmatpush3.xpose.msra.mxu1 %v25636_v58 }
 0x503   : > { %18016 = vmatprep.subr.mxu0 %v25637_v29  ;;  %18048 = vmatprep.subr.mxu1 %v25638_v51 }
 0x506   : > { %18017 = vmatpush3.xpose.msra.mxu0 %v25639_v20  ;;  %18049 = vmatpush3.xpose.msra.mxu1 %v25640_v62 }
 0x507   : > { %18018 = vmatprep.subr.mxu0 %v25641_v8  ;;  %18050 = vmatprep.subr.mxu1 %v25642_v46  ;;  %v25649_v8 = vld [vmem:[#allocation17_spill] sm:$0xff] }
 0x50a   : > { %18019 = vmatpush3.xpose.msra.mxu0 %v25643_v40  ;;  %18051 = vmatpush3.xpose.msra.mxu1 %v25644_v48 }
 0x50b   : > { %18020 = vmatprep.subr.mxu0 %v25645_v39  ;;  %18052 = vmatprep.subr.mxu1 %v25646_v13 }
 0x50e   : > { %18021 = vmatpush3.xpose.msra.mxu0 %v22353_v23  ;;  %18053 = vmatpush3.xpose.msra.mxu1 %v25647_v22  ;;  %v25650_v23 = vld [vmem:[#allocation6_spill] sm:$0xff] }
 0x50f   : > { %18022 = vmatprep.subr.mxu0 %v22365_v47  ;;  %18054 = vmatprep.subr.mxu1 %v25648_v50  ;;  %v25651_v47 = vld [vmem:[#allocation21_spill] sm:$0xff] }
 0x512   : > { %18023 = vmatpush3.xpose.msra.mxu0 %v22386_v38  ;;  %18055 = vmatpush3.xpose.msra.mxu1 %v25649_v8 }
 0x513   : > { %18024 = vmatprep.subr.mxu0 %v22396_v57  ;;  %18056 = vmatprep.subr.mxu1 %v22310_v56 }
 0x516   : > { %18025 = vmatpush3.xpose.msra.mxu0 %v22405_v19  ;;  %18057 = vmatpush3.xpose.msra.mxu1 %v22331_v43  ;;  %v25652_v43 = vand.u32 4294901760, %v22071_v54  ;;  %v25656_v54 = vand.u32 4294901760, %v22102_v41  ;;  %v25662_v41 = vand.u32 4294901760, %v22175_v16  ;;  %v537_v16 = vld [vmem:[%s18637_s21 + $0x7f8] sm:$0xff] }
 0x517   : > { %18026 = vmatprep.subr.mxu0 %v22419_v52  ;;  %18058 = vmatprep.subr.mxu1 %v25650_v23 }
 0x51a   : > { %18027 = vmatpush3.xpose.msra.mxu0 %v22423_v44  ;;  %18059 = vmatpush3.xpose.msra.mxu1 %v25651_v47  ;;  %v25653_v44 = vand.u32 4294901760, %v22087_v30  ;;  %v25654_v47 = vld [vmem:[#allocation30_spill] sm:$0xff]  ;;  %v25658_v30 = vand.u32 4294901760, %v22128_v49  ;;  %v25670_v49 = vand.u32 4294901760, %v22276_v25 }
 0x51b   : > { %18028 = vmatprep.subr.mxu0 %v22437_v60  ;;  %18060 = vmatprep.subr.mxu1 %v22371_v24  ;;  %v25674_v25 = vld [vmem:[#allocation14_spill] sm:$0xff] }
 0x51e   : > { %18029 = vmatpush3.xpose.msra.mxu0 %v22441_v28  ;;  %18061 = vmatpush3.xpose.msra.mxu1 %v22388_v1  ;;  %v25655_v28 = vand.u32 4294901760, %v22099_v42  ;;  %v25659_v42 = vld [vmem:[#allocation32_spill] sm:$0xff] }
 0x51f   : > { %18062 = vmatprep.subr.mxu1 %v22392_v32  ;;  %18070 = vmatprep.subr.mxu0 %v25652_v43  ;;  %v25657_v43 = vand.u32 4294901760, %v22116_v17  ;;  %v25665_v17 = vand.u32 4294901760, %v22208_v61  ;;  %v1325_v61 = vsel %vm552_vm0, %v537_v16, 0 }
 0x521   : > { %18031 = vmatmul.mubr.f32.vlgmr.msra.gmra.mxu0 %v18864_v10 }
 0x522   : > { %18063 = vmatpush3.xpose.msra.mxu1 %v22410_v63  ;;  %18071 = vmatpush3.xpose.msra.mxu0 %v25653_v44  ;;  %v22627_v44 = vpop.f32.mrf.mxu1 }
 0x523   : > { %18032 = vmatprep.mubr.f32.mxu0 %v25654_v47  ;;  %18064 = vmatprep.subr.mxu1 %v22414_v27  ;;  %25684 = vst [vmem:[#allocation25_spill] sm:$0xff] %v22627_v44 }
 0x524   : > { %18072 = vmatprep.subr.mxu0 %v25655_v28  ;;  %v25660_v28 = vand.u32 4294901760, %v22146_v12  ;;  %v25673_v12 = vand.u32 4294901760, %v25639_v20 }
 0x525   : > { %18033 = vmatmul.mubr.f32.gmra.mxu0 %v25654_v47 }
 0x526   : > { %18065 = vmatpush3.xpose.msra.mxu1 %v22428_v4  ;;  %18073 = vmatpush3.xpose.msra.mxu0 %v25656_v54 }
 0x527   : > { %18074 = vmatprep.subr.mxu0 %v25657_v43  ;;  %18106 = vmatprep.subr.mxu1 %v22054_v5  ;;  %v25661_v5 = vand.u32 4294901760, %v22155_v26  ;;  %v25675_v26 = vand.u32 4294901760, %v25674_v25 }
 0x528   : > { %18102 = vmatprep.mubr.f32.mxu0 %v18630_v3 }
 0x529   : > { %18067 = vmatmul.mubr.f32.vlgmr.msra.gmra.mxu1 %v18891_v33 }
 0x52a   : > { %18075 = vmatpush3.xpose.msra.mxu0 %v25658_v30  ;;  %18107 = vmatpush3.xpose.msra.mxu1 %v22067_v45  ;;  %v25663_v45 = vand.u32 4294901760, %v22190_v6  ;;  %v25680_v6 = vld [vmem:[#allocation19_spill] sm:$0xff]  ;;  %v534_v30 = vld [vmem:[%s18637_s21 + $0x7e0] sm:$0xff] }
 0x52b   : > { %18068 = vmatprep.mubr.f32.mxu1 %v25659_v42  ;;  %18076 = vmatprep.subr.mxu0 %v25660_v28  ;;  %v25693_v28 = vld [vmem:[#allocation20_spill] sm:$0xff] }
 0x52c   : > { %18108 = vmatprep.subr.mxu1 %v22078_v55  ;;  %v25664_v55 = vand.u32 4294901760, %v22195_v21  ;;  %v25681_v21 = vand.u32 4294901760, %v25680_v6  ;;  %v517_v6 = vld [vmem:[%s18637_s21 + $0x758] sm:$0xff] }
 0x52d   : > { %18069 = vmatmul.mubr.f32.gmra.mxu1 %v25659_v42  ;;  %v525_v42 = vld [vmem:[%s18637_s21 + $0x798] sm:$0xff] }
 0x52e   : > { %18077 = vmatpush3.xpose.msra.mxu0 %v25661_v5  ;;  %18109 = vmatpush3.xpose.msra.mxu1 %v22080_v35  ;;  %v25666_v35 = vand.u32 4294901760, %v22227_v34  ;;  %v521_v34 = vld [vmem:[%s18637_s21 + $0x778] sm:$0xff]  ;;  %v25694_v5 = vand.u32 4294901760, %v25693_v28  ;;  %v531_v28 = vld [vmem:[%s18637_s21 + $0x7c8] sm:$0xff] }
 0x52f   : > { %18078 = vmatprep.subr.mxu0 %v25662_v41  ;;  %18110 = vmatprep.subr.mxu1 %v22089_v11  ;;  %v25667_v11 = vand.u32 4294901760, %v22233_v15  ;;  %v22619_v15 = vpop.f32.mrf.mxu0  ;;  %v25695_v41 = vld [vmem:[#allocation21_spill] sm:$0xff] }
 0x530   : > { %18138 = vmatprep.mubr.f32.mxu1 %v18630_v3  ;;  %25682 = vst [vmem:[#allocation13_spill] sm:$0xff] %v22619_v15 }
 0x532   : > { %18079 = vmatpush3.xpose.msra.mxu0 %v25663_v45  ;;  %18111 = vmatpush3.xpose.msra.mxu1 %v22104_v59  ;;  %v25668_v59 = vand.u32 4294901760, %v22240_v9  ;;  %v25683_v9 = vand.u32 4294901760, %v22386_v38 }
 0x533   : > { %18080 = vmatprep.subr.mxu0 %v25664_v55  ;;  %18112 = vmatprep.subr.mxu1 %v22120_v18  ;;  %v25669_v18 = vand.u32 4294901760, %v22257_v0 }
 0x536   : > { %18081 = vmatpush3.xpose.msra.mxu0 %v25665_v17  ;;  %18113 = vmatpush3.xpose.msra.mxu1 %v22130_v31  ;;  %v25671_v31 = vand.u32 4294901760, %v22290_v14  ;;  %v22624_v14 = vand.u32 4294901760, %v1325_v61 }
 0x537   : > { %18082 = vmatprep.subr.mxu0 %v25666_v35  ;;  %18114 = vmatprep.subr.mxu1 %v22141_v2  ;;  %v25672_v2 = vand.u32 4294901760, %v25637_v29  ;;  %v25697_v35 = vand.u32 4294901760, %v22437_v60  ;;  %v25699_v60 = vld [vmem:[#allocation18_spill] sm:$0xff] }
 0x538   : > { %v25700_v25 = vand.u32 4294901760, %v25699_v60  ;;  %v515_v60 = vld [vmem:[%s18637_s21 + $0x748] sm:$0xff] }
 0x53a   : > { %18083 = vmatpush3.xpose.msra.mxu0 %v25667_v11  ;;  %18115 = vmatpush3.xpose.msra.mxu1 %v22164_v7  ;;  %v25676_v7 = vand.u32 4294901760, %v25643_v40  ;;  %v536_v40 = vld [vmem:[%s18637_s21 + $0x7f0] sm:$0xff]  ;;  %v518_v11 = vld [vmem:[%s18637_s21 + $0x760] sm:$0xff] }
 0x53b   : > { %18084 = vmatprep.subr.mxu0 %v25668_v59  ;;  %18116 = vmatprep.subr.mxu1 %v22166_v37  ;;  %v25677_v37 = vand.u32 4294901760, %v25645_v39  ;;  %v520_v39 = vld [vmem:[%s18637_s21 + $0x770] sm:$0xff]  ;;  %v1322_v38 = vsel %vm552_vm0, %v536_v40, 0  ;;  %v1316_v59 = vsel %vm552_vm0, %v534_v30, 0 }
 0x53e   : > { %18085 = vmatpush3.xpose.msra.mxu0 %v25669_v18  ;;  %18117 = vmatpush3.xpose.msra.mxu1 %v22185_v36  ;;  %v25678_v36 = vld [vmem:[#allocation22_spill] sm:$0xff] }
 0x53f   : > { %18086 = vmatprep.subr.mxu0 %v25670_v49  ;;  %18118 = vmatprep.subr.mxu1 %v25635_v53  ;;  %v25679_v0 = vand.u32 4294901760, %v25678_v36  ;;  %v25687_v53 = vand.u32 4294901760, %v22405_v19  ;;  %v22706_v36 = vand.u32 4294901760, %v1316_v59 }
 0x542   : > { %18087 = vmatpush3.xpose.msra.mxu0 %v25671_v31  ;;  %18119 = vmatpush3.xpose.msra.mxu1 %v25636_v58  ;;  %v25688_v58 = vld [vmem:[#allocation10_spill] sm:$0xff] }
 0x543   : > { %18088 = vmatprep.subr.mxu0 %v25672_v2  ;;  %18120 = vmatprep.subr.mxu1 %v25638_v51  ;;  %v22647_v51 = vpop.f32.mrf.mxu1 }
 0x544   : > { %25689 = vst [vmem:[#allocation12_spill] sm:$0xff] %v22647_v51 }
 0x545   : > { %v22658_v54 = vpop.f32.mrf.mxu1 }
 0x546   : > { %18089 = vmatpush3.xpose.msra.mxu0 %v25673_v12  ;;  %18121 = vmatpush3.xpose.msra.mxu1 %v25640_v62  ;;  %v25691_v62 = vand.u32 4294901760, %v22419_v52  ;;  %25692 = vst [vmem:[#allocation16_spill] sm:$0xff] %v22658_v54  ;;  %v533_v12 = vld [vmem:[%s18637_s21 + $0x7d8] sm:$0xff] }
 0x547   : > { %18090 = vmatprep.subr.mxu0 %v25675_v26  ;;  %18122 = vmatprep.subr.mxu1 %v25642_v46  ;;  %v22656_v46 = vand.u32 4294901760, %v1322_v38  ;;  %v22683_v49 = vpop.f32.mrf.mxu1 }
 0x548   : > { %25698 = vst [vmem:[#allocation29_spill] sm:$0xff] %v22683_v49 }
 0x549   : > { %v22681_v18 = vsub.f32 %v1322_v38, %v22656_v46 }
 0x54a   : > { %18091 = vmatpush3.xpose.msra.mxu0 %v25676_v7  ;;  %18123 = vmatpush3.xpose.msra.mxu1 %v25644_v48  ;;  %v535_v48 = vld [vmem:[%s18637_s21 + $0x7e8] sm:$0xff]  ;;  %v1268_v7 = vsel %vm552_vm0, %v518_v11, 0 }
 0x54b   : > { %18092 = vmatprep.subr.mxu0 %v25677_v37  ;;  %18124 = vmatprep.subr.mxu1 %v25646_v13  ;;  %v22635_v13 = vpop.f32.mrf.mxu0  ;;  %v1319_v19 = vsel %vm552_vm0, %v535_v48, 0  ;;  %v25704_v48 = vld [vmem:[#allocation28_spill] sm:$0xff] }
 0x54c   : > { %25686 = vst [vmem:[#allocation26_spill] sm:$0xff] %v22635_v13 }
 0x54d   : > { %v22649_v20 = vpop.f32.mrf.mxu0 }
 0x54e   : > { %18093 = vmatpush3.xpose.msra.mxu0 %v25679_v0  ;;  %18125 = vmatpush3.xpose.msra.mxu1 %v25647_v22  ;;  %v25685_v22 = vand.u32 4294901760, %v22396_v57  ;;  %v1274_v57 = vsel %vm552_vm0, %v520_v39, 0  ;;  %25690 = vst [vmem:[#allocation24_spill] sm:$0xff] %v22649_v20  ;;  %v1313_v0 = vsel %vm552_vm0, %v533_v12, 0 }
 0x54f   : > { %18094 = vmatprep.subr.mxu0 %v25681_v21  ;;  %18126 = vmatprep.subr.mxu1 %v25648_v50  ;;  %v1277_v50 = vsel %vm552_vm0, %v521_v34, 0  ;;  %v22660_v43 = vand.u32 4294901760, %v1274_v57  ;;  %v22673_v17 = vpop.f32.mrf.mxu0  ;;  %v532_v21 = vld [vmem:[%s18637_s21 + $0x7d0] sm:$0xff]  ;;  %v22731_v38 = vand.u32 4294901760, %v1313_v0 }
 0x550   : > { %v22641_v29 = vand.u32 4294901760, %v1277_v50  ;;  %25696 = vst [vmem:[#allocation7_spill] sm:$0xff] %v22673_v17  ;;  %v510_v17 = vld [vmem:[%s18637_s21 + $0x720] sm:$0xff] }
 0x551   : > { %v22686_v31 = vsub.f32 %v1274_v57, %v22660_v43  ;;  %v22702_v16 = vpop.f32.mrf.mxu0  ;;  %v516_v57 = vld [vmem:[%s18637_s21 + $0x750] sm:$0xff]  ;;  %v22769_v12 = vsub.f32 %v1313_v0, %v22731_v38  ;;  %v529_v0 = vld [vmem:[%s18637_s21 + $0x7b8] sm:$0xff] }
 0x552   : > { %18095 = vmatpush3.xpose.msra.mxu0 %v25683_v9  ;;  %18127 = vmatpush3.xpose.msra.mxu1 %v25649_v8  ;;  %v519_v8 = vld [vmem:[%s18637_s21 + $0x768] sm:$0xff]  ;;  %v22667_v52 = vsub.f32 %v1277_v50, %v22641_v29  ;;  %25701 = vst [vmem:[#allocation11_spill] sm:$0xff] %v22702_v16  ;;  %v22718_v9 = vand.u32 4294901760, %v1268_v7 }
 0x553   : > { %18096 = vmatprep.subr.mxu0 %v25685_v22  ;;  %18128 = vmatprep.subr.mxu1 %v22310_v56  ;;  %v22645_v56 = vsub.f32 %v1325_v61, %v22624_v14  ;;  %v1271_v55 = vsel %vm552_vm0, %v519_v8, 0  ;;  %v22712_v61 = vpop.f32.mrf.mxu1  ;;  %v22727_v39 = vpop.f32.mrf.mxu0  ;;  %v25717_v16 = vand.u32 4294901760, %v22769_v12 }
 0x554   : > { %v22688_v2 = vand.u32 4294901760, %v1271_v55  ;;  %v24987_v26 = vand.u32 4294901760, %v22667_v52  ;;  %25702 = vst [vmem:[#allocation8_spill] sm:$0xff] %v22712_v61  ;;  %25703 = vst [vmem:[#allocation15_spill] sm:$0xff] %v22727_v39 }
 0x555   : > { %v24988_v45 = vand.u32 4294901760, %v22645_v56  ;;  %v22761_v11 = vpop.f32.mrf.mxu0 }
 0x556   : > { %18097 = vmatpush3.xpose.msra.mxu0 %v25687_v53  ;;  %18129 = vmatpush3.xpose.msra.mxu1 %v25688_v58  ;;  %v22716_v34 = vsub.f32 %v1271_v55, %v22688_v2  ;;  %v7778_v22 = vsub.f32 %v22667_v52, %v24987_v26  ;;  %v1310_v53 = vsel %vm552_vm0, %v532_v21, 0  ;;  %v22736_v58 = vsub.f32 %v1316_v59, %v22706_v36 }
 0x557   : > { %18098 = vmatprep.subr.mxu0 %v25691_v62  ;;  %18130 = vmatprep.subr.mxu1 %v25650_v23  ;;  %v22669_v23 = vand.u32 4294901760, %v1319_v19  ;;  %v22758_v55 = vand.u32 4294901760, %v1310_v53  ;;  %25706 = vst [vmem:[#allocation31_spill] sm:$0xff] %v22761_v11 }
 0x558   : > { %v24985_v30 = vand.u32 4294901760, %v22716_v34 }
 0x559   : > { %v22700_v37 = vsub.f32 %v1319_v19, %v22669_v23  ;;  %v22743_v19 = vpop.f32.mrf.mxu1 }
 0x55a   : > { %18099 = vmatpush3.xpose.msra.mxu0 %v25694_v5  ;;  %18131 = vmatpush3.xpose.msra.mxu1 %v25695_v41  ;;  %25705 = vst [vmem:[#allocation9_spill] sm:$0xff] %v22743_v19  ;;  %v7779_v5 = vand.u32 4294901760, %v7778_v22  ;;  %v7792_v22 = vsub.f32 %v22716_v34, %v24985_v30 }
 0x55b   : > { %18100 = vmatprep.subr.mxu0 %v25697_v35  ;;  %18132 = vmatprep.subr.mxu1 %v22371_v24  ;;  %v7890_v24 = vsub.f32 %v22645_v56, %v24988_v45  ;;  %v24983_v50 = vand.u32 4294901760, %v22700_v37  ;;  %v1262_v35 = vsel %vm552_vm0, %v516_v57, 0  ;;  %v22775_v21 = vpop.f32.mrf.mxu1 }
 0x55c   : > { %25708 = vst [vmem:[#allocation23_spill] sm:$0xff] %v22775_v21  ;;  %v22781_v57 = vand.u32 4294901760, %v1262_v35  ;;  %v7793_v26 = vand.u32 4294901760, %v7792_v22 }
 0x55d   : > { %v7891_v40 = vand.u32 4294901760, %v7890_v24  ;;  %v7904_v59 = vsub.f32 %v22700_v37, %v24983_v50 }
 0x55e   : > { %18101 = vmatpush3.xpose.msra.mxu0 %v25700_v25  ;;  %18133 = vmatpush3.xpose.msra.mxu1 %v22388_v1  ;;  %v24986_v1 = vand.u32 4294901760, %v22681_v18  ;;  %v530_v25 = vld [vmem:[%s18637_s21 + $0x7c0] sm:$0xff]  ;;  %v22810_v45 = vsub.f32 %v1262_v35, %v22781_v57 }
 0x55f   : > { %18134 = vmatprep.subr.mxu1 %v22392_v32  ;;  %18142 = vmatprep.subr.mxu0 %v22624_v14  ;;  %v24984_v32 = vand.u32 4294901760, %v22686_v31  ;;  %v1304_v50 = vsel %vm552_vm0, %v530_v25, 0  ;;  %v7905_v30 = vand.u32 4294901760, %v7904_v59  ;;  %v514_v25 = vld [vmem:[%s18637_s21 + $0x740] sm:$0xff] }
 0x560   : > { %v7897_v62 = vsub.f32 %v22681_v18, %v24986_v1  ;;  %v1256_v35 = vsel %vm552_vm0, %v514_v25, 0 }
 0x561   : > { %18103 = vmatmul.mubr.f32.vlgmr.msra.gmra.mxu0 %v18630_v3  ;;  %v7785_v8 = vsub.f32 %v22686_v31, %v24984_v32  ;;  %v22793_v32 = vpop.f32.mrf.mxu0 }
 0x562   : > { %18135 = vmatpush3.xpose.msra.mxu1 %v22410_v63  ;;  %18143 = vmatpush3.xpose.msra.mxu0 %v22641_v29  ;;  %v1265_v63 = vsel %vm552_vm0, %v517_v6, 0  ;;  %v7898_v24 = vand.u32 4294901760, %v7897_v62  ;;  %v25707_v6 = vld [vmem:[#allocation27_spill] sm:$0xff]  ;;  %25709 = vst [vmem:[#allocation17_spill] sm:$0xff] %v22793_v32 }
 0x563   : > { %18104 = vmatprep.mubr.f32.mxu0 %v25704_v48  ;;  %18136 = vmatprep.subr.mxu1 %v22414_v27  ;;  %v22747_v27 = vsub.f32 %v1268_v7, %v22718_v9  ;;  %v22756_v41 = vand.u32 4294901760, %v1265_v63  ;;  %v1307_v7 = vsel %vm552_vm0, %v531_v28, 0  ;;  %v1259_v28 = vsel %vm552_vm0, %v515_v60, 0  ;;  %v22806_v1 = vpop.f32.mrf.mxu0 }
 0x564   : > { %18144 = vmatprep.subr.mxu0 %v22656_v46  ;;  %25712 = vst [vmem:[#allocation22_spill] sm:$0xff] %v22806_v1  ;;  %v22812_v59 = vand.u32 4294901760, %v1259_v28  ;;  %v513_v1 = vld [vmem:[%s18637_s21 + $0x738] sm:$0xff] }
 0x565   : > { %18105 = vmatmul.mubr.f32.gmra.mxu0 %v25704_v48  ;;  %v22786_v62 = vsub.f32 %v1265_v63, %v22756_v41  ;;  %v22836_v22 = vpop.f32.mrf.mxu0 }
 0x566   : > { %18137 = vmatpush3.xpose.msra.mxu1 %v22428_v4  ;;  %18145 = vmatpush3.xpose.msra.mxu0 %v22660_v43  ;;  %v24989_v4 = vand.u32 4294901760, %v22736_v58  ;;  %25713 = vst [vmem:[#allocation19_spill] sm:$0xff] %v22812_v59  ;;  %25718 = vst [vmem:[#allocation21_spill] sm:$0xff] %v22836_v22  ;;  %v22839_v25 = vsub.f32 %v1259_v28, %v22812_v59 }
 0x567   : > { %18146 = vmatprep.subr.mxu0 %v22669_v23  ;;  %18178 = vmatprep.subr.mxu1 %v7891_v40  ;;  %v7786_v40 = vand.u32 4294901760, %v7785_v8  ;;  %v22791_v8 = vsub.f32 %v1310_v53, %v22758_v55  ;;  %v22804_v53 = vpop.f32.mrf.mxu1  ;;  %v22864_v11 = vpop.f32.mrf.mxu0 }
 0x568   : > { %18174 = vmatprep.mubr.f32.mxu0 %v25707_v6  ;;  %v7911_v63 = vsub.f32 %v22736_v58, %v24989_v4  ;;  %25711 = vst [vmem:[#allocation14_spill] sm:$0xff] %v22804_v53  ;;  %v22814_v4 = vand.u32 4294901760, %v1304_v50  ;;  %25724 = vst [vmem:[#allocation35_spill] sm:$0xff] %v22864_v11 }
 0x569   : > { %18139 = vmatmul.mubr.f32.vlgmr.msra.gmra.mxu1 %v18630_v3  ;;  %v22824_v61 = vpop.f32.mrf.mxu1  ;;  %v25721_v28 = vand.u32 4294901760, %v22791_v8  ;;  %v22893_v13 = vpop.f32.mrf.mxu0 }
 0x56a   : > { %18147 = vmatpush3.xpose.msra.mxu0 %v22688_v2  ;;  %18179 = vmatpush3.xpose.msra.mxu1 %v7779_v5  ;;  %v22800_v5 = vand.u32 4294901760, %v1307_v7  ;;  %25714 = vst [vmem:[#allocation10_spill] sm:$0xff] %v22814_v4  ;;  %25716 = vst [vmem:[#allocation20_spill] sm:$0xff] %v22824_v61  ;;  %v7912_v19 = vand.u32 4294901760, %v7911_v63  ;;  %v22841_v61 = vand.u32 4294901760, %v1256_v35  ;;  %v528_v63 = vld [vmem:[%s18637_s21 + $0x7b0] sm:$0xff] }
 0x56b   : > { %18140 = vmatprep.mubr.f32.mxu1 %v25704_v48  ;;  %18148 = vmatprep.subr.mxu0 %v22706_v36  ;;  %v7925_v44 = vsub.f32 %v22791_v8, %v25721_v28  ;;  %v22855_v21 = vpop.f32.mrf.mxu1  ;;  %v1298_v51 = vsel %vm552_vm0, %v528_v63, 0  ;;  %v25725_v28 = vand.u32 4294901760, %v22810_v45  ;;  %25730 = vst [vmem:[#allocation39_spill] sm:$0xff] %v22893_v13  ;;  %v22912_v20 = vpop.f32.mrf.mxu0 }
 0x56c   : > { %25710 = vst [vmem:[#allocation6_spill] sm:$0xff] %v22800_v5  ;;  %18180 = vmatprep.subr.mxu1 %v7898_v24  ;;  %v25715_v24 = vand.u32 4294901760, %v22747_v27  ;;  %v22831_v39 = vsub.f32 %v1307_v7, %v22800_v5  ;;  %25719 = vst [vmem:[#allocation18_spill] sm:$0xff] %v22841_v61  ;;  %v22867_v53 = vsub.f32 %v1256_v35, %v22841_v61  ;;  %v22884_v15 = vand.u32 4294901760, %v1298_v51 }
 0x56d   : > { %18141 = vmatmul.mubr.f32.gmra.mxu1 %v25704_v48  ;;  %25722 = vst [vmem:[#allocation27_spill] sm:$0xff] %v22855_v21  ;;  %v7813_v21 = vsub.f32 %v22810_v45, %v25725_v28  ;;  %v7926_v63 = vand.u32 4294901760, %v7925_v44  ;;  %v22878_v35 = vpop.f32.mrf.mxu1  ;;  %v526_v44 = vld [vmem:[%s18637_s21 + $0x7a0] sm:$0xff]  ;;  %25736 = vst [vmem:[#allocation43_spill] sm:$0xff] %v22912_v20 }
 0x56e   : > { %18149 = vmatpush3.xpose.msra.mxu0 %v22718_v9  ;;  %18181 = vmatpush3.xpose.msra.mxu1 %v7786_v40  ;;  %v7799_v60 = vsub.f32 %v22747_v27, %v25715_v24  ;;  %v7918_v40 = vsub.f32 %v22769_v12, %v25717_v16  ;;  %v1301_v24 = vsel %vm552_vm0, %v529_v0, 0  ;;  %v22846_v16 = vsub.f32 %v1304_v50, %v22814_v4 }
 0x56f   : > { %18150 = vmatprep.subr.mxu0 %v22731_v38  ;;  %18182 = vmatprep.subr.mxu1 %v7905_v30  ;;  %v25720_v0 = vand.u32 4294901760, %v22786_v62  ;;  %v22858_v30 = vand.u32 4294901760, %v1301_v24  ;;  %25727 = vst [vmem:[#allocation37_spill] sm:$0xff] %v22878_v35  ;;  %v25728_v28 = vand.u32 4294901760, %v22831_v39  ;;  %25729 = vst [vmem:[#allocation38_spill] sm:$0xff] %v22884_v15  ;;  %v7814_v35 = vand.u32 4294901760, %v7813_v21  ;;  %v22910_v13 = vpop.f32.mrf.mxu1 }
 0x570   : > { %18210 = vmatprep.mubr.f32.mxu1 %v18630_v3  ;;  %v7800_v7 = vand.u32 4294901760, %v7799_v60  ;;  %v7919_v50 = vand.u32 4294901760, %v7918_v40  ;;  %v1253_v60 = vsel %vm552_vm0, %v513_v1, 0  ;;  %25735 = vst [vmem:[#allocation42_spill] sm:$0xff] %v22910_v13  ;;  %v25739_v13 = vand.u32 4294901760, %v22867_v53 }
 0x571   : > { %v7806_v22 = vsub.f32 %v22786_v62, %v25720_v0  ;;  %25723 = vst [vmem:[#allocation34_spill] sm:$0xff] %v22858_v30  ;;  %v512_v0 = vld [vmem:[%s18637_s21 + $0x730] sm:$0xff]  ;;  %v22876_v11 = vand.u32 4294901760, %v1253_v60  ;;  %v22888_v32 = vsub.f32 %v1301_v24, %v22858_v30 }
 0x572   : > { %18151 = vmatpush3.xpose.msra.mxu0 %v22756_v41  ;;  %18183 = vmatpush3.xpose.msra.mxu1 %v7793_v26  ;;  %v527_v26 = vld [vmem:[%s18637_s21 + $0x7a8] sm:$0xff]  ;;  %v1250_v40 = vsel %vm552_vm0, %v512_v0, 0  ;;  %v7827_v20 = vsub.f32 %v22867_v53, %v25739_v13 }
 0x573   : > { %18152 = vmatprep.subr.mxu0 %v22758_v55  ;;  %18184 = vmatprep.subr.mxu1 %v7912_v19  ;;  %v7807_v1 = vand.u32 4294901760, %v7806_v22  ;;  %25726 = vst [vmem:[#allocation36_spill] sm:$0xff] %v22876_v11  ;;  %v7932_v19 = vsub.f32 %v22831_v39, %v25728_v28  ;;  %v511_v22 = vld [vmem:[%s18637_s21 + $0x728] sm:$0xff]  ;;  %v25732_v28 = vand.u32 4294901760, %v22846_v16  ;;  %v22904_v24 = vsub.f32 %v1253_v60, %v22876_v11 }
 0x574   : > { %v1247_v21 = vsel %vm552_vm0, %v511_v22, 0  ;;  %v22919_v60 = vsub.f32 %v1298_v51, %v22884_v15  ;;  %v22923_v22 = vpop.f32.mrf.mxu1  ;;  %v25744_v13 = vand.u32 4294901760, %v22888_v32 }
 0x575   : > { %v7939_v49 = vsub.f32 %v22846_v16, %v25732_v28  ;;  %25733 = vst [vmem:[#allocation40_spill] sm:$0xff] %v22904_v24  ;;  %v7933_v28 = vand.u32 4294901760, %v7932_v19  ;;  %25738 = vst [vmem:[#allocation45_spill] sm:$0xff] %v22923_v22  ;;  %v22928_v47 = vand.u32 4294901760, %v1247_v21  ;;  %v22938_v22 = vpop.f32.mrf.mxu0 }
 0x576   : > { %18153 = vmatpush3.xpose.msra.mxu0 %v22781_v57  ;;  %18185 = vmatpush3.xpose.msra.mxu1 %v7800_v7  ;;  %v1295_v7 = vsel %vm552_vm0, %v527_v26, 0  ;;  %v22906_v26 = vand.u32 4294901760, %v1250_v40  ;;  %25743 = vst [vmem:[#allocation49_spill] sm:$0xff] %v22938_v22 }
 0x577   : > { %18154 = vmatprep.subr.mxu0 %v22800_v5  ;;  %18186 = vmatprep.subr.mxu1 %v7919_v50  ;;  %v25731_v50 = vand.u32 4294901760, %v22839_v25  ;;  %v22915_v0 = vand.u32 4294901760, %v1295_v7  ;;  %25740 = vst [vmem:[#allocation46_spill] sm:$0xff] %v22928_v47  ;;  %v22955_v22 = vsub.f32 %v1247_v21, %v22928_v47 }
 0x578   : > { %25734 = vst [vmem:[#allocation41_spill] sm:$0xff] %v22906_v26  ;;  %v22934_v51 = vsub.f32 %v1250_v40, %v22906_v26 }
 0x579   : > { %v7820_v54 = vsub.f32 %v22839_v25, %v25731_v50  ;;  %v1292_v50 = vsel %vm552_vm0, %v526_v44, 0  ;;  %25737 = vst [vmem:[#allocation44_spill] sm:$0xff] %v22915_v0  ;;  %v22947_v40 = vsub.f32 %v1295_v7, %v22915_v0  ;;  %25748 = vst [vmem:[#allocation53_spill] sm:$0xff] %v22955_v22  ;;  %v25750_v7 = vand.u32 4294901760, %v22904_v24 }
 0x57a   : > { %18155 = vmatpush3.xpose.msra.mxu0 %v22812_v59  ;;  %18187 = vmatpush3.xpose.msra.mxu1 %v7807_v1  ;;  %v22930_v19 = vand.u32 4294901760, %v1292_v50  ;;  %25742 = vst [vmem:[#allocation48_spill] sm:$0xff] %v22934_v51  ;;  %v22950_v1 = vpop.f32.mrf.mxu1  ;;  %v25753_v59 = vand.u32 4294901760, %v22919_v60 }
 0x57b   : > { %18156 = vmatprep.subr.mxu0 %v22814_v4  ;;  %18188 = vmatprep.subr.mxu1 %v7926_v63  ;;  %v7821_v44 = vand.u32 4294901760, %v7820_v54  ;;  %v7940_v63 = vand.u32 4294901760, %v7939_v49  ;;  %v1244_v54 = vsel %vm552_vm0, %v510_v17, 0  ;;  %v7946_v4 = vsub.f32 %v22888_v32, %v25744_v13  ;;  %25745 = vst [vmem:[#allocation50_spill] sm:$0xff] %v22947_v40  ;;  %25746 = vst [vmem:[#allocation51_spill] sm:$0xff] %v22950_v1  ;;  %v22952_v17 = vpop.f32.mrf.mxu0 }
 0x57c   : > { %25741 = vst [vmem:[#allocation47_spill] sm:$0xff] %v22930_v19  ;;  %v1289_v49 = vsel %vm552_vm0, %v525_v42, 0  ;;  %25747 = vst [vmem:[#allocation52_spill] sm:$0xff] %v22952_v17  ;;  %v22961_v13 = vsub.f32 %v1292_v50, %v22930_v19  ;;  %v7828_v42 = vand.u32 4294901760, %v7827_v20  ;;  %v22970_v17 = vpop.f32.mrf.mxu1 }
 0x57d   : > { %v22968_v21 = vand.u32 4294901760, %v1289_v49  ;;  %25752 = vst [vmem:[#allocation56_spill] sm:$0xff] %v22970_v17  ;;  %v7947_v50 = vand.u32 4294901760, %v7946_v4  ;;  %v22980_v1 = vpop.f32.mrf.mxu0  ;;  %v25758_v17 = vand.u32 4294901760, %v22947_v40 }
 0x57e   : > { %18157 = vmatpush3.xpose.msra.mxu0 %v22841_v61  ;;  %18189 = vmatpush3.xpose.msra.mxu1 %v7814_v35  ;;  %v509_v61 = vld [vmem:[%s18637_s21 + $0x718] sm:$0xff]  ;;  %25749 = vst [vmem:[#allocation54_spill] sm:$0xff] %v22961_v13  ;;  %v7834_v35 = vsub.f32 %v22904_v24, %v25750_v7  ;;  %v508_v24 = vld [vmem:[%s18637_s21 + $0x710] sm:$0xff]  ;;  %25754 = vst [vmem:[#allocation57_spill] sm:$0xff] %v22980_v1  ;;  %v22997_v1 = vpop.f32.mrf.mxu1 }
 0x57f   : > { %18158 = vmatprep.subr.mxu0 %v22858_v30  ;;  %18190 = vmatprep.subr.mxu1 %v7933_v28  ;;  %v22957_v28 = vand.u32 4294901760, %v1244_v54  ;;  %v524_v30 = vld [vmem:[%s18637_s21 + $0x790] sm:$0xff]  ;;  %25751 = vst [vmem:[#allocation55_spill] sm:$0xff] %v22968_v21  ;;  %25757 = vst [vmem:[#allocation59_spill] sm:$0xff] %v22997_v1 }
 0x580   : > { %v1286_v7 = vsel %vm552_vm0, %v524_v30, 0 }
 0x581   : > { %v22983_v5 = vsub.f32 %v1244_v54, %v22957_v28  ;;  %v22995_v54 = vsub.f32 %v1289_v49, %v22968_v21  ;;  %v25761_v49 = vand.u32 4294901760, %v22955_v22 }
 0x582   : > { %18159 = vmatpush3.xpose.msra.mxu0 %v22876_v11  ;;  %18191 = vmatpush3.xpose.msra.mxu1 %v7821_v44  ;;  %v7953_v44 = vsub.f32 %v22919_v60, %v25753_v59  ;;  %v1241_v11 = vsel %vm552_vm0, %v509_v61, 0  ;;  %v7835_v59 = vand.u32 4294901760, %v7834_v35  ;;  %v25755_v61 = vand.u32 4294901760, %v22934_v51 }
 0x583   : > { %18160 = vmatprep.subr.mxu0 %v22884_v15  ;;  %18192 = vmatprep.subr.mxu1 %v7940_v63  ;;  %v523_v63 = vld [vmem:[%s18637_s21 + $0x788] sm:$0xff]  ;;  %v22992_v20 = vand.u32 4294901760, %v1241_v11  ;;  %v7960_v35 = vsub.f32 %v22947_v40, %v25758_v17  ;;  %v7848_v1 = vsub.f32 %v22955_v22, %v25761_v49  ;;  %v522_v17 = vld [vmem:[%s18637_s21 + $0x780] sm:$0xff]  ;;  %v23025_v49 = vpop.f32.mrf.mxu1 }
 0x584   : > { %v7841_v30 = vsub.f32 %v22934_v51, %v25755_v61  ;;  %v7954_v4 = vand.u32 4294901760, %v7953_v44  ;;  %v1238_v61 = vsel %vm552_vm0, %v508_v24, 0  ;;  %v507_v15 = vld [vmem:[%s18637_s21 + $0x708] sm:$0xff]  ;;  %v23008_v51 = vpop.f32.mrf.mxu0  ;;  %25763 = vst [vmem:[#allocation62_spill] sm:$0xff] %v23025_v49  ;;  %v25765_v49 = vand.u32 4294901760, %v22983_v5 }
 0x585   : > { %25756 = vst [vmem:[#allocation58_spill] sm:$0xff] %v22992_v20  ;;  %25760 = vst [vmem:[#allocation61_spill] sm:$0xff] %v23008_v51  ;;  %v23022_v51 = vand.u32 4294901760, %v1238_v61  ;;  %v7849_v22 = vand.u32 4294901760, %v7848_v1  ;;  %v23051_v1 = vpop.f32.mrf.mxu1 }
 0x586   : > { %18161 = vmatpush3.xpose.msra.mxu0 %v22906_v26  ;;  %18193 = vmatpush3.xpose.msra.mxu1 %v7828_v42  ;;  %v23003_v42 = vand.u32 4294901760, %v1286_v7  ;;  %v1283_v26 = vsel %vm552_vm0, %v523_v63, 0  ;;  %v7842_v24 = vand.u32 4294901760, %v7841_v30  ;;  %v23020_v63 = vsub.f32 %v1241_v11, %v22992_v20  ;;  %v506_v30 = vld [vmem:[%s18637_s21 + $0x700] sm:$0xff]  ;;  %25767 = vst [vmem:[#allocation64_spill] sm:$0xff] %v23051_v1  ;;  %s24453_s21 = scalar_lea.vmem [#allocation3], %s16621_s20 }
 0x587   : > { %18162 = vmatprep.subr.mxu0 %v22915_v0  ;;  %18194 = vmatprep.subr.mxu1 %v7947_v50  ;;  %v25762_v50 = vand.u32 4294901760, %v22961_v13  ;;  %v23028_v0 = vand.u32 4294901760, %v1283_v26  ;;  %v1280_v11 = vsel %vm552_vm0, %v522_v17, 0  ;;  %s16558_s22 = sshll.u32 %s24453_s21, 4  ;;  %s16559_s22 = int_to_ptr.vmem [resolvable:$true] %s16558_s22 }
 0x588   : > { %25759 = vst [vmem:[#allocation60_spill] sm:$0xff] %v23003_v42  ;;  %s18466_s30 = scalar_lea.vmem %s16559_s22, 256  ;;  %p18473_p0 = scmp.lt.s32.totalorder %s16559_s22, %s18471_s10 }
 0x589   : > { %v7967_v44 = vsub.f32 %v22961_v13, %v25762_v50  ;;  %v7961_v50 = vand.u32 4294901760, %v7960_v35  ;;  %v1235_v13 = vsel %vm552_vm0, %v507_v15, 0  ;;  %v25766_v15 = vand.u32 4294901760, %v22995_v54  ;;  %p18467_p11 = scmp.ne.s32.totalorder %s16559_s22, %s18466_s30  ;;  %p18474_p1 = scmp.lt.s32.totalorder %s18472_s15, %s18466_s30 }
 0x58a   : > { %18163 = vmatpush3.xpose.msra.mxu0 %v22928_v47  ;;  %18195 = vmatpush3.xpose.msra.mxu1 %v7835_v59  ;;  %v23032_v59 = vsub.f32 %v1286_v7, %v23003_v42  ;;  %v23036_v47 = vpop.f32.mrf.mxu0  ;;  %v23048_v35 = vand.u32 4294901760, %v1235_v13 }
 0x58b   : > { %18164 = vmatprep.subr.mxu0 %v22930_v19  ;;  %18196 = vmatprep.subr.mxu1 %v7954_v4  ;;  %25764 = vst [vmem:[#allocation63_spill] sm:$0xff] %v23036_v47  ;;  %v7968_v40 = vand.u32 4294901760, %v7967_v44  ;;  %v7855_v19 = vsub.f32 %v22983_v5, %v25765_v49  ;;  %v23043_v4 = vsub.f32 %v1238_v61, %v23022_v51  ;;  %v23054_v44 = vand.u32 4294901760, %v1280_v11  ;;  %p18468_p12 = pnand %p18467_p11, %p18610_p5  ;;  %p18475_p2 = por %p18474_p1, %p18473_p0 }
 0x58c   : > { %v7974_v7 = vsub.f32 %v22995_v54, %v25766_v15  ;;  %v1232_v61 = vsel %vm552_vm0, %v506_v30, 0  ;;  %v23059_v49 = vsub.f32 %v1283_v26, %v23028_v0  ;;  %v23061_v47 = vpop.f32.mrf.mxu0  ;;  %v23065_v17 = vsub.f32 %v1235_v13, %v23048_v35 }
 0x58d   : > { %25768 = vst [vmem:[#allocation65_spill] sm:$0xff] %v23061_v47  ;;  %v7856_v15 = vand.u32 4294901760, %v7855_v19  ;;  %v25771_v19 = vand.u32 4294901760, %v23032_v59  ;;  %v23081_v47 = vsub.f32 %v1280_v11, %v23054_v44  ;;  %p18469_p13 = pneg %p18468_p12 }
 0x58e   : > { %18165 = vmatpush3.xpose.msra.mxu0 %v22957_v28  ;;  %18197 = vmatpush3.xpose.msra.mxu1 %v7842_v24  ;;  %v23073_v24 = vpop.f32.mrf.mxu1  ;;  %v7975_v26 = vand.u32 4294901760, %v7974_v7 }
 0x58f   : > { %18166 = vmatprep.subr.mxu0 %v22968_v21  ;;  %18198 = vmatprep.subr.mxu1 %v7961_v50  ;;  %v25769_v50 = vand.u32 4294901760, %v23020_v63  ;;  %v23070_v21 = vand.u32 4294901760, %v1232_v61  ;;  %25770 = vst [vmem:[#allocation66_spill] sm:$0xff] %v23073_v24  ;;  %p18476_p3 = pnand %p18475_p2, %p18469_p13 }
 0x591   : > { %v7862_v1 = vsub.f32 %v23020_v63, %v25769_v50  ;;  %v23083_v50 = vpop.f32.mrf.mxu0  ;;  %v23087_v24 = vsub.f32 %v1232_v61, %v23070_v21  ;;  %v25029_v61 = vand.u32 4294901760, %v23081_v47 }
 0x592   : > { %18167 = vmatpush3.xpose.msra.mxu0 %v22992_v20  ;;  %18199 = vmatpush3.xpose.msra.mxu1 %v7849_v22  ;;  %v7981_v22 = vsub.f32 %v23032_v59, %v25771_v19  ;;  %25772 = vst [vmem:[#allocation67_spill] sm:$0xff] %v23083_v50  ;;  %v25028_v19 = vand.u32 4294901760, %v23065_v17 }
 0x593   : > { %18168 = vmatprep.subr.mxu0 %v23003_v42  ;;  %18200 = vmatprep.subr.mxu1 %v7968_v40  ;;  %v7863_v30 = vand.u32 4294901760, %v7862_v1  ;;  %25773 = vst [vmem:[#allocation68_spill] sm:$0xff] %v23087_v24  ;;  %v25774_v40 = vand.u32 4294901760, %v23043_v4  ;;  %v23093_v42 = vpop.f32.mrf.mxu1  ;;  %v23095_v13 = vpop.f32.mrf.mxu0 }
 0x594   : > { %25775 = vst [vmem:[#allocation69_spill] sm:$0xff] %v23093_v42  ;;  %25776 = vst [vmem:[#allocation70_spill] sm:$0xff] %v23095_v13  ;;  %v7982_v11 = vand.u32 4294901760, %v7981_v22  ;;  %v7876_v13 = vsub.f32 %v23065_v17, %v25028_v19  ;;  %v25030_v42 = vand.u32 4294901760, %v23087_v24 }
 0x595   : > { %v7869_v7 = vsub.f32 %v23043_v4, %v25774_v40  ;;  %v23102_v50 = vpop.f32.mrf.mxu1 }
 0x596   : > { %18169 = vmatpush3.xpose.msra.mxu0 %v23022_v51  ;;  %18201 = vmatpush3.xpose.msra.mxu1 %v7856_v15  ;;  %v25777_v15 = vand.u32 4294901760, %v23059_v49  ;;  %25778 = vst [vmem:[#allocation71_spill] sm:$0xff] %v23102_v50 }
 0x597   : > { %18170 = vmatprep.subr.mxu0 %v23028_v0  ;;  %18202 = vmatprep.subr.mxu1 %v7975_v26  ;;  %v7870_v40 = vand.u32 4294901760, %v7869_v7  ;;  %v23109_v26 = vpop.f32.mrf.mxu0  ;;  %v23115_v50 = vpop.f32.mrf.mxu1  ;;  %v7883_v7 = vsub.f32 %v23087_v24, %v25030_v42 }
 0x598   : > { %v7988_v1 = vsub.f32 %v23059_v49, %v25777_v15  ;;  %25779 = vst [vmem:[#allocation72_spill] sm:$0xff] %v23109_v26  ;;  %v7995_v15 = vsub.f32 %v23081_v47, %v25029_v61  ;;  %25780 = vst [vmem:[#allocation73_spill] sm:$0xff] %v23115_v50 }
 0x599   : > { %v23121_v19 = vpop.f32.mrf.mxu0  ;;  %v7884_v61 = vand.u32 4294901760, %v7883_v7 }
 0x59a   : > { %18171 = vmatpush3.xpose.msra.mxu0 %v23048_v35  ;;  %18203 = vmatpush3.xpose.msra.mxu1 %v7863_v30  ;;  %v7989_v22 = vand.u32 4294901760, %v7988_v1  ;;  %v7877_v30 = vand.u32 4294901760, %v7876_v13  ;;  %25781 = vst [vmem:[#allocation74_spill] sm:$0xff] %v23121_v19  ;;  %v23124_v1 = vpop.f32.mrf.mxu1  ;;  %v25784_v13 = vld [vmem:[#allocation33_spill] sm:$0xff] }
 0x59b   : > { %18172 = vmatprep.subr.mxu0 %v23054_v44  ;;  %18204 = vmatprep.subr.mxu1 %v7982_v11  ;;  %v7996_v11 = vand.u32 4294901760, %v7995_v15  ;;  %25782 = vst [vmem:[#allocation75_spill] sm:$0xff] %v23124_v1  ;;  %v25815_v19 = vld [vmem:[#allocation53_spill] sm:$0xff] }
 0x59c   : > { %v23132_v42 = vpop.f32.mrf.mxu1 }
 0x59d   : > { %25785 = vst [vmem:[#allocation33_spill] sm:$0xff] %v23132_v42 }
 0x59e   : > { %18173 = vmatpush3.xpose.msra.mxu0 %v23070_v21  ;;  %18205 = vmatpush3.xpose.msra.mxu1 %v7870_v40  ;;  %v23128_v40 = vpop.f32.mrf.mxu0 }
 0x59f   : > { %18206 = vmatprep.subr.mxu1 %v7989_v22  ;;  %18214 = vmatprep.subr.mxu0 %v22645_v56  ;;  %25783 = vst [vmem:[#allocation76_spill] sm:$0xff] %v23128_v40  ;;  %v25818_v40 = vld [vmem:[#allocation54_spill] sm:$0xff] }
 0x5a0   : > { %v23134_v22 = vpop.f32.mrf.mxu0 }
 0x5a1   : > { %18175 = vmatmul.mubr.f32.vlgmr.msra.gmra.mxu0 %v25707_v6  ;;  %25786 = vst [vmem:[#allocation77_spill] sm:$0xff] %v23134_v22  ;;  %v23138_v6 = vpop.f32.mrf.mxu1 }
 0x5a2   : > { %18207 = vmatpush3.xpose.msra.mxu1 %v7877_v30  ;;  %18215 = vmatpush3.xpose.msra.mxu0 %v22667_v52  ;;  %25787 = vst [vmem:[#allocation78_spill] sm:$0xff] %v23138_v6  ;;  %v23143_v15 = vpop.f32.mrf.mxu0 }
 0x5a3   : > { %18208 = vmatprep.subr.mxu1 %v7996_v11  ;;  %18216 = vmatprep.subr.mxu0 %v22681_v18  ;;  %25788 = vst [vmem:[#allocation79_spill] sm:$0xff] %v23143_v15  ;;  %v23148_v30 = vpop.f32.mrf.mxu1 }
 0x5a4   : > { %18176 = vmatprep.mubr.f32.mxu0 %v25784_v13  ;;  %25789 = vst [vmem:[#allocation80_spill] sm:$0xff] %v23148_v30 }
 0x5a5   : > { %18177 = vmatmul.mubr.f32.gmra.mxu0 %v25784_v13  ;;  %v23155_v7 = vpop.f32.mrf.mxu1 }
 0x5a6   : > { %18209 = vmatpush3.xpose.msra.mxu1 %v7884_v61  ;;  %18217 = vmatpush3.xpose.msra.mxu0 %v22686_v31  ;;  %v23150_v61 = vpop.f32.mrf.mxu0  ;;  %25791 = vst [vmem:[#allocation82_spill] sm:$0xff] %v23155_v7 }
 0x5a7   : > { %18218 = vmatprep.subr.mxu0 %v22700_v37  ;;  %18250 = vmatprep.subr.mxu1 %v22624_v14  ;;  %25790 = vst [vmem:[#allocation81_spill] sm:$0xff] %v23150_v61  ;;  %v23165_v13 = vpop.f32.mrf.mxu1  ;;  %v25805_v61 = vld [vmem:[#allocation19_spill] sm:$0xff] }
 0x5a8   : > { %18246 = vmatprep.mubr.f32.mxu0 %v18864_v10  ;;  %v23160_v11 = vpop.f32.mrf.mxu0  ;;  %25793 = vst [vmem:[#allocation84_spill] sm:$0xff] %v23165_v13 }
 0x5a9   : > { %18211 = vmatmul.mubr.f32.vlgmr.msra.gmra.mxu1 %v18630_v3  ;;  %25792 = vst [vmem:[#allocation83_spill] sm:$0xff] %v23160_v11  ;;  %v23173_v30 = vpop.f32.mrf.mxu1  ;;  %v25810_v11 = vld [vmem:[#allocation18_spill] sm:$0xff] }
 0x5aa   : > { %18219 = vmatpush3.xpose.msra.mxu0 %v22716_v34  ;;  %18251 = vmatpush3.xpose.msra.mxu1 %v22641_v29  ;;  %v23169_v6 = vpop.f32.mrf.mxu0  ;;  %25795 = vst [vmem:[#allocation86_spill] sm:$0xff] %v23173_v30 }
 0x5ab   : > { %18220 = vmatprep.subr.mxu0 %v22736_v58  ;;  %18252 = vmatprep.subr.mxu1 %v22656_v46  ;;  %25794 = vst [vmem:[#allocation85_spill] sm:$0xff] %v23169_v6  ;;  %v23181_v15 = vpop.f32.mrf.mxu1 }
 0x5ac   : > { %18212 = vmatprep.mubr.f32.mxu1 %v25704_v48  ;;  %v23177_v22 = vpop.f32.mrf.mxu0  ;;  %25797 = vst [vmem:[#allocation88_spill] sm:$0xff] %v23181_v15  ;;  %v25801_v15 = vld [vmem:[#allocation6_spill] sm:$0xff] }
 0x5ad   : > { %18213 = vmatmul.mubr.f32.gmra.mxu1 %v25704_v48  ;;  %25796 = vst [vmem:[#allocation87_spill] sm:$0xff] %v23177_v22  ;;  %v23189_v30 = vpop.f32.mrf.mxu1 }
 0x5ae   : > { %18221 = vmatpush3.xpose.msra.mxu0 %v22747_v27  ;;  %18253 = vmatpush3.xpose.msra.mxu1 %v22660_v43  ;;  %v23185_v6 = vpop.f32.mrf.mxu0  ;;  %25799 = vst [vmem:[#allocation90_spill] sm:$0xff] %v23189_v30  ;;  %v25807_v30 = vld [vmem:[#allocation10_spill] sm:$0xff] }
 0x5af   : > { %18222 = vmatprep.subr.mxu0 %v22769_v12  ;;  %18254 = vmatprep.subr.mxu1 %v22669_v23  ;;  %25798 = vst [vmem:[#allocation89_spill] sm:$0xff] %v23185_v6  ;;  %v23197_v7 = vpop.f32.mrf.mxu1  ;;  %v25804_v6 = vld [vmem:[#allocation40_spill] sm:$0xff] }
 0x5b0   : > { %18282 = vmatprep.mubr.f32.mxu1 %v18891_v33  ;;  %v23193_v22 = vpop.f32.mrf.mxu0  ;;  %25802 = vst [vmem:[#allocation6_spill] sm:$0xff] %v23197_v7  ;;  %v25812_v7 = vld [vmem:[#allocation50_spill] sm:$0xff] }
 0x5b1   : > { %25800 = vst [vmem:[#allocation91_spill] sm:$0xff] %v23193_v22  ;;  %v23203_v50 = vpop.f32.mrf.mxu1  ;;  %v25809_v22 = vld [vmem:[#allocation48_spill] sm:$0xff] }
 0x5b2   : > { %18223 = vmatpush3.xpose.msra.mxu0 %v22786_v62  ;;  %18255 = vmatpush3.xpose.msra.mxu1 %v22688_v2  ;;  %v23199_v13 = vpop.f32.mrf.mxu0  ;;  %25806 = vst [vmem:[#allocation40_spill] sm:$0xff] %v23203_v50  ;;  %v25816_v50 = vld [vmem:[#allocation36_spill] sm:$0xff] }
 0x5b3   : > { %18224 = vmatprep.subr.mxu0 %v22791_v8  ;;  %18256 = vmatprep.subr.mxu1 %v22706_v36  ;;  %25803 = vst [vmem:[#allocation92_spill] sm:$0xff] %v23199_v13  ;;  %v23211_v48 = vpop.f32.mrf.mxu1  ;;  %v25813_v13 = vld [vmem:[#allocation34_spill] sm:$0xff] }
 0x5b4   : > { %v23207_v26 = vpop.f32.mrf.mxu0  ;;  %25811 = vst [vmem:[#allocation10_spill] sm:$0xff] %v23211_v48  ;;  %v25821_v48 = vld [vmem:[#allocation41_spill] sm:$0xff] }
 0x5b5   : > { %25808 = vst [vmem:[#allocation19_spill] sm:$0xff] %v23207_v26  ;;  %v23219_v42 = vpop.f32.mrf.mxu1  ;;  %v25819_v26 = vld [vmem:[#allocation38_spill] sm:$0xff] }
 0x5b6   : > { %18225 = vmatpush3.xpose.msra.mxu0 %v22810_v45  ;;  %18257 = vmatpush3.xpose.msra.mxu1 %v22718_v9  ;;  %v23215_v1 = vpop.f32.mrf.mxu0  ;;  %25817 = vst [vmem:[#allocation53_spill] sm:$0xff] %v23219_v42  ;;  %v25826_v42 = vld [vmem:[#allocation46_spill] sm:$0xff] }
 0x5b7   : > { %18226 = vmatprep.subr.mxu0 %v22831_v39  ;;  %18258 = vmatprep.subr.mxu1 %v22731_v38  ;;  %25814 = vst [vmem:[#allocation18_spill] sm:$0xff] %v23215_v1  ;;  %v25824_v1 = vld [vmem:[#allocation44_spill] sm:$0xff] }
 0x5ba   : > { %18227 = vmatpush3.xpose.msra.mxu0 %v22839_v25  ;;  %18259 = vmatpush3.xpose.msra.mxu1 %v22756_v41 }
 0x5bb   : > { %18228 = vmatprep.subr.mxu0 %v22846_v16  ;;  %18260 = vmatprep.subr.mxu1 %v22758_v55 }
 0x5be   : > { %18229 = vmatpush3.xpose.msra.mxu0 %v22867_v53  ;;  %18261 = vmatpush3.xpose.msra.mxu1 %v22781_v57 }
 0x5bf   : > { %18230 = vmatprep.subr.mxu0 %v22888_v32  ;;  %18262 = vmatprep.subr.mxu1 %v25801_v15 }
 0x5c2   : > { %18231 = vmatpush3.xpose.msra.mxu0 %v25804_v6  ;;  %18263 = vmatpush3.xpose.msra.mxu1 %v25805_v61 }
 0x5c3   : > { %18232 = vmatprep.subr.mxu0 %v22919_v60  ;;  %18264 = vmatprep.subr.mxu1 %v25807_v30 }
 0x5c6   : > { %18233 = vmatpush3.xpose.msra.mxu0 %v25809_v22  ;;  %18265 = vmatpush3.xpose.msra.mxu1 %v25810_v11  ;;  %v23223_v22 = vpop.f32.mrf.mxu0 }
 0x5c7   : > { %18234 = vmatprep.subr.mxu0 %v25812_v7  ;;  %18266 = vmatprep.subr.mxu1 %v25813_v13  ;;  %25820 = vst [vmem:[#allocation54_spill] sm:$0xff] %v23223_v22  ;;  %v23227_v7 = vpop.f32.mrf.mxu1  ;;  %v25828_v22 = vld [vmem:[#allocation47_spill] sm:$0xff] }
 0x5c8   : > { %25822 = vst [vmem:[#allocation93_spill] sm:$0xff] %v23227_v7  ;;  %v23229_v13 = vpop.f32.mrf.mxu0 }
 0x5c9   : > { %25823 = vst [vmem:[#allocation94_spill] sm:$0xff] %v23229_v13 }
 0x5ca   : > { %18235 = vmatpush3.xpose.msra.mxu0 %v25815_v19  ;;  %18267 = vmatpush3.xpose.msra.mxu1 %v25816_v50  ;;  %v23233_v50 = vpop.f32.mrf.mxu1 }
 0x5cb   : > { %18236 = vmatprep.subr.mxu0 %v25818_v40  ;;  %18268 = vmatprep.subr.mxu1 %v25819_v26  ;;  %25825 = vst [vmem:[#allocation44_spill] sm:$0xff] %v23233_v50  ;;  %v23237_v26 = vpop.f32.mrf.mxu0  ;;  %v25832_v50 = vld [vmem:[#allocation55_spill] sm:$0xff] }
 0x5cc   : > { %25827 = vst [vmem:[#allocation95_spill] sm:$0xff] %v23237_v26 }
 0x5cd   : > { %v23243_v7 = vpop.f32.mrf.mxu0 }
 0x5ce   : > { %18237 = vmatpush3.xpose.msra.mxu0 %v22983_v5  ;;  %18269 = vmatpush3.xpose.msra.mxu1 %v25821_v48  ;;  %v23241_v48 = vpop.f32.mrf.mxu1  ;;  %25830 = vst [vmem:[#allocation96_spill] sm:$0xff] %v23243_v7 }
 0x5cf   : > { %18238 = vmatprep.subr.mxu0 %v22995_v54  ;;  %18270 = vmatprep.subr.mxu1 %v25824_v1  ;;  %25829 = vst [vmem:[#allocation47_spill] sm:$0xff] %v23241_v48  ;;  %v25835_v48 = vld [vmem:[#allocation60_spill] sm:$0xff] }
 0x5d0   : > { %v23247_v13 = vpop.f32.mrf.mxu1 }
 0x5d1   : > { %25831 = vst [vmem:[#allocation97_spill] sm:$0xff] %v23247_v13 }
 0x5d2   : > { %18239 = vmatpush3.xpose.msra.mxu0 %v23020_v63  ;;  %18271 = vmatpush3.xpose.msra.mxu1 %v25826_v42  ;;  %v23251_v42 = vpop.f32.mrf.mxu0  ;;  %v23255_v26 = vpop.f32.mrf.mxu1 }
 0x5d3   : > { %18240 = vmatprep.subr.mxu0 %v23032_v59  ;;  %18272 = vmatprep.subr.mxu1 %v25828_v22  ;;  %25833 = vst [vmem:[#allocation55_spill] sm:$0xff] %v23251_v42  ;;  %25834 = vst [vmem:[#allocation98_spill] sm:$0xff] %v23255_v26  ;;  %v25838_v42 = vand.u32 4294901760, %v22645_v56  ;;  %v25839_v26 = vand.u32 4294901760, %v22667_v52 }
 0x5d4   : > { %v23259_v7 = vpop.f32.mrf.mxu0  ;;  %v23263_v13 = vpop.f32.mrf.mxu1 }
 0x5d5   : > { %25836 = vst [vmem:[#allocation60_spill] sm:$0xff] %v23259_v7  ;;  %25837 = vst [vmem:[#allocation99_spill] sm:$0xff] %v23263_v13  ;;  %v25841_v13 = vand.u32 4294901760, %v22681_v18 }
 0x5d6   : > { %18241 = vmatpush3.xpose.msra.mxu0 %v23043_v4  ;;  %18273 = vmatpush3.xpose.msra.mxu1 %v22957_v28  ;;  %v23274_v7 = vpop.f32.mrf.mxu1 }
 0x5d7   : > { %18242 = vmatprep.subr.mxu0 %v23059_v49  ;;  %18274 = vmatprep.subr.mxu1 %v25832_v50 }
 0x5d8   : > { %v23286_v52 = vpop.f32.mrf.mxu1 }
 0x5da   : > { %18243 = vmatpush3.xpose.msra.mxu0 %v23065_v17  ;;  %18275 = vmatpush3.xpose.msra.mxu1 %v22992_v20  ;;  %v23268_v20 = vpop.f32.mrf.mxu0 }
 0x5db   : > { %18244 = vmatprep.subr.mxu0 %v23081_v47  ;;  %18276 = vmatprep.subr.mxu1 %v25835_v48 }
 0x5dc   : > { %v23280_v56 = vpop.f32.mrf.mxu0 }
 0x5de   : > { %18245 = vmatpush3.xpose.msra.mxu0 %v23087_v24  ;;  %18277 = vmatpush3.xpose.msra.mxu1 %v23022_v51  ;;  %v25840_v24 = vld [vmem:[#allocation30_spill] sm:$0xff]  ;;  %v23292_v18 = vpop.f32.mrf.mxu0 }
 0x5df   : > { %18278 = vmatprep.subr.mxu1 %v23028_v0  ;;  %18286 = vmatprep.subr.mxu0 %v25838_v42  ;;  %v25843_v42 = vand.u32 4294901760, %v22700_v37  ;;  %v25846_v37 = vand.u32 4294901760, %v22736_v58 }
 0x5e1   : > { %18247 = vmatmul.mubr.f32.vlgmr.msra.gmra.mxu0 %v18864_v10  ;;  %v25842_v10 = vand.u32 4294901760, %v22686_v31  ;;  %v23298_v31 = vpop.f32.mrf.mxu1 }
 0x5e2   : > { %18279 = vmatpush3.xpose.msra.mxu1 %v23048_v35  ;;  %18287 = vmatpush3.xpose.msra.mxu0 %v25839_v26  ;;  %v23300_v26 = vpop.f32.mrf.mxu0 }
 0x5e3   : > { %18248 = vmatprep.mubr.f32.mxu0 %v25840_v24  ;;  %18280 = vmatprep.subr.mxu1 %v23054_v44 }
 0x5e4   : > { %18288 = vmatprep.subr.mxu0 %v25841_v13  ;;  %v25845_v13 = vld [vmem:[#allocation32_spill] sm:$0xff] }
 0x5e5   : > { %18249 = vmatmul.mubr.f32.gmra.mxu0 %v25840_v24  ;;  %v25844_v24 = vand.u32 4294901760, %v22716_v34  ;;  %v25848_v34 = vand.u32 4294901760, %v22769_v12 }
 0x5e6   : > { %18281 = vmatpush3.xpose.msra.mxu1 %v23070_v21  ;;  %18289 = vmatpush3.xpose.msra.mxu0 %v25842_v10 }
 0x5e7   : > { %18290 = vmatprep.subr.mxu0 %v25843_v42  ;;  %18322 = vmatprep.subr.mxu1 %v22624_v14  ;;  %v23306_v14 = vpop.f32.mrf.mxu1 }
 0x5e8   : > { %18318 = vmatprep.mubr.f32.mxu0 %v18630_v3 }
 0x5e9   : > { %18283 = vmatmul.mubr.f32.vlgmr.msra.gmra.mxu1 %v18891_v33  ;;  %v25847_v33 = vand.u32 4294901760, %v22747_v27  ;;  %v23318_v58 = vpop.f32.mrf.mxu1 }
 0x5ea   : > { %18291 = vmatpush3.xpose.msra.mxu0 %v25844_v24  ;;  %18323 = vmatpush3.xpose.msra.mxu1 %v22641_v29  ;;  %v23312_v29 = vpop.f32.mrf.mxu0 }
 0x5eb   : > { %18284 = vmatprep.mubr.f32.mxu1 %v25845_v13  ;;  %18292 = vmatprep.subr.mxu0 %v25846_v37  ;;  %v23328_v12 = vpop.f32.mrf.mxu1 }
 0x5ec   : > { %18324 = vmatprep.subr.mxu1 %v22656_v46  ;;  %v25849_v46 = vand.u32 4294901760, %v22786_v62  ;;  %v23323_v27 = vpop.f32.mrf.mxu0  ;;  %v25852_v62 = vand.u32 4294901760, %v22831_v39  ;;  %v25856_v39 = vld [vmem:[#allocation7_spill] sm:$0xff] }
 0x5ed   : > { %18285 = vmatmul.mubr.f32.gmra.mxu1 %v25845_v13  ;;  %v25857_v13 = vand.u32 4294901760, %v22867_v53 }
 0x5ee   : > { %18293 = vmatpush3.xpose.msra.mxu0 %v25847_v33  ;;  %18325 = vmatpush3.xpose.msra.mxu1 %v22660_v43  ;;  %v25850_v43 = vand.u32 4294901760, %v22791_v8  ;;  %v23333_v10 = vpop.f32.mrf.mxu0 }
 0x5ef   : > { %18294 = vmatprep.subr.mxu0 %v25848_v34  ;;  %18326 = vmatprep.subr.mxu1 %v22669_v23  ;;  %v25851_v23 = vand.u32 4294901760, %v22810_v45  ;;  %v23345_v45 = vpop.permute.xlu0 %549 }
 0x5f0   : > { %18354 = vmatprep.mubr.f32.mxu1 %v18630_v3  ;;  %v23340_v8 = vpop.f32.mrf.mxu0 }
 0x5f2   : > { %18295 = vmatpush3.xpose.msra.mxu0 %v25849_v46  ;;  %18327 = vmatpush3.xpose.msra.mxu1 %v22688_v2  ;;  %v23338_v2 = vpop.f32.mrf.mxu1  ;;  %v23354_v24 = vpop.f32.mrf.mxu0 }
 0x5f3   : > { %18296 = vmatprep.subr.mxu0 %v25850_v43  ;;  %18328 = vmatprep.subr.mxu1 %v22706_v36  ;;  %v25853_v36 = vand.u32 4294901760, %v22839_v25  ;;  %v23369_v46 = vpop.permute.xlu0 %544  ;;  %v25863_v43 = vld [vmem:[#allocation16_spill] sm:$0xff] }
 0x5f4   : > { %v23347_v42 = vpop.f32.mrf.mxu1  ;;  %v23363_v33 = vpop.f32.mrf.mxu0 }
 0x5f5   : > { %25854 = vst [vmem:[#allocation30_spill] sm:$0xff] %v23347_v42  ;;  %v25878_v42 = vld [vmem:[#allocation23_spill] sm:$0xff] }
 0x5f6   : > { %18297 = vmatpush3.xpose.msra.mxu0 %v25851_v23  ;;  %18329 = vmatpush3.xpose.msra.mxu1 %v22718_v9  ;;  %v25855_v9 = vand.u32 4294901760, %v22846_v16  ;;  %v23361_v37 = vpop.f32.mrf.mxu1  ;;  %v25860_v16 = vand.u32 4294901760, %v22888_v32  ;;  %v25864_v32 = vand.u32 4294901760, %v22919_v60  ;;  %v25871_v60 = vld [vmem:[#allocation31_spill] sm:$0xff] }
 0x5f7   : > { %18298 = vmatprep.subr.mxu0 %v25852_v62  ;;  %18330 = vmatprep.subr.mxu1 %v22731_v38  ;;  %v1444_v38 = vadd.f32 %v25856_v39, %v23345_v45  ;;  %25859 = vst [vmem:[#allocation32_spill] sm:$0xff] %v23361_v37  ;;  %v23377_v62 = vpop.f32.mrf.mxu0 }
 0x5f8   : > { %v23371_v53 = vpop.f32.mrf.mxu1 }
 0x5fa   : > { %18299 = vmatpush3.xpose.msra.mxu0 %v25853_v36  ;;  %18331 = vmatpush3.xpose.msra.mxu1 %v22756_v41  ;;  %v25858_v41 = vld [vmem:[#allocation24_spill] sm:$0xff] }
 0x5fb   : > { %18300 = vmatprep.subr.mxu0 %v25855_v9  ;;  %18332 = vmatprep.subr.mxu1 %v22758_v55  ;;  %v1442_v25 = vadd.f32 %v25858_v41, %v23345_v45  ;;  %v25861_v55 = vld [vmem:[#allocation29_spill] sm:$0xff] }
 0x5fc   : > { %v1683_v34 = vadd.f32 %v25861_v55, %v1444_v38  ;;  %v25866_v9 = vld [vmem:[#allocation17_spill] sm:$0xff]  ;;  %v23385_v38 = vpop.f32.mrf.mxu1 }
 0x5fd   : > { %v1681_v23 = vadd.f32 %v25863_v43, %v1442_v25  ;;  %v25869_v25 = vld [vmem:[#allocation48_spill] sm:$0xff] }
 0x5fe   : > { %18301 = vmatpush3.xpose.msra.mxu0 %v25857_v13  ;;  %18333 = vmatpush3.xpose.msra.mxu1 %v22781_v57  ;;  %v25862_v57 = vand.u32 4294901760, %v25804_v6  ;;  %v1828_v39 = vadd.f32 %v25866_v9, %v1683_v34  ;;  %v25867_v6 = vld [vmem:[#allocation13_spill] sm:$0xff]  ;;  %v25875_v34 = vld [vmem:[#allocation34_spill] sm:$0xff]  ;;  %v25877_v9 = vld [vmem:[#allocation39_spill] sm:$0xff] }
 0x5ff   : > { %18302 = vmatprep.subr.mxu0 %v25860_v16  ;;  %18334 = vmatprep.subr.mxu1 %v25801_v15  ;;  %v25865_v15 = vld [vmem:[#allocation26_spill] sm:$0xff]  ;;  %v1431_v13 = vadd.f32 %v25867_v6, %v23369_v46  ;;  %v25870_v16 = vand.u32 4294901760, %v25869_v25  ;;  %v1826_v55 = vadd.f32 %v25871_v60, %v1681_v23  ;;  %v25880_v25 = vld [vmem:[#allocation25_spill] sm:$0xff] }
 0x600   : > { %v1433_v36 = vadd.f32 %v25865_v15, %v23369_v46  ;;  %v25882_v23 = vld [vmem:[#allocation42_spill] sm:$0xff] }
 0x602   : > { %18303 = vmatpush3.xpose.msra.mxu0 %v25862_v57  ;;  %18335 = vmatpush3.xpose.msra.mxu1 %v25805_v61  ;;  %v25868_v61 = vld [vmem:[#allocation14_spill] sm:$0xff] }
 0x603   : > { %18304 = vmatprep.subr.mxu0 %v25864_v32  ;;  %18336 = vmatprep.subr.mxu1 %v25807_v30  ;;  %v1943_v41 = vadd.f32 %v25868_v61, %v1828_v39  ;;  %v23394_v30 = vpop.f32.mrf.mxu0  ;;  %v25873_v57 = vld [vmem:[#allocation50_spill] sm:$0xff]  ;;  %v25876_v32 = vld [vmem:[#allocation12_spill] sm:$0xff]  ;;  %v1941_v39 = vadd.f32 %v25878_v42, %v1826_v55  ;;  %v23402_v61 = vpop.f32.mrf.mxu1  ;;  %v25889_v55 = vld [vmem:[#allocation11_spill] sm:$0xff] }
 0x604   : > { %25872 = vst [vmem:[#allocation7_spill] sm:$0xff] %v23394_v30  ;;  %v25874_v43 = vand.u32 4294901760, %v25873_v57  ;;  %v1676_v15 = vadd.f32 %v25876_v32, %v1433_v36  ;;  %25879 = vst [vmem:[#allocation24_spill] sm:$0xff] %v23402_v61  ;;  %v25883_v30 = vand.u32 4294901760, %v25815_v19  ;;  %v25884_v57 = vld [vmem:[#allocation36_spill] sm:$0xff]  ;;  %v25888_v42 = vld [vmem:[#allocation38_spill] sm:$0xff] }
 0x605   : > { %v2118_v6 = vadd.f32 %v25877_v9, %v1943_v41  ;;  %v23411_v36 = vpop.f32.mrf.mxu0  ;;  %v25887_v41 = vand.u32 4294901760, %v25818_v40  ;;  %v25890_v32 = vld [vmem:[#allocation9_spill] sm:$0xff]  ;;  %v25893_v19 = vld [vmem:[#allocation8_spill] sm:$0xff] }
 0x606   : > { %18305 = vmatpush3.xpose.msra.mxu0 %v25870_v16  ;;  %18337 = vmatpush3.xpose.msra.mxu1 %v25810_v11  ;;  %v1674_v16 = vadd.f32 %v25880_v25, %v1431_v13  ;;  %v25881_v11 = vld [vmem:[#allocation15_spill] sm:$0xff]  ;;  %25886 = vst [vmem:[#allocation29_spill] sm:$0xff] %v23411_v36  ;;  %v25891_v9 = vld [vmem:[#allocation37_spill] sm:$0xff]  ;;  %v23419_v25 = vpop.f32.mrf.mxu1 }
 0x607   : > { %18306 = vmatprep.subr.mxu0 %v25874_v43  ;;  %18338 = vmatprep.subr.mxu1 %v25875_v34  ;;  %v1820_v37 = vadd.f32 %v25881_v11, %v1676_v15  ;;  %v2229_v60 = vadd.f32 %v25882_v23, %v2118_v6  ;;  %v25885_v43 = vld [vmem:[#allocation35_spill] sm:$0xff]  ;;  %25892 = vst [vmem:[#allocation16_spill] sm:$0xff] %v23419_v25  ;;  %v25894_v11 = vld [vmem:[#allocation21_spill] sm:$0xff] }
 0x608   : > { %v2116_v34 = vadd.f32 %v25885_v43, %v1941_v39  ;;  %v1818_v13 = vadd.f32 %v25889_v55, %v1674_v16  ;;  %v25896_v40 = vld [vmem:[#allocation41_spill] sm:$0xff]  ;;  %v23426_v43 = vpop.f32.mrf.mxu0  ;;  %v25897_v16 = vand.u32 4294901760, %v22995_v54  ;;  %v23436_v55 = vpop.f32.mrf.mxu1 }
 0x609   : > { %v1934_v15 = vadd.f32 %v25890_v32, %v1820_v37  ;;  %v8576_v39 = vmax.f32 %v2229_v60, 0.0  ;;  %v8591_v37 = vld [vmem:[%s24510_s3] sm:$0xff]  ;;  %v25899_v60 = vld [vmem:[#allocation27_spill] sm:$0xff] }
 0x60a   : > { %18307 = vmatpush3.xpose.msra.mxu0 %v25883_v30  ;;  %18339 = vmatpush3.xpose.msra.mxu1 %v25884_v57  ;;  %v2227_v6 = vadd.f32 %v25891_v9, %v2116_v34  ;;  %v1932_v30 = vadd.f32 %v25893_v19, %v1818_v13  ;;  %v25895_v57 = vand.u32 4294901760, %v22983_v5  ;;  %v25898_v34 = vld [vmem:[#allocation22_spill] sm:$0xff]  ;;  %v25900_v13 = vld [vmem:[#allocation20_spill] sm:$0xff]  ;;  %v25902_v9 = vand.u32 4294901760, %v23020_v63  ;;  %v23455_v63 = vpop.f32.mrf.mxu1 }
 0x60b   : > { %18308 = vmatprep.subr.mxu0 %v25887_v41  ;;  %18340 = vmatprep.subr.mxu1 %v25888_v42  ;;  %v2111_v23 = vadd.f32 %v25894_v11, %v1934_v15  ;;  %v8607_v54 = vsel %vm8602_vm2, %v8576_v39, 0  ;;  %v25901_v15 = vld [vmem:[#allocation57_spill] sm:$0xff]  ;;  %v25903_v19 = vld [vmem:[#allocation46_spill] sm:$0xff]  ;;  %v8600_v11 = vsel %vm8598_vm1, %v8591_v37, 0 }
 0x60c   : > { %v2109_v41 = vadd.f32 %v25898_v34, %v1932_v30  ;;  %v8575_v5 = vmax.f32 %v2227_v6, 0.0  ;;  %v23445_v30 = vpop.f32.mrf.mxu0  ;;  %v25904_v6 = vand.u32 4294901760, %v23032_v59  ;;  %v23451_v39 = vand.u32 4294901760, %v8607_v54 }
 0x60d   : > { %v2222_v42 = vadd.f32 %v25899_v60, %v2111_v23  ;;  %v23459_v37 = vand.u32 4294901760, %v8600_v11  ;;  %v25907_v60 = vld [vmem:[#allocation59_spill] sm:$0xff] }
 0x60e   : > { %18309 = vmatpush3.xpose.msra.mxu0 %v25895_v57  ;;  %18341 = vmatpush3.xpose.msra.mxu1 %v25896_v40  ;;  %v2220_v32 = vadd.f32 %v25900_v13, %v2109_v41  ;;  %v8604_v57 = vsel %vm8602_vm2, %v8575_v5, 0  ;;  %v25905_v40 = vld [vmem:[#allocation52_spill] sm:$0xff]  ;;  %v23457_v34 = vpop.f32.mrf.mxu0  ;;  %v25908_v13 = vand.u32 4294901760, %v23043_v4  ;;  %v23478_v4 = vsub.f32 %v8607_v54, %v23451_v39 }
 0x60f   : > { %18310 = vmatprep.subr.mxu0 %v25897_v16  ;;  %18342 = vmatprep.subr.mxu1 %v25824_v1  ;;  %v2348_v1 = vadd.f32 %v25901_v15, %v23345_v45  ;;  %v8560_v23 = vmax.f32 %v2222_v42, 0.0  ;;  %v2346_v16 = vadd.f32 %v25905_v40, %v23345_v45  ;;  %25906 = vst [vmem:[#allocation26_spill] sm:$0xff] %v23457_v34  ;;  %v25910_v42 = vand.u32 4294901760, %v23059_v49  ;;  %v25913_v49 = vld [vmem:[#allocation67_spill] sm:$0xff]  ;;  %v25915_v40 = vld [vmem:[#allocation58_spill] sm:$0xff]  ;;  %v25929_v34 = vld [vmem:[#allocation45_spill] sm:$0xff] }
 0x610   : > { %v8559_v41 = vmax.f32 %v2220_v32, 0.0  ;;  %v23472_v15 = vand.u32 4294901760, %v8604_v57  ;;  %v25918_v54 = vand.u32 4294901760, %v23081_v47  ;;  %v25927_v47 = vld [vmem:[#allocation66_spill] sm:$0xff] }
 0x611   : > { %v2587_v59 = vadd.f32 %v25907_v60, %v2348_v1  ;;  %v23470_v5 = vand.u32 4294901760, %v8560_v23  ;;  %v25916_v60 = vld [vmem:[#allocation49_spill] sm:$0xff] }
 0x612   : > { %18311 = vmatpush3.xpose.msra.mxu0 %v25902_v9  ;;  %18343 = vmatpush3.xpose.msra.mxu1 %v25903_v19  ;;  %v25911_v9 = vld [vmem:[#allocation56_spill] sm:$0xff]  ;;  %v23475_v19 = vpop.f32.mrf.mxu0  ;;  %v23483_v1 = vand.u32 4294901760, %v8559_v41 }
 0x613   : > { %18312 = vmatprep.subr.mxu0 %v25904_v6  ;;  %18344 = vmatprep.subr.mxu1 %v25828_v22  ;;  %v23465_v22 = vpop.f32.mrf.mxu1  ;;  %v2585_v32 = vadd.f32 %v25911_v9, %v2346_v16  ;;  %25912 = vst [vmem:[#allocation13_spill] sm:$0xff] %v23475_v19  ;;  %v2732_v6 = vadd.f32 %v25913_v49, %v2587_v59  ;;  %v25919_v59 = vld [vmem:[#allocation43_spill] sm:$0xff] }
 0x614   : > { %25909 = vst [vmem:[#allocation17_spill] sm:$0xff] %v23465_v22  ;;  %v2337_v16 = vadd.f32 %v25916_v60, %v23369_v46  ;;  %v23503_v49 = vsub.f32 %v8560_v23, %v23470_v5  ;;  %v23506_v60 = vpop.f32.mrf.mxu0  ;;  %v25924_v23 = vld [vmem:[#allocation68_spill] sm:$0xff] }
 0x615   : > { %25922 = vst [vmem:[#allocation48_spill] sm:$0xff] %v23506_v60 }
 0x616   : > { %18313 = vmatpush3.xpose.msra.mxu0 %v25908_v13  ;;  %18345 = vmatpush3.xpose.msra.mxu1 %v22957_v28  ;;  %v23481_v28 = vsub.f32 %v8600_v11, %v23459_v37  ;;  %v23491_v13 = vpop.f32.mrf.mxu1  ;;  %v23497_v11 = vsub.f32 %v8604_v57, %v23472_v15  ;;  %v23516_v57 = vsub.f32 %v8559_v41, %v23483_v1  ;;  %v25940_v41 = vld [vmem:[#allocation62_spill] sm:$0xff] }
 0x617   : > { %18314 = vmatprep.subr.mxu0 %v25910_v42  ;;  %18346 = vmatprep.subr.mxu1 %v25832_v50  ;;  %v25914_v50 = vand.u32 4294901760, %v23065_v17  ;;  %25917 = vst [vmem:[#allocation14_spill] sm:$0xff] %v23491_v13  ;;  %v2335_v42 = vadd.f32 %v25919_v59, %v23369_v46  ;;  %v25920_v17 = vld [vmem:[#allocation69_spill] sm:$0xff] }
 0x618   : > { %v2847_v9 = vadd.f32 %v25920_v17, %v2732_v6  ;;  %v25923_v6 = vld [vmem:[#allocation76_spill] sm:$0xff]  ;;  %v25925_v17 = vand.u32 4294901760, %v25924_v23  ;;  %v23524_v13 = vpop.f32.mrf.mxu1 }
 0x619   : > { %25928 = vst [vmem:[#allocation31_spill] sm:$0xff] %v23524_v13  ;;  %v2578_v19 = vadd.f32 %v25929_v34, %v2335_v42 }
 0x61a   : > { %18315 = vmatpush3.xpose.msra.mxu0 %v25914_v50  ;;  %18347 = vmatpush3.xpose.msra.mxu1 %v25915_v40  ;;  %v25921_v50 = vld [vmem:[#allocation65_spill] sm:$0xff]  ;;  %v3022_v59 = vadd.f32 %v25923_v6, %v2847_v9 }
 0x61b   : > { %18316 = vmatprep.subr.mxu0 %v25918_v54  ;;  %18348 = vmatprep.subr.mxu1 %v25835_v48  ;;  %v2730_v40 = vadd.f32 %v25921_v50, %v2585_v32  ;;  %v23510_v54 = vand.u32 4294901760, %v23481_v28  ;;  %v8592_v48 = vld [vmem:[%s24511_s4] sm:$0xff]  ;;  %v25926_v32 = vld [vmem:[#allocation51_spill] sm:$0xff] }
 0x61c   : > { %v2580_v50 = vadd.f32 %v25926_v32, %v2337_v16  ;;  %v25930_v9 = vld [vmem:[#allocation33_spill] sm:$0xff]  ;;  %8595 = vperm.xlu1 %18401, %v8592_v48   ;;  %v25932_v16 = vld [vmem:[#allocation74_spill] sm:$0xff] }
 0x61d   : > { %v2845_v22 = vadd.f32 %v25927_v47, %v2730_v40  ;;  %v3133_v6 = vadd.f32 %v25930_v9, %v3022_v59  ;;  %v23534_v40 = vpop.f32.mrf.mxu0  ;;  %v25933_v47 = vand.u32 4294901760, %v23478_v4  ;;  %v8723_v34 = vsub.f32 %v23481_v28, %v23510_v54  ;;  %v25934_v59 = vld [vmem:[#allocation61_spill] sm:$0xff] }
 0x61e   : > { %18317 = vmatpush3.xpose.msra.mxu0 %v25925_v17  ;;  %18349 = vmatpush3.xpose.msra.mxu1 %v23022_v51  ;;  %v25931_v51 = vld [vmem:[#allocation63_spill] sm:$0xff]  ;;  %v2722_v9 = vadd.f32 %v25934_v59, %v2578_v19  ;;  %v25943_v59 = vld [vmem:[#allocation72_spill] sm:$0xff] }
 0x61f   : > { %8680 = vmatprep.subr.mxu0 %v23451_v39  ;;  %18350 = vmatprep.subr.mxu1 %v23028_v0  ;;  %v2724_v17 = vadd.f32 %v25931_v51, %v2580_v50  ;;  %v3020_v32 = vadd.f32 %v25932_v16, %v2845_v22  ;;  %v8762_v0 = vsub.f32 %v23478_v4, %v25933_v47  ;;  %v25935_v22 = vld [vmem:[#allocation64_spill] sm:$0xff]  ;;  %v25936_v50 = vld [vmem:[#allocation75_spill] sm:$0xff]  ;;  %v23548_v16 = vpop.f32.mrf.mxu1  ;;  %v23550_v23 = vpop.f32.mrf.mxu0  ;;  %v8578_v61 = vmax.f32 %v3133_v6, 0.0 }
 0x620   : > { %25937 = vst [vmem:[#allocation50_spill] sm:$0xff] %v23548_v16  ;;  %25938 = vst [vmem:[#allocation34_spill] sm:$0xff] %v23550_v23  ;;  %v25939_v47 = vld [vmem:[#allocation28_spill] sm:$0xff]  ;;  %v2836_v42 = vadd.f32 %v25940_v41, %v2722_v9  ;;  %v25941_v19 = vld [vmem:[#allocation83_spill] sm:$0xff]  ;;  %v23567_v6 = vand.u32 4294901760, %v8723_v34  ;;  %v25945_v9 = vand.u32 4294901760, %v23503_v49 }
 0x621   : > { %18319 = vmatmul.mubr.f32.vlgmr.msra.gmra.mxu0 %v18630_v3  ;;  %v2838_v48 = vadd.f32 %v25935_v22, %v2724_v17  ;;  %v3131_v51 = vadd.f32 %v25936_v50, %v3020_v32  ;;  %v25942_v17 = vand.u32 4294901760, %v23497_v11  ;;  %v23563_v50 = vpop.f32.mrf.mxu1  ;;  %v8763_v41 = vand.u32 4294901760, %v8762_v0  ;;  %v25949_v34 = vld [vmem:[#allocation81_spill] sm:$0xff]  ;;  %v23583_v60 = vpop.f32.mrf.mxu0 }
 0x622   : > { %18351 = vmatpush3.xpose.msra.mxu1 %v23048_v35  ;;  %8682 = vmatpush1.msra.mxu0 %v23472_v15  ;;  %v3252_v35 = vadd.f32 %v25941_v19, %v23345_v45  ;;  %25944 = vst [vmem:[#allocation12_spill] sm:$0xff] %v23563_v50  ;;  %v8774_v19 = vsub.f32 %v23503_v49, %v25945_v9  ;;  %25950 = vst [vmem:[#allocation39_spill] sm:$0xff] %v23583_v60  ;;  %v25951_v9 = vld [vmem:[#allocation71_spill] sm:$0xff] }
 0x623   : > { %8684 = vmatprep.subr.mxu0 %v23470_v5  ;;  %18320 = vmatprep.mubr.f32.mxu0 %v25939_v47  ;;  %v8768_v32 = vsub.f32 %v23497_v11, %v25942_v17  ;;  %v3015_v22 = vadd.f32 %v25943_v59, %v2838_v48  ;;  %v25947_v17 = vld [vmem:[#allocation70_spill] sm:$0xff]  ;;  %v25034_v48 = vmov 0.0   ;;  %v25948_v59 = vld [vmem:[#allocation73_spill] sm:$0xff]  ;;  %v8577_v0 = vmax.f32 %v3131_v51, 0.0  ;;  %v23588_v16 = vpop.f32.mrf.mxu1 }
 0x624   : > { %8686 = vmatpush1.msra.mxu0 %v23483_v1  ;;  %18352 = vmatprep.subr.mxu1 %v23054_v44  ;;  %v25946_v44 = vand.u32 4294901760, %v23516_v57  ;;  %v3013_v13 = vadd.f32 %v25947_v17, %v2836_v42  ;;  %v3250_v25 = vadd.f32 %v25949_v34, %v23345_v45  ;;  %v25952_v42 = vld [vmem:[#allocation84_spill] sm:$0xff]  ;;  %25953 = vst [vmem:[#allocation23_spill] sm:$0xff] %v23588_v16  ;;  %v8775_v51 = vand.u32 4294901760, %v8774_v19  ;;  %v25957_v34 = vld [vmem:[#allocation91_spill] sm:$0xff] }
 0x625   : > { %18321 = vmatmul.mubr.f32.gmra.mxu0 %v25939_v47  ;;  %8853 = vmatprep.subr.mxu0 %v23478_v4  ;;  %v23579_v50 = vadd.f32 %v25948_v59, %v3015_v22  ;;  %v3491_v17 = vadd.f32 %v25952_v42, %v3252_v35  ;;  %v25955_v35 = vld [vmem:[#allocation82_spill] sm:$0xff]  ;;  %v23600_v59 = vpop.f32.mrf.mxu1  ;;  %v25960_v42 = vld [vmem:[#allocation77_spill] sm:$0xff] }
 0x626   : > { %v8780_v23 = vsub.f32 %v23516_v57, %v25946_v44  ;;  %18353 = vmatpush3.xpose.msra.mxu1 %v23070_v21  ;;  %8719 = vmatprep.mubr.f32.mxu0 %v25034_v48  ;;  %v3124_v36 = vadd.f32 %v25951_v9, %v3013_v13  ;;  %v8613_v44 = vsel %vm8602_vm2, %v8578_v61, 0  ;;  %v8769_v21 = vand.u32 4294901760, %v8768_v32  ;;  %v23590_v48 = vpop.f32.mrf.mxu0  ;;  %25956 = vst [vmem:[#allocation15_spill] sm:$0xff] %v23600_v59 }
 0x627   : > { %8764 = vmatprep.subr.mxu1 %v8763_v41  ;;  %25954 = vst [vmem:[#allocation25_spill] sm:$0xff] %v23590_v48  ;;  %v8562_v13 = vmax.f32 %v23579_v50, 0.0  ;;  %v8610_v61 = vsel %vm8602_vm2, %v8577_v0, 0  ;;  %v23597_v41 = vand.u32 4294901760, %v8613_v44  ;;  %v3489_v32 = vadd.f32 %v25955_v35, %v3250_v25  ;;  %v23622_v16 = vpop.f32.mrf.mxu1 }
 0x628   : > { %v8781_v22 = vand.u32 4294901760, %v8780_v23  ;;  %v3636_v19 = vadd.f32 %v25957_v34, %v3491_v17  ;;  %v25958_v23 = vld [vmem:[#allocation79_spill] sm:$0xff]  ;;  %v23608_v0 = vpop.f32.mrf.mxu0  ;;  %v25959_v9 = vmov 0.0   ;;  %v23611_v25 = vand.u32 4294901760, %v8610_v61  ;;  %v25963_v34 = vld [vmem:[#allocation89_spill] sm:$0xff]  ;;  %25964 = vst [vmem:[#allocation42_spill] sm:$0xff] %v23622_v16 }
 0x629   : > { %18355 = vmatmul.mubr.f32.vlgmr.msra.gmra.mxu1 %v18630_v3  ;;  %8725 = vmatmul.mubr.f32.vlgmr.msra.gmra.mxu0 %v23567_v6  ;;  %v8561_v3 = vmax.f32 %v3124_v36, 0.0  ;;  %v3241_v50 = vadd.f32 %v25958_v23, %v23369_v46  ;;  %v25961_v36 = vld [vmem:[#allocation6_spill] sm:$0xff]  ;;  %v25962_v17 = vand.u32 4294901760, %v23478_v4  ;;  %v23619_v35 = vand.u32 4294901760, %v8562_v13 }
 0x62a   : > { %8856 = vmatpush1.msra.mxu0 %v23497_v11  ;;  %8770 = vmatpush1.msra.mxu1 %v8769_v21  ;;  %v3239_v21 = vadd.f32 %v25960_v42, %v23369_v46  ;;  %v3634_v23 = vadd.f32 %v25963_v34, %v3489_v32  ;;  %v23637_v60 = vpop.f32.mrf.mxu0  ;;  %v25970_v59 = vand.u32 4294901760, %v23503_v49  ;;  %v25973_v16 = vand.u32 4294901760, %v23516_v57 }
 0x62b   : > { %8859 = vmatprep.subr.mxu0 %v23503_v49  ;;  %8776 = vmatprep.subr.mxu1 %v8775_v51  ;;  %v3751_v51 = vadd.f32 %v25961_v36, %v3636_v19  ;;  %v23629_v42 = vand.u32 4294901760, %v8561_v3  ;;  %v25965_v19 = vld [vmem:[#allocation54_spill] sm:$0xff]  ;;  %v25966_v36 = vand.u32 4294901760, %v23497_v11  ;;  %25969 = vst [vmem:[#allocation36_spill] sm:$0xff] %v23637_v60  ;;  %v25972_v11 = vld [vmem:[#allocation93_spill] sm:$0xff]  ;;  %v23652_v49 = vpop.f32.mrf.mxu1 }
 0x62c   : > { %8862 = vmatpush1.msra.mxu0 %v23516_v57  ;;  %18356 = vmatprep.mubr.f32.mxu1 %v25939_v47  ;;  %25976 = vst [vmem:[#allocation35_spill] sm:$0xff] %v23652_v49  ;;  %v25986_v49 = vld [vmem:[#allocation10_spill] sm:$0xff] }
 0x62d   : > { %8782 = vmatpush1.msra.mxu1 %v8781_v22  ;;  %8895 = vmatprep.mubr.f32.mxu0 %v25959_v9  ;;  %v23627_v22 = vsub.f32 %v8613_v44, %v23597_v41  ;;  %v3926_v4 = vadd.f32 %v25965_v19, %v3751_v51  ;;  %v23643_v44 = vsub.f32 %v8610_v61, %v23611_v25  ;;  %v25971_v51 = vld [vmem:[#allocation78_spill] sm:$0xff] }
 0x62e   : > { %9013 = vmatprep.subr.mxu0 %v25962_v17  ;;  %18357 = vmatmul.mubr.f32.gmra.mxu1 %v25939_v47  ;;  %v25967_v47 = vld [vmem:[#allocation80_spill] sm:$0xff]  ;;  %v25968_v17 = vld [vmem:[#allocation90_spill] sm:$0xff]  ;;  %v3482_v19 = vadd.f32 %v25971_v51, %v3239_v21  ;;  %v23657_v61 = vsub.f32 %v8562_v13, %v23619_v35  ;;  %v23661_v57 = vsub.f32 %v8561_v3, %v23629_v42 }
 0x62f   : > { %8898 = vmatmul.mubr.f32.vlgmr.msra.gmra.mxu0 %v23481_v28  ;;  %8933 = vmatprep.subr.mxu1 %v23451_v39  ;;  %v3484_v32 = vadd.f32 %v25967_v47, %v3241_v50  ;;  %v3749_v34 = vadd.f32 %v25968_v17, %v3634_v23  ;;  %v25974_v50 = vld [vmem:[#allocation87_spill] sm:$0xff]  ;;  %v25975_v47 = vld [vmem:[#allocation18_spill] sm:$0xff]  ;;  %v9258_v13 = vand.u32 4294901760, %v23643_v44 }
 0x630   : > { %9017 = vmatpush1.msra.mxu0 %v25966_v36  ;;  %8815 = vmatprep.mubr.f32.mxu1 %v25959_v9  ;;  %v4037_v36 = vadd.f32 %v25972_v11, %v3926_v4  ;;  %v25978_v4 = vld [vmem:[#allocation88_spill] sm:$0xff]  ;;  %v23668_v11 = vpop.f32.mrf.mxu0  ;;  %v25981_v3 = vld [vmem:[#allocation86_spill] sm:$0xff] }
 0x631   : > { %9021 = vmatprep.subr.mxu0 %v25970_v59  ;;  %9058 = vmatprep.mubr.f32.mxu0 %v25959_v9  ;;  %v3628_v23 = vadd.f32 %v25974_v50, %v3484_v32  ;;  %v3924_v17 = vadd.f32 %v25975_v47, %v3749_v34  ;;  %v9252_v59 = vand.u32 4294901760, %v23627_v22  ;;  %v25979_v34 = vld [vmem:[#allocation53_spill] sm:$0xff]  ;;  %25980 = vst [vmem:[#allocation38_spill] sm:$0xff] %v23668_v11  ;;  %v25988_v11 = vld [vmem:[#allocation40_spill] sm:$0xff] }
 0x632   : > { %9025 = vmatpush1.msra.mxu0 %v25973_v16  ;;  %8817 = vmatmul.mubr.f32.vlgmr.msra.gmra.mxu1 %v23459_v37  ;;  %v25977_v16 = vld [vmem:[#allocation85_spill] sm:$0xff]  ;;  %v8580_v47 = vmax.f32 %v4037_v36, 0.0  ;;  %v9270_v36 = vand.u32 4294901760, %v23661_v57 }
 0x633   : > { %9171 = vmatprep.subr.mxu0 %v23597_v41  ;;  %8935 = vmatpush1.msra.mxu1 %v23472_v15  ;;  %v3626_v21 = vadd.f32 %v25977_v16, %v3482_v19  ;;  %v3742_v32 = vadd.f32 %v25978_v4, %v3628_v23  ;;  %v4035_v51 = vadd.f32 %v25979_v34, %v3924_v17  ;;  %v25982_v19 = vld [vmem:[#allocation55_spill] sm:$0xff]  ;;  %v23679_v4 = vpop.f32.mrf.mxu1 }
 0x634   : > { %9060 = vmatmul.mubr.f32.vlgmr.msra.gmra.mxu0 %v23459_v37  ;;  %8937 = vmatprep.subr.mxu1 %v23470_v5  ;;  %v4156_v16 = vadd.f32 %v25982_v19, %v23345_v45  ;;  %v25983_v23 = vld [vmem:[#allocation19_spill] sm:$0xff]  ;;  %25984 = vst [vmem:[#allocation11_spill] sm:$0xff] %v23679_v4  ;;  %v9253_v34 = vsub.f32 %v23627_v22, %v9252_v59  ;;  %v25987_v4 = vld [vmem:[#allocation96_spill] sm:$0xff] }
 0x635   : > { %9173 = vmatpush1.msra.mxu0 %v23611_v25  ;;  %8939 = vmatpush1.msra.mxu1 %v23483_v1  ;;  %v3740_v50 = vadd.f32 %v25981_v3, %v3626_v21  ;;  %v3919_v17 = vadd.f32 %v25983_v23, %v3742_v32  ;;  %v9264_v21 = vand.u32 4294901760, %v23657_v61  ;;  %v25985_v3 = vld [vmem:[#allocation92_spill] sm:$0xff]  ;;  %v8579_v23 = vmax.f32 %v4035_v51, 0.0  ;;  %v23706_v51 = vpop.f32.mrf.mxu1 }
 0x636   : > { %9175 = vmatprep.subr.mxu0 %v23619_v35  ;;  %8972 = vmatprep.mubr.f32.mxu1 %v25959_v9  ;;  %v4154_v60 = vadd.f32 %v25987_v4, %v23345_v45  ;;  %v9271_v4 = vsub.f32 %v23661_v57, %v9270_v36 }
 0x637   : > { %9177 = vmatpush1.msra.mxu0 %v23629_v42  ;;  %9095 = vmatprep.subr.mxu1 %v23451_v39  ;;  %v3917_v19 = vadd.f32 %v25985_v3, %v3740_v50  ;;  %v23690_v32 = vadd.f32 %v25986_v49, %v3919_v17  ;;  %v23694_v39 = vpop.f32.mrf.mxu0  ;;  %v8619_v50 = vsel %vm8602_vm2, %v8580_v47, 0  ;;  %v25989_v3 = vld [vmem:[#allocation98_spill] sm:$0xff]  ;;  %v9259_v49 = vsub.f32 %v23643_v44, %v9258_v13 }
 0x638   : > { %9210 = vmatprep.mubr.f32.mxu0 %v25959_v9  ;;  %9344 = vmatprep.subr.mxu0 %v23627_v22  ;;  %v4395_v22 = vadd.f32 %v25989_v3, %v4156_v16  ;;  %v9254_v17 = vand.u32 4294901760, %v9253_v34  ;;  %v8616_v47 = vsel %vm8602_vm2, %v8579_v23, 0  ;;  %v25990_v16 = vld [vmem:[#allocation97_spill] sm:$0xff]  ;;  %v23727_v23 = vpop.f32.mrf.mxu1 }
 0x639   : > { %8976 = vmatmul.mubr.f32.vlgmr.msra.gmra.mxu1 %v23510_v54  ;;  %9216 = vmatmul.mubr.f32.vlgmr.msra.gmra.mxu0 %v23567_v6  ;;  %v23699_v48 = vadd.f32 %v25988_v11, %v3917_v19  ;;  %v9265_v11 = vsub.f32 %v23657_v61, %v9264_v21  ;;  %v4393_v19 = vadd.f32 %v25990_v16, %v4154_v60 }
 0x63a   : > { %9097 = vmatpush1.msra.mxu1 %v23472_v15  ;;  %9347 = vmatpush1.msra.mxu0 %v23643_v44  ;;  %v8564_v15 = vmax.f32 %v23690_v32, 0.0  ;;  %v23716_v44 = vand.u32 4294901760, %v8619_v50  ;;  %v4540_v34 = vadd.f32 %v23292_v18, %v4395_v22  ;;  %v25993_v18 = vld [vmem:[#allocation94_spill] sm:$0xff]  ;;  %v9272_v22 = vand.u32 4294901760, %v9271_v4 }
 0x63b   : > { %9099 = vmatprep.subr.mxu1 %v23470_v5  ;;  %9350 = vmatprep.subr.mxu0 %v23657_v61  ;;  %v23719_v5 = vpop.f32.mrf.mxu0  ;;  %v8563_v61 = vmax.f32 %v23699_v48, 0.0  ;;  %v9266_v60 = vand.u32 4294901760, %v9265_v11  ;;  %v4143_v48 = vadd.f32 %v25993_v18, %v23369_v46  ;;  %v4538_v16 = vadd.f32 %v23280_v56, %v4393_v19 }
 0x63c   : > { %9101 = vmatpush1.msra.mxu1 %v23483_v1  ;;  %9353 = vmatpush1.msra.mxu0 %v23661_v57  ;;  %v9260_v1 = vand.u32 4294901760, %v9259_v49  ;;  %v25991_v57 = vld [vmem:[#allocation95_spill] sm:$0xff]  ;;  %v23738_v49 = vand.u32 4294901760, %v8564_v15  ;;  %v23744_v11 = vsub.f32 %v8619_v50, %v23716_v44 }
 0x63d   : > { %9134 = vmatprep.mubr.f32.mxu1 %v25959_v9  ;;  %9255 = vmatprep.subr.mxu1 %v9254_v17  ;;  %v4145_v32 = vadd.f32 %v25991_v57, %v23369_v46  ;;  %v23729_v3 = vpop.f32.mrf.mxu0  ;;  %v23733_v17 = vand.u32 4294901760, %v8616_v47  ;;  %v23741_v57 = vpop.f32.mrf.mxu1  ;;  %v4653_v4 = vadd.f32 %v23286_v52, %v4538_v16  ;;  %v5060_v16 = vadd.f32 %v23377_v62, %v23345_v45 }
 0x63e   : > { %9386 = vmatprep.mubr.f32.mxu0 %v25959_v9  ;;  %9504 = vmatprep.subr.mxu0 %v9252_v59  ;;  %25992 = vst [vmem:[#allocation9_spill] sm:$0xff] %v23729_v3  ;;  %v4655_v59 = vadd.f32 %v23298_v31, %v4540_v34  ;;  %v23746_v3 = vand.u32 4294901760, %v8563_v61  ;;  %v25994_v31 = vld [vmem:[#allocation47_spill] sm:$0xff] }
 0x63f   : > { %9136 = vmatmul.mubr.f32.vlgmr.msra.gmra.mxu1 %v23459_v37  ;;  %9389 = vmatmul.mubr.f32.vlgmr.msra.gmra.mxu0 %v23481_v28  ;;  %v23751_v34 = vpop.f32.mrf.mxu0  ;;  %v23756_v56 = vsub.f32 %v8616_v47, %v23733_v17  ;;  %v4828_v52 = vadd.f32 %v23323_v27, %v4653_v4  ;;  %v23769_v47 = vsub.f32 %v8564_v15, %v23738_v49 }
 0x640   : > { %9261 = vmatpush1.msra.mxu1 %v9260_v1  ;;  %9508 = vmatpush1.msra.mxu0 %v9258_v13  ;;  %v4830_v18 = vadd.f32 %v23333_v10, %v4655_v59  ;;  %v4388_v13 = vadd.f32 %v25994_v31, %v4145_v32  ;;  %v9743_v1 = vand.u32 4294901760, %v23744_v11  ;;  %v25996_v32 = vld [vmem:[#allocation60_spill] sm:$0xff] }
 0x641   : > { %9267 = vmatprep.subr.mxu1 %v9266_v60  ;;  %9512 = vmatprep.subr.mxu0 %v9264_v21  ;;  %v25995_v21 = vld [vmem:[#allocation44_spill] sm:$0xff]  ;;  %v4939_v27 = vadd.f32 %v23328_v12, %v4828_v52  ;;  %v9749_v15 = vand.u32 4294901760, %v23756_v56  ;;  %v9755_v31 = vand.u32 4294901760, %v23769_v47 }
 0x642   : > { %9273 = vmatpush1.msra.mxu1 %v9272_v22  ;;  %9516 = vmatpush1.msra.mxu0 %v9270_v36  ;;  %v4386_v50 = vadd.f32 %v25995_v21, %v4143_v48  ;;  %v4941_v19 = vadd.f32 %v23338_v2, %v4830_v18  ;;  %v4532_v10 = vadd.f32 %v23268_v20, %v4388_v13  ;;  %v23764_v36 = vpop.f32.mrf.mxu1  ;;  %v23780_v48 = vpop.f32.mrf.mxu0 }
 0x643   : > { %9306 = vmatprep.mubr.f32.mxu1 %v25959_v9  ;;  %9424 = vmatprep.subr.mxu1 %v23597_v41  ;;  %v23773_v2 = vsub.f32 %v8563_v61, %v23746_v3  ;;  %v25997_v61 = vld [vmem:[#allocation99_spill] sm:$0xff]  ;;  %v9744_v18 = vsub.f32 %v23744_v11, %v9743_v1  ;;  %v8581_v4 = vmax.f32 %v4939_v27, 0.0  ;;  %v5058_v21 = vadd.f32 %v23363_v33, %v23345_v45 }
 0x644   : > { %9549 = vmatprep.mubr.f32.mxu0 %v25959_v9  ;;  %9662 = vmatprep.subr.mxu0 %v23716_v44  ;;  %v4530_v60 = vadd.f32 %v25996_v32, %v4386_v50  ;;  %v4646_v20 = vadd.f32 %v23274_v7, %v4532_v10  ;;  %v8582_v22 = vmax.f32 %v4941_v19, 0.0  ;;  %v23791_v12 = vpop.f32.mrf.mxu1  ;;  %v9756_v10 = vsub.f32 %v23769_v47, %v9755_v31 }
 0x645   : > { %9308 = vmatmul.mubr.f32.vlgmr.msra.gmra.mxu1 %v23459_v37  ;;  %9551 = vmatmul.mubr.f32.vlgmr.msra.gmra.mxu0 %v23459_v37  ;;  %v9761_v13 = vand.u32 4294901760, %v23773_v2  ;;  %v5297_v32 = vadd.f32 %v23371_v53, %v5058_v21  ;;  %v26000_v21 = vld [vmem:[#allocation50_spill] sm:$0xff] }
 0x646   : > { %9426 = vmatpush1.msra.mxu1 %v23611_v25  ;;  %9664 = vmatpush1.msra.mxu0 %v23733_v17  ;;  %v4644_v59 = vadd.f32 %v25997_v61, %v4530_v60  ;;  %v4823_v7 = vadd.f32 %v23312_v29, %v4646_v20  ;;  %v23818_v33 = vpop.f32.mrf.mxu1  ;;  %v9757_v53 = vand.u32 4294901760, %v9756_v10  ;;  %v5047_v61 = vadd.f32 %v23340_v8, %v23369_v46 }
 0x647   : > { %9428 = vmatprep.subr.mxu1 %v23619_v35  ;;  %9666 = vmatprep.subr.mxu0 %v23738_v49  ;;  %v9762_v52 = vsub.f32 %v23773_v2, %v9761_v13 }
 0x648   : > { %9430 = vmatpush1.msra.mxu1 %v23629_v42  ;;  %9668 = vmatpush1.msra.mxu0 %v23746_v3  ;;  %v4821_v62 = vadd.f32 %v23300_v26, %v4644_v59  ;;  %v23802_v29 = vadd.f32 %v23318_v58, %v4823_v7  ;;  %v8625_v26 = vsel %vm8602_vm2, %v8582_v22, 0  ;;  %v9750_v58 = vsub.f32 %v23756_v56, %v9749_v15 }
 0x649   : > { %9463 = vmatprep.mubr.f32.mxu1 %v25959_v9  ;;  %9586 = vmatprep.subr.mxu1 %v23597_v41  ;;  %v23806_v41 = vpop.f32.mrf.mxu0 }
 0x64a   : > { %9701 = vmatprep.mubr.f32.mxu0 %v25959_v9  ;;  %9835 = vmatprep.subr.mxu0 %v23744_v11  ;;  %v23811_v50 = vadd.f32 %v23306_v14, %v4821_v62  ;;  %v5299_v11 = vadd.f32 %v23385_v38, %v5060_v16  ;;  %v9745_v14 = vand.u32 4294901760, %v9744_v18  ;;  %v8566_v38 = vmax.f32 %v23802_v29, 0.0  ;;  %v25999_v29 = vld [vmem:[#allocation30_spill] sm:$0xff] }
 0x64b   : > { %9467 = vmatmul.mubr.f32.vlgmr.msra.gmra.mxu1 %v23510_v54  ;;  %9707 = vmatmul.mubr.f32.vlgmr.msra.gmra.mxu0 %v23567_v6  ;;  %v23820_v19 = vpop.f32.mrf.mxu0 }
 0x64c   : > { %9588 = vmatpush1.msra.mxu1 %v23611_v25  ;;  %9838 = vmatpush1.msra.mxu0 %v23756_v56  ;;  %v8622_v25 = vsel %vm8602_vm2, %v8581_v4, 0  ;;  %v23830_v56 = vand.u32 4294901760, %v8625_v26  ;;  %v5444_v60 = vadd.f32 %v23445_v30, %v5299_v11  ;;  %v23850_v59 = vand.u32 4294901760, %v8566_v38 }
 0x64d   : > { %9590 = vmatprep.subr.mxu1 %v23619_v35  ;;  %9841 = vmatprep.subr.mxu0 %v23769_v47  ;;  %v23833_v35 = vpop.f32.mrf.mxu1  ;;  %v8565_v47 = vmax.f32 %v23811_v50, 0.0  ;;  %v23841_v20 = vpop.f32.mrf.mxu0  ;;  %v23845_v27 = vand.u32 4294901760, %v8622_v25  ;;  %v5290_v4 = vadd.f32 %v25999_v29, %v5047_v61 }
 0x64e   : > { %9592 = vmatpush1.msra.mxu1 %v23629_v42  ;;  %9844 = vmatpush1.msra.mxu0 %v23773_v2  ;;  %v9751_v42 = vand.u32 4294901760, %v9750_v58  ;;  %v5049_v2 = vadd.f32 %v23354_v24, %v23369_v46  ;;  %v5559_v30 = vadd.f32 %v23455_v63, %v5444_v60  ;;  %v5442_v24 = vadd.f32 %v23426_v43, %v5297_v32  ;;  %v25998_v63 = vld [vmem:[#allocation32_spill] sm:$0xff] }
 0x64f   : > { %9625 = vmatprep.mubr.f32.mxu1 %v25959_v9  ;;  %9746 = vmatprep.subr.mxu1 %v9745_v14  ;;  %v23853_v22 = vpop.f32.mrf.mxu1  ;;  %v23855_v16 = vpop.f32.mrf.mxu0  ;;  %v23858_v7 = vsub.f32 %v8625_v26, %v23830_v56  ;;  %v23860_v18 = vand.u32 4294901760, %v8565_v47  ;;  %v23883_v58 = vsub.f32 %v8566_v38, %v23850_v59  ;;  %v26004_v32 = vld [vmem:[#allocation16_spill] sm:$0xff] }
 0x650   : > { %9877 = vmatprep.mubr.f32.mxu0 %v25959_v9  ;;  %9995 = vmatprep.subr.mxu0 %v9743_v1  ;;  %v9763_v1 = vand.u32 4294901760, %v9762_v52  ;;  %v5734_v8 = vadd.f32 %v23534_v40, %v5559_v30  ;;  %v5557_v62 = vadd.f32 %v23436_v55, %v5442_v24  ;;  %v26001_v40 = vld [vmem:[#allocation29_spill] sm:$0xff]  ;;  %v26002_v55 = vld [vmem:[#allocation48_spill] sm:$0xff]  ;;  %v26003_v52 = vld [vmem:[#allocation7_spill] sm:$0xff] }
 0x651   : > { %9627 = vmatmul.mubr.f32.vlgmr.msra.gmra.mxu1 %v23459_v37  ;;  %9880 = vmatmul.mubr.f32.vlgmr.msra.gmra.mxu0 %v23481_v28  ;;  %v23865_v43 = vpop.f32.mrf.mxu1  ;;  %v23878_v11 = vpop.f32.mrf.mxu0  ;;  %v10234_v14 = vand.u32 4294901760, %v23858_v7  ;;  %v23887_v10 = vsub.f32 %v8565_v47, %v23860_v18  ;;  %v26006_v47 = vld [vmem:[#allocation24_spill] sm:$0xff]  ;;  %v26007_v24 = vld [vmem:[#allocation13_spill] sm:$0xff] }
 0x652   : > { %9752 = vmatpush1.msra.mxu1 %v9751_v42  ;;  %9999 = vmatpush1.msra.mxu0 %v9749_v15  ;;  %v5292_v15 = vadd.f32 %v25998_v63, %v5049_v2  ;;  %v5845_v50 = vadd.f32 %v26000_v21, %v5734_v8  ;;  %v5732_v26 = vadd.f32 %v26002_v55, %v5557_v62  ;;  %v26005_v42 = vld [vmem:[#allocation31_spill] sm:$0xff]  ;;  %v10246_v62 = vand.u32 4294901760, %v23883_v58  ;;  %v26009_v21 = vld [vmem:[#allocation14_spill] sm:$0xff] }
 0x653   : > { %9758 = vmatprep.subr.mxu1 %v9757_v53  ;;  %10003 = vmatprep.subr.mxu0 %v9755_v31  ;;  %v23870_v31 = vsub.f32 %v8622_v25, %v23845_v27  ;;  %v5434_v25 = vadd.f32 %v26003_v52, %v5290_v4  ;;  %v23894_v53 = vpop.f32.mrf.mxu1  ;;  %v23905_v63 = vpop.f32.mrf.mxu0  ;;  %v10252_v29 = vand.u32 4294901760, %v23887_v10  ;;  %v26008_v4 = vld [vmem:[#allocation26_spill] sm:$0xff] }
 0x654   : > { %9764 = vmatpush1.msra.mxu1 %v9763_v1  ;;  %10007 = vmatpush1.msra.mxu0 %v9761_v13  ;;  %v5436_v13 = vadd.f32 %v26001_v40, %v5292_v15  ;;  %v5843_v2 = vadd.f32 %v26005_v42, %v5732_v26  ;;  %v8584_v30 = vmax.f32 %v5845_v50, 0.0  ;;  %v5964_v1 = vadd.f32 %v23608_v0, %v23345_v45  ;;  %v26011_v26 = vld [vmem:[#allocation17_spill] sm:$0xff] }
 0x655   : > { %9797 = vmatprep.mubr.f32.mxu1 %v25959_v9  ;;  %9915 = vmatprep.subr.mxu1 %v23716_v44  ;;  %v10240_v38 = vand.u32 4294901760, %v23870_v31  ;;  %v5548_v61 = vadd.f32 %v26006_v47, %v5434_v25  ;;  %v10235_v15 = vsub.f32 %v23858_v7, %v10234_v14  ;;  %v23932_v42 = vpop.f32.mrf.mxu0  ;;  %v10247_v47 = vsub.f32 %v23883_v58, %v10246_v62 }
 0x656   : > { %10040 = vmatprep.mubr.f32.mxu0 %v25959_v9  ;;  %10153 = vmatprep.subr.mxu0 %v23830_v56  ;;  %v5550_v60 = vadd.f32 %v26004_v32, %v5436_v13  ;;  %v8583_v40 = vmax.f32 %v5843_v2, 0.0  ;;  %v26010_v13 = vld [vmem:[#allocation25_spill] sm:$0xff]  ;;  %v8631_v25 = vsel %vm8602_vm2, %v8584_v30, 0  ;;  %v26012_v32 = vld [vmem:[#allocation42_spill] sm:$0xff] }
 0x657   : > { %9799 = vmatmul.mubr.f32.vlgmr.msra.gmra.mxu1 %v23459_v37  ;;  %10042 = vmatmul.mubr.f32.vlgmr.msra.gmra.mxu0 %v23459_v37  ;;  %v5725_v0 = vadd.f32 %v26008_v4, %v5548_v61  ;;  %v5962_v55 = vadd.f32 %v26010_v13, %v23345_v45  ;;  %v10236_v2 = vand.u32 4294901760, %v10235_v15  ;;  %v10253_v61 = vsub.f32 %v23887_v10, %v10252_v29  ;;  %v23953_v4 = vpop.f32.mrf.mxu0 }
 0x658   : > { %9917 = vmatpush1.msra.mxu1 %v23733_v17  ;;  %10155 = vmatpush1.msra.mxu0 %v23845_v27  ;;  %v5727_v8 = vadd.f32 %v26007_v24, %v5550_v60  ;;  %v10241_v60 = vsub.f32 %v23870_v31, %v10240_v38  ;;  %v8628_v30 = vsel %vm8602_vm2, %v8583_v40, 0 }
 0x659   : > { %9919 = vmatprep.subr.mxu1 %v23738_v49  ;;  %10157 = vmatprep.subr.mxu0 %v23850_v59  ;;  %v23925_v52 = vadd.f32 %v26011_v26, %v5725_v0  ;;  %v10248_v0 = vand.u32 4294901760, %v10247_v47 }
 0x65a   : > { %9921 = vmatpush1.msra.mxu1 %v23746_v3  ;;  %10159 = vmatpush1.msra.mxu0 %v23860_v18  ;;  %v23916_v50 = vadd.f32 %v26009_v21, %v5727_v8  ;;  %v23957_v21 = vand.u32 4294901760, %v8628_v30 }
 0x65b   : > { %9954 = vmatprep.mubr.f32.mxu1 %v25959_v9  ;;  %10077 = vmatprep.subr.mxu1 %v23716_v44  ;;  %v23920_v44 = vpop.f32.mrf.mxu1 }
 0x65c   : > { %10192 = vmatprep.mubr.f32.mxu0 %v25959_v9  ;;  %10326 = vmatprep.subr.mxu0 %v23858_v7  ;;  %v6203_v7 = vadd.f32 %v26012_v32, %v5964_v1  ;;  %v26013_v1 = vld [vmem:[#allocation15_spill] sm:$0xff] }
 0x65d   : > { %9958 = vmatmul.mubr.f32.vlgmr.msra.gmra.mxu1 %v23510_v54  ;;  %10198 = vmatmul.mubr.f32.vlgmr.msra.gmra.mxu0 %v23567_v6  ;;  %v6201_v24 = vadd.f32 %v26013_v1, %v5962_v55 }
 0x65e   : > { %10079 = vmatpush1.msra.mxu1 %v23733_v17  ;;  %10329 = vmatpush1.msra.mxu0 %v23870_v31  ;;  %v8568_v17 = vmax.f32 %v23916_v50, 0.0  ;;  %v23942_v31 = vand.u32 4294901760, %v8631_v25  ;;  %v6348_v8 = vadd.f32 %v23719_v5, %v6203_v7  ;;  %v26015_v50 = vld [vmem:[#allocation34_spill] sm:$0xff] }
 0x65f   : > { %10081 = vmatprep.subr.mxu1 %v23738_v49  ;;  %10332 = vmatprep.subr.mxu0 %v23883_v58  ;;  %v23945_v49 = vpop.f32.mrf.mxu1  ;;  %v8567_v58 = vmax.f32 %v23925_v52, 0.0  ;;  %v5951_v40 = vadd.f32 %v26015_v50, %v23369_v46  ;;  %v6346_v55 = vadd.f32 %v23694_v39, %v6201_v24  ;;  %v23980_v39 = vsub.f32 %v8628_v30, %v23957_v21 }
 0x660   : > { %10083 = vmatpush1.msra.mxu1 %v23746_v3  ;;  %10335 = vmatpush1.msra.mxu0 %v23887_v10  ;;  %v10242_v3 = vand.u32 4294901760, %v10241_v60  ;;  %v26014_v10 = vld [vmem:[#allocation39_spill] sm:$0xff]  ;;  %v6463_v5 = vadd.f32 %v23727_v23, %v6348_v8  ;;  %v23962_v13 = vand.u32 4294901760, %v8568_v17  ;;  %v23968_v52 = vsub.f32 %v8631_v25, %v23942_v31  ;;  %v26019_v8 = vld [vmem:[#allocation36_spill] sm:$0xff] }
 0x661   : > { %10116 = vmatprep.mubr.f32.mxu1 %v25959_v9  ;;  %10237 = vmatprep.subr.mxu1 %v10236_v2  ;;  %v5953_v15 = vadd.f32 %v26014_v10, %v23369_v46  ;;  %v23965_v26 = vpop.f32.mrf.mxu1  ;;  %v23970_v32 = vand.u32 4294901760, %v8567_v58  ;;  %v26016_v23 = vld [vmem:[#allocation23_spill] sm:$0xff]  ;;  %v6461_v60 = vadd.f32 %v23706_v51, %v6346_v55  ;;  %v23975_v2 = vpop.f32.mrf.mxu0 }
 0x662   : > { %10368 = vmatprep.mubr.f32.mxu0 %v25959_v9  ;;  %10486 = vmatprep.subr.mxu0 %v10234_v14  ;;  %v10254_v14 = vand.u32 4294901760, %v10253_v61  ;;  %v6638_v7 = vadd.f32 %v23806_v41, %v6463_v5  ;;  %v26018_v41 = vld [vmem:[#allocation38_spill] sm:$0xff]  ;;  %v23995_v30 = vsub.f32 %v8568_v17, %v23962_v13  ;;  %v10731_v17 = vand.u32 4294901760, %v23980_v39 }
 0x663   : > { %10118 = vmatmul.mubr.f32.vlgmr.msra.gmra.mxu1 %v23459_v37  ;;  %10371 = vmatmul.mubr.f32.vlgmr.msra.gmra.mxu0 %v23481_v28  ;;  %v6636_v51 = vadd.f32 %v23780_v48, %v6461_v60  ;;  %v23988_v61 = vpop.f32.mrf.mxu1  ;;  %v23990_v1 = vpop.f32.mrf.mxu0  ;;  %v23999_v24 = vsub.f32 %v8567_v58, %v23970_v32  ;;  %v26020_v48 = vld [vmem:[#allocation11_spill] sm:$0xff]  ;;  %v6868_v5 = vadd.f32 %v23878_v11, %v23345_v45 }
 0x664   : > { %10243 = vmatpush1.msra.mxu1 %v10242_v3  ;;  %10490 = vmatpush1.msra.mxu0 %v10240_v38  ;;  %v6196_v38 = vadd.f32 %v26016_v23, %v5953_v15  ;;  %v6749_v47 = vadd.f32 %v23818_v33, %v6638_v7  ;;  %v10725_v33 = vand.u32 4294901760, %v23968_v52  ;;  %v26021_v58 = vld [vmem:[#allocation35_spill] sm:$0xff]  ;;  %v10737_v7 = vand.u32 4294901760, %v23995_v30 }
 0x665   : > { %10249 = vmatprep.subr.mxu1 %v10248_v0  ;;  %10494 = vmatprep.subr.mxu0 %v10246_v62  ;;  %v26017_v62 = vld [vmem:[#allocation12_spill] sm:$0xff]  ;;  %v6747_v15 = vadd.f32 %v23791_v12, %v6636_v51  ;;  %v24006_v0 = vpop.f32.mrf.mxu1  ;;  %v10743_v23 = vand.u32 4294901760, %v23999_v24 }
 0x666   : > { %10255 = vmatpush1.msra.mxu1 %v10254_v14  ;;  %10498 = vmatpush1.msra.mxu0 %v10252_v29  ;;  %v6194_v25 = vadd.f32 %v26017_v62, %v5951_v40  ;;  %v6340_v29 = vadd.f32 %v26018_v41, %v6196_v38  ;;  %v8586_v40 = vmax.f32 %v6749_v47, 0.0  ;;  %v24017_v14 = vpop.f32.mrf.mxu0  ;;  %v10726_v55 = vsub.f32 %v23968_v52, %v10725_v33  ;;  %v26022_v38 = vld [vmem:[#allocation9_spill] sm:$0xff] }
 0x667   : > { %10288 = vmatprep.mubr.f32.mxu1 %v25959_v9  ;;  %10406 = vmatprep.subr.mxu1 %v23830_v56  ;;  %v8585_v60 = vmax.f32 %v6747_v15, 0.0  ;;  %v6866_v62 = vadd.f32 %v23855_v16, %v23345_v45 }
 0x668   : > { %10531 = vmatprep.mubr.f32.mxu0 %v25959_v9  ;;  %10644 = vmatprep.subr.mxu0 %v23942_v31  ;;  %v6338_v3 = vadd.f32 %v26019_v8, %v6194_v25  ;;  %v6454_v10 = vadd.f32 %v26020_v48, %v6340_v29  ;;  %v8637_v47 = vsel %vm8602_vm2, %v8586_v40, 0  ;;  %v7539_v16 = vpop.f32.mrf.mxu0  ;;  %v10727_v41 = vand.u32 4294901760, %v10726_v55 }
 0x669   : > { %10290 = vmatmul.mubr.f32.vlgmr.msra.gmra.mxu1 %v23459_v37  ;;  %10533 = vmatmul.mubr.f32.vlgmr.msra.gmra.mxu0 %v23459_v37  ;;  %v10738_v29 = vsub.f32 %v23995_v30, %v10737_v7  ;;  %v24052_v51 = vand.u32 4294901760, %v8637_v47 }
 0x66a   : > { %10408 = vmatpush1.msra.mxu1 %v23845_v27  ;;  %10646 = vmatpush1.msra.mxu0 %v23957_v21  ;;  %v6452_v50 = vadd.f32 %v26021_v58, %v6338_v3  ;;  %v6631_v12 = vadd.f32 %v23751_v34, %v6454_v10  ;;  %v7541_v3 = vpop.f32.mrf.mxu0  ;;  %v6855_v10 = vadd.f32 %v23820_v19, %v23369_v46 }
 0x66b   : > { %10410 = vmatprep.subr.mxu1 %v23850_v59  ;;  %10648 = vmatprep.subr.mxu0 %v23962_v13 }
 0x66c   : > { %10412 = vmatpush1.msra.mxu1 %v23860_v18  ;;  %10650 = vmatpush1.msra.mxu0 %v23970_v32  ;;  %v6629_v11 = vadd.f32 %v26022_v38, %v6452_v50  ;;  %v24028_v34 = vadd.f32 %v23764_v36, %v6631_v12  ;;  %v10732_v36 = vsub.f32 %v23980_v39, %v10731_v17 }
 0x66d   : > { %10445 = vmatprep.mubr.f32.mxu1 %v25959_v9  ;;  %10568 = vmatprep.subr.mxu1 %v23830_v56  ;;  %v24032_v56 = vpop.f32.mrf.mxu1  ;;  %v24072_v50 = vsub.f32 %v8637_v47, %v24052_v51 }
 0x66e   : > { %10683 = vmatprep.mubr.f32.mxu0 %v25959_v9  ;;  %10817 = vmatprep.subr.mxu0 %v23968_v52  ;;  %v24037_v25 = vadd.f32 %v23741_v57, %v6629_v11  ;;  %v7107_v52 = vadd.f32 %v23894_v53, %v6868_v5  ;;  %v10744_v57 = vsub.f32 %v23999_v24, %v10743_v23  ;;  %v8634_v53 = vsel %vm8602_vm2, %v8585_v60, 0 }
 0x66f   : > { %10449 = vmatmul.mubr.f32.vlgmr.msra.gmra.mxu1 %v23510_v54  ;;  %10689 = vmatmul.mubr.f32.vlgmr.msra.gmra.mxu0 %v23567_v6  ;;  %v24063_v48 = vand.u32 4294901760, %v8634_v53 }
 0x670   : > { %10570 = vmatpush1.msra.mxu1 %v23845_v27  ;;  %10820 = vmatpush1.msra.mxu0 %v23980_v39  ;;  %v8570_v27 = vmax.f32 %v24028_v34, 0.0  ;;  %v7105_v39 = vadd.f32 %v23865_v43, %v6866_v62  ;;  %v7252_v8 = vadd.f32 %v23975_v2, %v7107_v52  ;;  %v10739_v43 = vand.u32 4294901760, %v10738_v29 }
 0x671   : > { %10572 = vmatprep.subr.mxu1 %v23850_v59  ;;  %10823 = vmatprep.subr.mxu0 %v23995_v30  ;;  %v7650_v59 = vpop.f32.mrf.mxu1  ;;  %v8569_v30 = vmax.f32 %v24037_v25, 0.0 }
 0x672   : > { %10574 = vmatpush1.msra.mxu1 %v23860_v18  ;;  %10826 = vmatpush1.msra.mxu0 %v23999_v24  ;;  %v10733_v18 = vand.u32 4294901760, %v10732_v36  ;;  %v6857_v24 = vadd.f32 %v23841_v20, %v23369_v46  ;;  %v7367_v2 = vadd.f32 %v23988_v61, %v7252_v8  ;;  %v24068_v15 = vand.u32 4294901760, %v8570_v27 }
 0x673   : > { %10607 = vmatprep.mubr.f32.mxu1 %v25959_v9  ;;  %10728 = vmatprep.subr.mxu1 %v10727_v41  ;;  %v7250_v20 = vadd.f32 %v23953_v4, %v7105_v39  ;;  %v7652_v58 = vpop.f32.mrf.mxu1  ;;  %v24074_v40 = vand.u32 4294901760, %v8569_v30  ;;  %v24081_v4 = vsub.f32 %v8634_v53, %v24063_v48 }
 0x674   : > { %10859 = vmatprep.mubr.f32.mxu0 %v25959_v9  ;;  %10977 = vmatprep.subr.mxu0 %v10725_v33  ;;  %v10745_v33 = vand.u32 4294901760, %v10744_v57  ;;  %v7542_v5 = vadd.f32 %v7541_v3, %v7367_v2  ;;  %v7100_v19 = vadd.f32 %v23853_v22, %v6857_v24  ;;  %v11227_v22 = vsub.f32 %v8570_v27, %v24068_v15 }
 0x675   : > { %10609 = vmatmul.mubr.f32.vlgmr.msra.gmra.mxu1 %v23459_v37  ;;  %10862 = vmatmul.mubr.f32.vlgmr.msra.gmra.mxu0 %v23481_v28  ;;  %v7365_v61 = vadd.f32 %v23965_v26, %v7250_v20  ;;  %v11216_v26 = vand.u32 4294901760, %v24072_v50  ;;  %v11222_v11 = vand.u32 4294901760, %v24081_v4 }
 0x676   : > { %10734 = vmatpush1.msra.mxu1 %v10733_v18  ;;  %10981 = vmatpush1.msra.mxu0 %v10731_v17  ;;  %v7098_v17 = vadd.f32 %v23833_v35, %v6855_v10  ;;  %v7653_v12 = vadd.f32 %v7652_v58, %v7542_v5  ;;  %v7244_v55 = vadd.f32 %v23932_v42, %v7100_v19  ;;  %v11228_v62 = vand.u32 4294901760, %v11227_v22  ;;  %v7758_v5 = vpop.f32.mrf.mxu0 }
 0x677   : > { %10740 = vmatprep.subr.mxu1 %v10739_v43  ;;  %10985 = vmatprep.subr.mxu0 %v10737_v7  ;;  %v7540_v7 = vadd.f32 %v7539_v16, %v7365_v61 }
 0x678   : > { %10746 = vmatpush1.msra.mxu1 %v10745_v33  ;;  %10989 = vmatpush1.msra.mxu0 %v10743_v23  ;;  %v11233_v23 = vsub.f32 %v8569_v30, %v24074_v40  ;;  %v7242_v35 = vadd.f32 %v23905_v63, %v7098_v17  ;;  %v7358_v38 = vadd.f32 %v23945_v49, %v7244_v55  ;;  %v8588_v60 = vmax.f32 %v7653_v12, 0.0  ;;  %v7760_v19 = vpop.f32.mrf.mxu0 }
 0x679   : > { %10779 = vmatprep.mubr.f32.mxu1 %v25959_v9  ;;  %10897 = vmatprep.subr.mxu1 %v23942_v31  ;;  %v7651_v42 = vadd.f32 %v7650_v59, %v7540_v7  ;;  %v11217_v49 = vsub.f32 %v24072_v50, %v11216_v26 }
 0x67a   : > { %11022 = vmatprep.mubr.f32.mxu0 %v25959_v9  ;;  %11135 = vmatprep.subr.mxu0 %v24052_v51  ;;  %v7356_v34 = vadd.f32 %v23920_v44, %v7242_v35  ;;  %v7535_v63 = vadd.f32 %v24017_v14, %v7358_v38  ;;  %v11234_v25 = vand.u32 4294901760, %v11233_v23  ;;  %v7769_v61 = vpop.f32.mrf.mxu0  ;;  %v7759_v38 = vadd.f32 %v7758_v5, %v23369_v46 }
 0x67b   : > { %10781 = vmatmul.mubr.f32.vlgmr.msra.gmra.mxu1 %v23459_v37  ;;  %11024 = vmatmul.mubr.f32.vlgmr.msra.gmra.mxu0 %v23459_v37  ;;  %v8587_v52 = vmax.f32 %v7651_v42, 0.0  ;;  %v11218_v36 = vand.u32 4294901760, %v11217_v49  ;;  %v7770_v49 = vadd.f32 %v7769_v61, %v23345_v45 }
 0x67c   : > { %10899 = vmatpush1.msra.mxu1 %v23957_v21  ;;  %11137 = vmatpush1.msra.mxu0 %v24063_v48  ;;  %v7533_v47 = vadd.f32 %v23990_v1, %v7356_v34  ;;  %v7646_v44 = vadd.f32 %v24032_v56, %v7535_v63  ;;  %v11223_v1 = vsub.f32 %v24081_v4, %v11222_v11  ;;  %v7771_v17 = vpop.f32.mrf.mxu0 }
 0x67d   : > { %10901 = vmatprep.subr.mxu1 %v23962_v13  ;;  %11139 = vmatprep.subr.mxu0 %v24068_v15  ;;  %v11229_v56 = vsub.f32 %v11227_v22, %v11228_v62  ;;  %v11235_v16 = vsub.f32 %v11233_v23, %v11234_v25  ;;  %v7761_v34 = vadd.f32 %v7760_v19, %v23369_v46  ;;  %v12595_v19 = vld [vmem:[%s24512_s5] sm:$0x1] }
 0x67e   : > { %10903 = vmatpush1.msra.mxu1 %v23970_v32  ;;  %11141 = vmatpush1.msra.mxu0 %v24074_v40  ;;  %v7644_v14 = vadd.f32 %v24006_v0, %v7533_v47  ;;  %v8572_v41 = vmax.f32 %v7646_v44, 0.0  ;;  %v8640_v0 = vsel %vm8602_vm2, %v8587_v52, 0  ;;  %v7772_v52 = vadd.f32 %v7771_v17, %v23345_v45 }
 0x67f   : > { %10936 = vmatprep.mubr.f32.mxu1 %v25959_v9  ;;  %11059 = vmatprep.subr.mxu1 %v23942_v31  ;;  %v8643_v31 = vsel %vm8602_vm2, %v8588_v60, 0  ;;  %v11230_v57 = vand.u32 4294901760, %v11229_v56  ;;  %v11236_v27 = vand.u32 4294901760, %v11235_v16 }
 0x680   : > { %11174 = vmatprep.mubr.f32.mxu0 %v25959_v9  ;;  %11308 = vmatprep.subr.mxu0 %v24072_v50  ;;  %v24120_v29 = vand.u32 4294901760, %v8643_v31  ;;  %v24128_v53 = vand.u32 4294901760, %v8572_v41 }
 0x681   : > { %10940 = vmatmul.mubr.f32.vlgmr.msra.gmra.mxu1 %v23510_v54  ;;  %11180 = vmatmul.mubr.f32.vlgmr.msra.gmra.mxu0 %v23567_v6 }
 0x682   : > { %11061 = vmatpush1.msra.mxu1 %v23957_v21  ;;  %11311 = vmatpush1.msra.mxu0 %v24081_v4  ;;  %v8571_v21 = vmax.f32 %v7644_v14, 0.0  ;;  %v11706_v39 = vsub.f32 %v8643_v31, %v24120_v29  ;;  %v11718_v8 = vsub.f32 %v8572_v41, %v24128_v53  ;;  %v8001_v4 = vpop.f32.mrf.mxu1 }
 0x683   : > { %11063 = vmatprep.subr.mxu1 %v23962_v13  ;;  %11314 = vmatprep.subr.mxu0 %v11227_v22  ;;  %v11224_v13 = vand.u32 4294901760, %v11223_v1  ;;  %v8002_v63 = vadd.f32 %v8001_v4, %v7759_v38 }
 0x684   : > { %11065 = vmatpush1.msra.mxu1 %v23970_v32  ;;  %11317 = vmatpush1.msra.mxu0 %v11233_v23  ;;  %v24126_v32 = vand.u32 4294901760, %v8640_v0  ;;  %v24131_v59 = vand.u32 4294901760, %v8571_v21  ;;  %v11707_v18 = vand.u32 4294901760, %v11706_v39  ;;  %v11719_v10 = vand.u32 4294901760, %v11718_v8  ;;  %v8003_v12 = vpop.f32.mrf.mxu1 }
 0x685   : > { %11098 = vmatprep.mubr.f32.mxu1 %v25959_v9  ;;  %11219 = vmatprep.subr.mxu1 %v11218_v36  ;;  %v8004_v47 = vadd.f32 %v8003_v12, %v7761_v34 }
 0x686   : > { %11350 = vmatprep.mubr.f32.mxu0 %v25959_v9  ;;  %11468 = vmatprep.subr.mxu0 %v11216_v26  ;;  %v11712_v30 = vsub.f32 %v8640_v0, %v24126_v32  ;;  %v11724_v24 = vsub.f32 %v8571_v21, %v24131_v59  ;;  %v11708_v43 = vsub.f32 %v11706_v39, %v11707_v18  ;;  %v8008_v7 = vpop.f32.mrf.mxu1 }
 0x687   : > { %11100 = vmatmul.mubr.f32.vlgmr.msra.gmra.mxu1 %v23459_v37  ;;  %11353 = vmatmul.mubr.f32.vlgmr.msra.gmra.mxu0 %v23481_v28  ;;  %v11720_v58 = vsub.f32 %v11718_v8, %v11719_v10  ;;  %v8009_v36 = vadd.f32 %v8008_v7, %v7770_v49 }
 0x688   : > { %11225 = vmatpush1.msra.mxu1 %v11224_v13  ;;  %11472 = vmatpush1.msra.mxu0 %v11222_v11  ;;  %v11713_v3 = vand.u32 4294901760, %v11712_v30  ;;  %v11725_v2 = vand.u32 4294901760, %v11724_v24  ;;  %v11709_v20 = vand.u32 4294901760, %v11708_v43  ;;  %v8010_v26 = vpop.f32.mrf.mxu1 }
 0x689   : > { %11231 = vmatprep.subr.mxu1 %v11230_v57  ;;  %11476 = vmatprep.subr.mxu0 %v11228_v62 }
 0x68a   : > { %11237 = vmatpush1.msra.mxu1 %v11236_v27  ;;  %11480 = vmatpush1.msra.mxu0 %v11234_v25  ;;  %v11714_v33 = vsub.f32 %v11712_v30, %v11713_v3 }
 0x68b   : > { %11270 = vmatprep.mubr.f32.mxu1 %v25959_v9  ;;  %11388 = vmatprep.subr.mxu1 %v24052_v51 }
 0x68c   : > { %11513 = vmatprep.mubr.f32.mxu0 %v25959_v9  ;;  %11626 = vmatprep.subr.mxu0 %v24120_v29  ;;  %v11715_v50 = vand.u32 4294901760, %v11714_v33 }
 0x68d   : > { %11272 = vmatmul.mubr.f32.vlgmr.msra.gmra.mxu1 %v23459_v37  ;;  %11515 = vmatmul.mubr.f32.vlgmr.msra.gmra.mxu0 %v23459_v37 }
 0x68e   : > { %11390 = vmatpush1.msra.mxu1 %v24063_v48  ;;  %11628 = vmatpush1.msra.mxu0 %v24126_v32 }
 0x68f   : > { %11392 = vmatprep.subr.mxu1 %v24068_v15  ;;  %11630 = vmatprep.subr.mxu0 %v24128_v53 }
 0x690   : > { %11394 = vmatpush1.msra.mxu1 %v24074_v40  ;;  %11632 = vmatpush1.msra.mxu0 %v24131_v59 }
 0x691   : > { %11427 = vmatprep.mubr.f32.mxu1 %v25959_v9  ;;  %11550 = vmatprep.subr.mxu1 %v24052_v51  ;;  %v11726_v51 = vsub.f32 %v11724_v24, %v11725_v2 }
 0x692   : > { %11665 = vmatprep.mubr.f32.mxu0 %v25959_v9  ;;  %11799 = vmatprep.subr.mxu0 %v11706_v39 }
 0x693   : > { %11431 = vmatmul.mubr.f32.vlgmr.msra.gmra.mxu1 %v23510_v54  ;;  %11671 = vmatmul.mubr.f32.vlgmr.msra.gmra.mxu0 %v23567_v6 }
 0x694   : > { %11552 = vmatpush1.msra.mxu1 %v24063_v48  ;;  %11802 = vmatpush1.msra.mxu0 %v11712_v30  ;;  %v11721_v48 = vand.u32 4294901760, %v11720_v58 }
 0x695   : > { %11554 = vmatprep.subr.mxu1 %v24068_v15  ;;  %11805 = vmatprep.subr.mxu0 %v11718_v8  ;;  %v11727_v15 = vand.u32 4294901760, %v11726_v51 }
 0x696   : > { %11556 = vmatpush1.msra.mxu1 %v24074_v40  ;;  %11808 = vmatpush1.msra.mxu0 %v11724_v24  ;;  %v12596_v40 = vld [vmem:[#allocation2] sm:$0x1] }
 0x697   : > { %11589 = vmatprep.mubr.f32.mxu1 %v25959_v9  ;;  %11710 = vmatprep.subr.mxu1 %v11709_v20  ;;  %v24182_v45 = vpop.permute.xlu1 %8595 }
 0x698   : > { %11841 = vmatprep.mubr.f32.mxu0 %v25959_v9  ;;  %11959 = vmatprep.subr.mxu0 %v11707_v18 }
 0x699   : > { %11591 = vmatmul.mubr.f32.vlgmr.msra.gmra.mxu1 %v23459_v37  ;;  %11844 = vmatmul.mubr.f32.vlgmr.msra.gmra.mxu0 %v23481_v28 }
 0x69a   : > { %11716 = vmatpush1.msra.mxu1 %v11715_v50  ;;  %11963 = vmatpush1.msra.mxu0 %v11713_v3 }
 0x69b   : > { %11722 = vmatprep.subr.mxu1 %v11721_v48  ;;  %11967 = vmatprep.subr.mxu0 %v11719_v10 }
 0x69c   : > { %11728 = vmatpush1.msra.mxu1 %v11727_v15  ;;  %11971 = vmatpush1.msra.mxu0 %v11725_v2 }
 0x69d   : > { %11761 = vmatprep.mubr.f32.mxu1 %v25959_v9  ;;  %11879 = vmatprep.subr.mxu1 %v24120_v29 }
 0x69e   : > { %11763 = vmatmul.mubr.f32.vlgmr.msra.gmra.mxu1 %v23459_v37  ;;  %12004 = vmatprep.mubr.f32.mxu0 %v25959_v9 }
 0x69f   : > { %11881 = vmatpush1.msra.mxu1 %v24126_v32  ;;  %11918 = vmatprep.mubr.f32.mxu1 %v25959_v9 }
 0x6a0   : > { %11883 = vmatprep.subr.mxu1 %v24128_v53  ;;  %12006 = vmatmul.mubr.f32.vlgmr.msra.gmra.mxu0 %v23459_v37 }
 0x6a1   : > { %11885 = vmatpush1.msra.mxu1 %v24131_v59  ;;  %12599 = vperm.xlu1 %18401, %v12596_v40   ;;  %v8145_v55 = vpop.f32.mrf.mxu0 }
 0x6a2   : > { %12041 = vmatprep.subr.mxu1 %v24120_v29  ;;  %11922 = vmatmul.mubr.f32.vlgmr.msra.gmra.mxu1 %v23510_v54  ;;  %v8146_v44 = vadd.f32 %v8145_v55, %v8002_v63  ;;  %v8011_v29 = vadd.f32 %v8010_v26, %v7772_v52 }
 0x6a3   : > { %12043 = vmatpush1.msra.mxu1 %v24126_v32  ;;  %12080 = vmatprep.mubr.f32.mxu1 %v25959_v9  ;;  %v8147_v22 = vpop.f32.mrf.mxu0 }
 0x6a4   : > { %12045 = vmatprep.subr.mxu1 %v24128_v53  ;;  %12156 = vmatprep.mubr.f32.mxu0 %v25959_v9  ;;  %v8148_v31 = vadd.f32 %v8147_v22, %v8004_v47 }
 0x6a5   : > { %12047 = vmatpush1.msra.mxu1 %v24131_v59  ;;  %v8153_v23 = vpop.f32.mrf.mxu0 }
 0x6a6   : > { %12082 = vmatmul.mubr.f32.vlgmr.msra.gmra.mxu1 %v23459_v37  ;;  %v8154_v46 = vadd.f32 %v8153_v23, %v8009_v36  ;;  %v12607_v23 = vsel %vm552_vm0, %v12595_v19, 0 }
 0x6a7   : > { %12252 = vmatprep.mubr.f32.mxu1 %v25959_v9  ;;  %v8155_v42 = vpop.f32.mrf.mxu0 }
 0x6a8   : > { %v8156_v27 = vadd.f32 %v8155_v42, %v8011_v29 }
 0x6a9   : > { %v8259_v35 = vpop.f32.mrf.mxu1 }
 0x6aa   : > { %v8260_v1 = vadd.f32 %v8259_v35, %v8146_v44 }
 0x6ab   : > { %v8261_v11 = vpop.f32.mrf.mxu1 }
 0x6ac   : > { %v8262_v41 = vadd.f32 %v8261_v11, %v8148_v31 }
 0x6ad   : > { %v8268_v62 = vpop.f32.mrf.mxu1 }
 0x6ae   : > { %v8269_v53 = vadd.f32 %v8268_v62, %v8154_v46  ;;  %v24206_v62 = vand.u32 4294901760, %v12607_v23 }
 0x6af   : > { %v8270_v56 = vpop.f32.mrf.mxu1 }
 0x6b0   : > { %v8271_v8 = vadd.f32 %v8270_v56, %v8156_v27  ;;  %v24215_v29 = vsub.f32 %v12607_v23, %v24206_v62 }
 0x6e1   : > { %v8436_v60 = vpop.f32.mrf.mxu0 }
 0x6e2   : > { %v8437_v0 = vadd.f32 %v8436_v60, %v8260_v1 }
 0x6e3   : > { %v8438_v25 = vpop.f32.mrf.mxu0 }
 0x6e4   : > { %v8439_v57 = vadd.f32 %v8438_v25, %v8262_v41 }
 0x6e5   : > { %v8443_v14 = vpop.f32.mrf.mxu0 }
 0x6e6   : > { %v8444_v18 = vadd.f32 %v8443_v14, %v8269_v53 }
 0x6e7   : > { %v8445_v16 = vpop.f32.mrf.mxu0 }
 0x6e8   : > { %v8446_v10 = vadd.f32 %v8445_v16, %v8271_v8 }
 0x6e9   : > { %v8547_v21 = vpop.f32.mrf.mxu1  ;;  %v8726_v13 = vpop.f32.mrf.mxu0 }
 0x6ea   : > { %v8548_v32 = vadd.f32 %v8547_v21, %v8437_v0  ;;  %v8727_v33 = vadd.f32 %v8726_v13, %v24182_v45 }
 0x6eb   : > { %v8549_v39 = vpop.f32.mrf.mxu1  ;;  %v8728_v59 = vpop.f32.mrf.mxu0 }
 0x6ec   : > { %v8550_v30 = vadd.f32 %v8549_v39, %v8439_v57  ;;  %v8573_v24 = vmax.f32 %v8548_v32, 0.0  ;;  %v8729_v40 = vadd.f32 %v8728_v59, %v24182_v45 }
 0x6ee   : > { %v8574_v3 = vmax.f32 %v8550_v30, 0.0  ;;  %v8554_v43 = vpop.f32.mrf.mxu1  ;;  %v24187_v50 = vand.u32 4294901760, %v8573_v24  ;;  %v24221_v30 = vand.u32 4294901760, %v24215_v29 }
 0x6ef   : > { %v8555_v2 = vadd.f32 %v8554_v43, %v8444_v18  ;;  %v8899_v20 = vpop.f32.mrf.mxu0 }
 0x6f0   : > { %v24185_v58 = vand.u32 4294901760, %v8574_v3  ;;  %v8556_v51 = vpop.f32.mrf.mxu1  ;;  %v12215_v35 = vsub.f32 %v8573_v24, %v24187_v50 }
 0x6f1   : > { %v8589_v48 = vmax.f32 %v8555_v2, 0.0  ;;  %v8557_v15 = vadd.f32 %v8556_v51, %v8446_v10  ;;  %v8901_v5 = vpop.f32.mrf.mxu0 }
 0x6f2   : > { %v8818_v61 = vpop.f32.mrf.mxu1  ;;  %v24194_v4 = vsub.f32 %v8574_v3, %v24185_v58  ;;  %v12216_v52 = vand.u32 4294901760, %v12215_v35 }
 0x6f3   : > { %v8646_v17 = vsel %vm8602_vm2, %v8589_v48, 0  ;;  %v8590_v12 = vmax.f32 %v8557_v15, 0.0  ;;  %v8819_v55 = vadd.f32 %v8818_v61, %v8727_v33  ;;  %v12679_v33 = vsub.f32 %v24215_v29, %v24221_v30 }
 0x6f4   : > { %v24197_v7 = vand.u32 4294901760, %v8646_v17  ;;  %v8820_v22 = vpop.f32.mrf.mxu1  ;;  %v9061_v26 = vpop.f32.mrf.mxu0  ;;  %v12210_v49 = vand.u32 4294901760, %v24194_v4  ;;  %v12217_v57 = vsub.f32 %v12215_v35, %v12216_v52 }
 0x6f5   : > { %v8649_v38 = vsel %vm8602_vm2, %v8590_v12, 0  ;;  %v8821_v42 = vadd.f32 %v8820_v22, %v8729_v40  ;;  %v8900_v60 = vadd.f32 %v8899_v20, %v8819_v55 }
 0x6f6   : > { %v12203_v11 = vsub.f32 %v8646_v17, %v24197_v7  ;;  %v24203_v34 = vand.u32 4294901760, %v8649_v38  ;;  %v9063_v63 = vpop.f32.mrf.mxu0  ;;  %v12211_v0 = vsub.f32 %v24194_v4, %v12210_v49  ;;  %v12218_v24 = vand.u32 4294901760, %v12217_v57 }
 0x6f7   : > { %v8902_v47 = vadd.f32 %v8901_v5, %v8821_v42 }
 0x6f8   : > { %v12204_v25 = vand.u32 4294901760, %v12203_v11  ;;  %12117 = vmatprep.subr.mxu0 %v24203_v34  ;;  %v12197_v44 = vsub.f32 %v8649_v38, %v24203_v34 }
 0x6f9   : > { %v8977_v14 = vpop.f32.mrf.mxu1  ;;  %12119 = vmatpush1.msra.mxu0 %v24197_v7  ;;  %v9217_v31 = vpop.f32.mrf.mxu0 }
 0x6fa   : > { %v8978_v1 = vadd.f32 %v8977_v14, %v8900_v60  ;;  %12121 = vmatprep.subr.mxu0 %v24185_v58  ;;  %v12198_v36 = vand.u32 4294901760, %v12197_v44  ;;  %v12205_v41 = vsub.f32 %v12203_v11, %v12204_v25  ;;  %v9218_v2 = vadd.f32 %v9217_v31, %v24182_v45 }
 0x6fb   : > { %v8979_v56 = vpop.f32.mrf.mxu1  ;;  %12123 = vmatpush1.msra.mxu0 %v24187_v50  ;;  %v9219_v16 = vpop.f32.mrf.mxu0 }
 0x6fc   : > { %v8980_v46 = vadd.f32 %v8979_v56, %v8902_v47  ;;  %v9062_v21 = vadd.f32 %v9061_v26, %v8978_v1  ;;  %12162 = vmatmul.mubr.f32.vlgmr.msra.gmra.mxu0 %v23567_v6  ;;  %12290 = vmatprep.subr.mxu0 %v12197_v44  ;;  %v12199_v13 = vsub.f32 %v12197_v44, %v12198_v36  ;;  %v12206_v39 = vand.u32 4294901760, %v12205_v41 }
 0x6fd   : > { %12293 = vmatpush1.msra.mxu0 %v12203_v11  ;;  %12332 = vmatprep.mubr.f32.mxu0 %v25959_v9  ;;  %v12212_v6 = vand.u32 4294901760, %v12211_v0  ;;  %v9220_v51 = vadd.f32 %v9219_v16, %v24182_v45 }
 0x6fe   : > { %v9064_v32 = vadd.f32 %v9063_v63, %v8980_v46  ;;  %12296 = vmatprep.subr.mxu0 %v24194_v4  ;;  %v12200_v27 = vand.u32 4294901760, %v12199_v13  ;;  %v24240_v4 = vand.u32 4294901760, %v12679_v33 }
 0x6ff   : > { %v9137_v53 = vpop.f32.mrf.mxu1  ;;  %12299 = vmatpush1.msra.mxu0 %v12215_v35  ;;  %v9390_v59 = vpop.f32.mrf.mxu0 }
 0x700   : > { %v9138_v8 = vadd.f32 %v9137_v53, %v9062_v21  ;;  %12201 = vmatprep.subr.mxu1 %v12200_v27  ;;  %12335 = vmatmul.mubr.f32.vlgmr.msra.gmra.mxu0 %v23481_v28 }
 0x701   : > { %v9139_v18 = vpop.f32.mrf.mxu1  ;;  %12450 = vmatprep.subr.mxu0 %v12198_v36  ;;  %12207 = vmatpush1.msra.mxu1 %v12206_v39  ;;  %v9392_v3 = vpop.f32.mrf.mxu0 }
 0x702   : > { %v12579_v43 = vmax.f32 %v9138_v8, 0.0  ;;  %v9140_v10 = vadd.f32 %v9139_v18, %v9064_v32  ;;  %12454 = vmatpush1.msra.mxu0 %v12204_v25  ;;  %12213 = vmatprep.subr.mxu1 %v12212_v6 }
 0x703   : > { %12458 = vmatprep.subr.mxu0 %v12210_v49  ;;  %12219 = vmatpush1.msra.mxu1 %v12218_v24 }
 0x704   : > { %v24227_v20 = vand.u32 4294901760, %v12579_v43  ;;  %v12580_v28 = vmax.f32 %v9140_v10, 0.0  ;;  %12462 = vmatpush1.msra.mxu0 %v12216_v52  ;;  %12495 = vmatprep.mubr.f32.mxu0 %v25959_v9 }
 0x705   : > { %v9309_v48 = vpop.f32.mrf.mxu1  ;;  %12254 = vmatmul.mubr.f32.vlgmr.msra.gmra.mxu1 %v23459_v37  ;;  %12370 = vmatprep.subr.mxu1 %v24203_v34  ;;  %v9552_v15 = vpop.f32.mrf.mxu0 }
 0x706   : > { %v12724_v40 = vsub.f32 %v12579_v43, %v24227_v20  ;;  %v24234_v5 = vand.u32 4294901760, %v12580_v28  ;;  %v9310_v19 = vadd.f32 %v9309_v48, %v9218_v2  ;;  %12497 = vmatmul.mubr.f32.vlgmr.msra.gmra.mxu0 %v23459_v37  ;;  %12372 = vmatpush1.msra.mxu1 %v24197_v7 }
 0x707   : > { %v9311_v61 = vpop.f32.mrf.mxu1  ;;  %12374 = vmatprep.subr.mxu1 %v24185_v58  ;;  %12409 = vmatprep.mubr.f32.mxu1 %v25959_v9  ;;  %v9554_v17 = vpop.f32.mrf.mxu0 }
 0x708   : > { %v12725_v12 = vand.u32 4294901760, %v12724_v40  ;;  %v12718_v55 = vsub.f32 %v12580_v28, %v24234_v5  ;;  %v9312_v22 = vadd.f32 %v9311_v61, %v9220_v51  ;;  %v9391_v26 = vadd.f32 %v9390_v59, %v9310_v19  ;;  %12640 = vmatprep.subr.mxu0 %v24234_v5  ;;  %12376 = vmatpush1.msra.mxu1 %v24187_v50 }
 0x709   : > { %12642 = vmatpush1.msra.mxu0 %v24227_v20  ;;  %12675 = vmatprep.mubr.f32.mxu0 %v25959_v9 }
 0x70a   : > { %v12726_v23 = vsub.f32 %v12724_v40, %v12725_v12  ;;  %v9393_v35 = vadd.f32 %v9392_v3, %v9312_v22  ;;  %12413 = vmatmul.mubr.f32.vlgmr.msra.gmra.mxu1 %v23510_v54  ;;  %12532 = vmatprep.subr.mxu1 %v24203_v34  ;;  %v12719_v38 = vand.u32 4294901760, %v12718_v55 }
 0x70b   : > { %v9468_v42 = vpop.f32.mrf.mxu1  ;;  %12681 = vmatmul.mubr.f32.vlgmr.msra.gmra.mxu0 %v24240_v4  ;;  %12534 = vmatpush1.msra.mxu1 %v24197_v7  ;;  %v9708_v11 = vpop.f32.mrf.mxu0 }
 0x70c   : > { %v9469_v60 = vadd.f32 %v9468_v42, %v9391_v26  ;;  %12536 = vmatprep.subr.mxu1 %v24185_v58  ;;  %12801 = vmatprep.subr.mxu0 %v12718_v55  ;;  %v12720_v63 = vsub.f32 %v12718_v55, %v12719_v38  ;;  %v12727_v25 = vand.u32 4294901760, %v12726_v23  ;;  %v9709_v36 = vadd.f32 %v9708_v11, %v24182_v45 }
 0x70d   : > { %v9470_v49 = vpop.f32.mrf.mxu1  ;;  %12538 = vmatpush1.msra.mxu1 %v24187_v50  ;;  %12571 = vmatprep.mubr.f32.mxu1 %v25959_v9  ;;  %v9710_v54 = vpop.f32.mrf.mxu0 }
 0x70e   : > { %v9471_v34 = vadd.f32 %v9470_v49, %v9393_v35  ;;  %v9553_v47 = vadd.f32 %v9552_v15, %v9469_v60  ;;  %12804 = vmatpush1.msra.mxu0 %v12724_v40  ;;  %12837 = vmatprep.mubr.f32.mxu0 %v25959_v9  ;;  %v12721_v44 = vand.u32 4294901760, %v12720_v63  ;;  %v9711_v41 = vadd.f32 %v9710_v54, %v24182_v45 }
 0x70f   : > { %12573 = vmatmul.mubr.f32.vlgmr.msra.gmra.mxu1 %v23459_v37  ;;  %12840 = vmatmul.mubr.f32.vlgmr.msra.gmra.mxu0 %v24215_v29 }
 0x710   : > { %v9555_v58 = vadd.f32 %v9554_v17, %v9471_v34  ;;  %12722 = vmatprep.subr.mxu1 %v12721_v44  ;;  %12955 = vmatprep.subr.mxu0 %v12719_v38 }
 0x711   : > { %v9628_v7 = vpop.f32.mrf.mxu1  ;;  %v9881_v52 = vpop.f32.mrf.mxu0  ;;  %12728 = vmatpush1.msra.mxu1 %v12727_v25  ;;  %12761 = vmatprep.mubr.f32.mxu1 %v25959_v9 }
 0x712   : > { %v9629_v50 = vadd.f32 %v9628_v7, %v9553_v47  ;;  %12959 = vmatpush1.msra.mxu0 %v12725_v12  ;;  %12992 = vmatprep.mubr.f32.mxu0 %v25959_v9 }
 0x713   : > { %v9630_v14 = vpop.f32.mrf.mxu1  ;;  %12763 = vmatmul.mubr.f32.vlgmr.msra.gmra.mxu1 %v24206_v62  ;;  %12994 = vmatmul.mubr.f32.vlgmr.msra.gmra.mxu0 %v24206_v62  ;;  %v9883_v37 = vpop.f32.mrf.mxu0 }
 0x714   : > { %v12581_v31 = vmax.f32 %v9629_v50, 0.0  ;;  %v9631_v1 = vadd.f32 %v9630_v14, %v9555_v58  ;;  %12877 = vmatprep.subr.mxu1 %v24234_v5  ;;  %12912 = vmatprep.mubr.f32.mxu1 %v25959_v9 }
 0x715   : > { %12879 = vmatpush1.msra.mxu1 %v24227_v20  ;;  %13140 = vmatprep.mubr.f32.mxu0 %v25959_v9 }
 0x716   : > { %v24266_v56 = vand.u32 4294901760, %v12581_v31  ;;  %v12582_v16 = vmax.f32 %v9631_v1, 0.0  ;;  %13031 = vmatprep.subr.mxu1 %v24234_v5 }
 0x717   : > { %v9800_v0 = vpop.f32.mrf.mxu1  ;;  %v10043_v46 = vpop.f32.mrf.mxu0  ;;  %12916 = vmatmul.mubr.f32.vlgmr.msra.gmra.mxu1 %v24221_v30 }
 0x718   : > { %v13189_v21 = vsub.f32 %v12581_v31, %v24266_v56  ;;  %v13104_v13 = vand.u32 4294901760, %v12582_v16  ;;  %v9801_v57 = vadd.f32 %v9800_v0, %v9709_v36  ;;  %13033 = vmatpush1.msra.mxu1 %v24227_v20  ;;  %13066 = vmatprep.mubr.f32.mxu1 %v25959_v9 }
 0x719   : > { %v9802_v32 = vpop.f32.mrf.mxu1  ;;  %v10045_v27 = vpop.f32.mrf.mxu0 }
 0x71a   : > { %v13190_v53 = vand.u32 4294901760, %v13189_v21  ;;  %v13183_v39 = vsub.f32 %v12582_v16, %v13104_v13  ;;  %v9803_v59 = vadd.f32 %v9802_v32, %v9711_v41  ;;  %v9882_v8 = vadd.f32 %v9881_v52, %v9801_v57  ;;  %13105 = vmatprep.subr.mxu0 %v13104_v13 }
 0x71b   : > { %13107 = vmatpush1.msra.mxu0 %v24266_v56  ;;  %13068 = vmatmul.mubr.f32.vlgmr.msra.gmra.mxu1 %v24206_v62 }
 0x71c   : > { %v13191_v6 = vsub.f32 %v13189_v21, %v13190_v53  ;;  %v9884_v18 = vadd.f32 %v9883_v37, %v9803_v59  ;;  %13146 = vmatmul.mubr.f32.vlgmr.msra.gmra.mxu0 %v24240_v4  ;;  %13266 = vmatprep.subr.mxu0 %v13183_v39  ;;  %v13184_v24 = vand.u32 4294901760, %v13183_v39 }
 0x71d   : > { %v9959_v3 = vpop.f32.mrf.mxu1  ;;  %v10199_v43 = vpop.f32.mrf.mxu0  ;;  %13269 = vmatpush1.msra.mxu0 %v13189_v21  ;;  %13302 = vmatprep.mubr.f32.mxu0 %v25959_v9 }
 0x71e   : > { %v9960_v10 = vadd.f32 %v9959_v3, %v9882_v8  ;;  %v13185_v2 = vsub.f32 %v13183_v39, %v13184_v24  ;;  %13420 = vmatprep.subr.mxu0 %v13184_v24  ;;  %13226 = vmatprep.mubr.f32.mxu1 %v25959_v9  ;;  %v13192_v28 = vand.u32 4294901760, %v13191_v6  ;;  %v10200_v26 = vadd.f32 %v10199_v43, %v24182_v45 }
 0x71f   : > { %v9961_v33 = vpop.f32.mrf.mxu1  ;;  %v10201_v20 = vpop.f32.mrf.mxu0 }
 0x720   : > { %v9962_v51 = vadd.f32 %v9961_v33, %v9884_v18  ;;  %v10044_v48 = vadd.f32 %v10043_v46, %v9960_v10  ;;  %13305 = vmatmul.mubr.f32.vlgmr.msra.gmra.mxu0 %v24215_v29  ;;  %v13186_v15 = vand.u32 4294901760, %v13185_v2  ;;  %v10202_v38 = vadd.f32 %v10201_v20, %v24182_v45 }
 0x721   : > { %13424 = vmatpush1.msra.mxu0 %v13190_v53  ;;  %13457 = vmatprep.mubr.f32.mxu0 %v25959_v9 }
 0x722   : > { %v10046_v40 = vadd.f32 %v10045_v27, %v9962_v51  ;;  %13187 = vmatprep.subr.mxu1 %v13186_v15 }
 0x723   : > { %v10119_v5 = vpop.f32.mrf.mxu1  ;;  %v10372_v19 = vpop.f32.mrf.mxu0  ;;  %13193 = vmatpush1.msra.mxu1 %v13192_v28 }
 0x724   : > { %v10120_v61 = vadd.f32 %v10119_v5, %v10044_v48  ;;  %13228 = vmatmul.mubr.f32.vlgmr.msra.gmra.mxu1 %v24206_v62  ;;  %13459 = vmatmul.mubr.f32.vlgmr.msra.gmra.mxu0 %v24206_v62 }
 0x725   : > { %v10121_v17 = vpop.f32.mrf.mxu1  ;;  %v10374_v12 = vpop.f32.mrf.mxu0  ;;  %13342 = vmatprep.subr.mxu1 %v13104_v13  ;;  %13377 = vmatprep.mubr.f32.mxu1 %v25959_v9 }
 0x726   : > { %v12583_v55 = vmax.f32 %v10120_v61, 0.0  ;;  %v10122_v22 = vadd.f32 %v10121_v17, %v10046_v40  ;;  %13344 = vmatpush1.msra.mxu1 %v24266_v56  ;;  %13605 = vmatprep.mubr.f32.mxu0 %v25959_v9 }
 0x727   : > { %13496 = vmatprep.subr.mxu1 %v13104_v13 }
 0x728   : > { %v24287_v23 = vand.u32 4294901760, %v12583_v55  ;;  %v12584_v35 = vmax.f32 %v10122_v22, 0.0  ;;  %13381 = vmatmul.mubr.f32.vlgmr.msra.gmra.mxu1 %v24221_v30 }
 0x729   : > { %v10291_v42 = vpop.f32.mrf.mxu1  ;;  %v10534_v11 = vpop.f32.mrf.mxu0  ;;  %13498 = vmatpush1.msra.mxu1 %v24266_v56  ;;  %13531 = vmatprep.mubr.f32.mxu1 %v25959_v9 }
 0x72a   : > { %v13654_v60 = vsub.f32 %v12583_v55, %v24287_v23  ;;  %v13569_v63 = vand.u32 4294901760, %v12584_v35  ;;  %v10292_v49 = vadd.f32 %v10291_v42, %v10200_v26 }
 0x72b   : > { %v10293_v54 = vpop.f32.mrf.mxu1  ;;  %v10536_v25 = vpop.f32.mrf.mxu0 }
 0x72c   : > { %v13655_v34 = vand.u32 4294901760, %v13654_v60  ;;  %v13648_v47 = vsub.f32 %v12584_v35, %v13569_v63  ;;  %v10294_v44 = vadd.f32 %v10293_v54, %v10202_v38  ;;  %v10373_v58 = vadd.f32 %v10372_v19, %v10292_v49  ;;  %13570 = vmatprep.subr.mxu0 %v13569_v63  ;;  %13533 = vmatmul.mubr.f32.vlgmr.msra.gmra.mxu1 %v24206_v62 }
 0x72d   : > { %13572 = vmatpush1.msra.mxu0 %v24287_v23  ;;  %13691 = vmatprep.mubr.f32.mxu1 %v25959_v9 }
 0x72e   : > { %v13656_v7 = vsub.f32 %v13654_v60, %v13655_v34  ;;  %v10375_v52 = vadd.f32 %v10374_v12, %v10294_v44  ;;  %13611 = vmatmul.mubr.f32.vlgmr.msra.gmra.mxu0 %v24240_v4  ;;  %13731 = vmatprep.subr.mxu0 %v13648_v47  ;;  %v13649_v50 = vand.u32 4294901760, %v13648_v47 }
 0x72f   : > { %v10450_v14 = vpop.f32.mrf.mxu1  ;;  %v10690_v37 = vpop.f32.mrf.mxu0  ;;  %13734 = vmatpush1.msra.mxu0 %v13654_v60  ;;  %13767 = vmatprep.mubr.f32.mxu0 %v25959_v9 }
 0x730   : > { %v10451_v31 = vadd.f32 %v10450_v14, %v10373_v58  ;;  %v13650_v1 = vsub.f32 %v13648_v47, %v13649_v50  ;;  %13885 = vmatprep.subr.mxu0 %v13649_v50  ;;  %v13657_v16 = vand.u32 4294901760, %v13656_v7  ;;  %v10691_v8 = vadd.f32 %v10690_v37, %v24182_v45 }
 0x731   : > { %v10452_v36 = vpop.f32.mrf.mxu1  ;;  %v10692_v56 = vpop.f32.mrf.mxu0 }
 0x732   : > { %v10453_v41 = vadd.f32 %v10452_v36, %v10375_v52  ;;  %v10535_v0 = vadd.f32 %v10534_v11, %v10451_v31  ;;  %13770 = vmatmul.mubr.f32.vlgmr.msra.gmra.mxu0 %v24215_v29  ;;  %v13651_v46 = vand.u32 4294901760, %v13650_v1  ;;  %v10693_v24 = vadd.f32 %v10692_v56, %v24182_v45 }
 0x733   : > { %13889 = vmatpush1.msra.mxu0 %v13655_v34  ;;  %13922 = vmatprep.mubr.f32.mxu0 %v25959_v9 }
 0x734   : > { %v10537_v21 = vadd.f32 %v10536_v25, %v10453_v41  ;;  %13652 = vmatprep.subr.mxu1 %v13651_v46 }
 0x735   : > { %v10610_v13 = vpop.f32.mrf.mxu1  ;;  %v10863_v57 = vpop.f32.mrf.mxu0  ;;  %13658 = vmatpush1.msra.mxu1 %v13657_v16 }
 0x736   : > { %v10611_v32 = vadd.f32 %v10610_v13, %v10535_v0  ;;  %13693 = vmatmul.mubr.f32.vlgmr.msra.gmra.mxu1 %v24206_v62  ;;  %13924 = vmatmul.mubr.f32.vlgmr.msra.gmra.mxu0 %v24206_v62 }
 0x737   : > { %v10612_v27 = vpop.f32.mrf.mxu1  ;;  %v10865_v53 = vpop.f32.mrf.mxu0  ;;  %13807 = vmatprep.subr.mxu1 %v13569_v63  ;;  %13842 = vmatprep.mubr.f32.mxu1 %v25959_v9 }
 0x738   : > { %v12585_v39 = vmax.f32 %v10611_v32, 0.0  ;;  %v10613_v59 = vadd.f32 %v10612_v27, %v10537_v21  ;;  %13809 = vmatpush1.msra.mxu1 %v24287_v23  ;;  %14070 = vmatprep.mubr.f32.mxu0 %v25959_v9 }
 0x739   : > { %13961 = vmatprep.subr.mxu1 %v13569_v63 }
 0x73a   : > { %v24307_v6 = vand.u32 4294901760, %v12585_v39  ;;  %v12586_v18 = vmax.f32 %v10613_v59, 0.0  ;;  %13846 = vmatmul.mubr.f32.vlgmr.msra.gmra.mxu1 %v24221_v30 }
 0x73b   : > { %v10782_v3 = vpop.f32.mrf.mxu1  ;;  %v11025_v43 = vpop.f32.mrf.mxu0  ;;  %13963 = vmatpush1.msra.mxu1 %v24287_v23  ;;  %13996 = vmatprep.mubr.f32.mxu1 %v25959_v9 }
 0x73c   : > { %v14119_v10 = vsub.f32 %v12585_v39, %v24307_v6  ;;  %v14034_v2 = vand.u32 4294901760, %v12586_v18  ;;  %v10783_v33 = vadd.f32 %v10782_v3, %v10691_v8 }
 0x73d   : > { %v10784_v20 = vpop.f32.mrf.mxu1  ;;  %v11027_v28 = vpop.f32.mrf.mxu0 }
 0x73e   : > { %v14120_v51 = vand.u32 4294901760, %v14119_v10  ;;  %v14113_v48 = vsub.f32 %v12586_v18, %v14034_v2  ;;  %v10785_v15 = vadd.f32 %v10784_v20, %v10693_v24  ;;  %v10864_v40 = vadd.f32 %v10863_v57, %v10783_v33  ;;  %14035 = vmatprep.subr.mxu0 %v14034_v2  ;;  %13998 = vmatmul.mubr.f32.vlgmr.msra.gmra.mxu1 %v24206_v62 }
 0x73f   : > { %14037 = vmatpush1.msra.mxu0 %v24307_v6  ;;  %14156 = vmatprep.mubr.f32.mxu1 %v25959_v9 }
 0x740   : > { %v14121_v5 = vsub.f32 %v14119_v10, %v14120_v51  ;;  %v10866_v19 = vadd.f32 %v10865_v53, %v10785_v15  ;;  %14076 = vmatmul.mubr.f32.vlgmr.msra.gmra.mxu0 %v24240_v4  ;;  %14196 = vmatprep.subr.mxu0 %v14113_v48  ;;  %v14114_v61 = vand.u32 4294901760, %v14113_v48 }
 0x741   : > { %v10941_v17 = vpop.f32.mrf.mxu1  ;;  %v11181_v12 = vpop.f32.mrf.mxu0  ;;  %14199 = vmatpush1.msra.mxu0 %v14119_v10  ;;  %14232 = vmatprep.mubr.f32.mxu0 %v25959_v9 }
 0x742   : > { %v10942_v55 = vadd.f32 %v10941_v17, %v10864_v40  ;;  %v14115_v22 = vsub.f32 %v14113_v48, %v14114_v61  ;;  %14350 = vmatprep.subr.mxu0 %v14114_v61  ;;  %v14122_v35 = vand.u32 4294901760, %v14121_v5  ;;  %v11182_v58 = vadd.f32 %v11181_v12, %v24182_v45 }
 0x743   : > { %v10943_v26 = vpop.f32.mrf.mxu1  ;;  %v11183_v23 = vpop.f32.mrf.mxu0 }
 0x744   : > { %v10944_v38 = vadd.f32 %v10943_v26, %v10866_v19  ;;  %v11026_v42 = vadd.f32 %v11025_v43, %v10942_v55  ;;  %14235 = vmatmul.mubr.f32.vlgmr.msra.gmra.mxu0 %v24215_v29  ;;  %v14116_v11 = vand.u32 4294901760, %v14115_v22  ;;  %v11184_v50 = vadd.f32 %v11183_v23, %v24182_v45 }
 0x745   : > { %14354 = vmatpush1.msra.mxu0 %v14120_v51  ;;  %14387 = vmatprep.mubr.f32.mxu0 %v25959_v9 }
 0x746   : > { %v11028_v60 = vadd.f32 %v11027_v28, %v10944_v38  ;;  %14117 = vmatprep.subr.mxu1 %v14116_v11 }
 0x747   : > { %v11101_v63 = vpop.f32.mrf.mxu1  ;;  %v11354_v49 = vpop.f32.mrf.mxu0  ;;  %14123 = vmatpush1.msra.mxu1 %v14122_v35 }
 0x748   : > { %v11102_v54 = vadd.f32 %v11101_v63, %v11026_v42  ;;  %14158 = vmatmul.mubr.f32.vlgmr.msra.gmra.mxu1 %v24206_v62  ;;  %14389 = vmatmul.mubr.f32.vlgmr.msra.gmra.mxu0 %v24206_v62 }
 0x749   : > { %v11103_v25 = vpop.f32.mrf.mxu1  ;;  %v11356_v34 = vpop.f32.mrf.mxu0  ;;  %14272 = vmatprep.subr.mxu1 %v14034_v2  ;;  %14307 = vmatprep.mubr.f32.mxu1 %v25959_v9 }
 0x74a   : > { %v12587_v47 = vmax.f32 %v11102_v54, 0.0  ;;  %v11104_v44 = vadd.f32 %v11103_v25, %v11028_v60  ;;  %14274 = vmatpush1.msra.mxu1 %v24307_v6  ;;  %14535 = vmatprep.mubr.f32.mxu0 %v25959_v9 }
 0x74b   : > { %14426 = vmatprep.subr.mxu1 %v14034_v2 }
 0x74c   : > { %v24327_v7 = vand.u32 4294901760, %v12587_v47  ;;  %v12588_v52 = vmax.f32 %v11104_v44, 0.0  ;;  %14311 = vmatmul.mubr.f32.vlgmr.msra.gmra.mxu1 %v24221_v30 }
 0x74d   : > { %v11273_v14 = vpop.f32.mrf.mxu1  ;;  %v11516_v37 = vpop.f32.mrf.mxu0  ;;  %14428 = vmatpush1.msra.mxu1 %v24307_v6  ;;  %14461 = vmatprep.mubr.f32.mxu1 %v25959_v9 }
 0x74e   : > { %v14584_v31 = vsub.f32 %v12587_v47, %v24327_v7  ;;  %v14499_v1 = vand.u32 4294901760, %v12588_v52  ;;  %v11274_v36 = vadd.f32 %v11273_v14, %v11182_v58 }
 0x74f   : > { %v11275_v56 = vpop.f32.mrf.mxu1  ;;  %v11518_v16 = vpop.f32.mrf.mxu0 }
 0x750   : > { %v14585_v41 = vand.u32 4294901760, %v14584_v31  ;;  %v14578_v0 = vsub.f32 %v12588_v52, %v14499_v1  ;;  %v11276_v46 = vadd.f32 %v11275_v56, %v11184_v50  ;;  %v11355_v21 = vadd.f32 %v11354_v49, %v11274_v36  ;;  %14500 = vmatprep.subr.mxu0 %v14499_v1  ;;  %14463 = vmatmul.mubr.f32.vlgmr.msra.gmra.mxu1 %v24206_v62 }
 0x751   : > { %14502 = vmatpush1.msra.mxu0 %v24327_v7  ;;  %14621 = vmatprep.mubr.f32.mxu1 %v25959_v9 }
 0x752   : > { %v14586_v13 = vsub.f32 %v14584_v31, %v14585_v41  ;;  %v11357_v57 = vadd.f32 %v11356_v34, %v11276_v46  ;;  %14541 = vmatmul.mubr.f32.vlgmr.msra.gmra.mxu0 %v24240_v4  ;;  %14661 = vmatprep.subr.mxu0 %v14578_v0  ;;  %v14579_v32 = vand.u32 4294901760, %v14578_v0 }
 0x753   : > { %v11432_v27 = vpop.f32.mrf.mxu1  ;;  %v11672_v53 = vpop.f32.mrf.mxu0  ;;  %14664 = vmatpush1.msra.mxu0 %v14584_v31  ;;  %14697 = vmatprep.mubr.f32.mxu0 %v25959_v9 }
 0x754   : > { %v11433_v39 = vadd.f32 %v11432_v27, %v11355_v21  ;;  %v14580_v59 = vsub.f32 %v14578_v0, %v14579_v32  ;;  %14815 = vmatprep.subr.mxu0 %v14579_v32  ;;  %v14587_v18 = vand.u32 4294901760, %v14586_v13  ;;  %v11673_v51 = vadd.f32 %v11672_v53, %v24182_v45 }
 0x755   : > { %v11434_v8 = vpop.f32.mrf.mxu1  ;;  %v11674_v6 = vpop.f32.mrf.mxu0 }
 0x756   : > { %v11435_v24 = vadd.f32 %v11434_v8, %v11357_v57  ;;  %v11517_v3 = vadd.f32 %v11516_v37, %v11433_v39  ;;  %14700 = vmatmul.mubr.f32.vlgmr.msra.gmra.mxu0 %v24215_v29  ;;  %v14581_v43 = vand.u32 4294901760, %v14580_v59  ;;  %v11675_v5 = vadd.f32 %v11674_v6, %v24182_v45 }
 0x757   : > { %14819 = vmatpush1.msra.mxu0 %v14585_v41  ;;  %14852 = vmatprep.mubr.f32.mxu0 %v25959_v9 }
 0x758   : > { %v11519_v10 = vadd.f32 %v11518_v16, %v11435_v24  ;;  %14582 = vmatprep.subr.mxu1 %v14581_v43 }
 0x759   : > { %v11592_v2 = vpop.f32.mrf.mxu1  ;;  %v11845_v33 = vpop.f32.mrf.mxu0  ;;  %14588 = vmatpush1.msra.mxu1 %v14587_v18 }
 0x75a   : > { %v11593_v20 = vadd.f32 %v11592_v2, %v11517_v3  ;;  %14623 = vmatmul.mubr.f32.vlgmr.msra.gmra.mxu1 %v24206_v62  ;;  %14854 = vmatmul.mubr.f32.vlgmr.msra.gmra.mxu0 %v24206_v62 }
 0x75b   : > { %v11594_v28 = vpop.f32.mrf.mxu1  ;;  %14737 = vmatprep.subr.mxu1 %v14499_v1  ;;  %14772 = vmatprep.mubr.f32.mxu1 %v25959_v9  ;;  %v11847_v40 = vpop.f32.mrf.mxu0 }
 0x75c   : > { %v12589_v48 = vmax.f32 %v11593_v20, 0.0  ;;  %v11595_v15 = vadd.f32 %v11594_v28, %v11519_v10  ;;  %14739 = vmatpush1.msra.mxu1 %v24327_v7  ;;  %15000 = vmatprep.mubr.f32.mxu0 %v25959_v9 }
 0x75d   : > { %14891 = vmatprep.subr.mxu1 %v14499_v1 }
 0x75e   : > { %v24348_v19 = vand.u32 4294901760, %v12589_v48  ;;  %v12590_v61 = vmax.f32 %v11595_v15, 0.0  ;;  %v11764_v17 = vpop.f32.mrf.mxu1  ;;  %14776 = vmatmul.mubr.f32.vlgmr.msra.gmra.mxu1 %v24221_v30 }
 0x75f   : > { %v11765_v12 = vadd.f32 %v11764_v17, %v11673_v51  ;;  %14893 = vmatpush1.msra.mxu1 %v24327_v7  ;;  %14926 = vmatprep.mubr.f32.mxu1 %v25959_v9 }
 0x760   : > { %v15049_v55 = vsub.f32 %v12589_v48, %v24348_v19  ;;  %v14964_v22 = vand.u32 4294901760, %v12590_v61  ;;  %v11766_v26 = vpop.f32.mrf.mxu1  ;;  %v12007_v23 = vpop.f32.mrf.mxu0 }
 0x761   : > { %v11767_v35 = vadd.f32 %v11766_v26, %v11675_v5  ;;  %v11846_v38 = vadd.f32 %v11845_v33, %v11765_v12 }
 0x762   : > { %v15050_v42 = vand.u32 4294901760, %v15049_v55  ;;  %v15043_v11 = vsub.f32 %v12590_v61, %v14964_v22  ;;  %v11923_v60 = vpop.f32.mrf.mxu1  ;;  %14965 = vmatprep.subr.mxu0 %v14964_v22  ;;  %14928 = vmatmul.mubr.f32.vlgmr.msra.gmra.mxu1 %v24206_v62  ;;  %v12009_v34 = vpop.f32.mrf.mxu0 }
 0x763   : > { %v11848_v63 = vadd.f32 %v11847_v40, %v11767_v35  ;;  %v11924_v49 = vadd.f32 %v11923_v60, %v11846_v38  ;;  %14967 = vmatpush1.msra.mxu0 %v24348_v19  ;;  %15086 = vmatprep.mubr.f32.mxu1 %v25959_v9 }
 0x764   : > { %v15051_v54 = vsub.f32 %v15049_v55, %v15050_v42  ;;  %v11925_v25 = vpop.f32.mrf.mxu1  ;;  %15006 = vmatmul.mubr.f32.vlgmr.msra.gmra.mxu0 %v24240_v4  ;;  %15126 = vmatprep.subr.mxu0 %v15043_v11  ;;  %v15044_v47 = vand.u32 4294901760, %v15043_v11 }
 0x765   : > { %v11926_v44 = vadd.f32 %v11925_v25, %v11848_v63  ;;  %v12008_v58 = vadd.f32 %v12007_v23, %v11924_v49  ;;  %15129 = vmatpush1.msra.mxu0 %v15049_v55  ;;  %15162 = vmatprep.mubr.f32.mxu0 %v25959_v9 }
 0x766   : > { %v12083_v7 = vpop.f32.mrf.mxu1  ;;  %v15045_v52 = vsub.f32 %v15043_v11, %v15044_v47  ;;  %15280 = vmatprep.subr.mxu0 %v15044_v47  ;;  %v15052_v37 = vand.u32 4294901760, %v15051_v54 }
 0x767   : > { %v12010_v50 = vadd.f32 %v12009_v34, %v11926_v44  ;;  %v12084_v14 = vadd.f32 %v12083_v7, %v12008_v58 }
 0x768   : > { %v12085_v31 = vpop.f32.mrf.mxu1  ;;  %15165 = vmatmul.mubr.f32.vlgmr.msra.gmra.mxu0 %v24215_v29  ;;  %v15046_v1 = vand.u32 4294901760, %v15045_v52 }
 0x769   : > { %v12591_v36 = vmax.f32 %v12084_v14, 0.0  ;;  %v12086_v56 = vadd.f32 %v12085_v31, %v12010_v50  ;;  %15284 = vmatpush1.msra.mxu0 %v15050_v42  ;;  %15317 = vmatprep.mubr.f32.mxu0 %v25959_v9 }
 0x76a   : > { %15047 = vmatprep.subr.mxu1 %v15046_v1 }
 0x76b   : > { %v15431_v16 = vand.u32 4294901760, %v12591_v36  ;;  %v12592_v41 = vmax.f32 %v12086_v56, 0.0  ;;  %15053 = vmatpush1.msra.mxu1 %v15052_v37 }
 0x76c   : > { %15088 = vmatmul.mubr.f32.vlgmr.msra.gmra.mxu1 %v24206_v62  ;;  %15319 = vmatmul.mubr.f32.vlgmr.msra.gmra.mxu0 %v24206_v62 }
 0x76d   : > { %v15514_v0 = vsub.f32 %v12591_v36, %v15431_v16  ;;  %v15429_v46 = vand.u32 4294901760, %v12592_v41  ;;  %15202 = vmatprep.subr.mxu1 %v14964_v22  ;;  %15237 = vmatprep.mubr.f32.mxu1 %v25959_v9 }
 0x76e   : > { %15204 = vmatpush1.msra.mxu1 %v24348_v19  ;;  %15465 = vmatprep.mubr.f32.mxu0 %v25959_v9 }
 0x76f   : > { %v15515_v21 = vand.u32 4294901760, %v15514_v0  ;;  %v15508_v13 = vsub.f32 %v12592_v41, %v15429_v46  ;;  %15430 = vmatprep.subr.mxu0 %v15429_v46  ;;  %15356 = vmatprep.subr.mxu1 %v14964_v22 }
 0x770   : > { %15432 = vmatpush1.msra.mxu0 %v15431_v16  ;;  %15241 = vmatmul.mubr.f32.vlgmr.msra.gmra.mxu1 %v24221_v30 }
 0x771   : > { %v15516_v57 = vsub.f32 %v15514_v0, %v15515_v21  ;;  %15471 = vmatmul.mubr.f32.vlgmr.msra.gmra.mxu0 %v24240_v4  ;;  %15358 = vmatpush1.msra.mxu1 %v24348_v19  ;;  %v15509_v32 = vand.u32 4294901760, %v15508_v13 }
 0x772   : > { %15391 = vmatprep.mubr.f32.mxu1 %v25959_v9  ;;  %15591 = vmatprep.subr.mxu0 %v15508_v13 }
 0x773   : > { %v15510_v27 = vsub.f32 %v15508_v13, %v15509_v32  ;;  %15594 = vmatpush1.msra.mxu0 %v15514_v0  ;;  %15627 = vmatprep.mubr.f32.mxu0 %v25959_v9  ;;  %v15517_v53 = vand.u32 4294901760, %v15516_v57  ;;  %v12602_v0 = vlaneseq }
 0x774   : > { %15393 = vmatmul.mubr.f32.vlgmr.msra.gmra.mxu1 %v24206_v62  ;;  %15745 = vmatprep.subr.mxu0 %v15509_v32 }
 0x775   : > { %v15511_v39 = vand.u32 4294901760, %v15510_v27  ;;  %15551 = vmatprep.mubr.f32.mxu1 %v25959_v9  ;;  %15630 = vmatmul.mubr.f32.vlgmr.msra.gmra.mxu0 %v24215_v29 }
 0x776   : > { %15749 = vmatpush1.msra.mxu0 %v15515_v21  ;;  %15782 = vmatprep.mubr.f32.mxu0 %v25959_v9 }
 0x777   : > { %15512 = vmatprep.subr.mxu1 %v15511_v39 }
 0x778   : > { %15518 = vmatpush1.msra.mxu1 %v15517_v53  ;;  %v12600_v53 = vpop.permute.xlu1 %12599 }
 0x779   : > { %15553 = vmatmul.mubr.f32.vlgmr.msra.gmra.mxu1 %v24206_v62  ;;  %15667 = vmatprep.subr.mxu1 %v15429_v46 }
 0x77a   : > { %15669 = vmatpush1.msra.mxu1 %v15431_v16  ;;  %15702 = vmatprep.mubr.f32.mxu1 %v25959_v9 }
 0x77b   : > { %15784 = vmatmul.mubr.f32.vlgmr.msra.gmra.mxu0 %v24206_v62  ;;  %15821 = vmatprep.subr.mxu1 %v15429_v46 }
 0x77c   : > { %15930 = vmatprep.mubr.f32.mxu0 %v25959_v9 }
 0x77d   : > { %15706 = vmatmul.mubr.f32.vlgmr.msra.gmra.mxu1 %v24221_v30 }
 0x77e   : > { %15823 = vmatpush1.msra.mxu1 %v15431_v16  ;;  %15856 = vmatprep.mubr.f32.mxu1 %v25959_v9 }
 0x781   : > { %15858 = vmatmul.mubr.f32.vlgmr.msra.gmra.mxu1 %v24206_v62 }
 0x782   : > { %16016 = vmatprep.mubr.f32.mxu1 %v25959_v9 }
 0x7bc   : > { %v12163_v59 = vpop.f32.mrf.mxu0 }
 0x7bd   : > { %v12164_v24 = vadd.f32 %v12163_v59, %v24182_v45 }
 0x7be   : > { %v12165_v8 = vpop.f32.mrf.mxu0 }
 0x7bf   : > { %v12166_v43 = vadd.f32 %v12165_v8, %v24182_v45 }
 0x7c0   : > { %v12336_v6 = vpop.f32.mrf.mxu0 }
 0x7c2   : > { %v12338_v18 = vpop.f32.mrf.mxu0 }
 0x7c5   : > { %v12255_v3 = vpop.f32.mrf.mxu1 }
 0x7c6   : > { %v12256_v10 = vadd.f32 %v12255_v3, %v12164_v24  ;;  %v12498_v2 = vpop.f32.mrf.mxu0 }
 0x7c7   : > { %v12257_v33 = vpop.f32.mrf.mxu1 }
 0x7c8   : > { %v12258_v20 = vadd.f32 %v12257_v33, %v12166_v43  ;;  %v12500_v28 = vpop.f32.mrf.mxu0  ;;  %v12337_v51 = vadd.f32 %v12336_v6, %v12256_v10 }
 0x7ca   : > { %v12414_v48 = vpop.f32.mrf.mxu1  ;;  %v12339_v15 = vadd.f32 %v12338_v18, %v12258_v20 }
 0x7cb   : > { %v12415_v40 = vadd.f32 %v12414_v48, %v12337_v51  ;;  %v24385_v5 = vpop.f32.mrf.mxu0 }
 0x7cc   : > { %v12416_v19 = vpop.f32.mrf.mxu1 }
 0x7cd   : > { %v12417_v61 = vadd.f32 %v12416_v19, %v12339_v15  ;;  %v24387_v17 = vpop.f32.mrf.mxu0  ;;  %v12499_v12 = vadd.f32 %v12498_v2, %v12415_v40 }
 0x7cf   : > { %v12574_v55 = vpop.f32.mrf.mxu1  ;;  %v24389_v22 = vpop.f32.mrf.mxu0  ;;  %v12501_v45 = vadd.f32 %v12500_v28, %v12417_v61 }
 0x7d0   : > { %v12575_v26 = vadd.f32 %v12574_v55, %v12499_v12 }
 0x7d1   : > { %v12576_v23 = vpop.f32.mrf.mxu1  ;;  %v24391_v35 = vpop.f32.mrf.mxu0 }
 0x7d2   : > { %v12593_v38 = vmax.f32 %v12575_v26, 0.0  ;;  %v12577_v42 = vadd.f32 %v12576_v23, %v12501_v45 }
 0x7d3   : > { %v24393_v11 = vpop.f32.mrf.mxu1  ;;  %v24395_v49 = vpop.f32.mrf.mxu0 }
 0x7d4   : > { %v15896_v60 = vand.u32 4294901760, %v12593_v38  ;;  %v12594_v63 = vmax.f32 %v12577_v42, 0.0 }
 0x7d5   : > { %v12766_v54 = vpop.f32.mrf.mxu1  ;;  %v24399_v7 = vpop.f32.mrf.mxu0 }
 0x7d6   : > { %v15979_v25 = vsub.f32 %v12593_v38, %v15896_v60  ;;  %v15894_v34 = vand.u32 4294901760, %v12594_v63 }
 0x7d7   : > { %v24397_v47 = vpop.f32.mrf.mxu1 }
 0x7d8   : > { %v15980_v44 = vand.u32 4294901760, %v15979_v25  ;;  %v15973_v58 = vsub.f32 %v12594_v63, %v15894_v34  ;;  %15895 = vmatprep.subr.mxu0 %v15894_v34 }
 0x7d9   : > { %v24401_v52 = vpop.f32.mrf.mxu1  ;;  %15897 = vmatpush1.msra.mxu0 %v15896_v60 }
 0x7da   : > { %15936 = vmatmul.mubr.f32.vlgmr.msra.gmra.mxu0 %v24240_v4  ;;  %16056 = vmatprep.subr.mxu0 %v15973_v58  ;;  %v15974_v50 = vand.u32 4294901760, %v15973_v58  ;;  %v15981_v14 = vsub.f32 %v15979_v25, %v15980_v44 }
 0x7db   : > { %16059 = vmatpush1.msra.mxu0 %v15979_v25  ;;  %16092 = vmatprep.mubr.f32.mxu0 %v25959_v9  ;;  %v24405_v31 = vpop.f32.mrf.mxu1 }
 0x7dc   : > { %v13147_v37 = vpop.f32.mrf.mxu0  ;;  %16210 = vmatprep.subr.mxu0 %v15974_v50  ;;  %v15975_v1 = vsub.f32 %v15973_v58, %v15974_v50  ;;  %v15982_v16 = vand.u32 4294901760, %v15981_v14 }
 0x7dd   : > { %v24409_v41 = vpop.f32.mrf.mxu1 }
 0x7de   : > { %v13149_v36 = vpop.f32.mrf.mxu0  ;;  %16095 = vmatmul.mubr.f32.vlgmr.msra.gmra.mxu0 %v24215_v29  ;;  %v15976_v56 = vand.u32 4294901760, %v15975_v1  ;;  %v24414_v29 = vshrl.u32 %v12602_v0, 7 }
 0x7df   : > { %16214 = vmatpush1.msra.mxu0 %v15980_v44  ;;  %16247 = vmatprep.mubr.f32.mxu0 %v25959_v9 }
 0x7e0   : > { %v13306_v4 = vpop.f32.mrf.mxu0  ;;  %15977 = vmatprep.subr.mxu1 %v15976_v56  ;;  %v12604_v27 = vsub.s32 0, %v24414_v29 }
 0x7e1   : > { %15983 = vmatpush1.msra.mxu1 %v15982_v16 }
 0x7e2   : > { %v13308_v46 = vpop.f32.mrf.mxu0  ;;  %16018 = vmatmul.mubr.f32.vlgmr.msra.gmra.mxu1 %v24206_v62  ;;  %16132 = vmatprep.subr.mxu1 %v15894_v34  ;;  %v24420_v8 = vrot.slane %v12600_v53, %v12604_v27 }
 0x7e3   : > { %16134 = vmatpush1.msra.mxu1 %v15896_v60  ;;  %16167 = vmatprep.mubr.f32.mxu1 %v25959_v9 }
 0x7e4   : > { %v13229_v21 = vpop.f32.mrf.mxu1  ;;  %16286 = vmatprep.subr.mxu1 %v15894_v34  ;;  %16249 = vmatmul.mubr.f32.vlgmr.msra.gmra.mxu0 %v24206_v62  ;;  %v13460_v13 = vpop.f32.mrf.mxu0  ;;  %v13150_v24 = vadd.f32 %v13149_v36, %v24420_v8  ;;  %v12683_v10 = vadd.f32 %v24385_v5, %v24420_v8 }
 0x7e6   : > { %v13231_v57 = vpop.f32.mrf.mxu1  ;;  %16171 = vmatmul.mubr.f32.vlgmr.msra.gmra.mxu1 %v24221_v30  ;;  %v13462_v39 = vpop.f32.mrf.mxu0  ;;  %v12685_v30 = vadd.f32 %v24387_v17, %v24420_v8  ;;  %v12765_v28 = vadd.f32 %v24393_v11, %v12683_v10 }
 0x7e7   : > { %16288 = vmatpush1.msra.mxu1 %v15896_v60  ;;  %16321 = vmatprep.mubr.f32.mxu1 %v25959_v9  ;;  %v13148_v9 = vadd.f32 %v13147_v37, %v24420_v8  ;;  %v13232_v43 = vadd.f32 %v13231_v57, %v13150_v24 }
 0x7e8   : > { %v13382_v32 = vpop.f32.mrf.mxu1  ;;  %v12767_v2 = vadd.f32 %v12766_v54, %v12685_v30  ;;  %v12842_v55 = vadd.f32 %v24389_v22, %v12765_v28 }
 0x7e9   : > { %v13309_v15 = vadd.f32 %v13308_v46, %v13232_v43 }
 0x7ea   : > { %v13384_v59 = vpop.f32.mrf.mxu1  ;;  %16323 = vmatmul.mubr.f32.vlgmr.msra.gmra.mxu1 %v24206_v62  ;;  %v13230_v62 = vadd.f32 %v13229_v21, %v13148_v9  ;;  %v12844_v40 = vadd.f32 %v24391_v35, %v12767_v2  ;;  %v12918_v54 = vadd.f32 %v24397_v47, %v12842_v55 }
 0x7eb   : > { %v13385_v26 = vadd.f32 %v13384_v59, %v13309_v15 }
 0x7ec   : > { %v13534_v18 = vpop.f32.mrf.mxu1  ;;  %v13307_v61 = vadd.f32 %v13306_v4, %v13230_v62  ;;  %v12920_v38 = vadd.f32 %v24401_v52, %v12844_v40  ;;  %v12996_v37 = vadd.f32 %v24395_v49, %v12918_v54 }
 0x7ed   : > { %v13463_v34 = vadd.f32 %v13462_v39, %v13385_v26 }
 0x7ee   : > { %v13612_v6 = vpop.f32.mrf.mxu0  ;;  %v13536_v20 = vpop.f32.mrf.mxu1  ;;  %v13383_v11 = vadd.f32 %v13382_v32, %v13307_v61  ;;  %v12998_v58 = vadd.f32 %v24399_v7, %v12920_v38  ;;  %v13070_v46 = vadd.f32 %v24405_v31, %v12996_v37 }
 0x7ef   : > { %v13613_v48 = vadd.f32 %v13612_v6, %v24420_v8  ;;  %v13537_v36 = vadd.f32 %v13536_v20, %v13463_v34 }
 0x7f0   : > { %v13614_v3 = vpop.f32.mrf.mxu0  ;;  %v13461_v22 = vadd.f32 %v13460_v13, %v13383_v11  ;;  %v13072_v56 = vadd.f32 %v24409_v41, %v12998_v58  ;;  %v16329_v49 = vsub.f32 0.0, %v13070_v46 }
 0x7f1   : > { %v13615_v17 = vadd.f32 %v13614_v3, %v24420_v8  ;;  %v16332_v57 = vsub.f32 0.0, %v13537_v36 }
 0x7f2   : > { %v13771_v33 = vpop.f32.mrf.mxu0  ;;  %v13535_v0 = vadd.f32 %v13534_v18, %v13461_v22  ;;  %v16330_v7 = vsub.f32 0.0, %v13072_v56  ;;  %v16345_v2 = vmul.f32 1.442695, %v16329_v49  ;;  %v18530_v56 = vmov 1966171168  }
 0x7f3   : > { %v16351_v6 = vmul.f32 1.442695, %v16332_v57 }
 0x7f4   : > { %v13773_v51 = vpop.f32.mrf.mxu0  ;;  %v16331_v27 = vsub.f32 0.0, %v13535_v0  ;;  %v16347_v18 = vmul.f32 1.442695, %v16330_v7 }
 0x7f5   : > { %18402 = vpow2.f32 %v16351_v6 }
 0x7f6   : > { %v13694_v19 = vpop.f32.mrf.mxu1  ;;  %v13925_v5 = vpop.f32.mrf.mxu0  ;;  %v16349_v9 = vmul.f32 1.442695, %v16331_v27  ;;  %18404 = vpow2.f32 %v16347_v18 }
 0x7f7   : > { %v13695_v12 = vadd.f32 %v13694_v19, %v13613_v48 }
 0x7f8   : > { %v13696_v45 = vpop.f32.mrf.mxu1  ;;  %v13927_v35 = vpop.f32.mrf.mxu0  ;;  %18406 = vpow2.f32 %v16349_v9 }
 0x7f9   : > { %v13697_v23 = vadd.f32 %v13696_v45, %v13615_v17  ;;  %v13772_v60 = vadd.f32 %v13771_v33, %v13695_v12  ;;  %18408 = vpow2.f32 %v16345_v2 }
 0x7fa   : > { %v13847_v42 = vpop.f32.mrf.mxu1 }
 0x7fb   : > { %v13774_v63 = vadd.f32 %v13773_v51, %v13697_v23  ;;  %v13848_v14 = vadd.f32 %v13847_v42, %v13772_v60 }
 0x7fc   : > { %v13849_v25 = vpop.f32.mrf.mxu1 }
 0x7fd   : > { %v13850_v44 = vadd.f32 %v13849_v25, %v13774_v63  ;;  %v13926_v47 = vadd.f32 %v13925_v5, %v13848_v14 }
 0x7fe   : > { %v13999_v50 = vpop.f32.mrf.mxu1 }
 0x7ff   : > { %v13928_v52 = vadd.f32 %v13927_v35, %v13850_v44  ;;  %v14000_v53 = vadd.f32 %v13999_v50, %v13926_v47 }
 0x800   : > { %v14077_v1 = vpop.f32.mrf.mxu0  ;;  %v14001_v4 = vpop.f32.mrf.mxu1 }
 0x801   : > { %v14002_v32 = vadd.f32 %v14001_v4, %v13928_v52  ;;  %v14078_v13 = vadd.f32 %v14077_v1, %v24420_v8  ;;  %v16333_v31 = vsub.f32 0.0, %v14000_v53 }
 0x802   : > { %v14079_v16 = vpop.f32.mrf.mxu0  ;;  %v18403_v11 = vpop.eup %18402 }
 0x803   : > { %v14080_v41 = vadd.f32 %v14079_v16, %v24420_v8  ;;  %v16334_v24 = vsub.f32 0.0, %v14002_v32  ;;  %v16353_v15 = vmul.f32 1.442695, %v16333_v31  ;;  %v18405_v60 = vpop.eup %18404  ;;  %v16380_v35 = vadd.f32 1.0, %v18403_v11 }
 0x804   : > { %v14236_v21 = vpop.f32.mrf.mxu0  ;;  %v16378_v34 = vadd.f32 1.0, %v18405_v60  ;;  %v16446_v16 = vunpack.c.l.s4 %v18530_v56 }
 0x805   : > { %v16355_v62 = vmul.f32 1.442695, %v16334_v24  ;;  %v18407_v63 = vpop.eup %18406 }
 0x806   : > { %v14238_v39 = vpop.f32.mrf.mxu0  ;;  %v18409_v54 = vpop.eup %18408  ;;  %v16379_v44 = vadd.f32 1.0, %v18407_v63  ;;  %v16447_v47 = vunpack.c.0.s8 %v16446_v16 }
 0x807   : > { %18410 = vpow2.f32 %v16355_v62  ;;  %v16377_v50 = vadd.f32 1.0, %v18409_v54 }
 0x808   : > { %v14159_v59 = vpop.f32.mrf.mxu1  ;;  %v14390_v33 = vpop.f32.mrf.mxu0  ;;  %18412 = vpow2.f32 %v16353_v15  ;;  %v24442_v27 = vsub.s32 %v16447_v47, %v24414_v29 }
 0x809   : > { %v14160_v30 = vadd.f32 %v14159_v59, %v14078_v13 }
 0x80a   : > { %v14161_v3 = vpop.f32.mrf.mxu1  ;;  %v14392_v61 = vpop.f32.mrf.mxu0 }
 0x80b   : > { %v14162_v43 = vadd.f32 %v14161_v3, %v14080_v41  ;;  %v14237_v10 = vadd.f32 %v14236_v21, %v14160_v30 }
 0x80c   : > { %v14312_v20 = vpop.f32.mrf.mxu1 }
 0x80d   : > { %v14313_v28 = vadd.f32 %v14312_v20, %v14237_v10  ;;  %v14239_v51 = vadd.f32 %v14238_v39, %v14162_v43 }
 0x80e   : > { %v14314_v48 = vpop.f32.mrf.mxu1 }
 0x80f   : > { %v14315_v40 = vadd.f32 %v14314_v48, %v14239_v51  ;;  %v14391_v19 = vadd.f32 %v14390_v33, %v14313_v28 }
 0x810   : > { %v14464_v17 = vpop.f32.mrf.mxu1 }
 0x811   : > { %v14465_v12 = vadd.f32 %v14464_v17, %v14391_v19  ;;  %v14393_v55 = vadd.f32 %v14392_v61, %v14315_v40 }
 0x812   : > { %v14466_v5 = vpop.f32.mrf.mxu1  ;;  %v14542_v43 = vpop.f32.mrf.mxu0 }
 0x813   : > { %v16335_v45 = vsub.f32 0.0, %v14465_v12  ;;  %v14467_v26 = vadd.f32 %v14466_v5, %v14393_v55 }
 0x814   : > { %v18411_v25 = vpop.eup %18410  ;;  %v14544_v2 = vpop.f32.mrf.mxu0 }
 0x815   : > { %v16357_v23 = vmul.f32 1.442695, %v16335_v45  ;;  %v16336_v38 = vsub.f32 0.0, %v14467_v26  ;;  %v18413_v58 = vpop.eup %18412  ;;  %v16382_v22 = vadd.f32 1.0, %v18411_v25  ;;  %v14545_v25 = vadd.f32 %v14544_v2, %v24420_v8 }
 0x816   : > { %v16381_v14 = vadd.f32 1.0, %v18413_v58  ;;  %v14701_v20 = vpop.f32.mrf.mxu0 }
 0x817   : > { %18414 = vpow2.f32 %v16357_v23  ;;  %v16359_v42 = vmul.f32 1.442695, %v16336_v38 }
 0x818   : > { %v14703_v28 = vpop.f32.mrf.mxu0 }
 0x819   : > { %18416 = vpow2.f32 %v16359_v42 }
 0x81a   : > { %18418 = vrcp.f32 %v16380_v35  ;;  %v14624_v10 = vpop.f32.mrf.mxu1  ;;  %v14855_v48 = vpop.f32.mrf.mxu0 }
 0x81b   : > { %18420 = vrcp.f32 %v16378_v34 }
 0x81c   : > { %18422 = vrcp.f32 %v16379_v44  ;;  %v14626_v33 = vpop.f32.mrf.mxu1  ;;  %v14857_v40 = vpop.f32.mrf.mxu0 }
 0x81d   : > { %18424 = vrcp.f32 %v16377_v50  ;;  %v14543_v50 = vadd.f32 %v14542_v43, %v24420_v8 }
 0x81e   : > { %18426 = vrcp.f32 %v16382_v22  ;;  %v14777_v62 = vpop.f32.mrf.mxu1  ;;  %v14627_v22 = vadd.f32 %v14626_v33, %v14545_v25 }
 0x81f   : > { %18428 = vrcp.f32 %v16381_v14 }
 0x820   : > { %v14779_v51 = vpop.f32.mrf.mxu1 }
 0x822   : > { %v14929_v15 = vpop.f32.mrf.mxu1 }
 0x824   : > { %v18415_v37 = vpop.eup %18414  ;;  %v14931_v19 = vpop.f32.mrf.mxu1 }
 0x825   : > { %v16383_v1 = vadd.f32 1.0, %v18415_v37  ;;  %v15007_v61 = vpop.f32.mrf.mxu0 }
 0x826   : > { %v18417_v36 = vpop.eup %18416  ;;  %v15008_v44 = vadd.f32 %v15007_v61, %v24420_v8 }
 0x827   : > { %v16384_v52 = vadd.f32 1.0, %v18417_v36  ;;  %18430 = vrcp.f32 %v16383_v1  ;;  %v18419_v4 = vpop.eup %18418  ;;  %v15009_v12 = vpop.f32.mrf.mxu0 }
 0x828   : > { %v18421_v0 = vpop.eup %18420  ;;  %v15010_v35 = vadd.f32 %v15009_v12, %v24420_v8 }
 0x829   : > { %18432 = vrcp.f32 %v16384_v52  ;;  %v18423_v46 = vpop.eup %18422  ;;  %v15166_v5 = vpop.f32.mrf.mxu0  ;;  %v14625_v52 = vadd.f32 %v14624_v10, %v14543_v50 }
 0x82a   : > { %v18425_v21 = vpop.eup %18424  ;;  %v16442_v57 = vcombine.low %v18423_v46, %v18419_v4 }
 0x82b   : > { %v18427_v32 = vpop.eup %18426  ;;  %v16441_v7 = vcombine.low %v18425_v21, %v18421_v0  ;;  %v15168_v26 = vpop.f32.mrf.mxu0  ;;  %v14704_v0 = vadd.f32 %v14703_v28, %v14627_v22 }
 0x82c   : > { %v18429_v13 = vpop.eup %18428  ;;  %v16458_v39 = vrot.slane %v16442_v57, %v24442_v27  ;;  %v15089_v17 = vpop.f32.mrf.mxu1 }
 0x82d   : > { %v16443_v49 = vcombine.low %v18429_v13, %v18427_v32  ;;  %v16451_v41 = vrot.slane %v16441_v7, %v24442_v27  ;;  %v15320_v38 = vpop.f32.mrf.mxu0  ;;  %v15090_v1 = vadd.f32 %v15089_v17, %v15008_v44  ;;  %v14702_v32 = vadd.f32 %v14701_v20, %v14625_v52 }
 0x82e   : > { %v15091_v55 = vpop.f32.mrf.mxu1 }
 0x82f   : > { %v16465_v24 = vrot.slane %v16443_v49, %v24442_v27  ;;  %v16473_v18 = vcombine.low %v16451_v41, %v16458_v39  ;;  %v15322_v11 = vpop.f32.mrf.mxu0  ;;  %v15092_v58 = vadd.f32 %v15091_v55, %v15010_v35  ;;  %v15167_v21 = vadd.f32 %v15166_v5, %v15090_v1 }
 0x830   : > { %v15242_v45 = vpop.f32.mrf.mxu1  ;;  %v14778_v41 = vadd.f32 %v14777_v62, %v14702_v32 }
 0x831   : > { %v16481_v29 = vrot.slane %v16473_v18, %v24442_v27  ;;  %v15472_v63 = vpop.f32.mrf.mxu0  ;;  %v15169_v16 = vadd.f32 %v15168_v26, %v15092_v58 }
 0x832   : > { %v15244_v23 = vpop.f32.mrf.mxu1  ;;  %v15473_v56 = vadd.f32 %v15472_v63, %v24420_v8  ;;  %v14856_v43 = vadd.f32 %v14855_v48, %v14778_v41 }
 0x833   : > { %v15474_v34 = vpop.f32.mrf.mxu0  ;;  %v15245_v7 = vadd.f32 %v15244_v23, %v15169_v16 }
 0x834   : > { %v18431_v53 = vpop.eup %18430  ;;  %v15394_v42 = vpop.f32.mrf.mxu1  ;;  %v15475_v36 = vadd.f32 %v15474_v34, %v24420_v8  ;;  %v14930_v12 = vadd.f32 %v14929_v15, %v14856_v43 }
 0x835   : > { %v15631_v37 = vpop.f32.mrf.mxu0 }
 0x836   : > { %v18433_v59 = vpop.eup %18432  ;;  %v15396_v60 = vpop.f32.mrf.mxu1 }
 0x837   : > { %v16444_v6 = vcombine.low %v18431_v53, %v18433_v59  ;;  %v15633_v47 = vpop.f32.mrf.mxu0  ;;  %v14780_v53 = vadd.f32 %v14779_v51, %v14704_v0  ;;  %v15243_v59 = vadd.f32 %v15242_v45, %v15167_v21 }
 0x839   : > { %v16472_v30 = vrot.slane %v16444_v6, %v24442_v27  ;;  %v15554_v54 = vpop.f32.mrf.mxu1  ;;  %v14858_v18 = vadd.f32 %v14857_v40, %v14780_v53 }
 0x83a   : > { %v15555_v57 = vadd.f32 %v15554_v54, %v15473_v56 }
 0x83b   : > { %v16474_v3 = vcombine.low %v16465_v24, %v16472_v30  ;;  %v15556_v14 = vpop.f32.mrf.mxu1  ;;  %v15785_v39 = vpop.f32.mrf.mxu0  ;;  %v15323_v24 = vadd.f32 %v15322_v11, %v15245_v7  ;;  %v14932_v20 = vadd.f32 %v14931_v19, %v14858_v18 }
 0x83c   : > { %v15557_v4 = vadd.f32 %v15556_v14, %v15475_v36  ;;  %v15632_v6 = vadd.f32 %v15631_v37, %v15555_v57 }
 0x83d   : > { %v16488_v9 = vrot.slane %v16474_v3, %v24442_v27  ;;  %v15707_v46 = vpop.f32.mrf.mxu1  ;;  %v15787_v3 = vpop.f32.mrf.mxu0  ;;  %v15397_v2 = vadd.f32 %v15396_v60, %v15323_v24  ;;  %v16338_v45 = vsub.f32 0.0, %v14932_v20 }
 0x83e   : > { %v15634_v13 = vadd.f32 %v15633_v47, %v15557_v4 }
 0x83f   : > { %v16489_v31 = vcombine.low %v16481_v29, %v16488_v9  ;;  %v15709_v49 = vpop.f32.mrf.mxu1  ;;  %v15321_v9 = vadd.f32 %v15320_v38, %v15243_v59  ;;  %v16340_v5 = vsub.f32 0.0, %v15397_v2  ;;  %v16337_v38 = vsub.f32 0.0, %v14930_v12 }
 0x840   : > { %v15710_v30 = vadd.f32 %v15709_v49, %v15634_v13  ;;  %v16363_v35 = vmul.f32 1.442695, %v16338_v45 }
 0x841   : > { %16541 = vst [vmem:[%s24453_s21] sm:$0xff] %v16489_v31  ;;  %v15859_v29 = vpop.f32.mrf.mxu1  ;;  %v15708_v31 = vadd.f32 %v15707_v46, %v15632_v6  ;;  %v15395_v51 = vadd.f32 %v15394_v42, %v15321_v9  ;;  %v16367_v63 = vmul.f32 1.442695, %v16340_v5  ;;  %v16361_v58 = vmul.f32 1.442695, %v16337_v38 }
 0x842   : > { %v15788_v33 = vadd.f32 %v15787_v3, %v15710_v30 }
 0x843   : > { %v15861_v28 = vpop.f32.mrf.mxu1  ;;  %v15786_v17 = vadd.f32 %v15785_v39, %v15708_v31  ;;  %v16339_v26 = vsub.f32 0.0, %v15395_v51  ;;  %18434 = vpow2.f32 %v16367_v63 }
 0x844   : > { %v15862_v62 = vadd.f32 %v15861_v28, %v15788_v33  ;;  %18436 = vpow2.f32 %v16363_v35 }
 0x845   : > { %v15860_v40 = vadd.f32 %v15859_v29, %v15786_v17  ;;  %v16365_v25 = vmul.f32 1.442695, %v16339_v26 }
 0x846   : > { %v16342_v60 = vsub.f32 0.0, %v15862_v62 }
 0x847   : > { %v16341_v15 = vsub.f32 0.0, %v15860_v40  ;;  %18438 = vpow2.f32 %v16365_v25 }
 0x848   : > { %v16371_v14 = vmul.f32 1.442695, %v16342_v60  ;;  %18440 = vpow2.f32 %v16361_v58 }
 0x849   : > { %v16369_v52 = vmul.f32 1.442695, %v16341_v15 }
 0x84a   : > { %18442 = vpow2.f32 %v16371_v14 }
 0x84b   : > { %18444 = vpow2.f32 %v16369_v52 }
 0x850   : > { %v18435_v53 = vpop.eup %18434 }
 0x851   : > { %v18437_v49 = vpop.eup %18436  ;;  %v16388_v6 = vadd.f32 1.0, %v18435_v53 }
 0x852   : > { %v16386_v24 = vadd.f32 1.0, %v18437_v49 }
 0x854   : > { %v18439_v39 = vpop.eup %18438 }
 0x855   : > { %v18441_v59 = vpop.eup %18440  ;;  %v16387_v30 = vadd.f32 1.0, %v18439_v39 }
 0x856   : > { %v16385_v3 = vadd.f32 1.0, %v18441_v59 }
 0x857   : > { %v18443_v41 = vpop.eup %18442 }
 0x858   : > { %v18445_v18 = vpop.eup %18444  ;;  %v16390_v29 = vadd.f32 1.0, %v18443_v41 }
 0x859   : > { %v16389_v9 = vadd.f32 1.0, %v18445_v18 }
 0x89a   : > { %v15937_v10 = vpop.f32.mrf.mxu0 }
 0x89b   : > { %v15938_v23 = vadd.f32 %v15937_v10, %v24420_v8 }
 0x89c   : > { %v15939_v61 = vpop.f32.mrf.mxu0 }
 0x89d   : > { %v15940_v19 = vadd.f32 %v15939_v61, %v24420_v8 }
 0x89e   : > { %v16096_v55 = vpop.f32.mrf.mxu0 }
 0x8a0   : > { %v16098_v48 = vpop.f32.mrf.mxu0 }
 0x8a2   : > { %v16019_v11 = vpop.f32.mrf.mxu1 }
 0x8a3   : > { %v16020_v54 = vadd.f32 %v16019_v11, %v15938_v23 }
 0x8a4   : > { %v16021_v42 = vpop.f32.mrf.mxu1  ;;  %v16250_v22 = vpop.f32.mrf.mxu0 }
 0x8a5   : > { %v16022_v34 = vadd.f32 %v16021_v42, %v15940_v19  ;;  %v16097_v44 = vadd.f32 %v16096_v55, %v16020_v54 }
 0x8a6   : > { %v16172_v50 = vpop.f32.mrf.mxu1  ;;  %v16252_v16 = vpop.f32.mrf.mxu0 }
 0x8a7   : > { %v16099_v37 = vadd.f32 %v16098_v48, %v16022_v34  ;;  %v16173_v1 = vadd.f32 %v16172_v50, %v16097_v44 }
 0x8a8   : > { %v16174_v36 = vpop.f32.mrf.mxu1 }
 0x8a9   : > { %v16175_v56 = vadd.f32 %v16174_v36, %v16099_v37  ;;  %v16251_v8 = vadd.f32 %v16250_v22, %v16173_v1 }
 0x8aa   : > { %v16324_v4 = vpop.f32.mrf.mxu1 }
 0x8ab   : > { %v16253_v0 = vadd.f32 %v16252_v16, %v16175_v56  ;;  %v16325_v47 = vadd.f32 %v16324_v4, %v16251_v8 }
 0x8ac   : > { %v16326_v46 = vpop.f32.mrf.mxu1 }
 0x8ad   : > { %v16343_v21 = vsub.f32 0.0, %v16325_v47  ;;  %v16327_v57 = vadd.f32 %v16326_v46, %v16253_v0 }
 0x8af   : > { %v16373_v32 = vmul.f32 1.442695, %v16343_v21  ;;  %v16344_v7 = vsub.f32 0.0, %v16327_v57 }
 0x8b1   : > { %18446 = vpow2.f32 %v16373_v32  ;;  %v16375_v13 = vmul.f32 1.442695, %v16344_v7 }
 0x8b3   : > { %18448 = vpow2.f32 %v16375_v13 }
 0x8b4   : > { %18450 = vrcp.f32 %v16388_v6 }
 0x8b5   : > { %18452 = vrcp.f32 %v16386_v24 }
 0x8b6   : > { %18454 = vrcp.f32 %v16387_v30 }
 0x8b7   : > { %18456 = vrcp.f32 %v16385_v3 }
 0x8b8   : > { %18458 = vrcp.f32 %v16390_v29 }
 0x8b9   : > { %18460 = vrcp.f32 %v16389_v9 }
 0x8be   : > { %v18447_v31 = vpop.eup %18446 }
 0x8bf   : > { %v16391_v43 = vadd.f32 1.0, %v18447_v31 }
 0x8c0   : > { %v18449_v10 = vpop.eup %18448 }
 0x8c1   : > { %v16392_v2 = vadd.f32 1.0, %v18449_v10  ;;  %18462 = vrcp.f32 %v16391_v43  ;;  %v18451_v33 = vpop.eup %18450 }
 0x8c2   : > { %v18453_v20 = vpop.eup %18452 }
 0x8c3   : > { %18464 = vrcp.f32 %v16392_v2  ;;  %v18455_v28 = vpop.eup %18454 }
 0x8c4   : > { %v18457_v61 = vpop.eup %18456  ;;  %v16491_v51 = vcombine.low %v18455_v28, %v18451_v33 }
 0x8c5   : > { %v18459_v17 = vpop.eup %18458  ;;  %v16490_v12 = vcombine.low %v18457_v61, %v18453_v20 }
 0x8c6   : > { %v18461_v55 = vpop.eup %18460  ;;  %v16507_v45 = vrot.slane %v16491_v51, %v24442_v27 }
 0x8c7   : > { %v16492_v62 = vcombine.low %v18461_v55, %v18459_v17  ;;  %v16500_v23 = vrot.slane %v16490_v12, %v24442_v27 }
 0x8c9   : > { %v16514_v38 = vrot.slane %v16492_v62, %v24442_v27  ;;  %v16522_v48 = vcombine.low %v16500_v23, %v16507_v45 }
 0x8cb   : > { %v16530_v60 = vrot.slane %v16522_v48, %v24442_v27 }
 0x8ce   : > { %v18463_v5 = vpop.eup %18462 }
 0x8d0   : > { %v18465_v26 = vpop.eup %18464 }
 0x8d1   : > { %v16493_v40 = vcombine.low %v18463_v5, %v18465_v26 }
 0x8d3   : > { %v16521_v11 = vrot.slane %v16493_v40, %v24442_v27 }
 0x8d5   : > { %v16523_v63 = vcombine.low %v16514_v38, %v16521_v11 }
 0x8d7   : > { %v16537_v19 = vrot.slane %v16523_v63, %v24442_v27 }
 0x8d9   : > { %v16538_v54 = vcombine.low %v16530_v60, %v16537_v19 }
 0x8db   : > { %16542 = vst [vmem:[%s24453_s21 + $0x8] sm:$0xff] %v16538_v54 }
 0x8dc   : > { %18479 = shalt.err (!%p18476_p3)
}
 0x8dd   : > { %s18480_s16 = scalar_lea.hbm %s16556_s25, 256  ;;  %s18484_s18 = scalar_lea.hbm %s24514_s7, 512 }
 0x8de   : > { %p18481_p4 = scmp.ne.s32.totalorder %s16556_s25, %s18480_s16  ;;  %p18485_p9 = scmp.lt.s32.totalorder %s16556_s25, %s24514_s7 }
 0x8df   : > { %p18486_p10 = scmp.lt.s32.totalorder %s18484_s18, %s18480_s16 }
 0x8e0   : > { %p18482_p7 = pnand %p18481_p4, %p18610_p5 }
 0x8e1   : > { %p18487_p11 = por %p18486_p10, %p18485_p9 }
 0x8e2   : > { %p18483_p8 = pneg %p18482_p7 }
 0x8e4   : > { %p18488_p12 = pnand %p18487_p11, %p18483_p8 }
 0x8e6   : > { %18491 = shalt.err (!%p18488_p12)
}
 0x8e7   : > { %18358 = dma.vmem_to_hbm [thread:$0]  (%p18610_p5), %s16559_s22, 256, %s16556_s25, %s16544_s6  }
 0x8e8 PF: > { %p18364_p13 = scmp.ge.s32.totalorder %s18526_s29, 2  ;;  %s16570_s21 = sand.u32 1, %s18514_s26  }
 0x8e9   : > { %s16571_s23 = scalar_lea.sflag [#allocation4], %s16570_s21 }
 0x8ea   : > { %p18361_p0 = pnand %p18364_p13, %p18614_p6 }
 0x8ec   : > { %p18362_p1 = pneg %p18361_p0 }
 0x8ee   : > { %18509 = dma.done.wait (%p18362_p1), %s16571_s23, 256  }
 0x8ef   : > { %18511 = vsyncadd (%p18362_p1), %s16571_s23, 4294967040  ;;  %p19_p2 = scmp.ge.s32.totalorder %s18598_s8, 4   ;;  %s26023_s26 = smov %s18518_s27 }
 0x8f0   : > { %s26024_s27 = smov %s18522_s28  ;;  %s26025_s28 = smov %s18608_s11 }
 0x8f1   : > { %s26026_s29 = smov %s18598_s8  ;;  %21 = sbr.rel (!%p19_p2) target bundleno = 6 (0x6), region = 83 }
 0x8f6   :  { %16576 = vsyncpa [#allocation4], 1 }
 0x8f7   :  { %16578 = vsyncpa [#allocation4 + $0x1], 1 }

</bundles_post_ra>
